<compile_context>
chip_gen: v7x
topology: tpu7x:2x2x1
jax: 0.10.0
libtpu: 0.0.40
codegen_flags: <defaults>
</compile_context>

<pallas_src>
import functools

import jax
import jax.numpy as jnp
from jax.experimental import pallas as pl
from jax.experimental.pallas import tpu as pltpu

IMAGENET_MEAN = jnp.array([0.485, 0.456, 0.406], dtype=jnp.float32)
IMAGENET_STD = jnp.array([0.229, 0.224, 0.225], dtype=jnp.float32)


# ----------------------------------------------------------------------------
# Pallas kernels
# ----------------------------------------------------------------------------
def _conv3x3_kernel(x_ref, w_ref, b_ref, o_ref, *,
                    stride, dilation, oh, ow, clamp_input):
    """One batch element: 3x3 conv (BN folded) + bias + ReLU, 9 MXU matmuls.

    x_ref: (1, stride*stride, Hs, Ws, Cin)  phase-split, spatially padded input
    w_ref: (9, Cin, Cout) bf16              tap-major folded weights
    b_ref: (1, Cout) f32
    o_ref: (1, OH*OW, Cout) bf16
    """
    cin = w_ref.shape[1]
    cout = w_ref.shape[2]
    acc = jnp.zeros((oh * ow, cout), jnp.float32)
    for i in range(3):
        for j in range(3):
            ri, rj = i * dilation, j * dilation
            phase = (ri % stride) * stride + (rj % stride)
            r0, c0 = ri // stride, rj // stride
            win = x_ref[0, phase, r0:r0 + oh, c0:c0 + ow, :]
            if clamp_input:
                win = jnp.clip(win, 0.0, 1.0)      # stem: clamp raw image
            win = win.astype(jnp.bfloat16).reshape(oh * ow, cin)
            acc = acc + jnp.dot(win, w_ref[i * 3 + j],
                                preferred_element_type=jnp.float32)
    acc = acc + b_ref[...]                         # f32 epilogue
    acc = jnp.maximum(acc, 0.0)
    o_ref[0] = acc.astype(o_ref.dtype)


def _sse_kernel(p_ref, t_ref, o_ref):
    """Row-tiled sum of squared error, accumulated into an SMEM scalar."""
    @pl.when(pl.program_id(0) == 0)
    def _():
        o_ref[0, 0] = 0.0
    d = p_ref[...].astype(jnp.float32) - t_ref[...].astype(jnp.float32)
    o_ref[0, 0] += jnp.sum(d * d)


# ----------------------------------------------------------------------------
# Conv wrapper (padding + stride phase-split are cheap plain-JAX glue)
# ----------------------------------------------------------------------------
def conv3x3_bn_relu(x, w9, b, *, stride=1, dilation=1,
                    clamp_normalize_input=False):
    """x: (B, H, W, Cin) NHWC.  w9: (9, Cin, Cout) bf16.  b: (1, Cout) f32."""
    B, H, W, cin = x.shape
    cout = w9.shape[2]
    pad = dilation                       # 'same'-style padding for 3x3
    Hp, Wp = H + 2 * pad, W + 2 * pad
    OH = (Hp - 2 * dilation - 1) // stride + 1
    OW = (Wp - 2 * dilation - 1) // stride + 1
    assert Hp % stride == 0 and Wp % stride == 0

    if clamp_normalize_input:
        # Pad the raw image with the per-channel ImageNet mean: after the
        # in-kernel clamp and the 1/std,mean folded into the stem weights the
        # border contributes exactly 0 — equivalent to zero-padding the
        # normalized input (reference semantics).
        xp = jnp.pad(x - IMAGENET_MEAN,
                     ((0, 0), (pad, pad), (pad, pad), (0, 0))) + IMAGENET_MEAN
    else:
        xp = jnp.pad(x, ((0, 0), (pad, pad), (pad, pad), (0, 0)))

    # Space-to-phase rearrangement: for stride s every tap becomes a
    # contiguous (stride-1) slice of one phase plane inside the kernel.
    Hs, Ws = Hp // stride, Wp // stride
    xph = (xp.reshape(B, Hs, stride, Ws, stride, cin)
             .transpose(0, 2, 4, 1, 3, 5)
             .reshape(B, stride * stride, Hs, Ws, cin))

    kernel = functools.partial(
        _conv3x3_kernel, stride=stride, dilation=dilation, oh=OH, ow=OW,
        clamp_input=clamp_normalize_input)
    out = pl.pallas_call(
        kernel,
        out_shape=jax.ShapeDtypeStruct((B, OH * OW, cout), jnp.bfloat16),
        grid=(B,),
        in_specs=[
            pl.BlockSpec((1, stride * stride, Hs, Ws, cin),
                         lambda bi: (bi, 0, 0, 0, 0)),
            pl.BlockSpec((9, cin, cout), lambda bi: (0, 0, 0)),
            pl.BlockSpec((1, cout), lambda bi: (0, 0)),
        ],
        out_specs=pl.BlockSpec((1, OH * OW, cout), lambda bi: (bi, 0, 0)),
        compiler_params=pltpu.CompilerParams(
            dimension_semantics=("parallel",)),
    )(xph, w9, b)
    return out.reshape(B, OH, OW, cout)


# ----------------------------------------------------------------------------
# Mini dilated-ResNet encoder (eval mode, frozen, BN folded, bf16 weights)
# ----------------------------------------------------------------------------
_ENC_CFG = [
    # name,    cin, cout, stride, dilation, return_feature?
    ("stem",     3,   16, 1, 1, False),
    ("stage1",  16,   16, 1, 1, True),
    ("stage2",  16,   32, 2, 1, True),
    ("stage3",  32,   64, 1, 2, True),   # dilated: spatial size preserved
    ("stage4",  64,   64, 1, 4, True),   # dilated: spatial size preserved
]


def make_encoder_params(seed=0):
    """Deterministic weights; eval-mode BN folded into conv weight/bias; the
    ImageNet (x - mean)/std affine is additionally folded into the stem."""
    key = jax.random.PRNGKey(seed)
    params = {}
    eps = 1e-5
    for name, cin, cout, _, _, _ in _ENC_CFG:
        key, kw, kg, kb, km, kv = jax.random.split(key, 6)
        fan_in = 3 * 3 * cin
        w = jax.random.normal(kw, (3, 3, cin, cout), jnp.float32)
        w = w * (2.0 / fan_in) ** 0.5
        gamma = 1.0 + 0.1 * jax.random.normal(kg, (cout,), jnp.float32)
        beta = 0.1 * jax.random.normal(kb, (cout,), jnp.float32)
        rmean = 0.1 * jax.random.normal(km, (cout,), jnp.float32)
        rvar = 1.0 + 0.1 * jnp.abs(jax.random.normal(kv, (cout,), jnp.float32))
        scale = gamma / jnp.sqrt(rvar + eps)
        w_fold = w * scale[None, None, None, :]
        b_fold = beta - rmean * scale
        if name == "stem":
            # fold (x - mean) / std into the first conv; input is the clamped
            # raw image (mean-padded in glue).
            w_fold = w_fold / IMAGENET_STD[None, None, :, None]
            b_fold = b_fold - jnp.einsum("ijco,c->o", w_fold, IMAGENET_MEAN)
        params[name] = (w_fold.reshape(9, cin, cout).astype(jnp.bfloat16),
                        b_fold.reshape(1, cout).astype(jnp.float32))
    return params


def encoder_features(x_nhwc_raw, params):
    feats = []
    h = x_nhwc_raw
    for idx, (name, _, _, stride, dilation, ret) in enumerate(_ENC_CFG):
        w9, b = params[name]
        h = conv3x3_bn_relu(h, w9, b, stride=stride, dilation=dilation,
                            clamp_normalize_input=(idx == 0))
        if ret:
            feats.append(h)
    return feats


# ----------------------------------------------------------------------------
# MSE (mean over all elements) with a tiled Pallas SSE reduction
# ----------------------------------------------------------------------------
def _row_tile(rows, cap=512):
    """Largest pow-2 row tile (>=8, divides rows) leaving >=2 grid steps."""
    tr = 8
    limit = min(cap, max(8, rows // 2))
    while tr * 2 <= limit and rows % (tr * 2) == 0:
        tr *= 2
    return tr


def mse_pair_loss(feat, batch):
    """F.mse_loss(feat[:batch], feat[batch:]); feat is (2*batch, h, w, c)."""
    half = feat.size // 2
    if half % 1024 == 0:
        rows = half // 128                 # rows per half; multiple of 8
        tr = _row_tile(rows)
        g = rows // tr
        f2 = feat.reshape(2 * rows, 128)   # free: contiguous, batch-major
        sse = pl.pallas_call(
            _sse_kernel,
            out_shape=jax.ShapeDtypeStruct((1, 1), jnp.float32),
            grid=(g,),
            in_specs=[
                pl.BlockSpec((tr, 128), lambda i: (i, 0)),       # pred half
                pl.BlockSpec((tr, 128), lambda i: (i + g, 0)),   # target half
            ],
            out_specs=pl.BlockSpec((1, 1), lambda i: (0, 0),
                                   memory_space=pltpu.SMEM),
            compiler_params=pltpu.CompilerParams(
                dimension_semantics=("arbitrary",)),
        )(f2, f2)
    else:
        # Fallback for shapes that do not tile into lane-dense (., 128) rows.
        p = feat[:batch].reshape(1, half)
        t = feat[batch:].reshape(1, half)
        sse = pl.pallas_call(
            _sse_kernel,
            out_shape=jax.ShapeDtypeStruct((1, 1), jnp.float32),
            grid=(1,),
            in_specs=[pl.BlockSpec((1, half), lambda i: (0, 0)),
                      pl.BlockSpec((1, half), lambda i: (0, 0))],
            out_specs=pl.BlockSpec((1, 1), lambda i: (0, 0),
                                   memory_space=pltpu.SMEM),
            compiler_params=pltpu.CompilerParams(
                dimension_semantics=("arbitrary",)),
        )(p, t)
    return sse[0, 0] / half


# ----------------------------------------------------------------------------
# ResNetPL.forward
# ----------------------------------------------------------------------------
def resnet_pl_loss(pred_nchw, target_nchw, params, weight=1.0):
    batch = pred_nchw.shape[0]
    # One encoder pass over pred and target (concatenated on the batch axis).
    x = jnp.concatenate([pred_nchw, target_nchw], axis=0)
    # NCHW -> NHWC on the raw 3-channel image (cheap glue; clamp + ImageNet
    # normalization are fused into the stem kernel / folded stem weights).
    x = jnp.transpose(x, (0, 2, 3, 1))
    feats = encoder_features(x, params)
    losses = [mse_pair_loss(f, batch) for f in feats]
    return jnp.stack(losses).sum() * weight


if __name__ == "__main__":
    key = jax.random.PRNGKey(0)
    k1, k2 = jax.random.split(key)
    # values outside [0,1] so the clamp path is exercised
    pred = jax.random.uniform(k1, (2, 3, 16, 16), jnp.float32,
                              minval=-0.2, maxval=1.2)
    target = jax.random.uniform(k2, (2, 3, 16, 16), jnp.float32,
                                minval=-0.2, maxval=1.2)
    params = make_encoder_params(seed=0)

    loss_fn = jax.jit(functools.partial(resnet_pl_loss, weight=1.0))
    loss = loss_fn(pred, target, params)
    jax.block_until_ready(loss)
    assert loss.shape == () and bool(jnp.isfinite(loss))
    print("KERNEL_OK")
</pallas_src>

<mosaic_0001>
module attributes {stable_mosaic.version = 11 : i64} {
  func.func @_conv3x3_kernel(%arg0: i32, %arg1: memref<1x1x18x18x3xf32, #tpu.memory_space<vmem>>, %arg2: memref<9x3x16xbf16, #tpu.memory_space<vmem>>, %arg3: memref<1x16xf32, #tpu.memory_space<vmem>>, %arg4: memref<1x256x16xbf16, #tpu.memory_space<vmem>>) attributes {dimension_semantics = [#tpu.dimension_semantics<parallel>], iteration_bounds = array<i64: 4>, scalar_prefetch = 0 : i64, scratch_operands = 0 : i64, tpu.core_type = #tpu.core_type<tc>, window_params = [{transform_indices = @transform_0, window_bounds = array<i64: 1, 1, 18, 18, 3>}, {pipeline_mode = #tpu.pipeline_mode<synchronous>, transform_indices = @transform_1, window_bounds = array<i64: 9, 3, 16>}, {pipeline_mode = #tpu.pipeline_mode<synchronous>, transform_indices = @transform_2, window_bounds = array<i64: 1, 16>}, {transform_indices = @transform_3, window_bounds = array<i64: 1, 256, 16>}]} {
    %cst = arith.constant 0.000000e+00 : f32
    %0 = vector.broadcast %cst : f32 to vector<256x16xf32>
    %c0 = arith.constant 0 : index
    %c0_0 = arith.constant 0 : index
    %c0_1 = arith.constant 0 : index
    %c0_2 = arith.constant 0 : index
    %c0_3 = arith.constant 0 : index
    %1 = vector.load %arg1[%c0, %c0_0, %c0_1, %c0_2, %c0_3] : memref<1x1x18x18x3xf32, #tpu.memory_space<vmem>>, vector<1x1x16x16x3xf32>
    %2 = vector.shape_cast %1 : vector<1x1x16x16x3xf32> to vector<16x16x3xf32>
    %cst_4 = arith.constant 0.000000e+00 : f32
    %cst_5 = arith.constant 1.000000e+00 : f32
    %3 = vector.broadcast %cst_4 : f32 to vector<16x16x3xf32>
    %4 = arith.maximumf %3, %2 : vector<16x16x3xf32>
    %5 = vector.broadcast %cst_5 : f32 to vector<16x16x3xf32>
    %6 = arith.minimumf %5, %4 : vector<16x16x3xf32>
    %7 = arith.truncf %6 : vector<16x16x3xf32> to vector<16x16x3xbf16>
    %8 = vector.shape_cast %7 : vector<16x16x3xbf16> to vector<256x3xbf16>
    %c0_6 = arith.constant 0 : index
    %c0_7 = arith.constant 0 : index
    %c0_8 = arith.constant 0 : index
    %9 = vector.load %arg2[%c0_6, %c0_7, %c0_8] : memref<9x3x16xbf16, #tpu.memory_space<vmem>>, vector<1x3x16xbf16>
    %10 = vector.shape_cast %9 : vector<1x3x16xbf16> to vector<3x16xbf16>
    %cst_9 = arith.constant dense<0.000000e+00> : vector<256x16xf32>
    %11 = tpu.matmul %8, %10, %cst_9 {dimension_numbers = #tpu.dot_dimension_numbers<[1], [0], [0], [1], [0, 0, 1, 1], [], []>} : vector<256x3xbf16>, vector<3x16xbf16>, vector<256x16xf32> -> vector<256x16xf32>
    %12 = arith.addf %0, %11 : vector<256x16xf32>
    %c0_10 = arith.constant 0 : index
    %c0_11 = arith.constant 0 : index
    %c0_12 = arith.constant 0 : index
    %c1 = arith.constant 1 : index
    %c0_13 = arith.constant 0 : index
    %13 = vector.load %arg1[%c0_10, %c0_11, %c0_12, %c1, %c0_13] : memref<1x1x18x18x3xf32, #tpu.memory_space<vmem>>, vector<1x1x16x16x3xf32>
    %14 = vector.shape_cast %13 : vector<1x1x16x16x3xf32> to vector<16x16x3xf32>
    %cst_14 = arith.constant 0.000000e+00 : f32
    %cst_15 = arith.constant 1.000000e+00 : f32
    %15 = vector.broadcast %cst_14 : f32 to vector<16x16x3xf32>
    %16 = arith.maximumf %15, %14 : vector<16x16x3xf32>
    %17 = vector.broadcast %cst_15 : f32 to vector<16x16x3xf32>
    %18 = arith.minimumf %17, %16 : vector<16x16x3xf32>
    %19 = arith.truncf %18 : vector<16x16x3xf32> to vector<16x16x3xbf16>
    %20 = vector.shape_cast %19 : vector<16x16x3xbf16> to vector<256x3xbf16>
    %c1_16 = arith.constant 1 : index
    %c0_17 = arith.constant 0 : index
    %c0_18 = arith.constant 0 : index
    %21 = vector.load %arg2[%c1_16, %c0_17, %c0_18] : memref<9x3x16xbf16, #tpu.memory_space<vmem>>, vector<1x3x16xbf16>
    %22 = vector.shape_cast %21 : vector<1x3x16xbf16> to vector<3x16xbf16>
    %cst_19 = arith.constant dense<0.000000e+00> : vector<256x16xf32>
    %23 = tpu.matmul %20, %22, %cst_19 {dimension_numbers = #tpu.dot_dimension_numbers<[1], [0], [0], [1], [0, 0, 1, 1], [], []>} : vector<256x3xbf16>, vector<3x16xbf16>, vector<256x16xf32> -> vector<256x16xf32>
    %24 = arith.addf %12, %23 : vector<256x16xf32>
    %c0_20 = arith.constant 0 : index
    %c0_21 = arith.constant 0 : index
    %c0_22 = arith.constant 0 : index
    %c2 = arith.constant 2 : index
    %c0_23 = arith.constant 0 : index
    %25 = vector.load %arg1[%c0_20, %c0_21, %c0_22, %c2, %c0_23] : memref<1x1x18x18x3xf32, #tpu.memory_space<vmem>>, vector<1x1x16x16x3xf32>
    %26 = vector.shape_cast %25 : vector<1x1x16x16x3xf32> to vector<16x16x3xf32>
    %cst_24 = arith.constant 0.000000e+00 : f32
    %cst_25 = arith.constant 1.000000e+00 : f32
    %27 = vector.broadcast %cst_24 : f32 to vector<16x16x3xf32>
    %28 = arith.maximumf %27, %26 : vector<16x16x3xf32>
    %29 = vector.broadcast %cst_25 : f32 to vector<16x16x3xf32>
    %30 = arith.minimumf %29, %28 : vector<16x16x3xf32>
    %31 = arith.truncf %30 : vector<16x16x3xf32> to vector<16x16x3xbf16>
    %32 = vector.shape_cast %31 : vector<16x16x3xbf16> to vector<256x3xbf16>
    %c2_26 = arith.constant 2 : index
    %c0_27 = arith.constant 0 : index
    %c0_28 = arith.constant 0 : index
    %33 = vector.load %arg2[%c2_26, %c0_27, %c0_28] : memref<9x3x16xbf16, #tpu.memory_space<vmem>>, vector<1x3x16xbf16>
    %34 = vector.shape_cast %33 : vector<1x3x16xbf16> to vector<3x16xbf16>
    %cst_29 = arith.constant dense<0.000000e+00> : vector<256x16xf32>
    %35 = tpu.matmul %32, %34, %cst_29 {dimension_numbers = #tpu.dot_dimension_numbers<[1], [0], [0], [1], [0, 0, 1, 1], [], []>} : vector<256x3xbf16>, vector<3x16xbf16>, vector<256x16xf32> -> vector<256x16xf32>
    %36 = arith.addf %24, %35 : vector<256x16xf32>
    %c0_30 = arith.constant 0 : index
    %c0_31 = arith.constant 0 : index
    %c1_32 = arith.constant 1 : index
    %c0_33 = arith.constant 0 : index
    %c0_34 = arith.constant 0 : index
    %37 = vector.load %arg1[%c0_30, %c0_31, %c1_32, %c0_33, %c0_34] : memref<1x1x18x18x3xf32, #tpu.memory_space<vmem>>, vector<1x1x16x16x3xf32>
    %38 = vector.shape_cast %37 : vector<1x1x16x16x3xf32> to vector<16x16x3xf32>
    %cst_35 = arith.constant 0.000000e+00 : f32
    %cst_36 = arith.constant 1.000000e+00 : f32
    %39 = vector.broadcast %cst_35 : f32 to vector<16x16x3xf32>
    %40 = arith.maximumf %39, %38 : vector<16x16x3xf32>
    %41 = vector.broadcast %cst_36 : f32 to vector<16x16x3xf32>
    %42 = arith.minimumf %41, %40 : vector<16x16x3xf32>
    %43 = arith.truncf %42 : vector<16x16x3xf32> to vector<16x16x3xbf16>
    %44 = vector.shape_cast %43 : vector<16x16x3xbf16> to vector<256x3xbf16>
    %c3 = arith.constant 3 : index
    %c0_37 = arith.constant 0 : index
    %c0_38 = arith.constant 0 : index
    %45 = vector.load %arg2[%c3, %c0_37, %c0_38] : memref<9x3x16xbf16, #tpu.memory_space<vmem>>, vector<1x3x16xbf16>
    %46 = vector.shape_cast %45 : vector<1x3x16xbf16> to vector<3x16xbf16>
    %cst_39 = arith.constant dense<0.000000e+00> : vector<256x16xf32>
    %47 = tpu.matmul %44, %46, %cst_39 {dimension_numbers = #tpu.dot_dimension_numbers<[1], [0], [0], [1], [0, 0, 1, 1], [], []>} : vector<256x3xbf16>, vector<3x16xbf16>, vector<256x16xf32> -> vector<256x16xf32>
    %48 = arith.addf %36, %47 : vector<256x16xf32>
    %c0_40 = arith.constant 0 : index
    %c0_41 = arith.constant 0 : index
    %c1_42 = arith.constant 1 : index
    %c1_43 = arith.constant 1 : index
    %c0_44 = arith.constant 0 : index
    %49 = vector.load %arg1[%c0_40, %c0_41, %c1_42, %c1_43, %c0_44] : memref<1x1x18x18x3xf32, #tpu.memory_space<vmem>>, vector<1x1x16x16x3xf32>
    %50 = vector.shape_cast %49 : vector<1x1x16x16x3xf32> to vector<16x16x3xf32>
    %cst_45 = arith.constant 0.000000e+00 : f32
    %cst_46 = arith.constant 1.000000e+00 : f32
    %51 = vector.broadcast %cst_45 : f32 to vector<16x16x3xf32>
    %52 = arith.maximumf %51, %50 : vector<16x16x3xf32>
    %53 = vector.broadcast %cst_46 : f32 to vector<16x16x3xf32>
    %54 = arith.minimumf %53, %52 : vector<16x16x3xf32>
    %55 = arith.truncf %54 : vector<16x16x3xf32> to vector<16x16x3xbf16>
    %56 = vector.shape_cast %55 : vector<16x16x3xbf16> to vector<256x3xbf16>
    %c4 = arith.constant 4 : index
    %c0_47 = arith.constant 0 : index
    %c0_48 = arith.constant 0 : index
    %57 = vector.load %arg2[%c4, %c0_47, %c0_48] : memref<9x3x16xbf16, #tpu.memory_space<vmem>>, vector<1x3x16xbf16>
    %58 = vector.shape_cast %57 : vector<1x3x16xbf16> to vector<3x16xbf16>
    %cst_49 = arith.constant dense<0.000000e+00> : vector<256x16xf32>
    %59 = tpu.matmul %56, %58, %cst_49 {dimension_numbers = #tpu.dot_dimension_numbers<[1], [0], [0], [1], [0, 0, 1, 1], [], []>} : vector<256x3xbf16>, vector<3x16xbf16>, vector<256x16xf32> -> vector<256x16xf32>
    %60 = arith.addf %48, %59 : vector<256x16xf32>
    %c0_50 = arith.constant 0 : index
    %c0_51 = arith.constant 0 : index
    %c1_52 = arith.constant 1 : index
    %c2_53 = arith.constant 2 : index
    %c0_54 = arith.constant 0 : index
    %61 = vector.load %arg1[%c0_50, %c0_51, %c1_52, %c2_53, %c0_54] : memref<1x1x18x18x3xf32, #tpu.memory_space<vmem>>, vector<1x1x16x16x3xf32>
    %62 = vector.shape_cast %61 : vector<1x1x16x16x3xf32> to vector<16x16x3xf32>
    %cst_55 = arith.constant 0.000000e+00 : f32
    %cst_56 = arith.constant 1.000000e+00 : f32
    %63 = vector.broadcast %cst_55 : f32 to vector<16x16x3xf32>
    %64 = arith.maximumf %63, %62 : vector<16x16x3xf32>
    %65 = vector.broadcast %cst_56 : f32 to vector<16x16x3xf32>
    %66 = arith.minimumf %65, %64 : vector<16x16x3xf32>
    %67 = arith.truncf %66 : vector<16x16x3xf32> to vector<16x16x3xbf16>
    %68 = vector.shape_cast %67 : vector<16x16x3xbf16> to vector<256x3xbf16>
    %c5 = arith.constant 5 : index
    %c0_57 = arith.constant 0 : index
    %c0_58 = arith.constant 0 : index
    %69 = vector.load %arg2[%c5, %c0_57, %c0_58] : memref<9x3x16xbf16, #tpu.memory_space<vmem>>, vector<1x3x16xbf16>
    %70 = vector.shape_cast %69 : vector<1x3x16xbf16> to vector<3x16xbf16>
    %cst_59 = arith.constant dense<0.000000e+00> : vector<256x16xf32>
    %71 = tpu.matmul %68, %70, %cst_59 {dimension_numbers = #tpu.dot_dimension_numbers<[1], [0], [0], [1], [0, 0, 1, 1], [], []>} : vector<256x3xbf16>, vector<3x16xbf16>, vector<256x16xf32> -> vector<256x16xf32>
    %72 = arith.addf %60, %71 : vector<256x16xf32>
    %c0_60 = arith.constant 0 : index
    %c0_61 = arith.constant 0 : index
    %c2_62 = arith.constant 2 : index
    %c0_63 = arith.constant 0 : index
    %c0_64 = arith.constant 0 : index
    %73 = vector.load %arg1[%c0_60, %c0_61, %c2_62, %c0_63, %c0_64] : memref<1x1x18x18x3xf32, #tpu.memory_space<vmem>>, vector<1x1x16x16x3xf32>
    %74 = vector.shape_cast %73 : vector<1x1x16x16x3xf32> to vector<16x16x3xf32>
    %cst_65 = arith.constant 0.000000e+00 : f32
    %cst_66 = arith.constant 1.000000e+00 : f32
    %75 = vector.broadcast %cst_65 : f32 to vector<16x16x3xf32>
    %76 = arith.maximumf %75, %74 : vector<16x16x3xf32>
    %77 = vector.broadcast %cst_66 : f32 to vector<16x16x3xf32>
    %78 = arith.minimumf %77, %76 : vector<16x16x3xf32>
    %79 = arith.truncf %78 : vector<16x16x3xf32> to vector<16x16x3xbf16>
    %80 = vector.shape_cast %79 : vector<16x16x3xbf16> to vector<256x3xbf16>
    %c6 = arith.constant 6 : index
    %c0_67 = arith.constant 0 : index
    %c0_68 = arith.constant 0 : index
    %81 = vector.load %arg2[%c6, %c0_67, %c0_68] : memref<9x3x16xbf16, #tpu.memory_space<vmem>>, vector<1x3x16xbf16>
    %82 = vector.shape_cast %81 : vector<1x3x16xbf16> to vector<3x16xbf16>
    %cst_69 = arith.constant dense<0.000000e+00> : vector<256x16xf32>
    %83 = tpu.matmul %80, %82, %cst_69 {dimension_numbers = #tpu.dot_dimension_numbers<[1], [0], [0], [1], [0, 0, 1, 1], [], []>} : vector<256x3xbf16>, vector<3x16xbf16>, vector<256x16xf32> -> vector<256x16xf32>
    %84 = arith.addf %72, %83 : vector<256x16xf32>
    %c0_70 = arith.constant 0 : index
    %c0_71 = arith.constant 0 : index
    %c2_72 = arith.constant 2 : index
    %c1_73 = arith.constant 1 : index
    %c0_74 = arith.constant 0 : index
    %85 = vector.load %arg1[%c0_70, %c0_71, %c2_72, %c1_73, %c0_74] : memref<1x1x18x18x3xf32, #tpu.memory_space<vmem>>, vector<1x1x16x16x3xf32>
    %86 = vector.shape_cast %85 : vector<1x1x16x16x3xf32> to vector<16x16x3xf32>
    %cst_75 = arith.constant 0.000000e+00 : f32
    %cst_76 = arith.constant 1.000000e+00 : f32
    %87 = vector.broadcast %cst_75 : f32 to vector<16x16x3xf32>
    %88 = arith.maximumf %87, %86 : vector<16x16x3xf32>
    %89 = vector.broadcast %cst_76 : f32 to vector<16x16x3xf32>
    %90 = arith.minimumf %89, %88 : vector<16x16x3xf32>
    %91 = arith.truncf %90 : vector<16x16x3xf32> to vector<16x16x3xbf16>
    %92 = vector.shape_cast %91 : vector<16x16x3xbf16> to vector<256x3xbf16>
    %c7 = arith.constant 7 : index
    %c0_77 = arith.constant 0 : index
    %c0_78 = arith.constant 0 : index
    %93 = vector.load %arg2[%c7, %c0_77, %c0_78] : memref<9x3x16xbf16, #tpu.memory_space<vmem>>, vector<1x3x16xbf16>
    %94 = vector.shape_cast %93 : vector<1x3x16xbf16> to vector<3x16xbf16>
    %cst_79 = arith.constant dense<0.000000e+00> : vector<256x16xf32>
    %95 = tpu.matmul %92, %94, %cst_79 {dimension_numbers = #tpu.dot_dimension_numbers<[1], [0], [0], [1], [0, 0, 1, 1], [], []>} : vector<256x3xbf16>, vector<3x16xbf16>, vector<256x16xf32> -> vector<256x16xf32>
    %96 = arith.addf %84, %95 : vector<256x16xf32>
    %c0_80 = arith.constant 0 : index
    %c0_81 = arith.constant 0 : index
    %c2_82 = arith.constant 2 : index
    %c2_83 = arith.constant 2 : index
    %c0_84 = arith.constant 0 : index
    %97 = vector.load %arg1[%c0_80, %c0_81, %c2_82, %c2_83, %c0_84] : memref<1x1x18x18x3xf32, #tpu.memory_space<vmem>>, vector<1x1x16x16x3xf32>
    %98 = vector.shape_cast %97 : vector<1x1x16x16x3xf32> to vector<16x16x3xf32>
    %cst_85 = arith.constant 0.000000e+00 : f32
    %cst_86 = arith.constant 1.000000e+00 : f32
    %99 = vector.broadcast %cst_85 : f32 to vector<16x16x3xf32>
    %100 = arith.maximumf %99, %98 : vector<16x16x3xf32>
    %101 = vector.broadcast %cst_86 : f32 to vector<16x16x3xf32>
    %102 = arith.minimumf %101, %100 : vector<16x16x3xf32>
    %103 = arith.truncf %102 : vector<16x16x3xf32> to vector<16x16x3xbf16>
    %104 = vector.shape_cast %103 : vector<16x16x3xbf16> to vector<256x3xbf16>
    %c8 = arith.constant 8 : index
    %c0_87 = arith.constant 0 : index
    %c0_88 = arith.constant 0 : index
    %105 = vector.load %arg2[%c8, %c0_87, %c0_88] : memref<9x3x16xbf16, #tpu.memory_space<vmem>>, vector<1x3x16xbf16>
    %106 = vector.shape_cast %105 : vector<1x3x16xbf16> to vector<3x16xbf16>
    %cst_89 = arith.constant dense<0.000000e+00> : vector<256x16xf32>
    %107 = tpu.matmul %104, %106, %cst_89 {dimension_numbers = #tpu.dot_dimension_numbers<[1], [0], [0], [1], [0, 0, 1, 1], [], []>} : vector<256x3xbf16>, vector<3x16xbf16>, vector<256x16xf32> -> vector<256x16xf32>
    %108 = arith.addf %96, %107 : vector<256x16xf32>
    %c0_90 = arith.constant 0 : index
    %c0_91 = arith.constant 0 : index
    %109 = vector.load %arg3[%c0_90, %c0_91] : memref<1x16xf32, #tpu.memory_space<vmem>>, vector<1x16xf32>
    %110 = vector.broadcast %109 : vector<1x16xf32> to vector<256x16xf32>
    %111 = arith.addf %108, %110 : vector<256x16xf32>
    %cst_92 = arith.constant 0.000000e+00 : f32
    %112 = vector.broadcast %cst_92 : f32 to vector<256x16xf32>
    %113 = arith.maximumf %111, %112 : vector<256x16xf32>
    %114 = arith.truncf %113 : vector<256x16xf32> to vector<256x16xbf16>
    %c0_93 = arith.constant 0 : index
    %c0_94 = arith.constant 0 : index
    %c0_95 = arith.constant 0 : index
    %115 = vector.load %arg4[%c0_93, %c0_94, %c0_95] : memref<1x256x16xbf16, #tpu.memory_space<vmem>>, vector<1x256x16xbf16>
    %116 = vector.shape_cast %115 : vector<1x256x16xbf16> to vector<256x16xbf16>
    %117 = vector.shape_cast %114 : vector<256x16xbf16> to vector<1x256x16xbf16>
    tpu.vector_store %arg4[%c0_93, %c0_94, %c0_95], %117 {strides = array<i32>} : memref<1x256x16xbf16, #tpu.memory_space<vmem>>, vector<1x256x16xbf16>,
    return
  }
  func.func @transform_0(%arg0: i32) -> (i32, i32, i32, i32, i32) {
    %c0_i32 = arith.constant 0 : i32
    %c0_i32_0 = arith.constant 0 : i32
    %c0_i32_1 = arith.constant 0 : i32
    %c0_i32_2 = arith.constant 0 : i32
    %c0_i32_3 = arith.constant 0 : i32
    return %arg0, %c0_i32, %c0_i32_0, %c0_i32_1, %c0_i32_2 : i32, i32, i32, i32, i32
  }
  func.func @transform_1(%arg0: i32) -> (i32, i32, i32) {
    %c0_i32 = arith.constant 0 : i32
    %c0_i32_0 = arith.constant 0 : i32
    %c0_i32_1 = arith.constant 0 : i32
    %c0_i32_2 = arith.constant 0 : i32
    return %c0_i32, %c0_i32_0, %c0_i32_1 : i32, i32, i32
  }
  func.func @transform_2(%arg0: i32) -> (i32, i32) {
    %c0_i32 = arith.constant 0 : i32
    %c0_i32_0 = arith.constant 0 : i32
    %c0_i32_1 = arith.constant 0 : i32
    return %c0_i32, %c0_i32_0 : i32, i32
  }
  func.func @transform_3(%arg0: i32) -> (i32, i32, i32) {
    %c0_i32 = arith.constant 0 : i32
    %c0_i32_0 = arith.constant 0 : i32
    %c0_i32_1 = arith.constant 0 : i32
    return %arg0, %c0_i32, %c0_i32_0 : i32, i32, i32
  }
}

module attributes {stable_mosaic.version = 11 : i64} {
  func.func @_conv3x3_kernel(%arg0: i32, %arg1: memref<1x1x18x18x16xbf16, #tpu.memory_space<vmem>>, %arg2: memref<9x16x16xbf16, #tpu.memory_space<vmem>>, %arg3: memref<1x16xf32, #tpu.memory_space<vmem>>, %arg4: memref<1x256x16xbf16, #tpu.memory_space<vmem>>) attributes {dimension_semantics = [#tpu.dimension_semantics<parallel>], iteration_bounds = array<i64: 4>, scalar_prefetch = 0 : i64, scratch_operands = 0 : i64, tpu.core_type = #tpu.core_type<tc>, window_params = [{transform_indices = @transform_0, window_bounds = array<i64: 1, 1, 18, 18, 16>}, {pipeline_mode = #tpu.pipeline_mode<synchronous>, transform_indices = @transform_1, window_bounds = array<i64: 9, 16, 16>}, {pipeline_mode = #tpu.pipeline_mode<synchronous>, transform_indices = @transform_2, window_bounds = array<i64: 1, 16>}, {transform_indices = @transform_3, window_bounds = array<i64: 1, 256, 16>}]} {
    %cst = arith.constant 0.000000e+00 : f32
    %0 = vector.broadcast %cst : f32 to vector<256x16xf32>
    %c0 = arith.constant 0 : index
    %c0_0 = arith.constant 0 : index
    %c0_1 = arith.constant 0 : index
    %c0_2 = arith.constant 0 : index
    %c0_3 = arith.constant 0 : index
    %1 = vector.load %arg1[%c0, %c0_0, %c0_1, %c0_2, %c0_3] : memref<1x1x18x18x16xbf16, #tpu.memory_space<vmem>>, vector<1x1x16x16x16xbf16>
    %2 = vector.shape_cast %1 : vector<1x1x16x16x16xbf16> to vector<16x16x16xbf16>
    %3 = vector.shape_cast %2 : vector<16x16x16xbf16> to vector<256x16xbf16>
    %c0_4 = arith.constant 0 : index
    %c0_5 = arith.constant 0 : index
    %c0_6 = arith.constant 0 : index
    %4 = vector.load %arg2[%c0_4, %c0_5, %c0_6] : memref<9x16x16xbf16, #tpu.memory_space<vmem>>, vector<1x16x16xbf16>
    %5 = vector.shape_cast %4 : vector<1x16x16xbf16> to vector<16x16xbf16>
    %cst_7 = arith.constant dense<0.000000e+00> : vector<256x16xf32>
    %6 = tpu.matmul %3, %5, %cst_7 {dimension_numbers = #tpu.dot_dimension_numbers<[1], [0], [0], [1], [0, 0, 1, 1], [], []>} : vector<256x16xbf16>, vector<16x16xbf16>, vector<256x16xf32> -> vector<256x16xf32>
    %7 = arith.addf %0, %6 : vector<256x16xf32>
    %c0_8 = arith.constant 0 : index
    %c0_9 = arith.constant 0 : index
    %c0_10 = arith.constant 0 : index
    %c1 = arith.constant 1 : index
    %c0_11 = arith.constant 0 : index
    %8 = vector.load %arg1[%c0_8, %c0_9, %c0_10, %c1, %c0_11] : memref<1x1x18x18x16xbf16, #tpu.memory_space<vmem>>, vector<1x1x16x16x16xbf16>
    %9 = vector.shape_cast %8 : vector<1x1x16x16x16xbf16> to vector<16x16x16xbf16>
    %10 = vector.shape_cast %9 : vector<16x16x16xbf16> to vector<256x16xbf16>
    %c1_12 = arith.constant 1 : index
    %c0_13 = arith.constant 0 : index
    %c0_14 = arith.constant 0 : index
    %11 = vector.load %arg2[%c1_12, %c0_13, %c0_14] : memref<9x16x16xbf16, #tpu.memory_space<vmem>>, vector<1x16x16xbf16>
    %12 = vector.shape_cast %11 : vector<1x16x16xbf16> to vector<16x16xbf16>
    %cst_15 = arith.constant dense<0.000000e+00> : vector<256x16xf32>
    %13 = tpu.matmul %10, %12, %cst_15 {dimension_numbers = #tpu.dot_dimension_numbers<[1], [0], [0], [1], [0, 0, 1, 1], [], []>} : vector<256x16xbf16>, vector<16x16xbf16>, vector<256x16xf32> -> vector<256x16xf32>
    %14 = arith.addf %7, %13 : vector<256x16xf32>
    %c0_16 = arith.constant 0 : index
    %c0_17 = arith.constant 0 : index
    %c0_18 = arith.constant 0 : index
    %c2 = arith.constant 2 : index
    %c0_19 = arith.constant 0 : index
    %15 = vector.load %arg1[%c0_16, %c0_17, %c0_18, %c2, %c0_19] : memref<1x1x18x18x16xbf16, #tpu.memory_space<vmem>>, vector<1x1x16x16x16xbf16>
    %16 = vector.shape_cast %15 : vector<1x1x16x16x16xbf16> to vector<16x16x16xbf16>
    %17 = vector.shape_cast %16 : vector<16x16x16xbf16> to vector<256x16xbf16>
    %c2_20 = arith.constant 2 : index
    %c0_21 = arith.constant 0 : index
    %c0_22 = arith.constant 0 : index
    %18 = vector.load %arg2[%c2_20, %c0_21, %c0_22] : memref<9x16x16xbf16, #tpu.memory_space<vmem>>, vector<1x16x16xbf16>
    %19 = vector.shape_cast %18 : vector<1x16x16xbf16> to vector<16x16xbf16>
    %cst_23 = arith.constant dense<0.000000e+00> : vector<256x16xf32>
    %20 = tpu.matmul %17, %19, %cst_23 {dimension_numbers = #tpu.dot_dimension_numbers<[1], [0], [0], [1], [0, 0, 1, 1], [], []>} : vector<256x16xbf16>, vector<16x16xbf16>, vector<256x16xf32> -> vector<256x16xf32>
    %21 = arith.addf %14, %20 : vector<256x16xf32>
    %c0_24 = arith.constant 0 : index
    %c0_25 = arith.constant 0 : index
    %c1_26 = arith.constant 1 : index
    %c0_27 = arith.constant 0 : index
    %c0_28 = arith.constant 0 : index
    %22 = vector.load %arg1[%c0_24, %c0_25, %c1_26, %c0_27, %c0_28] : memref<1x1x18x18x16xbf16, #tpu.memory_space<vmem>>, vector<1x1x16x16x16xbf16>
    %23 = vector.shape_cast %22 : vector<1x1x16x16x16xbf16> to vector<16x16x16xbf16>
    %24 = vector.shape_cast %23 : vector<16x16x16xbf16> to vector<256x16xbf16>
    %c3 = arith.constant 3 : index
    %c0_29 = arith.constant 0 : index
    %c0_30 = arith.constant 0 : index
    %25 = vector.load %arg2[%c3, %c0_29, %c0_30] : memref<9x16x16xbf16, #tpu.memory_space<vmem>>, vector<1x16x16xbf16>
    %26 = vector.shape_cast %25 : vector<1x16x16xbf16> to vector<16x16xbf16>
    %cst_31 = arith.constant dense<0.000000e+00> : vector<256x16xf32>
    %27 = tpu.matmul %24, %26, %cst_31 {dimension_numbers = #tpu.dot_dimension_numbers<[1], [0], [0], [1], [0, 0, 1, 1], [], []>} : vector<256x16xbf16>, vector<16x16xbf16>, vector<256x16xf32> -> vector<256x16xf32>
    %28 = arith.addf %21, %27 : vector<256x16xf32>
    %c0_32 = arith.constant 0 : index
    %c0_33 = arith.constant 0 : index
    %c1_34 = arith.constant 1 : index
    %c1_35 = arith.constant 1 : index
    %c0_36 = arith.constant 0 : index
    %29 = vector.load %arg1[%c0_32, %c0_33, %c1_34, %c1_35, %c0_36] : memref<1x1x18x18x16xbf16, #tpu.memory_space<vmem>>, vector<1x1x16x16x16xbf16>
    %30 = vector.shape_cast %29 : vector<1x1x16x16x16xbf16> to vector<16x16x16xbf16>
    %31 = vector.shape_cast %30 : vector<16x16x16xbf16> to vector<256x16xbf16>
    %c4 = arith.constant 4 : index
    %c0_37 = arith.constant 0 : index
    %c0_38 = arith.constant 0 : index
    %32 = vector.load %arg2[%c4, %c0_37, %c0_38] : memref<9x16x16xbf16, #tpu.memory_space<vmem>>, vector<1x16x16xbf16>
    %33 = vector.shape_cast %32 : vector<1x16x16xbf16> to vector<16x16xbf16>
    %cst_39 = arith.constant dense<0.000000e+00> : vector<256x16xf32>
    %34 = tpu.matmul %31, %33, %cst_39 {dimension_numbers = #tpu.dot_dimension_numbers<[1], [0], [0], [1], [0, 0, 1, 1], [], []>} : vector<256x16xbf16>, vector<16x16xbf16>, vector<256x16xf32> -> vector<256x16xf32>
    %35 = arith.addf %28, %34 : vector<256x16xf32>
    %c0_40 = arith.constant 0 : index
    %c0_41 = arith.constant 0 : index
    %c1_42 = arith.constant 1 : index
    %c2_43 = arith.constant 2 : index
    %c0_44 = arith.constant 0 : index
    %36 = vector.load %arg1[%c0_40, %c0_41, %c1_42, %c2_43, %c0_44] : memref<1x1x18x18x16xbf16, #tpu.memory_space<vmem>>, vector<1x1x16x16x16xbf16>
    %37 = vector.shape_cast %36 : vector<1x1x16x16x16xbf16> to vector<16x16x16xbf16>
    %38 = vector.shape_cast %37 : vector<16x16x16xbf16> to vector<256x16xbf16>
    %c5 = arith.constant 5 : index
    %c0_45 = arith.constant 0 : index
    %c0_46 = arith.constant 0 : index
    %39 = vector.load %arg2[%c5, %c0_45, %c0_46] : memref<9x16x16xbf16, #tpu.memory_space<vmem>>, vector<1x16x16xbf16>
    %40 = vector.shape_cast %39 : vector<1x16x16xbf16> to vector<16x16xbf16>
    %cst_47 = arith.constant dense<0.000000e+00> : vector<256x16xf32>
    %41 = tpu.matmul %38, %40, %cst_47 {dimension_numbers = #tpu.dot_dimension_numbers<[1], [0], [0], [1], [0, 0, 1, 1], [], []>} : vector<256x16xbf16>, vector<16x16xbf16>, vector<256x16xf32> -> vector<256x16xf32>
    %42 = arith.addf %35, %41 : vector<256x16xf32>
    %c0_48 = arith.constant 0 : index
    %c0_49 = arith.constant 0 : index
    %c2_50 = arith.constant 2 : index
    %c0_51 = arith.constant 0 : index
    %c0_52 = arith.constant 0 : index
    %43 = vector.load %arg1[%c0_48, %c0_49, %c2_50, %c0_51, %c0_52] : memref<1x1x18x18x16xbf16, #tpu.memory_space<vmem>>, vector<1x1x16x16x16xbf16>
    %44 = vector.shape_cast %43 : vector<1x1x16x16x16xbf16> to vector<16x16x16xbf16>
    %45 = vector.shape_cast %44 : vector<16x16x16xbf16> to vector<256x16xbf16>
    %c6 = arith.constant 6 : index
    %c0_53 = arith.constant 0 : index
    %c0_54 = arith.constant 0 : index
    %46 = vector.load %arg2[%c6, %c0_53, %c0_54] : memref<9x16x16xbf16, #tpu.memory_space<vmem>>, vector<1x16x16xbf16>
    %47 = vector.shape_cast %46 : vector<1x16x16xbf16> to vector<16x16xbf16>
    %cst_55 = arith.constant dense<0.000000e+00> : vector<256x16xf32>
    %48 = tpu.matmul %45, %47, %cst_55 {dimension_numbers = #tpu.dot_dimension_numbers<[1], [0], [0], [1], [0, 0, 1, 1], [], []>} : vector<256x16xbf16>, vector<16x16xbf16>, vector<256x16xf32> -> vector<256x16xf32>
    %49 = arith.addf %42, %48 : vector<256x16xf32>
    %c0_56 = arith.constant 0 : index
    %c0_57 = arith.constant 0 : index
    %c2_58 = arith.constant 2 : index
    %c1_59 = arith.constant 1 : index
    %c0_60 = arith.constant 0 : index
    %50 = vector.load %arg1[%c0_56, %c0_57, %c2_58, %c1_59, %c0_60] : memref<1x1x18x18x16xbf16, #tpu.memory_space<vmem>>, vector<1x1x16x16x16xbf16>
    %51 = vector.shape_cast %50 : vector<1x1x16x16x16xbf16> to vector<16x16x16xbf16>
    %52 = vector.shape_cast %51 : vector<16x16x16xbf16> to vector<256x16xbf16>
    %c7 = arith.constant 7 : index
    %c0_61 = arith.constant 0 : index
    %c0_62 = arith.constant 0 : index
    %53 = vector.load %arg2[%c7, %c0_61, %c0_62] : memref<9x16x16xbf16, #tpu.memory_space<vmem>>, vector<1x16x16xbf16>
    %54 = vector.shape_cast %53 : vector<1x16x16xbf16> to vector<16x16xbf16>
    %cst_63 = arith.constant dense<0.000000e+00> : vector<256x16xf32>
    %55 = tpu.matmul %52, %54, %cst_63 {dimension_numbers = #tpu.dot_dimension_numbers<[1], [0], [0], [1], [0, 0, 1, 1], [], []>} : vector<256x16xbf16>, vector<16x16xbf16>, vector<256x16xf32> -> vector<256x16xf32>
    %56 = arith.addf %49, %55 : vector<256x16xf32>
    %c0_64 = arith.constant 0 : index
    %c0_65 = arith.constant 0 : index
    %c2_66 = arith.constant 2 : index
    %c2_67 = arith.constant 2 : index
    %c0_68 = arith.constant 0 : index
    %57 = vector.load %arg1[%c0_64, %c0_65, %c2_66, %c2_67, %c0_68] : memref<1x1x18x18x16xbf16, #tpu.memory_space<vmem>>, vector<1x1x16x16x16xbf16>
    %58 = vector.shape_cast %57 : vector<1x1x16x16x16xbf16> to vector<16x16x16xbf16>
    %59 = vector.shape_cast %58 : vector<16x16x16xbf16> to vector<256x16xbf16>
    %c8 = arith.constant 8 : index
    %c0_69 = arith.constant 0 : index
    %c0_70 = arith.constant 0 : index
    %60 = vector.load %arg2[%c8, %c0_69, %c0_70] : memref<9x16x16xbf16, #tpu.memory_space<vmem>>, vector<1x16x16xbf16>
    %61 = vector.shape_cast %60 : vector<1x16x16xbf16> to vector<16x16xbf16>
    %cst_71 = arith.constant dense<0.000000e+00> : vector<256x16xf32>
    %62 = tpu.matmul %59, %61, %cst_71 {dimension_numbers = #tpu.dot_dimension_numbers<[1], [0], [0], [1], [0, 0, 1, 1], [], []>} : vector<256x16xbf16>, vector<16x16xbf16>, vector<256x16xf32> -> vector<256x16xf32>
    %63 = arith.addf %56, %62 : vector<256x16xf32>
    %c0_72 = arith.constant 0 : index
    %c0_73 = arith.constant 0 : index
    %64 = vector.load %arg3[%c0_72, %c0_73] : memref<1x16xf32, #tpu.memory_space<vmem>>, vector<1x16xf32>
    %65 = vector.broadcast %64 : vector<1x16xf32> to vector<256x16xf32>
    %66 = arith.addf %63, %65 : vector<256x16xf32>
    %cst_74 = arith.constant 0.000000e+00 : f32
    %67 = vector.broadcast %cst_74 : f32 to vector<256x16xf32>
    %68 = arith.maximumf %66, %67 : vector<256x16xf32>
    %69 = arith.truncf %68 : vector<256x16xf32> to vector<256x16xbf16>
    %c0_75 = arith.constant 0 : index
    %c0_76 = arith.constant 0 : index
    %c0_77 = arith.constant 0 : index
    %70 = vector.load %arg4[%c0_75, %c0_76, %c0_77] : memref<1x256x16xbf16, #tpu.memory_space<vmem>>, vector<1x256x16xbf16>
    %71 = vector.shape_cast %70 : vector<1x256x16xbf16> to vector<256x16xbf16>
    %72 = vector.shape_cast %69 : vector<256x16xbf16> to vector<1x256x16xbf16>
    tpu.vector_store %arg4[%c0_75, %c0_76, %c0_77], %72 {strides = array<i32>} : memref<1x256x16xbf16, #tpu.memory_space<vmem>>, vector<1x256x16xbf16>,
    return
  }
  func.func @transform_0(%arg0: i32) -> (i32, i32, i32, i32, i32) {
    %c0_i32 = arith.constant 0 : i32
    %c0_i32_0 = arith.constant 0 : i32
    %c0_i32_1 = arith.constant 0 : i32
    %c0_i32_2 = arith.constant 0 : i32
    %c0_i32_3 = arith.constant 0 : i32
    return %arg0, %c0_i32, %c0_i32_0, %c0_i32_1, %c0_i32_2 : i32, i32, i32, i32, i32
  }
  func.func @transform_1(%arg0: i32) -> (i32, i32, i32) {
    %c0_i32 = arith.constant 0 : i32
    %c0_i32_0 = arith.constant 0 : i32
    %c0_i32_1 = arith.constant 0 : i32
    %c0_i32_2 = arith.constant 0 : i32
    return %c0_i32, %c0_i32_0, %c0_i32_1 : i32, i32, i32
  }
  func.func @transform_2(%arg0: i32) -> (i32, i32) {
    %c0_i32 = arith.constant 0 : i32
    %c0_i32_0 = arith.constant 0 : i32
    %c0_i32_1 = arith.constant 0 : i32
    return %c0_i32, %c0_i32_0 : i32, i32
  }
  func.func @transform_3(%arg0: i32) -> (i32, i32, i32) {
    %c0_i32 = arith.constant 0 : i32
    %c0_i32_0 = arith.constant 0 : i32
    %c0_i32_1 = arith.constant 0 : i32
    return %arg0, %c0_i32, %c0_i32_0 : i32, i32, i32
  }
}

module attributes {stable_mosaic.version = 11 : i64} {
  func.func @_sse_kernel(%arg0: i32, %arg1: memref<32x128xbf16, #tpu.memory_space<vmem>>, %arg2: memref<32x128xbf16, #tpu.memory_space<vmem>>, %arg3: memref<1x1xf32, #tpu.memory_space<smem>>) attributes {dimension_semantics = [#tpu.dimension_semantics<arbitrary>], iteration_bounds = array<i64: 2>, scalar_prefetch = 0 : i64, scratch_operands = 0 : i64, tpu.core_type = #tpu.core_type<tc>, window_params = [{transform_indices = @transform_0, window_bounds = array<i64: 32, 128>}, {transform_indices = @transform_1, window_bounds = array<i64: 32, 128>}, {transform_indices = @transform_2, window_bounds = array<i64: 1, 1>}]} {
    %c0_i32 = arith.constant 0 : i32
    %0 = arith.cmpi eq, %arg0, %c0_i32 : i32
    %1 = arith.extui %0 : i1 to i32
    %c0_i32_0 = arith.constant 0 : i32
    %2 = arith.cmpi ne, %1, %c0_i32_0 : i32
    scf.if %2 {
      %cst_8 = arith.constant 0.000000e+00 : f32
      %c0_9 = arith.constant 0 : index
      %c0_10 = arith.constant 0 : index
      %16 = memref.load %arg3[%c0_9, %c0_10] : memref<1x1xf32, #tpu.memory_space<smem>>
      memref.store %cst_8, %arg3[%c0_9, %c0_10] : memref<1x1xf32, #tpu.memory_space<smem>>
    } else {
    }
    %c0 = arith.constant 0 : index
    %c0_1 = arith.constant 0 : index
    %3 = vector.load %arg1[%c0, %c0_1] : memref<32x128xbf16, #tpu.memory_space<vmem>>, vector<32x128xbf16>
    %4 = arith.extf %3 : vector<32x128xbf16> to vector<32x128xf32>
    %c0_2 = arith.constant 0 : index
    %c0_3 = arith.constant 0 : index
    %5 = vector.load %arg2[%c0_2, %c0_3] : memref<32x128xbf16, #tpu.memory_space<vmem>>, vector<32x128xbf16>
    %6 = arith.extf %5 : vector<32x128xbf16> to vector<32x128xf32>
    %7 = arith.subf %4, %6 : vector<32x128xf32>
    %c0_4 = arith.constant 0 : index
    %c0_5 = arith.constant 0 : index
    %8 = memref.load %arg3[%c0_4, %c0_5] : memref<1x1xf32, #tpu.memory_space<smem>>
    %9 = arith.mulf %7, %7 : vector<32x128xf32>
    %10 = vector.shape_cast %9 : vector<32x128xf32> to vector<1x32x128xf32>
    %cst = arith.constant dense<0.000000e+00> : vector<1xf32>
    %11 = vector.multi_reduction <add>, %10, %cst [1, 2] : vector<1x32x128xf32> to vector<1xf32>
    %12 = vector.shape_cast %11 : vector<1xf32> to vector<1x1x1xf32>
    %13 = vector.extract %12[0, 0, 0] : f32 from vector<1x1x1xf32>
    %14 = arith.addf %8, %13 : f32
    %c0_6 = arith.constant 0 : index
    %c0_7 = arith.constant 0 : index
    %15 = memref.load %arg3[%c0_6, %c0_7] : memref<1x1xf32, #tpu.memory_space<smem>>
    memref.store %14, %arg3[%c0_6, %c0_7] : memref<1x1xf32, #tpu.memory_space<smem>>
    return
  }
  func.func @transform_0(%arg0: i32) -> (i32, i32) {
    %c0_i32 = arith.constant 0 : i32
    %c0_i32_0 = arith.constant 0 : i32
    return %arg0, %c0_i32 : i32, i32
  }
  func.func @transform_1(%arg0: i32) -> (i32, i32) {
    %c2_i32 = arith.constant 2 : i32
    %0 = arith.addi %arg0, %c2_i32 : i32
    %c0_i32 = arith.constant 0 : i32
    %c0_i32_0 = arith.constant 0 : i32
    return %0, %c0_i32 : i32, i32
  }
  func.func @transform_2(%arg0: i32) -> (i32, i32) {
    %c0_i32 = arith.constant 0 : i32
    %c0_i32_0 = arith.constant 0 : i32
    %c0_i32_1 = arith.constant 0 : i32
    return %c0_i32, %c0_i32_0 : i32, i32
  }
}

module attributes {stable_mosaic.version = 11 : i64} {
  func.func @_conv3x3_kernel(%arg0: i32, %arg1: memref<1x4x9x9x16xbf16, #tpu.memory_space<vmem>>, %arg2: memref<9x16x32xbf16, #tpu.memory_space<vmem>>, %arg3: memref<1x32xf32, #tpu.memory_space<vmem>>, %arg4: memref<1x64x32xbf16, #tpu.memory_space<vmem>>) attributes {dimension_semantics = [#tpu.dimension_semantics<parallel>], iteration_bounds = array<i64: 4>, scalar_prefetch = 0 : i64, scratch_operands = 0 : i64, tpu.core_type = #tpu.core_type<tc>, window_params = [{transform_indices = @transform_0, window_bounds = array<i64: 1, 4, 9, 9, 16>}, {pipeline_mode = #tpu.pipeline_mode<synchronous>, transform_indices = @transform_1, window_bounds = array<i64: 9, 16, 32>}, {pipeline_mode = #tpu.pipeline_mode<synchronous>, transform_indices = @transform_2, window_bounds = array<i64: 1, 32>}, {transform_indices = @transform_3, window_bounds = array<i64: 1, 64, 32>}]} {
    %cst = arith.constant 0.000000e+00 : f32
    %0 = vector.broadcast %cst : f32 to vector<64x32xf32>
    %c0 = arith.constant 0 : index
    %c0_0 = arith.constant 0 : index
    %c0_1 = arith.constant 0 : index
    %c0_2 = arith.constant 0 : index
    %c0_3 = arith.constant 0 : index
    %1 = vector.load %arg1[%c0, %c0_0, %c0_1, %c0_2, %c0_3] : memref<1x4x9x9x16xbf16, #tpu.memory_space<vmem>>, vector<1x1x8x8x16xbf16>
    %2 = vector.shape_cast %1 : vector<1x1x8x8x16xbf16> to vector<8x8x16xbf16>
    %3 = vector.shape_cast %2 : vector<8x8x16xbf16> to vector<64x16xbf16>
    %c0_4 = arith.constant 0 : index
    %c0_5 = arith.constant 0 : index
    %c0_6 = arith.constant 0 : index
    %4 = vector.load %arg2[%c0_4, %c0_5, %c0_6] : memref<9x16x32xbf16, #tpu.memory_space<vmem>>, vector<1x16x32xbf16>
    %5 = vector.shape_cast %4 : vector<1x16x32xbf16> to vector<16x32xbf16>
    %cst_7 = arith.constant dense<0.000000e+00> : vector<64x32xf32>
    %6 = tpu.matmul %3, %5, %cst_7 {dimension_numbers = #tpu.dot_dimension_numbers<[1], [0], [0], [1], [0, 0, 1, 1], [], []>} : vector<64x16xbf16>, vector<16x32xbf16>, vector<64x32xf32> -> vector<64x32xf32>
    %7 = arith.addf %0, %6 : vector<64x32xf32>
    %c0_8 = arith.constant 0 : index
    %c1 = arith.constant 1 : index
    %c0_9 = arith.constant 0 : index
    %c0_10 = arith.constant 0 : index
    %c0_11 = arith.constant 0 : index
    %8 = vector.load %arg1[%c0_8, %c1, %c0_9, %c0_10, %c0_11] : memref<1x4x9x9x16xbf16, #tpu.memory_space<vmem>>, vector<1x1x8x8x16xbf16>
    %9 = vector.shape_cast %8 : vector<1x1x8x8x16xbf16> to vector<8x8x16xbf16>
    %10 = vector.shape_cast %9 : vector<8x8x16xbf16> to vector<64x16xbf16>
    %c1_12 = arith.constant 1 : index
    %c0_13 = arith.constant 0 : index
    %c0_14 = arith.constant 0 : index
    %11 = vector.load %arg2[%c1_12, %c0_13, %c0_14] : memref<9x16x32xbf16, #tpu.memory_space<vmem>>, vector<1x16x32xbf16>
    %12 = vector.shape_cast %11 : vector<1x16x32xbf16> to vector<16x32xbf16>
    %cst_15 = arith.constant dense<0.000000e+00> : vector<64x32xf32>
    %13 = tpu.matmul %10, %12, %cst_15 {dimension_numbers = #tpu.dot_dimension_numbers<[1], [0], [0], [1], [0, 0, 1, 1], [], []>} : vector<64x16xbf16>, vector<16x32xbf16>, vector<64x32xf32> -> vector<64x32xf32>
    %14 = arith.addf %7, %13 : vector<64x32xf32>
    %c0_16 = arith.constant 0 : index
    %c0_17 = arith.constant 0 : index
    %c0_18 = arith.constant 0 : index
    %c1_19 = arith.constant 1 : index
    %c0_20 = arith.constant 0 : index
    %15 = vector.load %arg1[%c0_16, %c0_17, %c0_18, %c1_19, %c0_20] : memref<1x4x9x9x16xbf16, #tpu.memory_space<vmem>>, vector<1x1x8x8x16xbf16>
    %16 = vector.shape_cast %15 : vector<1x1x8x8x16xbf16> to vector<8x8x16xbf16>
    %17 = vector.shape_cast %16 : vector<8x8x16xbf16> to vector<64x16xbf16>
    %c2 = arith.constant 2 : index
    %c0_21 = arith.constant 0 : index
    %c0_22 = arith.constant 0 : index
    %18 = vector.load %arg2[%c2, %c0_21, %c0_22] : memref<9x16x32xbf16, #tpu.memory_space<vmem>>, vector<1x16x32xbf16>
    %19 = vector.shape_cast %18 : vector<1x16x32xbf16> to vector<16x32xbf16>
    %cst_23 = arith.constant dense<0.000000e+00> : vector<64x32xf32>
    %20 = tpu.matmul %17, %19, %cst_23 {dimension_numbers = #tpu.dot_dimension_numbers<[1], [0], [0], [1], [0, 0, 1, 1], [], []>} : vector<64x16xbf16>, vector<16x32xbf16>, vector<64x32xf32> -> vector<64x32xf32>
    %21 = arith.addf %14, %20 : vector<64x32xf32>
    %c0_24 = arith.constant 0 : index
    %c2_25 = arith.constant 2 : index
    %c0_26 = arith.constant 0 : index
    %c0_27 = arith.constant 0 : index
    %c0_28 = arith.constant 0 : index
    %22 = vector.load %arg1[%c0_24, %c2_25, %c0_26, %c0_27, %c0_28] : memref<1x4x9x9x16xbf16, #tpu.memory_space<vmem>>, vector<1x1x8x8x16xbf16>
    %23 = vector.shape_cast %22 : vector<1x1x8x8x16xbf16> to vector<8x8x16xbf16>
    %24 = vector.shape_cast %23 : vector<8x8x16xbf16> to vector<64x16xbf16>
    %c3 = arith.constant 3 : index
    %c0_29 = arith.constant 0 : index
    %c0_30 = arith.constant 0 : index
    %25 = vector.load %arg2[%c3, %c0_29, %c0_30] : memref<9x16x32xbf16, #tpu.memory_space<vmem>>, vector<1x16x32xbf16>
    %26 = vector.shape_cast %25 : vector<1x16x32xbf16> to vector<16x32xbf16>
    %cst_31 = arith.constant dense<0.000000e+00> : vector<64x32xf32>
    %27 = tpu.matmul %24, %26, %cst_31 {dimension_numbers = #tpu.dot_dimension_numbers<[1], [0], [0], [1], [0, 0, 1, 1], [], []>} : vector<64x16xbf16>, vector<16x32xbf16>, vector<64x32xf32> -> vector<64x32xf32>
    %28 = arith.addf %21, %27 : vector<64x32xf32>
    %c0_32 = arith.constant 0 : index
    %c3_33 = arith.constant 3 : index
    %c0_34 = arith.constant 0 : index
    %c0_35 = arith.constant 0 : index
    %c0_36 = arith.constant 0 : index
    %29 = vector.load %arg1[%c0_32, %c3_33, %c0_34, %c0_35, %c0_36] : memref<1x4x9x9x16xbf16, #tpu.memory_space<vmem>>, vector<1x1x8x8x16xbf16>
    %30 = vector.shape_cast %29 : vector<1x1x8x8x16xbf16> to vector<8x8x16xbf16>
    %31 = vector.shape_cast %30 : vector<8x8x16xbf16> to vector<64x16xbf16>
    %c4 = arith.constant 4 : index
    %c0_37 = arith.constant 0 : index
    %c0_38 = arith.constant 0 : index
    %32 = vector.load %arg2[%c4, %c0_37, %c0_38] : memref<9x16x32xbf16, #tpu.memory_space<vmem>>, vector<1x16x32xbf16>
    %33 = vector.shape_cast %32 : vector<1x16x32xbf16> to vector<16x32xbf16>
    %cst_39 = arith.constant dense<0.000000e+00> : vector<64x32xf32>
    %34 = tpu.matmul %31, %33, %cst_39 {dimension_numbers = #tpu.dot_dimension_numbers<[1], [0], [0], [1], [0, 0, 1, 1], [], []>} : vector<64x16xbf16>, vector<16x32xbf16>, vector<64x32xf32> -> vector<64x32xf32>
    %35 = arith.addf %28, %34 : vector<64x32xf32>
    %c0_40 = arith.constant 0 : index
    %c2_41 = arith.constant 2 : index
    %c0_42 = arith.constant 0 : index
    %c1_43 = arith.constant 1 : index
    %c0_44 = arith.constant 0 : index
    %36 = vector.load %arg1[%c0_40, %c2_41, %c0_42, %c1_43, %c0_44] : memref<1x4x9x9x16xbf16, #tpu.memory_space<vmem>>, vector<1x1x8x8x16xbf16>
    %37 = vector.shape_cast %36 : vector<1x1x8x8x16xbf16> to vector<8x8x16xbf16>
    %38 = vector.shape_cast %37 : vector<8x8x16xbf16> to vector<64x16xbf16>
    %c5 = arith.constant 5 : index
    %c0_45 = arith.constant 0 : index
    %c0_46 = arith.constant 0 : index
    %39 = vector.load %arg2[%c5, %c0_45, %c0_46] : memref<9x16x32xbf16, #tpu.memory_space<vmem>>, vector<1x16x32xbf16>
    %40 = vector.shape_cast %39 : vector<1x16x32xbf16> to vector<16x32xbf16>
    %cst_47 = arith.constant dense<0.000000e+00> : vector<64x32xf32>
    %41 = tpu.matmul %38, %40, %cst_47 {dimension_numbers = #tpu.dot_dimension_numbers<[1], [0], [0], [1], [0, 0, 1, 1], [], []>} : vector<64x16xbf16>, vector<16x32xbf16>, vector<64x32xf32> -> vector<64x32xf32>
    %42 = arith.addf %35, %41 : vector<64x32xf32>
    %c0_48 = arith.constant 0 : index
    %c0_49 = arith.constant 0 : index
    %c1_50 = arith.constant 1 : index
    %c0_51 = arith.constant 0 : index
    %c0_52 = arith.constant 0 : index
    %43 = vector.load %arg1[%c0_48, %c0_49, %c1_50, %c0_51, %c0_52] : memref<1x4x9x9x16xbf16, #tpu.memory_space<vmem>>, vector<1x1x8x8x16xbf16>
    %44 = vector.shape_cast %43 : vector<1x1x8x8x16xbf16> to vector<8x8x16xbf16>
    %45 = vector.shape_cast %44 : vector<8x8x16xbf16> to vector<64x16xbf16>
    %c6 = arith.constant 6 : index
    %c0_53 = arith.constant 0 : index
    %c0_54 = arith.constant 0 : index
    %46 = vector.load %arg2[%c6, %c0_53, %c0_54] : memref<9x16x32xbf16, #tpu.memory_space<vmem>>, vector<1x16x32xbf16>
    %47 = vector.shape_cast %46 : vector<1x16x32xbf16> to vector<16x32xbf16>
    %cst_55 = arith.constant dense<0.000000e+00> : vector<64x32xf32>
    %48 = tpu.matmul %45, %47, %cst_55 {dimension_numbers = #tpu.dot_dimension_numbers<[1], [0], [0], [1], [0, 0, 1, 1], [], []>} : vector<64x16xbf16>, vector<16x32xbf16>, vector<64x32xf32> -> vector<64x32xf32>
    %49 = arith.addf %42, %48 : vector<64x32xf32>
    %c0_56 = arith.constant 0 : index
    %c1_57 = arith.constant 1 : index
    %c1_58 = arith.constant 1 : index
    %c0_59 = arith.constant 0 : index
    %c0_60 = arith.constant 0 : index
    %50 = vector.load %arg1[%c0_56, %c1_57, %c1_58, %c0_59, %c0_60] : memref<1x4x9x9x16xbf16, #tpu.memory_space<vmem>>, vector<1x1x8x8x16xbf16>
    %51 = vector.shape_cast %50 : vector<1x1x8x8x16xbf16> to vector<8x8x16xbf16>
    %52 = vector.shape_cast %51 : vector<8x8x16xbf16> to vector<64x16xbf16>
    %c7 = arith.constant 7 : index
    %c0_61 = arith.constant 0 : index
    %c0_62 = arith.constant 0 : index
    %53 = vector.load %arg2[%c7, %c0_61, %c0_62] : memref<9x16x32xbf16, #tpu.memory_space<vmem>>, vector<1x16x32xbf16>
    %54 = vector.shape_cast %53 : vector<1x16x32xbf16> to vector<16x32xbf16>
    %cst_63 = arith.constant dense<0.000000e+00> : vector<64x32xf32>
    %55 = tpu.matmul %52, %54, %cst_63 {dimension_numbers = #tpu.dot_dimension_numbers<[1], [0], [0], [1], [0, 0, 1, 1], [], []>} : vector<64x16xbf16>, vector<16x32xbf16>, vector<64x32xf32> -> vector<64x32xf32>
    %56 = arith.addf %49, %55 : vector<64x32xf32>
    %c0_64 = arith.constant 0 : index
    %c0_65 = arith.constant 0 : index
    %c1_66 = arith.constant 1 : index
    %c1_67 = arith.constant 1 : index
    %c0_68 = arith.constant 0 : index
    %57 = vector.load %arg1[%c0_64, %c0_65, %c1_66, %c1_67, %c0_68] : memref<1x4x9x9x16xbf16, #tpu.memory_space<vmem>>, vector<1x1x8x8x16xbf16>
    %58 = vector.shape_cast %57 : vector<1x1x8x8x16xbf16> to vector<8x8x16xbf16>
    %59 = vector.shape_cast %58 : vector<8x8x16xbf16> to vector<64x16xbf16>
    %c8 = arith.constant 8 : index
    %c0_69 = arith.constant 0 : index
    %c0_70 = arith.constant 0 : index
    %60 = vector.load %arg2[%c8, %c0_69, %c0_70] : memref<9x16x32xbf16, #tpu.memory_space<vmem>>, vector<1x16x32xbf16>
    %61 = vector.shape_cast %60 : vector<1x16x32xbf16> to vector<16x32xbf16>
    %cst_71 = arith.constant dense<0.000000e+00> : vector<64x32xf32>
    %62 = tpu.matmul %59, %61, %cst_71 {dimension_numbers = #tpu.dot_dimension_numbers<[1], [0], [0], [1], [0, 0, 1, 1], [], []>} : vector<64x16xbf16>, vector<16x32xbf16>, vector<64x32xf32> -> vector<64x32xf32>
    %63 = arith.addf %56, %62 : vector<64x32xf32>
    %c0_72 = arith.constant 0 : index
    %c0_73 = arith.constant 0 : index
    %64 = vector.load %arg3[%c0_72, %c0_73] : memref<1x32xf32, #tpu.memory_space<vmem>>, vector<1x32xf32>
    %65 = vector.broadcast %64 : vector<1x32xf32> to vector<64x32xf32>
    %66 = arith.addf %63, %65 : vector<64x32xf32>
    %cst_74 = arith.constant 0.000000e+00 : f32
    %67 = vector.broadcast %cst_74 : f32 to vector<64x32xf32>
    %68 = arith.maximumf %66, %67 : vector<64x32xf32>
    %69 = arith.truncf %68 : vector<64x32xf32> to vector<64x32xbf16>
    %c0_75 = arith.constant 0 : index
    %c0_76 = arith.constant 0 : index
    %c0_77 = arith.constant 0 : index
    %70 = vector.load %arg4[%c0_75, %c0_76, %c0_77] : memref<1x64x32xbf16, #tpu.memory_space<vmem>>, vector<1x64x32xbf16>
    %71 = vector.shape_cast %70 : vector<1x64x32xbf16> to vector<64x32xbf16>
    %72 = vector.shape_cast %69 : vector<64x32xbf16> to vector<1x64x32xbf16>
    tpu.vector_store %arg4[%c0_75, %c0_76, %c0_77], %72 {strides = array<i32>} : memref<1x64x32xbf16, #tpu.memory_space<vmem>>, vector<1x64x32xbf16>,
    return
  }
  func.func @transform_0(%arg0: i32) -> (i32, i32, i32, i32, i32) {
    %c0_i32 = arith.constant 0 : i32
    %c0_i32_0 = arith.constant 0 : i32
    %c0_i32_1 = arith.constant 0 : i32
    %c0_i32_2 = arith.constant 0 : i32
    %c0_i32_3 = arith.constant 0 : i32
    return %arg0, %c0_i32, %c0_i32_0, %c0_i32_1, %c0_i32_2 : i32, i32, i32, i32, i32
  }
  func.func @transform_1(%arg0: i32) -> (i32, i32, i32) {
    %c0_i32 = arith.constant 0 : i32
    %c0_i32_0 = arith.constant 0 : i32
    %c0_i32_1 = arith.constant 0 : i32
    %c0_i32_2 = arith.constant 0 : i32
    return %c0_i32, %c0_i32_0, %c0_i32_1 : i32, i32, i32
  }
  func.func @transform_2(%arg0: i32) -> (i32, i32) {
    %c0_i32 = arith.constant 0 : i32
    %c0_i32_0 = arith.constant 0 : i32
    %c0_i32_1 = arith.constant 0 : i32
    return %c0_i32, %c0_i32_0 : i32, i32
  }
  func.func @transform_3(%arg0: i32) -> (i32, i32, i32) {
    %c0_i32 = arith.constant 0 : i32
    %c0_i32_0 = arith.constant 0 : i32
    %c0_i32_1 = arith.constant 0 : i32
    return %arg0, %c0_i32, %c0_i32_0 : i32, i32, i32
  }
}

module attributes {stable_mosaic.version = 11 : i64} {
  func.func @_sse_kernel(%arg0: i32, %arg1: memref<16x128xbf16, #tpu.memory_space<vmem>>, %arg2: memref<16x128xbf16, #tpu.memory_space<vmem>>, %arg3: memref<1x1xf32, #tpu.memory_space<smem>>) attributes {dimension_semantics = [#tpu.dimension_semantics<arbitrary>], iteration_bounds = array<i64: 2>, scalar_prefetch = 0 : i64, scratch_operands = 0 : i64, tpu.core_type = #tpu.core_type<tc>, window_params = [{transform_indices = @transform_0, window_bounds = array<i64: 16, 128>}, {transform_indices = @transform_1, window_bounds = array<i64: 16, 128>}, {transform_indices = @transform_2, window_bounds = array<i64: 1, 1>}]} {
    %c0_i32 = arith.constant 0 : i32
    %0 = arith.cmpi eq, %arg0, %c0_i32 : i32
    %1 = arith.extui %0 : i1 to i32
    %c0_i32_0 = arith.constant 0 : i32
    %2 = arith.cmpi ne, %1, %c0_i32_0 : i32
    scf.if %2 {
      %cst_8 = arith.constant 0.000000e+00 : f32
      %c0_9 = arith.constant 0 : index
      %c0_10 = arith.constant 0 : index
      %16 = memref.load %arg3[%c0_9, %c0_10] : memref<1x1xf32, #tpu.memory_space<smem>>
      memref.store %cst_8, %arg3[%c0_9, %c0_10] : memref<1x1xf32, #tpu.memory_space<smem>>
    } else {
    }
    %c0 = arith.constant 0 : index
    %c0_1 = arith.constant 0 : index
    %3 = vector.load %arg1[%c0, %c0_1] : memref<16x128xbf16, #tpu.memory_space<vmem>>, vector<16x128xbf16>
    %4 = arith.extf %3 : vector<16x128xbf16> to vector<16x128xf32>
    %c0_2 = arith.constant 0 : index
    %c0_3 = arith.constant 0 : index
    %5 = vector.load %arg2[%c0_2, %c0_3] : memref<16x128xbf16, #tpu.memory_space<vmem>>, vector<16x128xbf16>
    %6 = arith.extf %5 : vector<16x128xbf16> to vector<16x128xf32>
    %7 = arith.subf %4, %6 : vector<16x128xf32>
    %c0_4 = arith.constant 0 : index
    %c0_5 = arith.constant 0 : index
    %8 = memref.load %arg3[%c0_4, %c0_5] : memref<1x1xf32, #tpu.memory_space<smem>>
    %9 = arith.mulf %7, %7 : vector<16x128xf32>
    %10 = vector.shape_cast %9 : vector<16x128xf32> to vector<1x16x128xf32>
    %cst = arith.constant dense<0.000000e+00> : vector<1xf32>
    %11 = vector.multi_reduction <add>, %10, %cst [1, 2] : vector<1x16x128xf32> to vector<1xf32>
    %12 = vector.shape_cast %11 : vector<1xf32> to vector<1x1x1xf32>
    %13 = vector.extract %12[0, 0, 0] : f32 from vector<1x1x1xf32>
    %14 = arith.addf %8, %13 : f32
    %c0_6 = arith.constant 0 : index
    %c0_7 = arith.constant 0 : index
    %15 = memref.load %arg3[%c0_6, %c0_7] : memref<1x1xf32, #tpu.memory_space<smem>>
    memref.store %14, %arg3[%c0_6, %c0_7] : memref<1x1xf32, #tpu.memory_space<smem>>
    return
  }
  func.func @transform_0(%arg0: i32) -> (i32, i32) {
    %c0_i32 = arith.constant 0 : i32
    %c0_i32_0 = arith.constant 0 : i32
    return %arg0, %c0_i32 : i32, i32
  }
  func.func @transform_1(%arg0: i32) -> (i32, i32) {
    %c2_i32 = arith.constant 2 : i32
    %0 = arith.addi %arg0, %c2_i32 : i32
    %c0_i32 = arith.constant 0 : i32
    %c0_i32_0 = arith.constant 0 : i32
    return %0, %c0_i32 : i32, i32
  }
  func.func @transform_2(%arg0: i32) -> (i32, i32) {
    %c0_i32 = arith.constant 0 : i32
    %c0_i32_0 = arith.constant 0 : i32
    %c0_i32_1 = arith.constant 0 : i32
    return %c0_i32, %c0_i32_0 : i32, i32
  }
}

module attributes {stable_mosaic.version = 11 : i64} {
  func.func @_conv3x3_kernel(%arg0: i32, %arg1: memref<1x1x12x12x32xbf16, #tpu.memory_space<vmem>>, %arg2: memref<9x32x64xbf16, #tpu.memory_space<vmem>>, %arg3: memref<1x64xf32, #tpu.memory_space<vmem>>, %arg4: memref<1x64x64xbf16, #tpu.memory_space<vmem>>) attributes {dimension_semantics = [#tpu.dimension_semantics<parallel>], iteration_bounds = array<i64: 4>, scalar_prefetch = 0 : i64, scratch_operands = 0 : i64, tpu.core_type = #tpu.core_type<tc>, window_params = [{transform_indices = @transform_0, window_bounds = array<i64: 1, 1, 12, 12, 32>}, {pipeline_mode = #tpu.pipeline_mode<synchronous>, transform_indices = @transform_1, window_bounds = array<i64: 9, 32, 64>}, {pipeline_mode = #tpu.pipeline_mode<synchronous>, transform_indices = @transform_2, window_bounds = array<i64: 1, 64>}, {transform_indices = @transform_3, window_bounds = array<i64: 1, 64, 64>}]} {
    %cst = arith.constant 0.000000e+00 : f32
    %0 = vector.broadcast %cst : f32 to vector<64x64xf32>
    %c0 = arith.constant 0 : index
    %c0_0 = arith.constant 0 : index
    %c0_1 = arith.constant 0 : index
    %c0_2 = arith.constant 0 : index
    %c0_3 = arith.constant 0 : index
    %1 = vector.load %arg1[%c0, %c0_0, %c0_1, %c0_2, %c0_3] : memref<1x1x12x12x32xbf16, #tpu.memory_space<vmem>>, vector<1x1x8x8x32xbf16>
    %2 = vector.shape_cast %1 : vector<1x1x8x8x32xbf16> to vector<8x8x32xbf16>
    %3 = vector.shape_cast %2 : vector<8x8x32xbf16> to vector<64x32xbf16>
    %c0_4 = arith.constant 0 : index
    %c0_5 = arith.constant 0 : index
    %c0_6 = arith.constant 0 : index
    %4 = vector.load %arg2[%c0_4, %c0_5, %c0_6] : memref<9x32x64xbf16, #tpu.memory_space<vmem>>, vector<1x32x64xbf16>
    %5 = vector.shape_cast %4 : vector<1x32x64xbf16> to vector<32x64xbf16>
    %cst_7 = arith.constant dense<0.000000e+00> : vector<64x64xf32>
    %6 = tpu.matmul %3, %5, %cst_7 {dimension_numbers = #tpu.dot_dimension_numbers<[1], [0], [0], [1], [0, 0, 1, 1], [], []>} : vector<64x32xbf16>, vector<32x64xbf16>, vector<64x64xf32> -> vector<64x64xf32>
    %7 = arith.addf %0, %6 : vector<64x64xf32>
    %c0_8 = arith.constant 0 : index
    %c0_9 = arith.constant 0 : index
    %c0_10 = arith.constant 0 : index
    %c2 = arith.constant 2 : index
    %c0_11 = arith.constant 0 : index
    %8 = vector.load %arg1[%c0_8, %c0_9, %c0_10, %c2, %c0_11] : memref<1x1x12x12x32xbf16, #tpu.memory_space<vmem>>, vector<1x1x8x8x32xbf16>
    %9 = vector.shape_cast %8 : vector<1x1x8x8x32xbf16> to vector<8x8x32xbf16>
    %10 = vector.shape_cast %9 : vector<8x8x32xbf16> to vector<64x32xbf16>
    %c1 = arith.constant 1 : index
    %c0_12 = arith.constant 0 : index
    %c0_13 = arith.constant 0 : index
    %11 = vector.load %arg2[%c1, %c0_12, %c0_13] : memref<9x32x64xbf16, #tpu.memory_space<vmem>>, vector<1x32x64xbf16>
    %12 = vector.shape_cast %11 : vector<1x32x64xbf16> to vector<32x64xbf16>
    %cst_14 = arith.constant dense<0.000000e+00> : vector<64x64xf32>
    %13 = tpu.matmul %10, %12, %cst_14 {dimension_numbers = #tpu.dot_dimension_numbers<[1], [0], [0], [1], [0, 0, 1, 1], [], []>} : vector<64x32xbf16>, vector<32x64xbf16>, vector<64x64xf32> -> vector<64x64xf32>
    %14 = arith.addf %7, %13 : vector<64x64xf32>
    %c0_15 = arith.constant 0 : index
    %c0_16 = arith.constant 0 : index
    %c0_17 = arith.constant 0 : index
    %c4 = arith.constant 4 : index
    %c0_18 = arith.constant 0 : index
    %15 = vector.load %arg1[%c0_15, %c0_16, %c0_17, %c4, %c0_18] : memref<1x1x12x12x32xbf16, #tpu.memory_space<vmem>>, vector<1x1x8x8x32xbf16>
    %16 = vector.shape_cast %15 : vector<1x1x8x8x32xbf16> to vector<8x8x32xbf16>
    %17 = vector.shape_cast %16 : vector<8x8x32xbf16> to vector<64x32xbf16>
    %c2_19 = arith.constant 2 : index
    %c0_20 = arith.constant 0 : index
    %c0_21 = arith.constant 0 : index
    %18 = vector.load %arg2[%c2_19, %c0_20, %c0_21] : memref<9x32x64xbf16, #tpu.memory_space<vmem>>, vector<1x32x64xbf16>
    %19 = vector.shape_cast %18 : vector<1x32x64xbf16> to vector<32x64xbf16>
    %cst_22 = arith.constant dense<0.000000e+00> : vector<64x64xf32>
    %20 = tpu.matmul %17, %19, %cst_22 {dimension_numbers = #tpu.dot_dimension_numbers<[1], [0], [0], [1], [0, 0, 1, 1], [], []>} : vector<64x32xbf16>, vector<32x64xbf16>, vector<64x64xf32> -> vector<64x64xf32>
    %21 = arith.addf %14, %20 : vector<64x64xf32>
    %c0_23 = arith.constant 0 : index
    %c0_24 = arith.constant 0 : index
    %c2_25 = arith.constant 2 : index
    %c0_26 = arith.constant 0 : index
    %c0_27 = arith.constant 0 : index
    %22 = vector.load %arg1[%c0_23, %c0_24, %c2_25, %c0_26, %c0_27] : memref<1x1x12x12x32xbf16, #tpu.memory_space<vmem>>, vector<1x1x8x8x32xbf16>
    %23 = vector.shape_cast %22 : vector<1x1x8x8x32xbf16> to vector<8x8x32xbf16>
    %24 = vector.shape_cast %23 : vector<8x8x32xbf16> to vector<64x32xbf16>
    %c3 = arith.constant 3 : index
    %c0_28 = arith.constant 0 : index
    %c0_29 = arith.constant 0 : index
    %25 = vector.load %arg2[%c3, %c0_28, %c0_29] : memref<9x32x64xbf16, #tpu.memory_space<vmem>>, vector<1x32x64xbf16>
    %26 = vector.shape_cast %25 : vector<1x32x64xbf16> to vector<32x64xbf16>
    %cst_30 = arith.constant dense<0.000000e+00> : vector<64x64xf32>
    %27 = tpu.matmul %24, %26, %cst_30 {dimension_numbers = #tpu.dot_dimension_numbers<[1], [0], [0], [1], [0, 0, 1, 1], [], []>} : vector<64x32xbf16>, vector<32x64xbf16>, vector<64x64xf32> -> vector<64x64xf32>
    %28 = arith.addf %21, %27 : vector<64x64xf32>
    %c0_31 = arith.constant 0 : index
    %c0_32 = arith.constant 0 : index
    %c2_33 = arith.constant 2 : index
    %c2_34 = arith.constant 2 : index
    %c0_35 = arith.constant 0 : index
    %29 = vector.load %arg1[%c0_31, %c0_32, %c2_33, %c2_34, %c0_35] : memref<1x1x12x12x32xbf16, #tpu.memory_space<vmem>>, vector<1x1x8x8x32xbf16>
    %30 = vector.shape_cast %29 : vector<1x1x8x8x32xbf16> to vector<8x8x32xbf16>
    %31 = vector.shape_cast %30 : vector<8x8x32xbf16> to vector<64x32xbf16>
    %c4_36 = arith.constant 4 : index
    %c0_37 = arith.constant 0 : index
    %c0_38 = arith.constant 0 : index
    %32 = vector.load %arg2[%c4_36, %c0_37, %c0_38] : memref<9x32x64xbf16, #tpu.memory_space<vmem>>, vector<1x32x64xbf16>
    %33 = vector.shape_cast %32 : vector<1x32x64xbf16> to vector<32x64xbf16>
    %cst_39 = arith.constant dense<0.000000e+00> : vector<64x64xf32>
    %34 = tpu.matmul %31, %33, %cst_39 {dimension_numbers = #tpu.dot_dimension_numbers<[1], [0], [0], [1], [0, 0, 1, 1], [], []>} : vector<64x32xbf16>, vector<32x64xbf16>, vector<64x64xf32> -> vector<64x64xf32>
    %35 = arith.addf %28, %34 : vector<64x64xf32>
    %c0_40 = arith.constant 0 : index
    %c0_41 = arith.constant 0 : index
    %c2_42 = arith.constant 2 : index
    %c4_43 = arith.constant 4 : index
    %c0_44 = arith.constant 0 : index
    %36 = vector.load %arg1[%c0_40, %c0_41, %c2_42, %c4_43, %c0_44] : memref<1x1x12x12x32xbf16, #tpu.memory_space<vmem>>, vector<1x1x8x8x32xbf16>
    %37 = vector.shape_cast %36 : vector<1x1x8x8x32xbf16> to vector<8x8x32xbf16>
    %38 = vector.shape_cast %37 : vector<8x8x32xbf16> to vector<64x32xbf16>
    %c5 = arith.constant 5 : index
    %c0_45 = arith.constant 0 : index
    %c0_46 = arith.constant 0 : index
    %39 = vector.load %arg2[%c5, %c0_45, %c0_46] : memref<9x32x64xbf16, #tpu.memory_space<vmem>>, vector<1x32x64xbf16>
    %40 = vector.shape_cast %39 : vector<1x32x64xbf16> to vector<32x64xbf16>
    %cst_47 = arith.constant dense<0.000000e+00> : vector<64x64xf32>
    %41 = tpu.matmul %38, %40, %cst_47 {dimension_numbers = #tpu.dot_dimension_numbers<[1], [0], [0], [1], [0, 0, 1, 1], [], []>} : vector<64x32xbf16>, vector<32x64xbf16>, vector<64x64xf32> -> vector<64x64xf32>
    %42 = arith.addf %35, %41 : vector<64x64xf32>
    %c0_48 = arith.constant 0 : index
    %c0_49 = arith.constant 0 : index
    %c4_50 = arith.constant 4 : index
    %c0_51 = arith.constant 0 : index
    %c0_52 = arith.constant 0 : index
    %43 = vector.load %arg1[%c0_48, %c0_49, %c4_50, %c0_51, %c0_52] : memref<1x1x12x12x32xbf16, #tpu.memory_space<vmem>>, vector<1x1x8x8x32xbf16>
    %44 = vector.shape_cast %43 : vector<1x1x8x8x32xbf16> to vector<8x8x32xbf16>
    %45 = vector.shape_cast %44 : vector<8x8x32xbf16> to vector<64x32xbf16>
    %c6 = arith.constant 6 : index
    %c0_53 = arith.constant 0 : index
    %c0_54 = arith.constant 0 : index
    %46 = vector.load %arg2[%c6, %c0_53, %c0_54] : memref<9x32x64xbf16, #tpu.memory_space<vmem>>, vector<1x32x64xbf16>
    %47 = vector.shape_cast %46 : vector<1x32x64xbf16> to vector<32x64xbf16>
    %cst_55 = arith.constant dense<0.000000e+00> : vector<64x64xf32>
    %48 = tpu.matmul %45, %47, %cst_55 {dimension_numbers = #tpu.dot_dimension_numbers<[1], [0], [0], [1], [0, 0, 1, 1], [], []>} : vector<64x32xbf16>, vector<32x64xbf16>, vector<64x64xf32> -> vector<64x64xf32>
    %49 = arith.addf %42, %48 : vector<64x64xf32>
    %c0_56 = arith.constant 0 : index
    %c0_57 = arith.constant 0 : index
    %c4_58 = arith.constant 4 : index
    %c2_59 = arith.constant 2 : index
    %c0_60 = arith.constant 0 : index
    %50 = vector.load %arg1[%c0_56, %c0_57, %c4_58, %c2_59, %c0_60] : memref<1x1x12x12x32xbf16, #tpu.memory_space<vmem>>, vector<1x1x8x8x32xbf16>
    %51 = vector.shape_cast %50 : vector<1x1x8x8x32xbf16> to vector<8x8x32xbf16>
    %52 = vector.shape_cast %51 : vector<8x8x32xbf16> to vector<64x32xbf16>
    %c7 = arith.constant 7 : index
    %c0_61 = arith.constant 0 : index
    %c0_62 = arith.constant 0 : index
    %53 = vector.load %arg2[%c7, %c0_61, %c0_62] : memref<9x32x64xbf16, #tpu.memory_space<vmem>>, vector<1x32x64xbf16>
    %54 = vector.shape_cast %53 : vector<1x32x64xbf16> to vector<32x64xbf16>
    %cst_63 = arith.constant dense<0.000000e+00> : vector<64x64xf32>
    %55 = tpu.matmul %52, %54, %cst_63 {dimension_numbers = #tpu.dot_dimension_numbers<[1], [0], [0], [1], [0, 0, 1, 1], [], []>} : vector<64x32xbf16>, vector<32x64xbf16>, vector<64x64xf32> -> vector<64x64xf32>
    %56 = arith.addf %49, %55 : vector<64x64xf32>
    %c0_64 = arith.constant 0 : index
    %c0_65 = arith.constant 0 : index
    %c4_66 = arith.constant 4 : index
    %c4_67 = arith.constant 4 : index
    %c0_68 = arith.constant 0 : index
    %57 = vector.load %arg1[%c0_64, %c0_65, %c4_66, %c4_67, %c0_68] : memref<1x1x12x12x32xbf16, #tpu.memory_space<vmem>>, vector<1x1x8x8x32xbf16>
    %58 = vector.shape_cast %57 : vector<1x1x8x8x32xbf16> to vector<8x8x32xbf16>
    %59 = vector.shape_cast %58 : vector<8x8x32xbf16> to vector<64x32xbf16>
    %c8 = arith.constant 8 : index
    %c0_69 = arith.constant 0 : index
    %c0_70 = arith.constant 0 : index
    %60 = vector.load %arg2[%c8, %c0_69, %c0_70] : memref<9x32x64xbf16, #tpu.memory_space<vmem>>, vector<1x32x64xbf16>
    %61 = vector.shape_cast %60 : vector<1x32x64xbf16> to vector<32x64xbf16>
    %cst_71 = arith.constant dense<0.000000e+00> : vector<64x64xf32>
    %62 = tpu.matmul %59, %61, %cst_71 {dimension_numbers = #tpu.dot_dimension_numbers<[1], [0], [0], [1], [0, 0, 1, 1], [], []>} : vector<64x32xbf16>, vector<32x64xbf16>, vector<64x64xf32> -> vector<64x64xf32>
    %63 = arith.addf %56, %62 : vector<64x64xf32>
    %c0_72 = arith.constant 0 : index
    %c0_73 = arith.constant 0 : index
    %64 = vector.load %arg3[%c0_72, %c0_73] : memref<1x64xf32, #tpu.memory_space<vmem>>, vector<1x64xf32>
    %65 = vector.broadcast %64 : vector<1x64xf32> to vector<64x64xf32>
    %66 = arith.addf %63, %65 : vector<64x64xf32>
    %cst_74 = arith.constant 0.000000e+00 : f32
    %67 = vector.broadcast %cst_74 : f32 to vector<64x64xf32>
    %68 = arith.maximumf %66, %67 : vector<64x64xf32>
    %69 = arith.truncf %68 : vector<64x64xf32> to vector<64x64xbf16>
    %c0_75 = arith.constant 0 : index
    %c0_76 = arith.constant 0 : index
    %c0_77 = arith.constant 0 : index
    %70 = vector.load %arg4[%c0_75, %c0_76, %c0_77] : memref<1x64x64xbf16, #tpu.memory_space<vmem>>, vector<1x64x64xbf16>
    %71 = vector.shape_cast %70 : vector<1x64x64xbf16> to vector<64x64xbf16>
    %72 = vector.shape_cast %69 : vector<64x64xbf16> to vector<1x64x64xbf16>
    tpu.vector_store %arg4[%c0_75, %c0_76, %c0_77], %72 {strides = array<i32>} : memref<1x64x64xbf16, #tpu.memory_space<vmem>>, vector<1x64x64xbf16>,
    return
  }
  func.func @transform_0(%arg0: i32) -> (i32, i32, i32, i32, i32) {
    %c0_i32 = arith.constant 0 : i32
    %c0_i32_0 = arith.constant 0 : i32
    %c0_i32_1 = arith.constant 0 : i32
    %c0_i32_2 = arith.constant 0 : i32
    %c0_i32_3 = arith.constant 0 : i32
    return %arg0, %c0_i32, %c0_i32_0, %c0_i32_1, %c0_i32_2 : i32, i32, i32, i32, i32
  }
  func.func @transform_1(%arg0: i32) -> (i32, i32, i32) {
    %c0_i32 = arith.constant 0 : i32
    %c0_i32_0 = arith.constant 0 : i32
    %c0_i32_1 = arith.constant 0 : i32
    %c0_i32_2 = arith.constant 0 : i32
    return %c0_i32, %c0_i32_0, %c0_i32_1 : i32, i32, i32
  }
  func.func @transform_2(%arg0: i32) -> (i32, i32) {
    %c0_i32 = arith.constant 0 : i32
    %c0_i32_0 = arith.constant 0 : i32
    %c0_i32_1 = arith.constant 0 : i32
    return %c0_i32, %c0_i32_0 : i32, i32
  }
  func.func @transform_3(%arg0: i32) -> (i32, i32, i32) {
    %c0_i32 = arith.constant 0 : i32
    %c0_i32_0 = arith.constant 0 : i32
    %c0_i32_1 = arith.constant 0 : i32
    return %arg0, %c0_i32, %c0_i32_0 : i32, i32, i32
  }
}

module attributes {stable_mosaic.version = 11 : i64} {
  func.func @_conv3x3_kernel(%arg0: i32, %arg1: memref<1x1x16x16x64xbf16, #tpu.memory_space<vmem>>, %arg2: memref<9x64x64xbf16, #tpu.memory_space<vmem>>, %arg3: memref<1x64xf32, #tpu.memory_space<vmem>>, %arg4: memref<1x64x64xbf16, #tpu.memory_space<vmem>>) attributes {dimension_semantics = [#tpu.dimension_semantics<parallel>], iteration_bounds = array<i64: 4>, scalar_prefetch = 0 : i64, scratch_operands = 0 : i64, tpu.core_type = #tpu.core_type<tc>, window_params = [{transform_indices = @transform_0, window_bounds = array<i64: 1, 1, 16, 16, 64>}, {pipeline_mode = #tpu.pipeline_mode<synchronous>, transform_indices = @transform_1, window_bounds = array<i64: 9, 64, 64>}, {pipeline_mode = #tpu.pipeline_mode<synchronous>, transform_indices = @transform_2, window_bounds = array<i64: 1, 64>}, {transform_indices = @transform_3, window_bounds = array<i64: 1, 64, 64>}]} {
    %cst = arith.constant 0.000000e+00 : f32
    %0 = vector.broadcast %cst : f32 to vector<64x64xf32>
    %c0 = arith.constant 0 : index
    %c0_0 = arith.constant 0 : index
    %c0_1 = arith.constant 0 : index
    %c0_2 = arith.constant 0 : index
    %c0_3 = arith.constant 0 : index
    %1 = vector.load %arg1[%c0, %c0_0, %c0_1, %c0_2, %c0_3] : memref<1x1x16x16x64xbf16, #tpu.memory_space<vmem>>, vector<1x1x8x8x64xbf16>
    %2 = vector.shape_cast %1 : vector<1x1x8x8x64xbf16> to vector<8x8x64xbf16>
    %3 = vector.shape_cast %2 : vector<8x8x64xbf16> to vector<64x64xbf16>
    %c0_4 = arith.constant 0 : index
    %c0_5 = arith.constant 0 : index
    %c0_6 = arith.constant 0 : index
    %4 = vector.load %arg2[%c0_4, %c0_5, %c0_6] : memref<9x64x64xbf16, #tpu.memory_space<vmem>>, vector<1x64x64xbf16>
    %5 = vector.shape_cast %4 : vector<1x64x64xbf16> to vector<64x64xbf16>
    %cst_7 = arith.constant dense<0.000000e+00> : vector<64x64xf32>
    %6 = tpu.matmul %3, %5, %cst_7 {dimension_numbers = #tpu.dot_dimension_numbers<[1], [0], [0], [1], [0, 0, 1, 1], [], []>} : vector<64x64xbf16>, vector<64x64xbf16>, vector<64x64xf32> -> vector<64x64xf32>
    %7 = arith.addf %0, %6 : vector<64x64xf32>
    %c0_8 = arith.constant 0 : index
    %c0_9 = arith.constant 0 : index
    %c0_10 = arith.constant 0 : index
    %c4 = arith.constant 4 : index
    %c0_11 = arith.constant 0 : index
    %8 = vector.load %arg1[%c0_8, %c0_9, %c0_10, %c4, %c0_11] : memref<1x1x16x16x64xbf16, #tpu.memory_space<vmem>>, vector<1x1x8x8x64xbf16>
    %9 = vector.shape_cast %8 : vector<1x1x8x8x64xbf16> to vector<8x8x64xbf16>
    %10 = vector.shape_cast %9 : vector<8x8x64xbf16> to vector<64x64xbf16>
    %c1 = arith.constant 1 : index
    %c0_12 = arith.constant 0 : index
    %c0_13 = arith.constant 0 : index
    %11 = vector.load %arg2[%c1, %c0_12, %c0_13] : memref<9x64x64xbf16, #tpu.memory_space<vmem>>, vector<1x64x64xbf16>
    %12 = vector.shape_cast %11 : vector<1x64x64xbf16> to vector<64x64xbf16>
    %cst_14 = arith.constant dense<0.000000e+00> : vector<64x64xf32>
    %13 = tpu.matmul %10, %12, %cst_14 {dimension_numbers = #tpu.dot_dimension_numbers<[1], [0], [0], [1], [0, 0, 1, 1], [], []>} : vector<64x64xbf16>, vector<64x64xbf16>, vector<64x64xf32> -> vector<64x64xf32>
    %14 = arith.addf %7, %13 : vector<64x64xf32>
    %c0_15 = arith.constant 0 : index
    %c0_16 = arith.constant 0 : index
    %c0_17 = arith.constant 0 : index
    %c8 = arith.constant 8 : index
    %c0_18 = arith.constant 0 : index
    %15 = vector.load %arg1[%c0_15, %c0_16, %c0_17, %c8, %c0_18] : memref<1x1x16x16x64xbf16, #tpu.memory_space<vmem>>, vector<1x1x8x8x64xbf16>
    %16 = vector.shape_cast %15 : vector<1x1x8x8x64xbf16> to vector<8x8x64xbf16>
    %17 = vector.shape_cast %16 : vector<8x8x64xbf16> to vector<64x64xbf16>
    %c2 = arith.constant 2 : index
    %c0_19 = arith.constant 0 : index
    %c0_20 = arith.constant 0 : index
    %18 = vector.load %arg2[%c2, %c0_19, %c0_20] : memref<9x64x64xbf16, #tpu.memory_space<vmem>>, vector<1x64x64xbf16>
    %19 = vector.shape_cast %18 : vector<1x64x64xbf16> to vector<64x64xbf16>
    %cst_21 = arith.constant dense<0.000000e+00> : vector<64x64xf32>
    %20 = tpu.matmul %17, %19, %cst_21 {dimension_numbers = #tpu.dot_dimension_numbers<[1], [0], [0], [1], [0, 0, 1, 1], [], []>} : vector<64x64xbf16>, vector<64x64xbf16>, vector<64x64xf32> -> vector<64x64xf32>
    %21 = arith.addf %14, %20 : vector<64x64xf32>
    %c0_22 = arith.constant 0 : index
    %c0_23 = arith.constant 0 : index
    %c4_24 = arith.constant 4 : index
    %c0_25 = arith.constant 0 : index
    %c0_26 = arith.constant 0 : index
    %22 = vector.load %arg1[%c0_22, %c0_23, %c4_24, %c0_25, %c0_26] : memref<1x1x16x16x64xbf16, #tpu.memory_space<vmem>>, vector<1x1x8x8x64xbf16>
    %23 = vector.shape_cast %22 : vector<1x1x8x8x64xbf16> to vector<8x8x64xbf16>
    %24 = vector.shape_cast %23 : vector<8x8x64xbf16> to vector<64x64xbf16>
    %c3 = arith.constant 3 : index
    %c0_27 = arith.constant 0 : index
    %c0_28 = arith.constant 0 : index
    %25 = vector.load %arg2[%c3, %c0_27, %c0_28] : memref<9x64x64xbf16, #tpu.memory_space<vmem>>, vector<1x64x64xbf16>
    %26 = vector.shape_cast %25 : vector<1x64x64xbf16> to vector<64x64xbf16>
    %cst_29 = arith.constant dense<0.000000e+00> : vector<64x64xf32>
    %27 = tpu.matmul %24, %26, %cst_29 {dimension_numbers = #tpu.dot_dimension_numbers<[1], [0], [0], [1], [0, 0, 1, 1], [], []>} : vector<64x64xbf16>, vector<64x64xbf16>, vector<64x64xf32> -> vector<64x64xf32>
    %28 = arith.addf %21, %27 : vector<64x64xf32>
    %c0_30 = arith.constant 0 : index
    %c0_31 = arith.constant 0 : index
    %c4_32 = arith.constant 4 : index
    %c4_33 = arith.constant 4 : index
    %c0_34 = arith.constant 0 : index
    %29 = vector.load %arg1[%c0_30, %c0_31, %c4_32, %c4_33, %c0_34] : memref<1x1x16x16x64xbf16, #tpu.memory_space<vmem>>, vector<1x1x8x8x64xbf16>
    %30 = vector.shape_cast %29 : vector<1x1x8x8x64xbf16> to vector<8x8x64xbf16>
    %31 = vector.shape_cast %30 : vector<8x8x64xbf16> to vector<64x64xbf16>
    %c4_35 = arith.constant 4 : index
    %c0_36 = arith.constant 0 : index
    %c0_37 = arith.constant 0 : index
    %32 = vector.load %arg2[%c4_35, %c0_36, %c0_37] : memref<9x64x64xbf16, #tpu.memory_space<vmem>>, vector<1x64x64xbf16>
    %33 = vector.shape_cast %32 : vector<1x64x64xbf16> to vector<64x64xbf16>
    %cst_38 = arith.constant dense<0.000000e+00> : vector<64x64xf32>
    %34 = tpu.matmul %31, %33, %cst_38 {dimension_numbers = #tpu.dot_dimension_numbers<[1], [0], [0], [1], [0, 0, 1, 1], [], []>} : vector<64x64xbf16>, vector<64x64xbf16>, vector<64x64xf32> -> vector<64x64xf32>
    %35 = arith.addf %28, %34 : vector<64x64xf32>
    %c0_39 = arith.constant 0 : index
    %c0_40 = arith.constant 0 : index
    %c4_41 = arith.constant 4 : index
    %c8_42 = arith.constant 8 : index
    %c0_43 = arith.constant 0 : index
    %36 = vector.load %arg1[%c0_39, %c0_40, %c4_41, %c8_42, %c0_43] : memref<1x1x16x16x64xbf16, #tpu.memory_space<vmem>>, vector<1x1x8x8x64xbf16>
    %37 = vector.shape_cast %36 : vector<1x1x8x8x64xbf16> to vector<8x8x64xbf16>
    %38 = vector.shape_cast %37 : vector<8x8x64xbf16> to vector<64x64xbf16>
    %c5 = arith.constant 5 : index
    %c0_44 = arith.constant 0 : index
    %c0_45 = arith.constant 0 : index
    %39 = vector.load %arg2[%c5, %c0_44, %c0_45] : memref<9x64x64xbf16, #tpu.memory_space<vmem>>, vector<1x64x64xbf16>
    %40 = vector.shape_cast %39 : vector<1x64x64xbf16> to vector<64x64xbf16>
    %cst_46 = arith.constant dense<0.000000e+00> : vector<64x64xf32>
    %41 = tpu.matmul %38, %40, %cst_46 {dimension_numbers = #tpu.dot_dimension_numbers<[1], [0], [0], [1], [0, 0, 1, 1], [], []>} : vector<64x64xbf16>, vector<64x64xbf16>, vector<64x64xf32> -> vector<64x64xf32>
    %42 = arith.addf %35, %41 : vector<64x64xf32>
    %c0_47 = arith.constant 0 : index
    %c0_48 = arith.constant 0 : index
    %c8_49 = arith.constant 8 : index
    %c0_50 = arith.constant 0 : index
    %c0_51 = arith.constant 0 : index
    %43 = vector.load %arg1[%c0_47, %c0_48, %c8_49, %c0_50, %c0_51] : memref<1x1x16x16x64xbf16, #tpu.memory_space<vmem>>, vector<1x1x8x8x64xbf16>
    %44 = vector.shape_cast %43 : vector<1x1x8x8x64xbf16> to vector<8x8x64xbf16>
    %45 = vector.shape_cast %44 : vector<8x8x64xbf16> to vector<64x64xbf16>
    %c6 = arith.constant 6 : index
    %c0_52 = arith.constant 0 : index
    %c0_53 = arith.constant 0 : index
    %46 = vector.load %arg2[%c6, %c0_52, %c0_53] : memref<9x64x64xbf16, #tpu.memory_space<vmem>>, vector<1x64x64xbf16>
    %47 = vector.shape_cast %46 : vector<1x64x64xbf16> to vector<64x64xbf16>
    %cst_54 = arith.constant dense<0.000000e+00> : vector<64x64xf32>
    %48 = tpu.matmul %45, %47, %cst_54 {dimension_numbers = #tpu.dot_dimension_numbers<[1], [0], [0], [1], [0, 0, 1, 1], [], []>} : vector<64x64xbf16>, vector<64x64xbf16>, vector<64x64xf32> -> vector<64x64xf32>
    %49 = arith.addf %42, %48 : vector<64x64xf32>
    %c0_55 = arith.constant 0 : index
    %c0_56 = arith.constant 0 : index
    %c8_57 = arith.constant 8 : index
    %c4_58 = arith.constant 4 : index
    %c0_59 = arith.constant 0 : index
    %50 = vector.load %arg1[%c0_55, %c0_56, %c8_57, %c4_58, %c0_59] : memref<1x1x16x16x64xbf16, #tpu.memory_space<vmem>>, vector<1x1x8x8x64xbf16>
    %51 = vector.shape_cast %50 : vector<1x1x8x8x64xbf16> to vector<8x8x64xbf16>
    %52 = vector.shape_cast %51 : vector<8x8x64xbf16> to vector<64x64xbf16>
    %c7 = arith.constant 7 : index
    %c0_60 = arith.constant 0 : index
    %c0_61 = arith.constant 0 : index
    %53 = vector.load %arg2[%c7, %c0_60, %c0_61] : memref<9x64x64xbf16, #tpu.memory_space<vmem>>, vector<1x64x64xbf16>
    %54 = vector.shape_cast %53 : vector<1x64x64xbf16> to vector<64x64xbf16>
    %cst_62 = arith.constant dense<0.000000e+00> : vector<64x64xf32>
    %55 = tpu.matmul %52, %54, %cst_62 {dimension_numbers = #tpu.dot_dimension_numbers<[1], [0], [0], [1], [0, 0, 1, 1], [], []>} : vector<64x64xbf16>, vector<64x64xbf16>, vector<64x64xf32> -> vector<64x64xf32>
    %56 = arith.addf %49, %55 : vector<64x64xf32>
    %c0_63 = arith.constant 0 : index
    %c0_64 = arith.constant 0 : index
    %c8_65 = arith.constant 8 : index
    %c8_66 = arith.constant 8 : index
    %c0_67 = arith.constant 0 : index
    %57 = vector.load %arg1[%c0_63, %c0_64, %c8_65, %c8_66, %c0_67] : memref<1x1x16x16x64xbf16, #tpu.memory_space<vmem>>, vector<1x1x8x8x64xbf16>
    %58 = vector.shape_cast %57 : vector<1x1x8x8x64xbf16> to vector<8x8x64xbf16>
    %59 = vector.shape_cast %58 : vector<8x8x64xbf16> to vector<64x64xbf16>
    %c8_68 = arith.constant 8 : index
    %c0_69 = arith.constant 0 : index
    %c0_70 = arith.constant 0 : index
    %60 = vector.load %arg2[%c8_68, %c0_69, %c0_70] : memref<9x64x64xbf16, #tpu.memory_space<vmem>>, vector<1x64x64xbf16>
    %61 = vector.shape_cast %60 : vector<1x64x64xbf16> to vector<64x64xbf16>
    %cst_71 = arith.constant dense<0.000000e+00> : vector<64x64xf32>
    %62 = tpu.matmul %59, %61, %cst_71 {dimension_numbers = #tpu.dot_dimension_numbers<[1], [0], [0], [1], [0, 0, 1, 1], [], []>} : vector<64x64xbf16>, vector<64x64xbf16>, vector<64x64xf32> -> vector<64x64xf32>
    %63 = arith.addf %56, %62 : vector<64x64xf32>
    %c0_72 = arith.constant 0 : index
    %c0_73 = arith.constant 0 : index
    %64 = vector.load %arg3[%c0_72, %c0_73] : memref<1x64xf32, #tpu.memory_space<vmem>>, vector<1x64xf32>
    %65 = vector.broadcast %64 : vector<1x64xf32> to vector<64x64xf32>
    %66 = arith.addf %63, %65 : vector<64x64xf32>
    %cst_74 = arith.constant 0.000000e+00 : f32
    %67 = vector.broadcast %cst_74 : f32 to vector<64x64xf32>
    %68 = arith.maximumf %66, %67 : vector<64x64xf32>
    %69 = arith.truncf %68 : vector<64x64xf32> to vector<64x64xbf16>
    %c0_75 = arith.constant 0 : index
    %c0_76 = arith.constant 0 : index
    %c0_77 = arith.constant 0 : index
    %70 = vector.load %arg4[%c0_75, %c0_76, %c0_77] : memref<1x64x64xbf16, #tpu.memory_space<vmem>>, vector<1x64x64xbf16>
    %71 = vector.shape_cast %70 : vector<1x64x64xbf16> to vector<64x64xbf16>
    %72 = vector.shape_cast %69 : vector<64x64xbf16> to vector<1x64x64xbf16>
    tpu.vector_store %arg4[%c0_75, %c0_76, %c0_77], %72 {strides = array<i32>} : memref<1x64x64xbf16, #tpu.memory_space<vmem>>, vector<1x64x64xbf16>,
    return
  }
  func.func @transform_0(%arg0: i32) -> (i32, i32, i32, i32, i32) {
    %c0_i32 = arith.constant 0 : i32
    %c0_i32_0 = arith.constant 0 : i32
    %c0_i32_1 = arith.constant 0 : i32
    %c0_i32_2 = arith.constant 0 : i32
    %c0_i32_3 = arith.constant 0 : i32
    return %arg0, %c0_i32, %c0_i32_0, %c0_i32_1, %c0_i32_2 : i32, i32, i32, i32, i32
  }
  func.func @transform_1(%arg0: i32) -> (i32, i32, i32) {
    %c0_i32 = arith.constant 0 : i32
    %c0_i32_0 = arith.constant 0 : i32
    %c0_i32_1 = arith.constant 0 : i32
    %c0_i32_2 = arith.constant 0 : i32
    return %c0_i32, %c0_i32_0, %c0_i32_1 : i32, i32, i32
  }
  func.func @transform_2(%arg0: i32) -> (i32, i32) {
    %c0_i32 = arith.constant 0 : i32
    %c0_i32_0 = arith.constant 0 : i32
    %c0_i32_1 = arith.constant 0 : i32
    return %c0_i32, %c0_i32_0 : i32, i32
  }
  func.func @transform_3(%arg0: i32) -> (i32, i32, i32) {
    %c0_i32 = arith.constant 0 : i32
    %c0_i32_0 = arith.constant 0 : i32
    %c0_i32_1 = arith.constant 0 : i32
    return %arg0, %c0_i32, %c0_i32_0 : i32, i32, i32
  }
}

</mosaic_0001>

<bundles_post_ra>
// kernel: resnet_pl_loss.14
= control target key start
LH: loop header
LB: loop body
LE: loop exit
PB: predicated region body
PF: predicated region fallthrough
CT: control target
= control target key end

     0   :  { %7 = vsyncpa [#allocation3], 0  ;;  %s359_s9 = smov 0   ;;  %s393_s0 = inlined_call_operand.vmem [shape: bf16[128,128], index: 0, kind: input, shape index: {}, may-alias: {0,1}]   ;;  %s394_s1 = inlined_call_operand.vmem [shape: bf16[128,128], index: 1, kind: input, shape index: {}, may-alias: {0,1}]   ;;  %s395_s2 = inlined_call_operand.hbm [shape: f32[1,1], index: 2, kind: output, shape index: {}]  }
   0x1 LB: > { %s365_s10 = sadd.s32 4294967295, %s340_s9   ;;  %p267_p0 = scmp.ge.s32.totalorder %s340_s9, 1  ;;  %s340_s9 = sphi %s359_s9, %s13_s9  }
   0x2   : > { %p124_p1 = scmp.lt.s32.totalorder %s340_s9, 3 }
   0x4   : > { %p125_p2 = pnand %p267_p0, %p124_p1 }
   0x5   : > { %s268_s11 = sshll.u32 (!%p125_p2), %s365_s10, 2  ;;  %p305_p5 = scmp.eq.s32.totalorder (!%p125_p2), %s365_s10, 0 }
   0x6   : > { %128 = sbr.rel (%p125_p2) target bundleno = 243 (0xf3), region = 28  ;;  %p148_p3 = scmp.lt.s32.totalorder (!%p125_p2), %s268_s11, 15 }
   0x7   : > { %s278_s12 = sadd.s32 (!%p125_p2), 8, %s268_s11  ;;  %s342_s21 = smov (!%p125_p2), 0.0  }
   0x8   : > { %p155_p4 = scmp.lt.s32.totalorder (!%p125_p2), %s278_s12, 15  ;;  %p306_p6 = scmp.eq.s32.totalorder (!%p125_p2), %s365_s10, 1 }
   0x9   : > { %s318_s27 = scalar_lea.hbm (!%p125_p2), %s395_s2, 16 }
   0xa   : > { %p319_p7 = scmp.ne.s32.totalorder (!%p125_p2), %s395_s2, %s318_s27  ;;  %p324_p10 = scmp.lt.u32.totalorder (!%p125_p2), %s318_s27, %s395_s2 }
   0xc   : > { %p320_p8 = pnand (!%p125_p2), %p319_p7, %p306_p6 }
   0xd   : > { %s397_s11 = smov (!%p148_p3, %s268_s11), 15  ;;  %s399_s12 = smov (!%p155_p4, %s278_s12), 15 }
   0xe   : > { %s269_s13 = sshll.u32 %s397_s11, 2  ;;  %s271_s17 = sshll.u32 %s399_s12, 2 }
   0xf   : > { %s151_s16 = scalar_lea.vmem %s393_s0, %s269_s13  ;;  %s158_s20 = scalar_lea.vmem %s394_s1, %s271_s17 }
  0x10   : > { %v280_v0 = vld [vmem:[%s151_s16] sm:$0xff]   ;;  %v295_v1 = vld [vmem:[%s151_s16 + $0x8] sm:$0xff]   ;;  %300 = sst [smem:[#allocation2]] (%p305_p5), %s342_s21  ;;  %p321_p9 = pneg %p320_p8 }
  0x11   : > { %v281_v2 = vunpack.c.l.bf16 %v280_v0  ;;  %v282_v3 = vunpack.c.h.bf16 %v280_v0  ;;  %v285_v4 = vunpack.c.l.bf16 %v295_v1  ;;  %v286_v5 = vunpack.c.h.bf16 %v295_v1  ;;  %v288_v6 = vld [vmem:[%s158_s20] sm:$0xff]   ;;  %v296_v7 = vld [vmem:[%s158_s20 + $0x8] sm:$0xff]   ;;  %s187_s22 = sld [smem:[#allocation2]] }
  0x12   : > { %v289_v8 = vunpack.c.l.bf16 %v288_v6  ;;  %v290_v9 = vunpack.c.h.bf16 %v288_v6  ;;  %v293_v10 = vunpack.c.l.bf16 %v296_v7  ;;  %v294_v11 = vunpack.c.h.bf16 %v296_v7  ;;  %p326_p11 = pnand %p324_p10, %p321_p9 }
  0x14   : > { %v183_v12 = vsub.f32 %v281_v2, %v289_v8  ;;  %v184_v13 = vsub.f32 %v282_v3, %v290_v9  ;;  %v185_v14 = vsub.f32 %v285_v4, %v293_v10  ;;  %v186_v15 = vsub.f32 %v286_v5, %v294_v11 }
  0x16   : > { %v188_v16 = vmul.f32 %v183_v12, %v183_v12  ;;  %v189_v17 = vmul.f32 %v184_v13, %v184_v13  ;;  %v190_v18 = vmul.f32 %v185_v14, %v185_v14  ;;  %v191_v19 = vmul.f32 %v186_v15, %v186_v15 }
  0x18   : > { %v192_v20 = vadd.f32 %v189_v17, %v188_v16 }
  0x1a   : > { %v193_v21 = vadd.f32 %v192_v20, %v190_v18 }
  0x1c   : > { %v194_v22 = vadd.f32 %v193_v21, %v191_v19 }
  0x1e   : > { %195 = vadd.xlane.f32.xlu0 %v194_v22 }
  0xab   : > { %v196_v23 = vpop.xlane.xlu0 %195 }
  0xac   : > { %v197_v24 = vrot.slane %v196_v23, 4 }
  0xae   : > { %v198_v25 = vadd.f32 %v197_v24, %v196_v23 }
  0xb0   : > { %v199_v26 = vrot.slane %v198_v25, 2 }
  0xb2   : > { %v200_v27 = vadd.f32 %v199_v26, %v198_v25 }
  0xb4   : > { %v201_v28 = vrot.slane %v200_v27, 1 }
  0xb6   : > { %v202_v29 = vadd.f32 %v201_v28, %v200_v27 }
  0xb8   : > { %297 = vpush %v202_v29 }
  0xe9   : > { %s298_s23 = spop %297 }
  0xea   : > { %s204_s24 = sadd.f32 %s298_s23, %s187_s22 }
  0xec   : > { %206 = sst [smem:[#allocation2]] %s204_s24 }
  0xed   : > { %329 = shalt.err (!%p326_p11)
}
  0xee   : > { %s343_s4 = smov [#allocation2]  }
  0xef   : > { %302 = dma.smem_to_hbm (%p306_p6), %s343_s4, 16, %s395_s2, [#allocation3]  }
  0xf0   : > { %335 = dma.done.wait (%p306_p6), [#allocation3], 16  }
  0xf1   : > { %337 = vsyncadd (%p306_p6), [#allocation3], 4294967280 }
  0xf2   : > { %220 = sfence }
  0xf3 PF: > { %s13_s9 = sadd.s32 1, %s340_s9  }
  0xf4   : > { %p10_p12 = scmp.ge.s32.totalorder %s13_s9, 4  }
  0xf6   :  { %12 = sbr.rel (!%p10_p12) target bundleno = 1 (0x1), region = 64 }
  0xfd   :  { %226 = vsyncpa [#allocation3], 1 }
  0xfe   :  { %228 = vsyncpa [#allocation3 + $0x1], 1 }

// kernel: resnet_pl_loss.9
= control target key start
LH: loop header
LB: loop body
LE: loop exit
PB: predicated region body
PF: predicated region fallthrough
CT: control target
= control target key end

     0   :  { %s4799_s12 = smov 0   ;;  %s5487_s0 = inlined_call_operand.vmem [shape: f32[4,1,18,18,3], index: 0, kind: input, shape index: {}]   ;;  %s5488_s1 = inlined_call_operand.vmem [shape: bf16[9,3,16], index: 1, kind: input, shape index: {}]   ;;  %s5489_s2 = inlined_call_operand.vmem [shape: f32[1,16], index: 2, kind: input, shape index: {}]   ;;  %s5490_s3 = inlined_call_operand.vmem [shape: bf16[4,256,16], index: 3, kind: output, shape index: {}]  }
   0x1 LB: > { %s3623_s13 = sadd.s32 4294967295, %s4776_s12   ;;  %p3627_p0 = scmp.ge.s32.totalorder %s4776_s12, 1  ;;  %s4776_s12 = sphi %s4799_s12, %s13_s12  }
   0x2   : > { %p137_p1 = scmp.lt.s32.totalorder %s4776_s12, 5 }
   0x4   : > { %p138_p2 = pnand %p3627_p0, %p137_p1 }
   0x5   : > { %v3631_v0 = vld [vmem:[%s5488_s1 + $0x2] sm:$0x3] (!%p138_p2)  ;;  %vm448_vm0 = vcmask (!%p138_p2), 1040384   ;;  %vm449_vm1 = vcmask (!%p138_p2), 1041408   ;;  %p161_p3 = scmp.lt.s32.totalorder (!%p138_p2), %s3623_s13, 3  ;;  %v4778_v1 = vmov (!%p138_p2), 65535  }
   0x6   : > { %141 = sbr.rel (%p138_p2) target bundleno = 530 (0x212), region = 32  ;;  %v450_v2 = vsel (!%p138_p2), %vm448_vm0, 4294967295, %v4778_v1  ;;  %v3762_v3 = vld [vmem:[%s5488_s1 + $0x8] sm:$0x3] (!%p138_p2)  ;;  %v284_v4 = vld [vmem:[%s5488_s1] sm:$0x3] (!%p138_p2) }
   0x7   : > { %v4816_v5 = vsel (!%p138_p2), %vm449_vm1, %v450_v2, 0  ;;  %v3811_v6 = vld [vmem:[%s5488_s1 + $0xa] sm:$0x3] (!%p138_p2)  ;;  %vm399_vm2 = vcmask (!%p138_p2), 23552   ;;  %v3860_v26 = vld [vmem:[%s5488_s1 + $0xc] sm:$0x3] (!%p138_p2) }
   0x8   : > { %v453_v7 = vand.u32 (!%p138_p2), %v3631_v0, %v4816_v5  ;;  %v4825_v8 = vand.u32 (!%p138_p2), %v3762_v3, %v4816_v5  ;;  %v665_v9 = vand.u32 (!%p138_p2), %v4816_v5, %v284_v4  ;;  %v2066_v10 = vand.u32 (!%p138_p2), %v3811_v6, %v4816_v5  ;;  %v3664_v42 = vld [vmem:[%s5488_s1 + $0x4] sm:$0x3] (!%p138_p2) }
   0x9   : > { %v4857_v48 = vand.u32 (!%p138_p2), %v3860_v26, %v4816_v5  ;;  %v4862_v50 = vand.u32 (!%p138_p2), %v3664_v42, %v4816_v5  ;;  %vm3535_vm3 = vcmask (!%p138_p2), 125952  }
   0xa   : > { %4196 = vmatprep.subr.bf16.mxu1 (!%p138_p2), %v453_v7  ;;  %4332 = vmatprep.subr.bf16.mxu0 (!%p138_p2), %v4825_v8 }
   0xb   : > { %4197 = vmatpush3.bf16.msra.mxu1 (!%p138_p2), %v453_v7  ;;  %4333 = vmatpush3.bf16.msra.mxu0 (!%p138_p2), %v4825_v8 }
   0xc   : > { %4230 = vmatprep.subr.bf16.mxu1 (!%p138_p2), %v665_v9  ;;  %4366 = vmatprep.subr.bf16.mxu0 (!%p138_p2), %v2066_v10 }
   0xd   : > { %s5492_s13 = smov (!%p161_p3, %s3623_s13), 3 }
   0xe   : > { %s4760_s22 = smul.u32 432, %s5492_s13  ;;  %s4010_s11 = sshll.u32 %s5492_s13, 7 }
   0xf   : > { %s5383_s16 = scalar_lea.vmem %s5490_s3, %s4010_s11 }
  0x10   : > { %s4835_s25 = scalar_lea.vmem %s5487_s0, %s4760_s22 }
  0x11   : > { %v285_v11 = vld [vmem:[%s4835_s25 + $0x1] sm:$0xff]  ;;  %v286_v12 = vld [vmem:[%s4835_s25 + $0x9] sm:$0xff]  ;;  %v3730_v13 = vld [vmem:[%s4835_s25 + $0x19] sm:$0xff] }
  0x12   : > { %v317_v14 = vmax.f32 %v285_v11, 0.0  ;;  %v318_v15 = vmax.f32 %v286_v12, 0.0  ;;  %v3731_v16 = vld [vmem:[%s4835_s25 + $0x21] sm:$0xff]  ;;  %v1577_v17 = vmax.f32 %v3730_v13, 0.0  ;;  %v3732_v18 = vld [vmem:[%s4835_s25 + $0x31] sm:$0xff]  ;;  %v3733_v19 = vld [vmem:[%s4835_s25 + $0x39] sm:$0xff] }
  0x13   : > { %v1578_v20 = vmax.f32 %v3731_v16, 0.0  ;;  %v1579_v21 = vmax.f32 %v3732_v18, 0.0  ;;  %v1580_v22 = vmax.f32 %v3733_v19, 0.0  ;;  %v3734_v23 = vld [vmem:[%s4835_s25 + $0x49] sm:$0xff]  ;;  %v3735_v24 = vld [vmem:[%s4835_s25 + $0x51] sm:$0xff]  ;;  %v3736_v25 = vld [vmem:[%s4835_s25 + $0x61] sm:$0xff] }
  0x14   : > { %v349_v27 = vmin.f32 %v317_v14, 1.0  ;;  %v350_v28 = vmin.f32 %v318_v15, 1.0  ;;  %v1609_v29 = vmin.f32 %v1577_v17, 1.0  ;;  %v1581_v30 = vmax.f32 %v3734_v23, 0.0  ;;  %v3737_v31 = vld [vmem:[%s4835_s25 + $0x69] sm:$0xff]  ;;  %v3738_v32 = vld [vmem:[%s4835_s25 + $0x79] sm:$0xff] }
  0x15   : > { %v1610_v33 = vmin.f32 %v1578_v20, 1.0  ;;  %v1611_v34 = vmin.f32 %v1579_v21, 1.0  ;;  %v1612_v35 = vmin.f32 %v1580_v22, 1.0  ;;  %v1582_v36 = vmax.f32 %v3735_v24, 0.0  ;;  %v3739_v37 = vld [vmem:[%s4835_s25 + $0x81] sm:$0xff]  ;;  %v3740_v55 = vld [vmem:[%s4835_s25 + $0x91] sm:$0xff] }
  0x16   : > { %v381_v38 = vpack.c.bf16 %v350_v28, %v349_v27  ;;  %v1613_v39 = vmin.f32 %v1581_v30, 1.0  ;;  %v1583_v40 = vmax.f32 %v3736_v25, 0.0  ;;  %v1584_v41 = vmax.f32 %v3737_v31, 0.0  ;;  %v3741_v56 = vld [vmem:[%s4835_s25 + $0x99] sm:$0xff]  ;;  %v3742_v57 = vld [vmem:[%s4835_s25 + $0xa9] sm:$0xff]  ;;  %v3743_v58 = vld [vmem:[%s4835_s25 + $0xb1] sm:$0xff] }
  0x17   : > { %v1641_v43 = vpack.c.bf16 %v1610_v33, %v1609_v29  ;;  %v1642_v44 = vpack.c.bf16 %v1612_v35, %v1611_v34  ;;  %v1614_v45 = vmin.f32 %v1582_v36, 1.0  ;;  %v1585_v46 = vmax.f32 %v3738_v32, 0.0  ;;  %v3744_v6 = vld [vmem:[%s4835_s25 + $0xc1] sm:$0xff]  ;;  %v3745_v7 = vld [vmem:[%s4835_s25 + $0xc9] sm:$0xff]  ;;  %v303_v17 = vld [vmem:[%s4835_s25 + $0xd9] sm:$0xff] }
  0x18   : > { %4198 = vmatprep.mubr.msk.bf16.mxu1 %vm399_vm2, %v381_v38  ;;  %v1586_v47 = vmax.f32 %v3739_v37, 0.0  ;;  %v1615_v51 = vmin.f32 %v1583_v40, 1.0  ;;  %v1616_v52 = vmin.f32 %v1584_v41, 1.0  ;;  %v1587_v60 = vmax.f32 %v3740_v55, 0.0  ;;  %v304_v18 = vld [vmem:[%s4835_s25 + $0xe1] sm:$0xff]  ;;  %v3781_v19 = vld [vmem:[%s4835_s25 + $0x32] sm:$0xff] }
  0x19   : > { %4334 = vmatprep.mubr.msk.bf16.mxu0 %vm399_vm2, %v1641_v43  ;;  %4199 = vmatmul.mubr.msk.bf16.vlgmr.msra.gmra.mrb[0].mxu1 %vm399_vm2, %v1641_v43  ;;  %v1643_v49 = vpack.c.bf16 %v1614_v45, %v1613_v39  ;;  %v1617_v53 = vmin.f32 %v1585_v46, 1.0  ;;  %v1588_v61 = vmax.f32 %v3741_v56, 0.0  ;;  %v1589_v63 = vmax.f32 %v3742_v57, 0.0  ;;  %v3782_v22 = vld [vmem:[%s4835_s25 + $0x3a] sm:$0xff]  ;;  %v305_v23 = vld [vmem:[%s4835_s25 + $0xf1] sm:$0xff]  ;;  %v307_v45 = vld [vmem:[%s4835_s25 + $0x109] sm:$0xff] }
  0x1a   : > { %4231 = vmatpush3.bf16.msra.mxu1 %v665_v9  ;;  %4335 = vmatmul.mubr.msk.bf16.vlgmr.msra.gmra.mrb[0].mxu0 %vm399_vm2, %v1642_v44  ;;  %v1618_v54 = vmin.f32 %v1586_v47, 1.0  ;;  %v1644_v59 = vpack.c.bf16 %v1616_v52, %v1615_v51  ;;  %v1590_v0 = vmax.f32 %v3743_v58, 0.0  ;;  %v1619_v1 = vmin.f32 %v1587_v60, 1.0  ;;  %v3779_v9 = vld [vmem:[%s4835_s25 + $0x1a] sm:$0xff]  ;;  %v3783_v29 = vld [vmem:[%s4835_s25 + $0x4a] sm:$0xff]  ;;  %v3784_v30 = vld [vmem:[%s4835_s25 + $0x52] sm:$0xff] }
  0x1b   : > { %4367 = vmatpush3.bf16.msra.mxu0 %v2066_v10  ;;  %4202 = vmatprep.mubr.msk.bf16.mxu1 %vm399_vm2, %v1642_v44  ;;  %v1620_v2 = vmin.f32 %v1588_v61, 1.0  ;;  %v1621_v3 = vmin.f32 %v1589_v63, 1.0  ;;  %v3780_v10 = vld [vmem:[%s4835_s25 + $0x22] sm:$0xff]  ;;  %v1591_v12 = vmax.f32 %v3744_v6, 0.0  ;;  %v1592_v13 = vmax.f32 %v3745_v7, 0.0  ;;  %v306_v24 = vld [vmem:[%s4835_s25 + $0xf9] sm:$0xff] }
  0x1c   : > { %4338 = vmatprep.mubr.msk.bf16.mxu0 %vm399_vm2, %v1643_v49  ;;  %4400 = vmatprep.subr.bf16.mxu0 %v4857_v48  ;;  %v1645_v62 = vpack.c.bf16 %v1618_v54, %v1617_v53  ;;  %v1622_v4 = vmin.f32 %v1590_v0, 1.0  ;;  %v1935_v15 = vmax.f32 %v3779_v9, 0.0  ;;  %v1936_v16 = vmax.f32 %v3780_v10, 0.0  ;;  %v308_v46 = vld [vmem:[%s4835_s25 + $0x111] sm:$0xff]  ;;  %v3785_v47 = vld [vmem:[%s4835_s25 + $0x62] sm:$0xff]  ;;  %v3787_v57 = vld [vmem:[%s4835_s25 + $0x7a] sm:$0xff] }
  0x1d   : > { %4264 = vmatprep.subr.bf16.mxu1 %v4862_v50  ;;  %v1646_v11 = vpack.c.bf16 %v1620_v2, %v1619_v1  ;;  %v1623_v20 = vmin.f32 %v1591_v12, 1.0  ;;  %v1624_v21 = vmin.f32 %v1592_v13, 1.0  ;;  %v335_v27 = vmax.f32 %v303_v17, 0.0  ;;  %v3786_v52 = vld [vmem:[%s4835_s25 + $0x6a] sm:$0xff]  ;;  %v309_v53 = vld [vmem:[%s4835_s25 + $0x121] sm:$0xff]  ;;  %v311_v10 = vld [vmem:[%s4835_s25 + $0x139] sm:$0xff] }
  0x1e   : > { %v1647_v14 = vpack.c.bf16 %v1622_v4, %v1621_v3  ;;  %v1967_v25 = vmin.f32 %v1935_v15, 1.0  ;;  %v1968_v26 = vmin.f32 %v1936_v16, 1.0  ;;  %v336_v28 = vmax.f32 %v304_v18, 0.0  ;;  %v310_v54 = vld [vmem:[%s4835_s25 + $0x129] sm:$0xff]  ;;  %v312_v12 = vld [vmem:[%s4835_s25 + $0x141] sm:$0xff]  ;;  %v3789_v13 = vld [vmem:[%s4835_s25 + $0x92] sm:$0xff] }
  0x1f   : > { %v1937_v31 = vmax.f32 %v3781_v19, 0.0  ;;  %v1938_v32 = vmax.f32 %v3782_v22, 0.0  ;;  %v337_v33 = vmax.f32 %v305_v23, 0.0  ;;  %v338_v34 = vmax.f32 %v306_v24, 0.0  ;;  %v3788_v58 = vld [vmem:[%s4835_s25 + $0x82] sm:$0xff]  ;;  %v313_v19 = vld [vmem:[%s4835_s25 + $0x151] sm:$0xff] }
  0x20   : > { %v1648_v35 = vpack.c.bf16 %v1624_v21, %v1623_v20  ;;  %v4893_v36 = vpack.c.bf16 %v1968_v26, %v1967_v25  ;;  %v1939_v37 = vmax.f32 %v3783_v29, 0.0  ;;  %v1940_v38 = vmax.f32 %v3784_v30, 0.0  ;;  %v314_v20 = vld [vmem:[%s4835_s25 + $0x159] sm:$0xff]  ;;  %v3791_v26 = vld [vmem:[%s4835_s25 + $0xaa] sm:$0xff] }
  0x21   : > { %4203 = vmatmul.mubr.msk.bf16.gmra.mrb[4].mxu1 %vm399_vm2, %v1643_v49  ;;  %v367_v39 = vmin.f32 %v335_v27, 1.0  ;;  %v368_v40 = vmin.f32 %v336_v28, 1.0  ;;  %v1969_v41 = vmin.f32 %v1937_v31, 1.0  ;;  %v1970_v42 = vmin.f32 %v1938_v32, 1.0  ;;  %v3792_v27 = vld [vmem:[%s4835_s25 + $0xb2] sm:$0xff] }
  0x22   : > { %4339 = vmatmul.mubr.msk.bf16.gmra.mrb[4].mxu0 %vm399_vm2, %v1644_v59  ;;  %4206 = vmatprep.mubr.msk.bf16.mxu1 %vm399_vm2, %v1644_v59  ;;  %v369_v43 = vmin.f32 %v337_v33, 1.0  ;;  %v370_v44 = vmin.f32 %v338_v34, 1.0  ;;  %v1971_v49 = vmin.f32 %v1939_v37, 1.0  ;;  %v1972_v51 = vmin.f32 %v1940_v38, 1.0 }
  0x23   : > { %4342 = vmatprep.mubr.msk.bf16.mxu0 %vm399_vm2, %v1645_v62  ;;  %v339_v55 = vmax.f32 %v307_v45, 0.0  ;;  %v340_v56 = vmax.f32 %v308_v46, 0.0  ;;  %v390_v59 = vpack.c.bf16 %v368_v40, %v367_v39  ;;  %v4908_v60 = vpack.c.bf16 %v1970_v42, %v1969_v41  ;;  %v3793_v45 = vld [vmem:[%s4835_s25 + $0xc2] sm:$0xff]  ;;  %v3794_v46 = vld [vmem:[%s4835_s25 + $0xca] sm:$0xff] }
  0x24   : > { %v391_v61 = vpack.c.bf16 %v370_v44, %v369_v43  ;;  %v1941_v63 = vmax.f32 %v3785_v47, 0.0  ;;  %v1942_v0 = vmax.f32 %v3786_v52, 0.0  ;;  %v341_v1 = vmax.f32 %v309_v53, 0.0  ;;  %v315_v43 = vld [vmem:[%s4835_s25 + $0x169] sm:$0xff]  ;;  %v316_v44 = vld [vmem:[%s4835_s25 + $0x171] sm:$0xff]  ;;  %v172_v47 = vld [vmem:[%s4835_s25] sm:$0xff] }
  0x25   : > { %v342_v2 = vmax.f32 %v310_v54, 0.0  ;;  %v4913_v3 = vpack.c.bf16 %v1972_v51, %v1971_v49  ;;  %v1943_v4 = vmax.f32 %v3787_v57, 0.0  ;;  %v1944_v6 = vmax.f32 %v3788_v58, 0.0  ;;  %v173_v52 = vld [vmem:[%s4835_s25 + $0x8] sm:$0xff]  ;;  %v3795_v53 = vld [vmem:[%s4835_s25 + $0xda] sm:$0xff] }
  0x26   : > { %v371_v7 = vmin.f32 %v339_v55, 1.0  ;;  %v372_v9 = vmin.f32 %v340_v56, 1.0  ;;  %v1973_v15 = vmin.f32 %v1941_v63, 1.0  ;;  %v1974_v16 = vmin.f32 %v1942_v0, 1.0  ;;  %v3796_v54 = vld [vmem:[%s4835_s25 + $0xe2] sm:$0xff] }
  0x27   : > { %v373_v17 = vmin.f32 %v341_v1, 1.0  ;;  %v374_v18 = vmin.f32 %v342_v2, 1.0  ;;  %v1975_v21 = vmin.f32 %v1943_v4, 1.0  ;;  %v1976_v22 = vmin.f32 %v1944_v6, 1.0 }
  0x28   : > { %v392_v23 = vpack.c.bf16 %v372_v9, %v371_v7  ;;  %v343_v24 = vmax.f32 %v311_v10, 0.0  ;;  %v344_v25 = vmax.f32 %v312_v12, 0.0  ;;  %v1945_v28 = vmax.f32 %v3789_v13, 0.0  ;;  %v174_v12 = vld [vmem:[%s4835_s25 + $0x18] sm:$0xff]  ;;  %v175_v13 = vld [vmem:[%s4835_s25 + $0x20] sm:$0xff] }
  0x29   : > { %4207 = vmatmul.mubr.msk.bf16.gmra.mrb[8].mxu1 %vm399_vm2, %v1645_v62  ;;  %v3909_v62 = vld [vmem:[%s5488_s1 + $0xe] sm:$0x3]  ;;  %v345_v30 = vmax.f32 %v313_v19, 0.0  ;;  %v346_v31 = vmax.f32 %v314_v20, 0.0  ;;  %v4934_v32 = vpack.c.bf16 %v1974_v16, %v1973_v15  ;;  %v4936_v33 = vpack.c.bf16 %v1976_v22, %v1975_v21  ;;  %v3798_v19 = vld [vmem:[%s4835_s25 + $0xfa] sm:$0xff]  ;;  %v176_v20 = vld [vmem:[%s4835_s25 + $0x30] sm:$0xff] }
  0x2a   : > { %4343 = vmatmul.mubr.msk.bf16.gmra.mrb[8].mxu0 %vm399_vm2, %v1646_v11  ;;  %4210 = vmatprep.mubr.msk.bf16.mxu1 %vm399_vm2, %v1646_v11  ;;  %v4917_v11 = vand.u32 %v3909_v62, %v4816_v5  ;;  %v1947_v34 = vmax.f32 %v3791_v26, 0.0  ;;  %v375_v37 = vmin.f32 %v343_v24, 1.0  ;;  %v376_v38 = vmin.f32 %v344_v25, 1.0  ;;  %v177_v22 = vld [vmem:[%s4835_s25 + $0x38] sm:$0xff] }
  0x2b   : > { %4346 = vmatprep.mubr.msk.bf16.mxu0 %vm399_vm2, %v1647_v14  ;;  %v1977_v39 = vmin.f32 %v1945_v28, 1.0  ;;  %v377_v41 = vmin.f32 %v345_v30, 1.0  ;;  %v378_v42 = vmin.f32 %v346_v31, 1.0  ;;  %v347_v56 = vmax.f32 %v315_v43, 0.0  ;;  %v3800_v24 = vld [vmem:[%s4835_s25 + $0x112] sm:$0xff] }
  0x2c   : > { %v1979_v49 = vmin.f32 %v1947_v34, 1.0  ;;  %v394_v55 = vpack.c.bf16 %v376_v38, %v375_v37  ;;  %v348_v57 = vmax.f32 %v316_v44, 0.0  ;;  %v1950_v62 = vmax.f32 %v3794_v46, 0.0  ;;  %v179_v43 = vld [vmem:[%s4835_s25 + $0x50] sm:$0xff]  ;;  %v3801_v44 = vld [vmem:[%s4835_s25 + $0x122] sm:$0xff] }
  0x2d   : > { %v204_v63 = vmax.f32 %v172_v47, 0.0  ;;  %v205_v0 = vmax.f32 %v173_v52, 0.0  ;;  %v1951_v1 = vmax.f32 %v3795_v53, 0.0  ;;  %v1952_v2 = vmax.f32 %v3796_v54, 0.0  ;;  %v180_v52 = vld [vmem:[%s4835_s25 + $0x60] sm:$0xff]  ;;  %v181_v53 = vld [vmem:[%s4835_s25 + $0x68] sm:$0xff] }
  0x2e   : > { %v379_v6 = vmin.f32 %v347_v56, 1.0  ;;  %v380_v7 = vmin.f32 %v348_v57, 1.0  ;;  %v1982_v10 = vmin.f32 %v1950_v62, 1.0  ;;  %v206_v25 = vmax.f32 %v174_v12, 0.0  ;;  %v3803_v56 = vld [vmem:[%s4835_s25 + $0x13a] sm:$0xff]  ;;  %v3804_v57 = vld [vmem:[%s4835_s25 + $0x142] sm:$0xff] }
  0x2f   : > { %v237_v15 = vmin.f32 %v205_v0, 1.0  ;;  %v1983_v16 = vmin.f32 %v1951_v1, 1.0  ;;  %v207_v26 = vmax.f32 %v175_v13, 0.0  ;;  %v1954_v28 = vmax.f32 %v3798_v19, 0.0  ;;  %v3713_v62 = vld [vmem:[%s5488_s1 + $0x6] sm:$0x3] }
  0x30   : > { %v396_v21 = vpack.c.bf16 %v380_v7, %v379_v6  ;;  %v209_v34 = vmax.f32 %v177_v22, 0.0  ;;  %v1956_v37 = vmax.f32 %v3800_v24, 0.0  ;;  %v238_v38 = vmin.f32 %v206_v25, 1.0  ;;  %v185_v24 = vld [vmem:[%s4835_s25 + $0x98] sm:$0xff] }
  0x31   : > { %4211 = vmatmul.mubr.msk.bf16.gmra.mrb[12].mxu1 %vm399_vm2, %v1647_v14  ;;  %v3790_v14 = vld [vmem:[%s4835_s25 + $0x9a] sm:$0xff]  ;;  %v212_v1 = vmax.f32 %v180_v52, 0.0  ;;  %v186_v52 = vld [vmem:[%s4835_s25 + $0xa8] sm:$0xff] }
  0x32   : > { %4347 = vmatmul.mubr.msk.bf16.gmra.mrb[12].mxu0 %vm399_vm2, %v1648_v35  ;;  %4214 = vmatprep.mubr.msk.bf16.mxu1 %vm399_vm2, %v1648_v35  ;;  %v1946_v29 = vmax.f32 %v3790_v14, 0.0  ;;  %v1948_v35 = vmax.f32 %v3792_v27, 0.0  ;;  %v236_v14 = vmin.f32 %v204_v63, 1.0  ;;  %v241_v47 = vmin.f32 %v209_v34, 1.0 }
  0x33   : > { %4368 = vmatprep.mubr.msk.bf16.mxu0 %vm399_vm2, %v4893_v36  ;;  %v1957_v63 = vmax.f32 %v3801_v44, 0.0 }
  0x34   : > { %v1978_v40 = vmin.f32 %v1946_v29, 1.0  ;;  %v1980_v51 = vmin.f32 %v1948_v35, 1.0  ;;  %v268_v30 = vpack.c.bf16 %v237_v15, %v236_v14  ;;  %v182_v14 = vld [vmem:[%s4835_s25 + $0x78] sm:$0xff]  ;;  %v5001_v15 = vand.u32 %v3713_v62, %v4816_v5  ;;  %v188_v62 = vld [vmem:[%s4835_s25 + $0xc0] sm:$0xff] }
  0x35   : > { %v1989_v19 = vmin.f32 %v1957_v63, 1.0  ;;  %v189_v63 = vld [vmem:[%s4835_s25 + $0xc8] sm:$0xff] }
  0x36   : > { %v4952_v58 = vpack.c.bf16 %v1978_v40, %v1977_v39  ;;  %v4954_v4 = vpack.c.bf16 %v1980_v51, %v1979_v49  ;;  %v239_v39 = vmin.f32 %v207_v26, 1.0  ;;  %v1988_v51 = vmin.f32 %v1956_v37, 1.0 }
  0x39   : > { %4215 = vmatmul.mubr.msk.bf16.gmra.mrb[16].mxu1 %vm399_vm2, %v390_v59  ;;  %v395_v59 = vpack.c.bf16 %v378_v42, %v377_v41  ;;  %v1986_v41 = vmin.f32 %v1954_v28, 1.0  ;;  %v178_v42 = vld [vmem:[%s4835_s25 + $0x48] sm:$0xff] }
  0x3a   : > { %4369 = vmatmul.mubr.msk.bf16.vlgmr.msra.gmra.mrb[0].mxu0 %vm399_vm2, %v4908_v60  ;;  %4218 = vmatprep.mubr.msk.bf16.mxu1 %vm399_vm2, %v391_v61  ;;  %v1949_v61 = vmax.f32 %v3793_v45, 0.0  ;;  %v3802_v45 = vld [vmem:[%s4835_s25 + $0x12a] sm:$0xff]  ;;  %v210_v54 = vmax.f32 %v178_v42, 0.0 }
  0x3b   : > { %4401 = vmatpush3.bf16.msra.mxu0 %v4857_v48  ;;  %4372 = vmatprep.mubr.msk.bf16.mxu0 %vm399_vm2, %v4913_v3  ;;  %v393_v48 = vpack.c.bf16 %v374_v18, %v373_v17  ;;  %v1984_v17 = vmin.f32 %v1952_v2, 1.0  ;;  %v3797_v18 = vld [vmem:[%s4835_s25 + $0xf2] sm:$0xff]  ;;  %v1958_v0 = vmax.f32 %v3802_v45, 0.0  ;;  %v213_v2 = vmax.f32 %v181_v53, 0.0 }
  0x3c   : > { %4434 = vmatprep.subr.bf16.mxu0 %v4917_v11  ;;  %v1981_v9 = vmin.f32 %v1949_v61, 1.0  ;;  %v1953_v27 = vmax.f32 %v3797_v18, 0.0  ;;  %v242_v12 = vmin.f32 %v210_v54, 1.0  ;;  %v3806_v18 = vld [vmem:[%s4835_s25 + $0x15a] sm:$0xff]  ;;  %v187_v53 = vld [vmem:[%s4835_s25 + $0xb0] sm:$0xff]  ;;  %v3809_v54 = vld [vmem:[%s4835_s25 + $0x182] sm:$0xff] }
  0x3d   : > { %v4972_v31 = vpack.c.bf16 %v1984_v17, %v1983_v16  ;;  %v183_v16 = vld [vmem:[%s4835_s25 + $0x80] sm:$0xff]  ;;  %v3805_v17 = vld [vmem:[%s4835_s25 + $0x152] sm:$0xff]  ;;  %v245_v22 = vmin.f32 %v213_v2, 1.0 }
  0x3e   : > { %v4970_v29 = vpack.c.bf16 %v1982_v10, %v1981_v9  ;;  %v1985_v40 = vmin.f32 %v1953_v27, 1.0  ;;  %v1959_v9 = vmax.f32 %v3803_v56, 0.0  ;;  %v1960_v10 = vmax.f32 %v3804_v57, 0.0  ;;  %v3810_v57 = vld [vmem:[%s4835_s25 + $0x18a] sm:$0xff] }
  0x3f   : > { %v215_v28 = vmax.f32 %v183_v16, 0.0  ;;  %v1961_v34 = vmax.f32 %v3805_v17, 0.0  ;;  %v221_v16 = vmax.f32 %v189_v63, 0.0 }
  0x40   : > { %v4990_v61 = vpack.c.bf16 %v1986_v41, %v1985_v40  ;;  %v1991_v25 = vmin.f32 %v1959_v9, 1.0  ;;  %v1992_v26 = vmin.f32 %v1960_v10, 1.0  ;;  %v218_v9 = vmax.f32 %v186_v52, 0.0 }
  0x41   : > { %4219 = vmatmul.mubr.msk.bf16.gmra.mrb[20].mxu1 %vm399_vm2, %v392_v23  ;;  %v3799_v23 = vld [vmem:[%s4835_s25 + $0x10a] sm:$0xff]  ;;  %v247_v45 = vmin.f32 %v215_v28, 1.0  ;;  %v219_v10 = vmax.f32 %v187_v53, 0.0 }
  0x42   : > { %4373 = vmatmul.mubr.msk.bf16.gmra.mrb[4].mxu0 %vm399_vm2, %v4934_v32  ;;  %4222 = vmatprep.mubr.msk.bf16.mxu1 %vm399_vm2, %v393_v48  ;;  %v208_v48 = vmax.f32 %v176_v20, 0.0  ;;  %v1955_v35 = vmax.f32 %v3799_v23, 0.0  ;;  %v1990_v20 = vmin.f32 %v1958_v0, 1.0  ;;  %v184_v23 = vld [vmem:[%s4835_s25 + $0x90] sm:$0xff]  ;;  %v5026_v41 = vpack.c.bf16 %v1992_v26, %v1991_v25  ;;  %v191_v25 = vld [vmem:[%s4835_s25 + $0xe0] sm:$0xff] }
  0x43   : > { %4376 = vmatprep.mubr.msk.bf16.mxu0 %vm399_vm2, %v4936_v33  ;;  %v216_v37 = vmax.f32 %v184_v23, 0.0  ;;  %v253_v23 = vmin.f32 %v221_v16, 1.0  ;;  %v192_v26 = vld [vmem:[%s4835_s25 + $0xf0] sm:$0xff]  ;;  %v199_v16 = vld [vmem:[%s4835_s25 + $0x140] sm:$0xff] }
  0x44   : > { %v240_v46 = vmin.f32 %v208_v48, 1.0  ;;  %v1987_v49 = vmin.f32 %v1955_v35, 1.0  ;;  %v3808_v48 = vld [vmem:[%s4835_s25 + $0x172] sm:$0xff]  ;;  %v1962_v35 = vmax.f32 %v3806_v18, 0.0  ;;  %v250_v18 = vmin.f32 %v218_v9, 1.0 }
  0x46   : > { %v4995_v6 = vpack.c.bf16 %v241_v47, %v240_v46  ;;  %v4997_v7 = vpack.c.bf16 %v1988_v51, %v1987_v49  ;;  %v1993_v46 = vmin.f32 %v1961_v34, 1.0  ;;  %v1994_v47 = vmin.f32 %v1962_v35, 1.0 }
  0x47   : > { %v248_v49 = vmin.f32 %v216_v37, 1.0  ;;  %v224_v37 = vmax.f32 %v192_v26, 0.0 }
  0x49   : > { %4223 = vmatmul.mubr.msk.bf16.gmra.mrb[24].mxu1 %vm399_vm2, %v394_v55  ;;  %v211_v55 = vmax.f32 %v179_v43, 0.0  ;;  %v1964_v43 = vmax.f32 %v3808_v48, 0.0  ;;  %v223_v48 = vmax.f32 %v191_v25, 0.0 }
  0x4a   : > { %4377 = vmatmul.mubr.msk.bf16.gmra.mrb[8].mxu0 %vm399_vm2, %v4952_v58  ;;  %4226 = vmatprep.mubr.msk.bf16.mxu1 %vm399_vm2, %v395_v59  ;;  %v4988_v59 = vpack.c.bf16 %v239_v39, %v238_v38  ;;  %v217_v38 = vmax.f32 %v185_v24, 0.0  ;;  %v5022_v39 = vpack.c.bf16 %v1990_v20, %v1989_v19  ;;  %v251_v19 = vmin.f32 %v219_v10, 1.0  ;;  %v190_v24 = vld [vmem:[%s4835_s25 + $0xd8] sm:$0xff] }
  0x4b   : > { %4380 = vmatprep.mubr.msk.bf16.mxu0 %vm399_vm2, %v4954_v4  ;;  %v243_v13 = vmin.f32 %v211_v55, 1.0  ;;  %v1996_v56 = vmin.f32 %v1964_v43, 1.0  ;;  %v255_v43 = vmin.f32 %v223_v48, 1.0  ;;  %v203_v48 = vld [vmem:[%s4835_s25 + $0x170] sm:$0xff] }
  0x4c   : > { %v249_v51 = vmin.f32 %v217_v38, 1.0  ;;  %v5062_v28 = vpack.c.bf16 %v251_v19, %v250_v18  ;;  %v201_v18 = vld [vmem:[%s4835_s25 + $0x158] sm:$0xff] }
  0x4d   : > { %v5017_v27 = vpack.c.bf16 %v243_v13, %v242_v12  ;;  %v1965_v12 = vmax.f32 %v3809_v54, 0.0  ;;  %v1966_v13 = vmax.f32 %v3810_v57, 0.0 }
  0x4e   : > { %v5046_v2 = vpack.c.bf16 %v249_v51, %v248_v49  ;;  %v196_v49 = vld [vmem:[%s4835_s25 + $0x120] sm:$0xff]  ;;  %v197_v51 = vld [vmem:[%s4835_s25 + $0x128] sm:$0xff] }
  0x4f   : > { %v1997_v20 = vmin.f32 %v1965_v12, 1.0  ;;  %v228_v57 = vmax.f32 %v196_v49, 0.0 }
  0x51   : > { %4227 = vmatmul.mubr.msk.bf16.gmra.mrb[28].mxu1 %vm399_vm2, %v396_v21  ;;  %v244_v21 = vmin.f32 %v212_v1, 1.0  ;;  %v5044_v1 = vpack.c.bf16 %v1994_v47, %v1993_v46  ;;  %v194_v46 = vld [vmem:[%s4835_s25 + $0x108] sm:$0xff]  ;;  %v195_v47 = vld [vmem:[%s4835_s25 + $0x110] sm:$0xff]  ;;  %v260_v12 = vmin.f32 %v228_v57, 1.0  ;;  %v3856_v57 = vld [vmem:[%s4835_s25 + $0x180] sm:$0xff] }
  0x52   : > { %4381 = vmatmul.mubr.msk.bf16.gmra.mrb[12].mxu0 %vm399_vm2, %v4970_v29  ;;  %4232 = vmatprep.mubr.msk.bf16.mxu1 %vm399_vm2, %v268_v30  ;;  %v3807_v30 = vld [vmem:[%s4835_s25 + $0x16a] sm:$0xff]  ;;  %v226_v53 = vmax.f32 %v194_v46, 0.0  ;;  %v227_v54 = vmax.f32 %v195_v47, 0.0 }
  0x53   : > { %4384 = vmatprep.mubr.msk.bf16.mxu0 %vm399_vm2, %v4972_v31  ;;  %v5024_v40 = vpack.c.bf16 %v245_v22, %v244_v21  ;;  %v1963_v42 = vmax.f32 %v3807_v30, 0.0  ;;  %v1998_v21 = vmin.f32 %v1966_v13, 1.0  ;;  %v222_v30 = vmax.f32 %v190_v24, 0.0 }
  0x54   : > { %v258_v9 = vmin.f32 %v226_v53, 1.0  ;;  %v259_v10 = vmin.f32 %v227_v54, 1.0  ;;  %v233_v24 = vmax.f32 %v201_v18, 0.0 }
  0x55   : > { %v1995_v55 = vmin.f32 %v1963_v42, 1.0  ;;  %v2014_v34 = vpack.c.bf16 %v1998_v21, %v1997_v20  ;;  %v254_v42 = vmin.f32 %v222_v30, 1.0  ;;  %v231_v21 = vmax.f32 %v199_v16, 0.0  ;;  %v202_v30 = vld [vmem:[%s4835_s25 + $0x168] sm:$0xff] }
  0x56   : > { %v5101_v19 = vpack.c.bf16 %v259_v10, %v258_v9  ;;  %v3858_v10 = vld [vmem:[%s4835_s25 + $0x198] sm:$0xff] }
  0x57   : > { %v5048_v17 = vpack.c.bf16 %v1996_v56, %v1995_v55  ;;  %v5077_v52 = vpack.c.bf16 %v255_v43, %v254_v42  ;;  %v3958_v55 = vld [vmem:[%s5488_s1 + $0x10] sm:$0x3]  ;;  %v263_v25 = vmin.f32 %v231_v21, 1.0  ;;  %v234_v42 = vmax.f32 %v202_v30, 0.0 }
  0x58   : > { %v5085_v63 = vand.u32 %v3958_v55, %v4816_v5  ;;  %v200_v5 = vld [vmem:[%s4835_s25 + $0x150] sm:$0xff]  ;;  %v235_v43 = vmax.f32 %v203_v48, 0.0  ;;  %v2324_v16 = vmax.f32 %v3858_v10, 0.0 }
  0x59   : > { %4233 = vmatmul.mubr.msk.bf16.vlgmr.msra.gmra.mrb[0].mxu1 %vm399_vm2, %v4988_v59  ;;  %v266_v47 = vmin.f32 %v234_v42, 1.0 }
  0x5a   : > { %4265 = vmatpush3.bf16.msra.mxu1 %v4862_v50  ;;  %4385 = vmatmul.mubr.msk.bf16.gmra.mrb[16].mxu0 %vm399_vm2, %v4990_v61  ;;  %v214_v50 = vmax.f32 %v182_v14, 0.0  ;;  %v220_v14 = vmax.f32 %v188_v62, 0.0  ;;  %v229_v62 = vmax.f32 %v197_v51, 0.0  ;;  %v267_v49 = vmin.f32 %v235_v43, 1.0 }
  0x5b   : > { %4236 = vmatprep.mubr.msk.bf16.mxu1 %vm399_vm2, %v4995_v6  ;;  %4388 = vmatprep.mubr.msk.bf16.mxu0 %vm399_vm2, %v4997_v7 }
  0x5c   : > { %4298 = vmatprep.subr.bf16.mxu1 %v5001_v15  ;;  %v246_v44 = vmin.f32 %v214_v50, 1.0  ;;  %v252_v22 = vmin.f32 %v220_v14, 1.0  ;;  %v193_v50 = vld [vmem:[%s4835_s25 + $0xf8] sm:$0xff]  ;;  %v261_v13 = vmin.f32 %v229_v62, 1.0  ;;  %v5129_v54 = vpack.c.bf16 %v267_v49, %v266_v47  ;;  %v3857_v62 = vld [vmem:[%s4835_s25 + $0x188] sm:$0xff] }
  0x5d   : > { %v225_v38 = vmax.f32 %v193_v50, 0.0  ;;  %v198_v14 = vld [vmem:[%s4835_s25 + $0x138] sm:$0xff]  ;;  %v265_v50 = vmin.f32 %v233_v24, 1.0  ;;  %v2323_v9 = vmax.f32 %v3857_v62, 0.0  ;;  %v3884_v49 = vld [vmem:[%s4835_s25 + $0x81] sm:$0xff] }
  0x5e   : > { %v5042_v0 = vpack.c.bf16 %v247_v45, %v246_v44  ;;  %v5064_v35 = vpack.c.bf16 %v253_v23, %v252_v22  ;;  %v256_v44 = vmin.f32 %v224_v37, 1.0  ;;  %v230_v20 = vmax.f32 %v198_v14, 0.0  ;;  %v829_v37 = vld [vmem:[%s4835_s25 + $0xa] sm:$0xff]  ;;  %v3878_v14 = vld [vmem:[%s4835_s25 + $0x39] sm:$0xff] }
  0x5f   : > { %v257_v45 = vmin.f32 %v225_v38, 1.0  ;;  %v5103_v22 = vpack.c.bf16 %v261_v13, %v260_v12  ;;  %v232_v23 = vmax.f32 %v200_v5, 0.0  ;;  %v861_v46 = vmax.f32 %v829_v37, 0.0  ;;  %v3859_v12 = vld [vmem:[%s4835_s25 + $0x1a0] sm:$0xff]  ;;  %v3877_v13 = vld [vmem:[%s4835_s25 + $0x31] sm:$0xff] }
  0x60   : > { %v2652_v18 = vmax.f32 %v3877_v13, 0.0  ;;  %v3883_v47 = vld [vmem:[%s4835_s25 + $0x79] sm:$0xff]  ;;  %v3888_v13 = vld [vmem:[%s4835_s25 + $0xb1] sm:$0xff] }
  0x61   : > { %4237 = vmatmul.mubr.msk.bf16.gmra.mrb[4].mxu1 %vm399_vm2, %v5017_v27  ;;  %v5082_v56 = vpack.c.bf16 %v257_v45, %v256_v44  ;;  %v264_v26 = vmin.f32 %v232_v23, 1.0  ;;  %v893_v53 = vmin.f32 %v861_v46, 1.0 }
  0x62   : > { %4389 = vmatmul.mubr.msk.bf16.gmra.mrb[20].mxu0 %vm399_vm2, %v5022_v39  ;;  %4240 = vmatprep.mubr.msk.bf16.mxu1 %vm399_vm2, %v5024_v40  ;;  %v2684_v23 = vmin.f32 %v2652_v18, 1.0  ;;  %v2663_v18 = vmax.f32 %v3888_v13, 0.0 }
  0x63   : > { %4392 = vmatprep.mubr.msk.bf16.mxu0 %vm399_vm2, %v5026_v41  ;;  %v5119_v44 = vpack.c.bf16 %v265_v50, %v264_v26  ;;  %v3881_v26 = vld [vmem:[%s4835_s25 + $0x61] sm:$0xff]  ;;  %v3882_v50 = vld [vmem:[%s4835_s25 + $0x69] sm:$0xff] }
  0x64   : > { %v2657_v37 = vmax.f32 %v3882_v50, 0.0  ;;  %v3894_v50 = vld [vmem:[%s4835_s25 + $0xf9] sm:$0xff] }
  0x66   : > { %v2689_v46 = vmin.f32 %v2657_v37, 1.0 }
  0x69   : > { %4241 = vmatmul.mubr.msk.bf16.gmra.mrb[8].mxu1 %vm399_vm2, %v5042_v0 }
  0x6a   : > { %4393 = vmatmul.mubr.msk.bf16.gmra.mrb[24].mxu0 %vm399_vm2, %v5044_v1  ;;  %4244 = vmatprep.mubr.msk.bf16.mxu1 %vm399_vm2, %v5046_v2 }
  0x6b   : > { %4396 = vmatprep.mubr.msk.bf16.mxu0 %vm399_vm2, %v5048_v17 }
  0x71   : > { %4245 = vmatmul.mubr.msk.bf16.gmra.mrb[12].mxu1 %vm399_vm2, %v5062_v28 }
  0x72   : > { %4397 = vmatmul.mubr.msk.bf16.gmra.mrb[28].mxu0 %vm399_vm2, %v2014_v34  ;;  %4248 = vmatprep.mubr.msk.bf16.mxu1 %vm399_vm2, %v5064_v35  ;;  %v828_v34 = vld [vmem:[%s4835_s25 + $0x2] sm:$0xff] }
  0x73   : > { %4402 = vmatprep.mubr.msk.bf16.mxu0 %vm399_vm2, %v4995_v6  ;;  %v860_v45 = vmax.f32 %v828_v34, 0.0 }
  0x75   : > { %v892_v51 = vmin.f32 %v860_v45, 1.0 }
  0x77   : > { %v924_v55 = vpack.c.bf16 %v893_v53, %v892_v51  ;;  %v3885_v51 = vld [vmem:[%s4835_s25 + $0x91] sm:$0xff]  ;;  %v3886_v53 = vld [vmem:[%s4835_s25 + $0x99] sm:$0xff] }
  0x79   : > { %4249 = vmatmul.mubr.msk.bf16.gmra.mrb[16].mxu1 %vm399_vm2, %v5077_v52 }
  0x7a   : > { %4403 = vmatmul.mubr.msk.bf16.vlgmr.msra.gmra.mrb[0].mxu0 %vm399_vm2, %v5017_v27  ;;  %4252 = vmatprep.mubr.msk.bf16.mxu1 %vm399_vm2, %v5082_v56 }
  0x7b   : > { %4435 = vmatpush3.bf16.msra.mxu0 %v4917_v11  ;;  %4406 = vmatprep.mubr.msk.bf16.mxu0 %vm399_vm2, %v5024_v40  ;;  %v262_v11 = vmin.f32 %v230_v20, 1.0  ;;  %v2653_v20 = vmax.f32 %v3878_v14, 0.0  ;;  %v3889_v14 = vld [vmem:[%s4835_s25 + $0xc1] sm:$0xff] }
  0x7c   : > { %4468 = vmatprep.subr.bf16.mxu0 %v5085_v63 }
  0x7d   : > { %v5117_v38 = vpack.c.bf16 %v263_v25, %v262_v11  ;;  %v2685_v24 = vmin.f32 %v2653_v20, 1.0  ;;  %v3879_v11 = vld [vmem:[%s4835_s25 + $0x49] sm:$0xff]  ;;  %v3880_v25 = vld [vmem:[%s4835_s25 + $0x51] sm:$0xff]  ;;  %v2664_v20 = vmax.f32 %v3889_v14, 0.0 }
  0x7e   : > { %v2654_v30 = vmax.f32 %v3879_v11, 0.0  ;;  %v2655_v48 = vmax.f32 %v3880_v25, 0.0  ;;  %v3891_v11 = vld [vmem:[%s4835_s25 + $0xd9] sm:$0xff]  ;;  %v3892_v25 = vld [vmem:[%s4835_s25 + $0xe1] sm:$0xff] }
  0x7f   : > { %v2716_v34 = vpack.c.bf16 %v2685_v24, %v2684_v23  ;;  %v2696_v23 = vmin.f32 %v2664_v20, 1.0  ;;  %v3903_v20 = vld [vmem:[%s4835_s25 + $0x169] sm:$0xff] }
  0x80   : > { %v2686_v42 = vmin.f32 %v2654_v30, 1.0  ;;  %v2687_v43 = vmin.f32 %v2655_v48, 1.0  ;;  %v2667_v30 = vmax.f32 %v3892_v25, 0.0 }
  0x81   : > { %4253 = vmatmul.mubr.msk.bf16.gmra.mrb[20].mxu1 %vm399_vm2, %v5101_v19 }
  0x82   : > { %4407 = vmatmul.mubr.msk.bf16.gmra.mrb[4].mxu0 %vm399_vm2, %v5042_v0  ;;  %4256 = vmatprep.mubr.msk.bf16.mxu1 %vm399_vm2, %v5103_v22  ;;  %v2699_v37 = vmin.f32 %v2667_v30, 1.0  ;;  %v3908_v30 = vld [vmem:[%s4835_s25 + $0x1a1] sm:$0xff] }
  0x83   : > { %4410 = vmatprep.mubr.msk.bf16.mxu0 %vm399_vm2, %v5046_v2 }
  0x89   : > { %4257 = vmatmul.mubr.msk.bf16.gmra.mrb[24].mxu1 %vm399_vm2, %v5117_v38 }
  0x8a   : > { %4411 = vmatmul.mubr.msk.bf16.gmra.mrb[8].mxu0 %vm399_vm2, %v5062_v28  ;;  %4260 = vmatprep.mubr.msk.bf16.mxu1 %vm399_vm2, %v5119_v44 }
  0x8b   : > { %4414 = vmatprep.mubr.msk.bf16.mxu0 %vm399_vm2, %v5064_v35 }
  0x91   : > { %4261 = vmatmul.mubr.msk.bf16.gmra.mrb[28].mxu1 %vm399_vm2, %v5129_v54 }
  0x92   : > { %4415 = vmatmul.mubr.msk.bf16.gmra.mrb[12].mxu0 %vm399_vm2, %v5077_v52  ;;  %4266 = vmatprep.mubr.msk.bf16.mxu1 %vm399_vm2, %v924_v55  ;;  %v2717_v55 = vpack.c.bf16 %v2687_v43, %v2686_v42 }
  0x93   : > { %4418 = vmatprep.mubr.msk.bf16.mxu0 %vm399_vm2, %v5082_v56 }
  0x99   : > { %4267 = vmatmul.mubr.msk.bf16.vlgmr.msra.gmra.mrb[0].mxu1 %vm399_vm2, %v4893_v36  ;;  %v2322_v36 = vmax.f32 %v3856_v57, 0.0  ;;  %v2658_v57 = vmax.f32 %v3883_v47, 0.0  ;;  %v3897_v47 = vld [vmem:[%s4835_s25 + $0x121] sm:$0xff] }
  0x9a   : > { %4299 = vmatpush3.bf16.msra.mxu1 %v5001_v15  ;;  %4419 = vmatmul.mubr.msk.bf16.gmra.mrb[16].mxu0 %vm399_vm2, %v5101_v19  ;;  %v2355_v15 = vmin.f32 %v2323_v9, 1.0 }
  0x9b   : > { %4270 = vmatprep.mubr.msk.bf16.mxu1 %vm399_vm2, %v4908_v60  ;;  %4422 = vmatprep.mubr.msk.bf16.mxu0 %vm399_vm2, %v5103_v22  ;;  %v2354_v60 = vmin.f32 %v2322_v36, 1.0  ;;  %v2660_v36 = vmax.f32 %v3885_v51, 0.0  ;;  %v2690_v9 = vmin.f32 %v2658_v57, 1.0 }
  0x9c   : > { %4502 = vmatprep.subr.bf16.mxu1 %v4825_v8 }
  0x9d   : > { %v5162_v5 = vpack.c.bf16 %v2355_v15, %v2354_v60  ;;  %v2692_v15 = vmin.f32 %v2660_v36, 1.0 }
  0xa1   : > { %4271 = vmatmul.mubr.msk.bf16.gmra.mrb[4].mxu1 %vm399_vm2, %v4913_v3  ;;  %v2325_v3 = vmax.f32 %v3859_v12, 0.0  ;;  %v3887_v12 = vld [vmem:[%s4835_s25 + $0xa9] sm:$0xff] }
  0xa2   : > { %4423 = vmatmul.mubr.msk.bf16.gmra.mrb[20].mxu0 %vm399_vm2, %v5117_v38  ;;  %4274 = vmatprep.mubr.msk.bf16.mxu1 %vm399_vm2, %v4934_v32  ;;  %v2356_v32 = vmin.f32 %v2324_v16, 1.0  ;;  %v3890_v16 = vld [vmem:[%s4835_s25 + $0xc9] sm:$0xff] }
  0xa3   : > { %4426 = vmatprep.mubr.msk.bf16.mxu0 %vm399_vm2, %v5119_v44  ;;  %v2357_v21 = vmin.f32 %v2325_v3, 1.0  ;;  %v2662_v3 = vmax.f32 %v3887_v12, 0.0 }
  0xa9   : > { %4275 = vmatmul.mubr.msk.bf16.gmra.mrb[8].mxu1 %vm399_vm2, %v4936_v33  ;;  %v2373_v33 = vpack.c.bf16 %v2357_v21, %v2356_v32  ;;  %v2665_v32 = vmax.f32 %v3890_v16, 0.0  ;;  %v2695_v21 = vmin.f32 %v2663_v18, 1.0 }
  0xaa   : > { %4427 = vmatmul.mubr.msk.bf16.gmra.mrb[24].mxu0 %vm399_vm2, %v5129_v54  ;;  %4278 = vmatprep.mubr.msk.bf16.mxu1 %vm399_vm2, %v4952_v58  ;;  %v2656_v58 = vmax.f32 %v3881_v26, 0.0  ;;  %v3893_v26 = vld [vmem:[%s4835_s25 + $0xf1] sm:$0xff] }
  0xab   : > { %4430 = vmatprep.mubr.msk.bf16.mxu0 %vm399_vm2, %v5162_v5  ;;  %v2697_v24 = vmin.f32 %v2665_v32, 1.0  ;;  %v3904_v32 = vld [vmem:[%s4835_s25 + $0x171] sm:$0xff] }
  0xac   : > { %v2688_v45 = vmin.f32 %v2656_v58, 1.0 }
  0xad   : > { %v2722_v48 = vpack.c.bf16 %v2697_v24, %v2696_v23  ;;  %v2679_v23 = vmax.f32 %v3904_v32, 0.0 }
  0xae   : > { %v2718_v62 = vpack.c.bf16 %v2689_v46, %v2688_v45  ;;  %v3895_v45 = vld [vmem:[%s4835_s25 + $0x109] sm:$0xff]  ;;  %v3896_v46 = vld [vmem:[%s4835_s25 + $0x111] sm:$0xff] }
  0xb1   : > { %4279 = vmatmul.mubr.msk.bf16.gmra.mrb[12].mxu1 %vm399_vm2, %v4954_v4  ;;  %v2659_v4 = vmax.f32 %v3884_v49, 0.0  ;;  %v3898_v49 = vld [vmem:[%s4835_s25 + $0x129] sm:$0xff] }
  0xb2   : > { %4431 = vmatmul.mubr.msk.bf16.gmra.mrb[28].mxu0 %vm399_vm2, %v2373_v33  ;;  %4282 = vmatprep.mubr.msk.bf16.mxu1 %vm399_vm2, %v4970_v29  ;;  %v2661_v29 = vmax.f32 %v3886_v53, 0.0  ;;  %v2671_v53 = vmax.f32 %v3896_v46, 0.0  ;;  %v2673_v57 = vmax.f32 %v3898_v49, 0.0  ;;  %v3928_v49 = vld [vmem:[%s4835_s25 + $0x4a] sm:$0xff] }
  0xb3   : > { %4436 = vmatprep.mubr.msk.bf16.mxu0 %vm399_vm2, %v2716_v34  ;;  %v2691_v60 = vmin.f32 %v2659_v4, 1.0  ;;  %v2668_v34 = vmax.f32 %v3893_v26, 0.0  ;;  %v2711_v26 = vmin.f32 %v2679_v23, 1.0  ;;  %v3938_v23 = vld [vmem:[%s4835_s25 + $0xc2] sm:$0xff] }
  0xb4   : > { %v2693_v10 = vmin.f32 %v2661_v29, 1.0  ;;  %v2705_v29 = vmin.f32 %v2673_v57, 1.0  ;;  %v3012_v57 = vmax.f32 %v3928_v49, 0.0 }
  0xb5   : > { %v2700_v42 = vmin.f32 %v2668_v34, 1.0  ;;  %v3927_v34 = vld [vmem:[%s4835_s25 + $0x3a] sm:$0xff] }
  0xb9   : > { %4283 = vmatmul.mubr.msk.bf16.gmra.mrb[16].mxu1 %vm399_vm2, %v4972_v31  ;;  %v2719_v31 = vpack.c.bf16 %v2691_v60, %v2690_v9  ;;  %v3899_v9 = vld [vmem:[%s4835_s25 + $0x139] sm:$0xff]  ;;  %v3900_v60 = vld [vmem:[%s4835_s25 + $0x141] sm:$0xff] }
  0xba   : > { %4437 = vmatmul.mubr.msk.bf16.vlgmr.msra.gmra.mrb[0].mxu0 %vm399_vm2, %v2717_v55  ;;  %4286 = vmatprep.mubr.msk.bf16.mxu1 %vm399_vm2, %v4990_v61  ;;  %v2720_v61 = vpack.c.bf16 %v2693_v10, %v2692_v15  ;;  %v3901_v15 = vld [vmem:[%s4835_s25 + $0x151] sm:$0xff]  ;;  %v3902_v10 = vld [vmem:[%s4835_s25 + $0x159] sm:$0xff]  ;;  %v2675_v13 = vmax.f32 %v3900_v60, 0.0 }
  0xbb   : > { %4469 = vmatpush3.bf16.msra.mxu0 %v5085_v63  ;;  %4440 = vmatprep.mubr.msk.bf16.mxu0 %vm399_vm2, %v2718_v62  ;;  %v2694_v63 = vmin.f32 %v2662_v3, 1.0  ;;  %v2703_v62 = vmin.f32 %v2671_v53, 1.0  ;;  %v2676_v14 = vmax.f32 %v3901_v15, 0.0  ;;  %v2677_v16 = vmax.f32 %v3902_v10, 0.0  ;;  %v3930_v53 = vld [vmem:[%s4835_s25 + $0x62] sm:$0xff]  ;;  %v3932_v10 = vld [vmem:[%s4835_s25 + $0x7a] sm:$0xff] }
  0xbc   : > { %v2707_v3 = vmin.f32 %v2675_v13, 1.0  ;;  %v3934_v13 = vld [vmem:[%s4835_s25 + $0x92] sm:$0xff] }
  0xbd   : > { %v2721_v33 = vpack.c.bf16 %v2695_v21, %v2694_v63  ;;  %v2708_v18 = vmin.f32 %v2676_v14, 1.0  ;;  %v3905_v63 = vld [vmem:[%s4835_s25 + $0x181] sm:$0xff]  ;;  %v2678_v21 = vmax.f32 %v3903_v20, 0.0 }
  0xbe   : > { %v3935_v14 = vld [vmem:[%s4835_s25 + $0x9a] sm:$0xff] }
  0xbf   : > { %v2710_v25 = vmin.f32 %v2678_v21, 1.0  ;;  %v3937_v21 = vld [vmem:[%s4835_s25 + $0xb2] sm:$0xff] }
  0xc1   : > { %4287 = vmatmul.mubr.msk.bf16.gmra.mrb[20].mxu1 %vm399_vm2, %v4997_v7  ;;  %v2666_v7 = vmax.f32 %v3891_v11, 0.0 }
  0xc2   : > { %4441 = vmatmul.mubr.msk.bf16.gmra.mrb[4].mxu0 %vm399_vm2, %v2719_v31  ;;  %4290 = vmatprep.mubr.msk.bf16.mxu1 %vm399_vm2, %v5022_v39  ;;  %v2669_v39 = vmax.f32 %v3894_v50, 0.0 }
  0xc3   : > { %4444 = vmatprep.mubr.msk.bf16.mxu0 %vm399_vm2, %v2720_v61  ;;  %v2698_v58 = vmin.f32 %v2666_v7, 1.0  ;;  %v2709_v61 = vmin.f32 %v2677_v16, 1.0  ;;  %v3907_v7 = vld [vmem:[%s4835_s25 + $0x199] sm:$0xff] }
  0xc4   : > { %v2701_v43 = vmin.f32 %v2669_v39, 1.0  ;;  %v2682_v39 = vmax.f32 %v3907_v7, 0.0 }
  0xc5   : > { %v5217_v51 = vpack.c.bf16 %v2699_v37, %v2698_v58  ;;  %v5252_v24 = vpack.c.bf16 %v2709_v61, %v2708_v18  ;;  %v2683_v58 = vmax.f32 %v3908_v30, 0.0  ;;  %v3018_v18 = vmax.f32 %v3934_v13, 0.0  ;;  %v3949_v13 = vld [vmem:[%s4835_s25 + $0x142] sm:$0xff] }
  0xc6   : > { %v5219_v55 = vpack.c.bf16 %v2701_v43, %v2700_v42  ;;  %v3011_v42 = vmax.f32 %v3927_v34, 0.0  ;;  %v2714_v43 = vmin.f32 %v2682_v39, 1.0  ;;  %v3940_v34 = vld [vmem:[%s4835_s25 + $0xda] sm:$0xff]  ;;  %v3941_v39 = vld [vmem:[%s4835_s25 + $0xe2] sm:$0xff] }
  0xc7   : > { %v3050_v32 = vmin.f32 %v3018_v18, 1.0 }
  0xc9   : > { %4291 = vmatmul.mubr.msk.bf16.gmra.mrb[24].mxu1 %vm399_vm2, %v5026_v41  ;;  %v2670_v41 = vmax.f32 %v3895_v45, 0.0  ;;  %v2715_v45 = vmin.f32 %v2683_v58, 1.0  ;;  %v3942_v58 = vld [vmem:[%s4835_s25 + $0xf2] sm:$0xff] }
  0xca   : > { %4445 = vmatmul.mubr.msk.bf16.gmra.mrb[8].mxu0 %vm399_vm2, %v2721_v33  ;;  %4294 = vmatprep.mubr.msk.bf16.mxu1 %vm399_vm2, %v5044_v1  ;;  %v2672_v1 = vmax.f32 %v3897_v47, 0.0  ;;  %v3043_v47 = vmin.f32 %v3011_v42, 1.0 }
  0xcb   : > { %4448 = vmatprep.mubr.msk.bf16.mxu0 %vm399_vm2, %v2722_v48  ;;  %v2702_v4 = vmin.f32 %v2670_v41, 1.0  ;;  %v3926_v48 = vld [vmem:[%s4835_s25 + $0x32] sm:$0xff] }
  0xcc   : > { %v2704_v36 = vmin.f32 %v2672_v1, 1.0  ;;  %v3010_v37 = vmax.f32 %v3926_v48, 0.0  ;;  %v3929_v41 = vld [vmem:[%s4835_s25 + $0x52] sm:$0xff]  ;;  %v3931_v1 = vld [vmem:[%s4835_s25 + $0x6a] sm:$0xff] }
  0xcd   : > { %v5233_v12 = vpack.c.bf16 %v2703_v62, %v2702_v4  ;;  %v3013_v4 = vmax.f32 %v3929_v41, 0.0 }
  0xce   : > { %v3042_v46 = vmin.f32 %v3010_v37, 1.0  ;;  %v3943_v37 = vld [vmem:[%s4835_s25 + $0xfa] sm:$0xff] }
  0xd0   : > { %v3074_v62 = vpack.c.bf16 %v3043_v47, %v3042_v46  ;;  %v3026_v46 = vmax.f32 %v3942_v58, 0.0 }
  0xd1   : > { %4295 = vmatmul.mubr.msk.bf16.gmra.mrb[28].mxu1 %vm399_vm2, %v5048_v17  ;;  %v2674_v17 = vmax.f32 %v3899_v9, 0.0  ;;  %v3045_v9 = vmin.f32 %v3013_v4, 1.0  ;;  %v3947_v4 = vld [vmem:[%s4835_s25 + $0x12a] sm:$0xff] }
  0xd2   : > { %4449 = vmatmul.mubr.msk.bf16.gmra.mrb[12].mxu0 %vm399_vm2, %v5217_v51  ;;  %4300 = vmatprep.mubr.msk.bf16.mxu1 %vm399_vm2, %v4988_v59  ;;  %v5235_v59 = vpack.c.bf16 %v2705_v29, %v2704_v36  ;;  %v3015_v36 = vmax.f32 %v3931_v1, 0.0  ;;  %v3044_v29 = vmin.f32 %v3012_v57, 1.0  ;;  %v3058_v41 = vmin.f32 %v3026_v46, 1.0  ;;  %v3944_v1 = vld [vmem:[%s4835_s25 + $0x10a] sm:$0xff]  ;;  %v3946_v57 = vld [vmem:[%s4835_s25 + $0x122] sm:$0xff] }
  0xd3   : > { %4452 = vmatprep.mubr.msk.bf16.mxu0 %vm399_vm2, %v5219_v55  ;;  %v2706_v31 = vmin.f32 %v2674_v17, 1.0  ;;  %v3933_v17 = vld [vmem:[%s4835_s25 + $0x82] sm:$0xff] }
  0xd4   : > { %v3047_v15 = vmin.f32 %v3015_v36, 1.0  ;;  %v3075_v16 = vpack.c.bf16 %v3045_v9, %v3044_v29  ;;  %v3030_v29 = vmax.f32 %v3946_v57, 0.0 }
  0xd9   : > { %4301 = vmatmul.mubr.msk.bf16.vlgmr.msra.gmra.mrb[0].mxu1 %vm399_vm2, %v4995_v6  ;;  %v3906_v6 = vld [vmem:[%s4835_s25 + $0x189] sm:$0xff] }
  0xda   : > { %4503 = vmatpush3.bf16.msra.mxu1 %v4825_v8  ;;  %4453 = vmatmul.mubr.msk.bf16.gmra.mrb[16].mxu0 %vm399_vm2, %v5233_v12  ;;  %v5250_v8 = vpack.c.bf16 %v2707_v3, %v2706_v31  ;;  %v2681_v11 = vmax.f32 %v3906_v6, 0.0  ;;  %v3017_v31 = vmax.f32 %v3933_v17, 0.0  ;;  %v3936_v6 = vld [vmem:[%s4835_s25 + $0xaa] sm:$0xff]  ;;  %v3948_v17 = vld [vmem:[%s4835_s25 + $0x13a] sm:$0xff] }
  0xdb   : > { %4304 = vmatprep.mubr.msk.bf16.mxu1 %vm399_vm2, %v5017_v27  ;;  %4456 = vmatprep.mubr.msk.bf16.mxu0 %vm399_vm2, %v5235_v59  ;;  %v2680_v27 = vmax.f32 %v3905_v63, 0.0 }
  0xdc   : > { %v2713_v33 = vmin.f32 %v2681_v11, 1.0  ;;  %v3049_v20 = vmin.f32 %v3017_v31, 1.0  ;;  %v3033_v31 = vmax.f32 %v3949_v13, 0.0 }
  0xdd   : > { %v2712_v50 = vmin.f32 %v2680_v27, 1.0  ;;  %v3939_v27 = vld [vmem:[%s4835_s25 + $0xca] sm:$0xff] }
  0xe1   : > { %4305 = vmatmul.mubr.msk.bf16.gmra.mrb[4].mxu1 %vm399_vm2, %v5024_v40  ;;  %v5266_v40 = vpack.c.bf16 %v2711_v26, %v2710_v25  ;;  %v3021_v25 = vmax.f32 %v3937_v21, 0.0  ;;  %v3954_v21 = vld [vmem:[%s4835_s25 + $0x182] sm:$0xff] }
  0xe2   : > { %4457 = vmatmul.mubr.msk.bf16.gmra.mrb[20].mxu0 %vm399_vm2, %v5250_v8  ;;  %4308 = vmatprep.mubr.msk.bf16.mxu1 %vm399_vm2, %v5042_v0  ;;  %v5268_v0 = vpack.c.bf16 %v2713_v33, %v2712_v50  ;;  %v3022_v50 = vmax.f32 %v3938_v23, 0.0  ;;  %v3955_v23 = vld [vmem:[%s4835_s25 + $0x18a] sm:$0xff] }
  0xe3   : > { %4460 = vmatprep.mubr.msk.bf16.mxu0 %vm399_vm2, %v5252_v24  ;;  %v3053_v7 = vmin.f32 %v3021_v25, 1.0  ;;  %v3038_v25 = vmax.f32 %v3954_v21, 0.0 }
  0xe4   : > { %v3054_v30 = vmin.f32 %v3022_v50, 1.0 }
  0xe9   : > { %4309 = vmatmul.mubr.msk.bf16.gmra.mrb[8].mxu1 %vm399_vm2, %v5046_v2  ;;  %v2731_v2 = vpack.c.bf16 %v2715_v45, %v2714_v43  ;;  %v3025_v43 = vmax.f32 %v3941_v39, 0.0 }
  0xea   : > { %4461 = vmatmul.mubr.msk.bf16.gmra.mrb[24].mxu0 %vm399_vm2, %v5266_v40  ;;  %4312 = vmatprep.mubr.msk.bf16.mxu1 %vm399_vm2, %v5062_v28  ;;  %v3014_v28 = vmax.f32 %v3930_v53, 0.0 }
  0xeb   : > { %4464 = vmatprep.mubr.msk.bf16.mxu0 %vm399_vm2, %v5268_v0  ;;  %v3057_v49 = vmin.f32 %v3025_v43, 1.0 }
  0xec   : > { %v3046_v60 = vmin.f32 %v3014_v28, 1.0 }
  0xee   : > { %v3076_v3 = vpack.c.bf16 %v3047_v15, %v3046_v60  ;;  %v3062_v15 = vmin.f32 %v3030_v29, 1.0 }
  0xf1   : > { %4313 = vmatmul.mubr.msk.bf16.gmra.mrb[12].mxu1 %vm399_vm2, %v5064_v35  ;;  %v3016_v35 = vmax.f32 %v3932_v10, 0.0 }
  0xf2   : > { %4465 = vmatmul.mubr.msk.bf16.gmra.mrb[28].mxu0 %vm399_vm2, %v2731_v2  ;;  %4316 = vmatprep.mubr.msk.bf16.mxu1 %vm399_vm2, %v5077_v52  ;;  %v3019_v52 = vmax.f32 %v3935_v14, 0.0  ;;  %v3945_v2 = vld [vmem:[%s4835_s25 + $0x112] sm:$0xff] }
  0xf3   : > { %4470 = vmatprep.mubr.msk.bf16.mxu0 %vm399_vm2, %v3074_v62  ;;  %v3048_v61 = vmin.f32 %v3016_v35, 1.0  ;;  %v3029_v28 = vmax.f32 %v3945_v2, 0.0  ;;  %v3950_v14 = vld [vmem:[%s4835_s25 + $0x152] sm:$0xff] }
  0xf4   : > { %v3051_v63 = vmin.f32 %v3019_v52, 1.0  ;;  %v3034_v18 = vmax.f32 %v3950_v14, 0.0 }
  0xf5   : > { %v3077_v11 = vpack.c.bf16 %v3049_v20, %v3048_v61  ;;  %v3061_v60 = vmin.f32 %v3029_v28, 1.0  ;;  %v3065_v61 = vmin.f32 %v3033_v31, 1.0 }
  0xf6   : > { %v3078_v26 = vpack.c.bf16 %v3051_v63, %v3050_v32  ;;  %v3066_v20 = vmin.f32 %v3034_v18, 1.0  ;;  %v3952_v63 = vld [vmem:[%s4835_s25 + $0x16a] sm:$0xff] }
  0xf9   : > { %4317 = vmatmul.mubr.msk.bf16.gmra.mrb[16].mxu1 %vm399_vm2, %v5082_v56  ;;  %v3020_v56 = vmax.f32 %v3936_v6, 0.0  ;;  %v3953_v6 = vld [vmem:[%s4835_s25 + $0x172] sm:$0xff] }
  0xfa   : > { %4471 = vmatmul.mubr.msk.bf16.vlgmr.msra.gmra.mrb[0].mxu0 %vm399_vm2, %v3075_v16  ;;  %4320 = vmatprep.mubr.msk.bf16.mxu1 %vm399_vm2, %v5101_v19  ;;  %v3023_v19 = vmax.f32 %v3939_v27, 0.0  ;;  %v3951_v16 = vld [vmem:[%s4835_s25 + $0x15a] sm:$0xff] }
  0xfb   : > { %4474 = vmatprep.mubr.msk.bf16.mxu0 %vm399_vm2, %v3076_v3  ;;  %v3052_v33 = vmin.f32 %v3020_v56, 1.0 }
  0xfc   : > { %v3055_v48 = vmin.f32 %v3023_v19, 1.0  ;;  %v3070_v19 = vmin.f32 %v3038_v25, 1.0 }
  0xfd   : > { %v3079_v42 = vpack.c.bf16 %v3053_v7, %v3052_v33  ;;  %v3956_v7 = vld [vmem:[%s4835_s25 + $0x19a] sm:$0xff] }
  0xfe   : > { %v3080_v45 = vpack.c.bf16 %v3055_v48, %v3054_v30  ;;  %v3957_v30 = vld [vmem:[%s4835_s25 + $0x1a2] sm:$0xff] }
  0xff   : > { %v3041_v39 = vmax.f32 %v3957_v30, 0.0 }
 0x101   : > { %4321 = vmatmul.mubr.msk.bf16.gmra.mrb[20].mxu1 %vm399_vm2, %v5103_v22  ;;  %v3024_v22 = vmax.f32 %v3940_v34, 0.0  ;;  %v3040_v34 = vmax.f32 %v3956_v7, 0.0 }
 0x102   : > { %4475 = vmatmul.mubr.msk.bf16.gmra.mrb[4].mxu0 %vm399_vm2, %v3077_v11  ;;  %4324 = vmatprep.mubr.msk.bf16.mxu1 %vm399_vm2, %v5117_v38  ;;  %v3027_v38 = vmax.f32 %v3943_v37, 0.0  ;;  %v3036_v11 = vmax.f32 %v3952_v63, 0.0 }
 0x103   : > { %4478 = vmatprep.mubr.msk.bf16.mxu0 %vm399_vm2, %v3078_v26  ;;  %v3056_v47 = vmin.f32 %v3024_v22, 1.0  ;;  %v3039_v26 = vmax.f32 %v3955_v23, 0.0 }
 0x104   : > { %v3059_v53 = vmin.f32 %v3027_v38, 1.0 }
 0x105   : > { %v3081_v62 = vpack.c.bf16 %v3057_v49, %v3056_v47  ;;  %v3071_v33 = vmin.f32 %v3039_v26, 1.0 }
 0x106   : > { %v3082_v36 = vpack.c.bf16 %v3059_v53, %v3058_v41 }
 0x107   : > { %v3088_v58 = vpack.c.bf16 %v3071_v33, %v3070_v19 }
 0x109   : > { %4325 = vmatmul.mubr.msk.bf16.gmra.mrb[24].mxu1 %vm399_vm2, %v5119_v44  ;;  %v3028_v44 = vmax.f32 %v3944_v1, 0.0 }
 0x10a   : > { %4479 = vmatmul.mubr.msk.bf16.gmra.mrb[8].mxu0 %vm399_vm2, %v3079_v42  ;;  %4328 = vmatprep.mubr.msk.bf16.mxu1 %vm399_vm2, %v5129_v54  ;;  %v3031_v54 = vmax.f32 %v3947_v4, 0.0 }
 0x10b   : > { %4482 = vmatprep.mubr.msk.bf16.mxu0 %vm399_vm2, %v3080_v45  ;;  %v3060_v9 = vmin.f32 %v3028_v44, 1.0 }
 0x10c   : > { %v3063_v10 = vmin.f32 %v3031_v54, 1.0 }
 0x10d   : > { %v3083_v35 = vpack.c.bf16 %v3061_v60, %v3060_v9 }
 0x10e   : > { %v3084_v3 = vpack.c.bf16 %v3063_v10, %v3062_v15 }
 0x111   : > { %4329 = vmatmul.mubr.msk.bf16.gmra.mrb[28].mxu1 %vm399_vm2, %v5162_v5  ;;  %v3032_v5 = vmax.f32 %v3948_v17, 0.0 }
 0x112   : > { %4483 = vmatmul.mubr.msk.bf16.gmra.mrb[12].mxu0 %vm399_vm2, %v3081_v62  ;;  %4350 = vmatprep.mubr.msk.bf16.mxu1 %vm399_vm2, %v5217_v51  ;;  %v3035_v51 = vmax.f32 %v3951_v16, 0.0  ;;  %v5374_v62 = vld [vmem:[%s5489_s2] ss:$0 sm:$0xff] }
 0x113   : > { %4486 = vmatprep.mubr.msk.bf16.mxu0 %vm399_vm2, %v3082_v36  ;;  %v3064_v52 = vmin.f32 %v3032_v5, 1.0 }
 0x114   : > { %v3067_v32 = vmin.f32 %v3035_v51, 1.0 }
 0x115   : > { %v3085_v27 = vpack.c.bf16 %v3065_v61, %v3064_v52 }
 0x116   : > { %v3086_v56 = vpack.c.bf16 %v3067_v32, %v3066_v20 }
 0x119   : > { %4351 = vmatmul.mubr.msk.bf16.vlgmr.msra.gmra.mrb[16].mxu1 %vm399_vm2, %v5219_v55  ;;  %v3037_v55 = vmax.f32 %v3953_v6, 0.0 }
 0x11a   : > { %4487 = vmatmul.mubr.msk.bf16.gmra.mrb[16].mxu0 %vm399_vm2, %v3083_v35  ;;  %4354 = vmatprep.mubr.msk.bf16.mxu1 %vm399_vm2, %v5233_v12  ;;  %v3068_v12 = vmin.f32 %v3036_v11, 1.0 }
 0x11b   : > { %4490 = vmatprep.mubr.msk.bf16.mxu0 %vm399_vm2, %v3084_v3  ;;  %v3069_v50 = vmin.f32 %v3037_v55, 1.0 }
 0x11d   : > { %v3087_v48 = vpack.c.bf16 %v3069_v50, %v3068_v12 }
 0x121   : > { %4355 = vmatmul.mubr.msk.bf16.gmra.mrb[20].mxu1 %vm399_vm2, %v5235_v59  ;;  %v3072_v59 = vmin.f32 %v3040_v34, 1.0 }
 0x122   : > { %4491 = vmatmul.mubr.msk.bf16.gmra.mrb[20].mxu0 %vm399_vm2, %v3085_v27  ;;  %4358 = vmatprep.mubr.msk.bf16.mxu1 %vm399_vm2, %v5250_v8  ;;  %v3073_v8 = vmin.f32 %v3041_v39, 1.0 }
 0x123   : > { %4494 = vmatprep.mubr.msk.bf16.mxu0 %vm399_vm2, %v3086_v56 }
 0x124   : > { %v3089_v37 = vpack.c.bf16 %v3073_v8, %v3072_v59 }
 0x129   : > { %4359 = vmatmul.mubr.msk.bf16.gmra.mrb[24].mxu1 %vm399_vm2, %v5252_v24 }
 0x12a   : > { %4495 = vmatmul.mubr.msk.bf16.gmra.mrb[24].mxu0 %vm399_vm2, %v3087_v48  ;;  %4362 = vmatprep.mubr.msk.bf16.mxu1 %vm399_vm2, %v5266_v40 }
 0x12b   : > { %4498 = vmatprep.mubr.msk.bf16.mxu0 %vm399_vm2, %v3088_v58 }
 0x131   : > { %4363 = vmatmul.mubr.msk.bf16.gmra.mrb[28].mxu1 %vm399_vm2, %v5268_v0 }
 0x132   : > { %4499 = vmatmul.mubr.msk.bf16.gmra.mrb[28].mxu0 %vm399_vm2, %v3089_v37 }
 0x1ac   : > { %v4302_v42 = vpop.f32.mrb[0].mxu1 }
 0x1ad   : > { %v1386_v22 = vpop.f32.mrb[1].mxu1 }
 0x1ae   : > { %v4303_v43 = vpop.f32.mrb[2].mxu1 }
 0x1af   : > { %v1389_v45 = vpop.f32.mrb[3].mxu1 }
 0x1b4   : > { %v4306_v24 = vpop.f32.mrb[4].mxu1 }
 0x1b5   : > { %v1402_v46 = vpop.f32.mrb[5].mxu1 }
 0x1b6   : > { %v4307_v38 = vpop.f32.mrb[6].mxu1 }
 0x1b7   : > { %v1405_v47 = vpop.f32.mrb[7].mxu1 }
 0x1bc   : > { %v4310_v40 = vpop.f32.mrb[8].mxu1 }
 0x1bd   : > { %v1418_v49 = vpop.f32.mrb[9].mxu1 }
 0x1be   : > { %v5359_v41 = vpop.f32.mrb[10].mxu1 }
 0x1bf   : > { %v5361_v53 = vpop.f32.mrb[11].mxu1 }
 0x1c4   : > { %v5363_v1 = vpop.f32.mrb[12].mxu1 }
 0x1c5   : > { %v5365_v0 = vpop.f32.mrb[13].mxu1 }
 0x1c6   : > { %v5367_v2 = vpop.f32.mrb[14].mxu1 }
 0x1c7   : > { %v5369_v57 = vpop.f32.mrb[15].mxu1 }
 0x1cd   : > { %v4472_v4 = vpop.f32.mrb[0].mxu0 }
 0x1ce   : > { %v4504_v44 = vadd.f32 %v4472_v4, %v4302_v42  ;;  %v3177_v28 = vpop.f32.mrb[1].mxu0 }
 0x1cf   : > { %v4505_v36 = vadd.f32 %v3177_v28, %v1386_v22  ;;  %v4473_v29 = vpop.f32.mrb[2].mxu0 }
 0x1d0   : > { %v3345_v54 = vadd.f32 %v4504_v44, %v5374_v62  ;;  %v4506_v9 = vadd.f32 %v4473_v29, %v4303_v43  ;;  %v3180_v60 = vpop.f32.mrb[3].mxu0 }
 0x1d1   : > { %v3343_v15 = vadd.f32 %v4505_v36, %v5374_v62  ;;  %v4507_v10 = vadd.f32 %v3180_v60, %v1389_v45 }
 0x1d2   : > { %v3377_v17 = vmax.f32 %v3345_v54, 0.0  ;;  %v3346_v13 = vadd.f32 %v4506_v9, %v5374_v62 }
 0x1d3   : > { %v3375_v14 = vmax.f32 %v3343_v15, 0.0  ;;  %v3344_v16 = vadd.f32 %v4507_v10, %v5374_v62 }
 0x1d4   : > { %v4013_v35 = vpack.c.bf16 %v3377_v17, %v3377_v17  ;;  %v3378_v5 = vmax.f32 %v3346_v13, 0.0 }
 0x1d5   : > { %v4011_v31 = vpack.c.bf16 %v3375_v14, %v3375_v14  ;;  %v3376_v3 = vmax.f32 %v3344_v16, 0.0  ;;  %v4476_v18 = vpop.f32.mrb[4].mxu0 }
 0x1d6   : > { %3538 = vst.msk [vmem:[%s5383_s16 + $0x8] sm:$0xf] %vm3535_vm3, %v4013_v35  ;;  %v4014_v51 = vpack.c.bf16 %v3378_v5, %v3378_v5  ;;  %v4508_v52 = vadd.f32 %v4476_v18, %v4306_v24  ;;  %v3193_v61 = vpop.f32.mrb[5].mxu0 }
 0x1d7   : > { %3536 = vst.msk [vmem:[%s5383_s16] sm:$0xf] %vm3535_vm3, %v4011_v31  ;;  %v4012_v20 = vpack.c.bf16 %v3376_v3, %v3376_v3  ;;  %v4509_v32 = vadd.f32 %v3193_v61, %v1402_v46  ;;  %v4477_v63 = vpop.f32.mrb[6].mxu0 }
 0x1d8   : > { %3539 = vst.msk [vmem:[%s5383_s16 + $0xc] sm:$0xf] %vm3535_vm3, %v4014_v51  ;;  %v3349_v6 = vadd.f32 %v4508_v52, %v5374_v62  ;;  %v4510_v21 = vadd.f32 %v4477_v63, %v4307_v38  ;;  %v3196_v23 = vpop.f32.mrb[7].mxu0 }
 0x1d9   : > { %3537 = vst.msk [vmem:[%s5383_s16 + $0x4] sm:$0xf] %vm3535_vm3, %v4012_v20  ;;  %v3347_v27 = vadd.f32 %v4509_v32, %v5374_v62  ;;  %v4511_v11 = vadd.f32 %v3196_v23, %v1405_v47 }
 0x1da   : > { %v3381_v55 = vmax.f32 %v3349_v6, 0.0  ;;  %v3350_v56 = vadd.f32 %v4510_v21, %v5374_v62 }
 0x1db   : > { %v3379_v25 = vmax.f32 %v3347_v27, 0.0  ;;  %v3348_v26 = vadd.f32 %v4511_v11, %v5374_v62 }
 0x1dc   : > { %v4017_v12 = vpack.c.bf16 %v3381_v55, %v3381_v55  ;;  %v3382_v50 = vmax.f32 %v3350_v56, 0.0 }
 0x1dd   : > { %v4015_v19 = vpack.c.bf16 %v3379_v25, %v3379_v25  ;;  %v3380_v33 = vmax.f32 %v3348_v26, 0.0  ;;  %v4480_v7 = vpop.f32.mrb[8].mxu0 }
 0x1de   : > { %3542 = vst.msk [vmem:[%s5383_s16 + $0x18] sm:$0xf] %vm3535_vm3, %v4017_v12  ;;  %v4018_v30 = vpack.c.bf16 %v3382_v50, %v3382_v50  ;;  %v4512_v48 = vadd.f32 %v4480_v7, %v4310_v40  ;;  %v3209_v34 = vpop.f32.mrb[9].mxu0 }
 0x1df   : > { %3540 = vst.msk [vmem:[%s5383_s16 + $0x10] sm:$0xf] %vm3535_vm3, %v4015_v19  ;;  %v4016_v39 = vpack.c.bf16 %v3380_v33, %v3380_v33  ;;  %v4513_v58 = vadd.f32 %v3209_v34, %v1418_v49  ;;  %v4481_v59 = vpop.f32.mrb[10].mxu0 }
 0x1e0   : > { %3543 = vst.msk [vmem:[%s5383_s16 + $0x1c] sm:$0xf] %vm3535_vm3, %v4018_v30  ;;  %v3353_v8 = vadd.f32 %v4512_v48, %v5374_v62  ;;  %v4514_v37 = vadd.f32 %v4481_v59, %v5359_v41  ;;  %v3212_v42 = vpop.f32.mrb[11].mxu0 }
 0x1e1   : > { %3541 = vst.msk [vmem:[%s5383_s16 + $0x14] sm:$0xf] %vm3535_vm3, %v4016_v39  ;;  %v3351_v22 = vadd.f32 %v4513_v58, %v5374_v62  ;;  %v4515_v43 = vadd.f32 %v3212_v42, %v5361_v53 }
 0x1e2   : > { %v3385_v45 = vmax.f32 %v3353_v8, 0.0  ;;  %v3354_v24 = vadd.f32 %v4514_v37, %v5374_v62 }
 0x1e3   : > { %v3383_v46 = vmax.f32 %v3351_v22, 0.0  ;;  %v3352_v38 = vadd.f32 %v4515_v43, %v5374_v62 }
 0x1e4   : > { %v4021_v47 = vpack.c.bf16 %v3385_v45, %v3385_v45  ;;  %v3386_v40 = vmax.f32 %v3354_v24, 0.0 }
 0x1e5   : > { %v4019_v49 = vpack.c.bf16 %v3383_v46, %v3383_v46  ;;  %v3384_v41 = vmax.f32 %v3352_v38, 0.0  ;;  %v4484_v4 = vpop.f32.mrb[12].mxu0 }
 0x1e6   : > { %3546 = vst.msk [vmem:[%s5383_s16 + $0x28] sm:$0xf] %vm3535_vm3, %v4021_v47  ;;  %v4022_v44 = vpack.c.bf16 %v3386_v40, %v3386_v40  ;;  %v4516_v28 = vadd.f32 %v4484_v4, %v5363_v1  ;;  %v3225_v36 = vpop.f32.mrb[13].mxu0 }
 0x1e7   : > { %3544 = vst.msk [vmem:[%s5383_s16 + $0x20] sm:$0xf] %vm3535_vm3, %v4019_v49  ;;  %v4020_v53 = vpack.c.bf16 %v3384_v41, %v3384_v41  ;;  %v4517_v29 = vadd.f32 %v3225_v36, %v5365_v0  ;;  %v4485_v54 = vpop.f32.mrb[14].mxu0 }
 0x1e8   : > { %3547 = vst.msk [vmem:[%s5383_s16 + $0x2c] sm:$0xf] %vm3535_vm3, %v4022_v44  ;;  %v3357_v9 = vadd.f32 %v4516_v28, %v5374_v62  ;;  %v4518_v60 = vadd.f32 %v4485_v54, %v5367_v2  ;;  %v3228_v15 = vpop.f32.mrb[15].mxu0 }
 0x1e9   : > { %3545 = vst.msk [vmem:[%s5383_s16 + $0x24] sm:$0xf] %vm3535_vm3, %v4020_v53  ;;  %v3355_v10 = vadd.f32 %v4517_v29, %v5374_v62  ;;  %v4519_v1 = vadd.f32 %v3228_v15, %v5369_v57 }
 0x1ea   : > { %v3389_v17 = vmax.f32 %v3357_v9, 0.0  ;;  %v3358_v13 = vadd.f32 %v4518_v60, %v5374_v62 }
 0x1eb   : > { %v3387_v0 = vmax.f32 %v3355_v10, 0.0  ;;  %v3356_v14 = vadd.f32 %v4519_v1, %v5374_v62 }
 0x1ec   : > { %v4025_v16 = vpack.c.bf16 %v3389_v17, %v3389_v17  ;;  %v3390_v35 = vmax.f32 %v3358_v13, 0.0  ;;  %v4352_v5 = vpop.f32.mrb[16].mxu1 }
 0x1ed   : > { %v4023_v2 = vpack.c.bf16 %v3387_v0, %v3387_v0  ;;  %v3388_v31 = vmax.f32 %v3356_v14, 0.0  ;;  %v4488_v3 = vpop.f32.mrb[16].mxu0  ;;  %v1808_v18 = vpop.f32.mrb[17].mxu1 }
 0x1ee   : > { %3550 = vst.msk [vmem:[%s5383_s16 + $0x38] sm:$0xf] %vm3535_vm3, %v4025_v16  ;;  %v4026_v51 = vpack.c.bf16 %v3390_v35, %v3390_v35  ;;  %v4520_v57 = vadd.f32 %v4488_v3, %v4352_v5  ;;  %v3241_v52 = vpop.f32.mrb[17].mxu0  ;;  %v4353_v61 = vpop.f32.mrb[18].mxu1 }
 0x1ef   : > { %3548 = vst.msk [vmem:[%s5383_s16 + $0x30] sm:$0xf] %vm3535_vm3, %v4023_v2  ;;  %v4024_v20 = vpack.c.bf16 %v3388_v31, %v3388_v31  ;;  %v4521_v32 = vadd.f32 %v3241_v52, %v1808_v18  ;;  %v4489_v63 = vpop.f32.mrb[18].mxu0  ;;  %v1811_v6 = vpop.f32.mrb[19].mxu1 }
 0x1f0   : > { %3551 = vst.msk [vmem:[%s5383_s16 + $0x3c] sm:$0xf] %vm3535_vm3, %v4026_v51  ;;  %v3361_v21 = vadd.f32 %v4520_v57, %v5374_v62  ;;  %v4522_v23 = vadd.f32 %v4489_v63, %v4353_v61  ;;  %v3244_v27 = vpop.f32.mrb[19].mxu0 }
 0x1f1   : > { %3549 = vst.msk [vmem:[%s5383_s16 + $0x34] sm:$0xf] %vm3535_vm3, %v4024_v20  ;;  %v3359_v11 = vadd.f32 %v4521_v32, %v5374_v62  ;;  %v4523_v55 = vadd.f32 %v3244_v27, %v1811_v6 }
 0x1f2   : > { %v3393_v56 = vmax.f32 %v3361_v21, 0.0  ;;  %v3362_v25 = vadd.f32 %v4522_v23, %v5374_v62 }
 0x1f3   : > { %v3391_v26 = vmax.f32 %v3359_v11, 0.0  ;;  %v3360_v12 = vadd.f32 %v4523_v55, %v5374_v62 }
 0x1f4   : > { %v4029_v50 = vpack.c.bf16 %v3393_v56, %v3393_v56  ;;  %v3394_v19 = vmax.f32 %v3362_v25, 0.0  ;;  %v4356_v33 = vpop.f32.mrb[20].mxu1 }
 0x1f5   : > { %v4027_v7 = vpack.c.bf16 %v3391_v26, %v3391_v26  ;;  %v3392_v30 = vmax.f32 %v3360_v12, 0.0  ;;  %v4492_v48 = vpop.f32.mrb[20].mxu0  ;;  %v1824_v34 = vpop.f32.mrb[21].mxu1 }
 0x1f6   : > { %3554 = vst.msk [vmem:[%s5383_s16 + $0x48] sm:$0xf] %vm3535_vm3, %v4029_v50  ;;  %v4030_v39 = vpack.c.bf16 %v3394_v19, %v3394_v19  ;;  %v4524_v58 = vadd.f32 %v4492_v48, %v4356_v33  ;;  %v3257_v59 = vpop.f32.mrb[21].mxu0  ;;  %v4357_v8 = vpop.f32.mrb[22].mxu1 }
 0x1f7   : > { %3552 = vst.msk [vmem:[%s5383_s16 + $0x40] sm:$0xf] %vm3535_vm3, %v4027_v7  ;;  %v4028_v37 = vpack.c.bf16 %v3392_v30, %v3392_v30  ;;  %v4525_v42 = vadd.f32 %v3257_v59, %v1824_v34  ;;  %v4493_v22 = vpop.f32.mrb[22].mxu0  ;;  %v1827_v43 = vpop.f32.mrb[23].mxu1 }
 0x1f8   : > { %3555 = vst.msk [vmem:[%s5383_s16 + $0x4c] sm:$0xf] %vm3535_vm3, %v4030_v39  ;;  %v3365_v45 = vadd.f32 %v4524_v58, %v5374_v62  ;;  %v4526_v24 = vadd.f32 %v4493_v22, %v4357_v8  ;;  %v3260_v46 = vpop.f32.mrb[23].mxu0 }
 0x1f9   : > { %3553 = vst.msk [vmem:[%s5383_s16 + $0x44] sm:$0xf] %vm3535_vm3, %v4028_v37  ;;  %v3363_v38 = vadd.f32 %v4525_v42, %v5374_v62  ;;  %v4527_v47 = vadd.f32 %v3260_v46, %v1827_v43 }
 0x1fa   : > { %v3397_v40 = vmax.f32 %v3365_v45, 0.0  ;;  %v3366_v49 = vadd.f32 %v4526_v24, %v5374_v62 }
 0x1fb   : > { %v3395_v41 = vmax.f32 %v3363_v38, 0.0  ;;  %v3364_v4 = vadd.f32 %v4527_v47, %v5374_v62 }
 0x1fc   : > { %v4033_v44 = vpack.c.bf16 %v3397_v40, %v3397_v40  ;;  %v3398_v28 = vmax.f32 %v3366_v49, 0.0  ;;  %v4360_v36 = vpop.f32.mrb[24].mxu1 }
 0x1fd   : > { %v4031_v53 = vpack.c.bf16 %v3395_v41, %v3395_v41  ;;  %v3396_v29 = vmax.f32 %v3364_v4, 0.0  ;;  %v4496_v54 = vpop.f32.mrb[24].mxu0  ;;  %v1840_v9 = vpop.f32.mrb[25].mxu1 }
 0x1fe   : > { %3558 = vst.msk [vmem:[%s5383_s16 + $0x58] sm:$0xf] %vm3535_vm3, %v4033_v44  ;;  %v4034_v60 = vpack.c.bf16 %v3398_v28, %v3398_v28  ;;  %v4528_v15 = vadd.f32 %v4496_v54, %v4360_v36  ;;  %v3273_v10 = vpop.f32.mrb[25].mxu0  ;;  %v4361_v1 = vpop.f32.mrb[26].mxu1 }
 0x1ff   : > { %3556 = vst.msk [vmem:[%s5383_s16 + $0x50] sm:$0xf] %vm3535_vm3, %v4031_v53  ;;  %v4032_v17 = vpack.c.bf16 %v3396_v29, %v3396_v29  ;;  %v4529_v13 = vadd.f32 %v3273_v10, %v1840_v9  ;;  %v4497_v0 = vpop.f32.mrb[26].mxu0  ;;  %v1843_v14 = vpop.f32.mrb[27].mxu1 }
 0x200   : > { %3559 = vst.msk [vmem:[%s5383_s16 + $0x5c] sm:$0xf] %vm3535_vm3, %v4034_v60  ;;  %v3369_v16 = vadd.f32 %v4528_v15, %v5374_v62  ;;  %v4530_v35 = vadd.f32 %v4497_v0, %v4361_v1  ;;  %v3276_v5 = vpop.f32.mrb[27].mxu0 }
 0x201   : > { %3557 = vst.msk [vmem:[%s5383_s16 + $0x54] sm:$0xf] %vm3535_vm3, %v4032_v17  ;;  %v3367_v2 = vadd.f32 %v4529_v13, %v5374_v62  ;;  %v4531_v31 = vadd.f32 %v3276_v5, %v1843_v14 }
 0x202   : > { %v3401_v3 = vmax.f32 %v3369_v16, 0.0  ;;  %v3370_v18 = vadd.f32 %v4530_v35, %v5374_v62 }
 0x203   : > { %v3399_v51 = vmax.f32 %v3367_v2, 0.0  ;;  %v3368_v57 = vadd.f32 %v4531_v31, %v5374_v62 }
 0x204   : > { %v4037_v52 = vpack.c.bf16 %v3401_v3, %v3401_v3  ;;  %v3402_v61 = vmax.f32 %v3370_v18, 0.0  ;;  %v4364_v20 = vpop.f32.mrb[28].mxu1 }
 0x205   : > { %v4035_v32 = vpack.c.bf16 %v3399_v51, %v3399_v51  ;;  %v3400_v63 = vmax.f32 %v3368_v57, 0.0  ;;  %v4500_v6 = vpop.f32.mrb[28].mxu0  ;;  %v1856_v21 = vpop.f32.mrb[29].mxu1 }
 0x206   : > { %3562 = vst.msk [vmem:[%s5383_s16 + $0x68] sm:$0xf] %vm3535_vm3, %v4037_v52  ;;  %v4038_v23 = vpack.c.bf16 %v3402_v61, %v3402_v61  ;;  %v4532_v27 = vadd.f32 %v4500_v6, %v4364_v20  ;;  %v3289_v11 = vpop.f32.mrb[29].mxu0  ;;  %v4365_v55 = vpop.f32.mrb[30].mxu1 }
 0x207   : > { %3560 = vst.msk [vmem:[%s5383_s16 + $0x60] sm:$0xf] %vm3535_vm3, %v4035_v32  ;;  %v4036_v56 = vpack.c.bf16 %v3400_v63, %v3400_v63  ;;  %v4533_v25 = vadd.f32 %v3289_v11, %v1856_v21  ;;  %v4501_v26 = vpop.f32.mrb[30].mxu0  ;;  %v1859_v12 = vpop.f32.mrb[31].mxu1 }
 0x208   : > { %3563 = vst.msk [vmem:[%s5383_s16 + $0x6c] sm:$0xf] %vm3535_vm3, %v4038_v23  ;;  %v3373_v50 = vadd.f32 %v4532_v27, %v5374_v62  ;;  %v4534_v19 = vadd.f32 %v4501_v26, %v4365_v55  ;;  %v3292_v33 = vpop.f32.mrb[31].mxu0 }
 0x209   : > { %3561 = vst.msk [vmem:[%s5383_s16 + $0x64] sm:$0xf] %vm3535_vm3, %v4036_v56  ;;  %v3371_v7 = vadd.f32 %v4533_v25, %v5374_v62  ;;  %v4535_v30 = vadd.f32 %v3292_v33, %v1859_v12 }
 0x20a   : > { %v3405_v48 = vmax.f32 %v3373_v50, 0.0  ;;  %v3374_v34 = vadd.f32 %v4534_v19, %v5374_v62 }
 0x20b   : > { %v3403_v39 = vmax.f32 %v3371_v7, 0.0  ;;  %v3372_v58 = vadd.f32 %v4535_v30, %v5374_v62 }
 0x20c   : > { %v4041_v59 = vpack.c.bf16 %v3405_v48, %v3405_v48  ;;  %v3406_v8 = vmax.f32 %v3374_v34, 0.0 }
 0x20d   : > { %v4039_v37 = vpack.c.bf16 %v3403_v39, %v3403_v39  ;;  %v3404_v42 = vmax.f32 %v3372_v58, 0.0 }
 0x20e   : > { %3566 = vst.msk [vmem:[%s5383_s16 + $0x78] sm:$0xf] %vm3535_vm3, %v4041_v59  ;;  %v4042_v22 = vpack.c.bf16 %v3406_v8, %v3406_v8 }
 0x20f   : > { %3564 = vst.msk [vmem:[%s5383_s16 + $0x70] sm:$0xf] %vm3535_vm3, %v4039_v37  ;;  %v4040_v43 = vpack.c.bf16 %v3404_v42, %v3404_v42 }
 0x210   : > { %3567 = vst.msk [vmem:[%s5383_s16 + $0x7c] sm:$0xf] %vm3535_vm3, %v4042_v22 }
 0x211   : > { %3565 = vst.msk [vmem:[%s5383_s16 + $0x74] sm:$0xf] %vm3535_vm3, %v4040_v43 }
 0x212 PF: > { %s13_s12 = sadd.s32 1, %s4776_s12  }
 0x213   : > { %p10_p4 = scmp.ge.s32.totalorder %s13_s12, 6  }
 0x215   :  { %12 = sbr.rel (!%p10_p4) target bundleno = 1 (0x1), region = 72 }

// kernel: resnet_pl_loss.10
= control target key start
LH: loop header
LB: loop body
LE: loop exit
PB: predicated region body
PF: predicated region fallthrough
CT: control target
= control target key end

     0   :  { %s6552_s12 = smov 0   ;;  %s8370_s0 = inlined_call_operand.vmem [shape: bf16[4,1,18,18,16], index: 0, kind: input, shape index: {}]   ;;  %s8371_s1 = inlined_call_operand.vmem [shape: bf16[9,16,16], index: 1, kind: input, shape index: {}]   ;;  %s8372_s2 = inlined_call_operand.vmem [shape: f32[1,16], index: 2, kind: input, shape index: {}]   ;;  %s8373_s3 = inlined_call_operand.vmem [shape: bf16[4,256,16], index: 3, kind: output, shape index: {}]  }
   0x1 LB: > { %s5053_s13 = sadd.s32 4294967295, %s6530_s12   ;;  %p5057_p0 = scmp.ge.s32.totalorder %s6530_s12, 1  ;;  %s6530_s12 = sphi %s6552_s12, %s13_s12  }
   0x2   : > { %p137_p1 = scmp.lt.s32.totalorder %s6530_s12, 5 }
   0x4   : > { %p138_p2 = pnand %p5057_p0, %p137_p1 }
   0x6   : > { %141 = sbr.rel (%p138_p2) target bundleno = 589 (0x24d), region = 32 }
   0xd   : > { %v6408_v0 = vld [vmem:[%s8371_s1 + $0x8] sm:$0xff]   ;;  %p161_p3 = scmp.lt.s32.totalorder %s5053_s13, 3  ;;  %v6409_v1 = vld [vmem:[%s8371_s1 + $0x20] sm:$0xff]   ;;  %vm222_vm0 = vsmask.f32 3328  ;;  %vm666_vm3 = vcmask 130048  }
   0xe   : > { %5835 = vmatprep.subr.bf16.mxu1 %v6408_v0  ;;  %v6571_v2 = vld [vmem:[%s8371_s1] sm:$0xff]   ;;  %5971 = vmatprep.subr.bf16.mxu0 %v6409_v1  ;;  %v6578_v3 = vld [vmem:[%s8371_s1 + $0x28] sm:$0xff]   ;;  %vm223_vm1 = vsmask.f32 7440  ;;  %vm1219_vm4 = vcmask 1042432   ;;  %vm1220_vm5 = vcmask 1046532  }
   0xf   : > { %s8439_s13 = smov (!%p161_p3, %s5053_s13), 3  ;;  %5836 = vmatpush3.bf16.msra.mxu1 %v6408_v0  ;;  %5972 = vmatpush3.bf16.msra.mxu0 %v6409_v1  ;;  %vm6602_vm2 = vmor %vm222_vm0, %vm223_vm1  ;;  %vm4965_vm7 = vcmask 125952  }
  0x10   : > { %s6399_s20 = smul.u32 216, %s8439_s13  ;;  %5869 = vmatprep.subr.bf16.mxu1 %v6571_v2  ;;  %6005 = vmatprep.subr.bf16.mxu0 %v6578_v3  ;;  %vm6824_vm6 = vmor %vm1219_vm4, %vm1220_vm5  ;;  %s5649_s17 = sshll.u32 %s8439_s13, 7 }
  0x12   : > { %s6583_s25 = scalar_lea.vmem %s8370_s0, %s6399_s20  ;;  %s8266_s20 = scalar_lea.vmem %s8373_s3, %s5649_s17 }
  0x13   : > { %v172_v4 = vld [vmem:[%s6583_s25] sm:$0xf]  ;;  %v173_v5 = vld [vmem:[%s6583_s25 + $0x4] sm:$0xf]  ;;  %v206_v6 = vld [vmem:[%s6583_s25 + $0x8] sm:$0x1] }
  0x14   : > { %v226_v7 = vshrl.u32 %v172_v4, 16  ;;  %v229_v8 = vshll.u32 %v172_v4, 16  ;;  %v235_v9 = vshll.u32 %v173_v5, 16  ;;  %v239_v10 = vshrl.u32 %v173_v5, 16  ;;  %v5247_v11 = vld [vmem:[%s6583_s25 + $0xc] sm:$0xf] }
  0x15   : > { %v245_v12 = vshll.u32 %v206_v6, 16  ;;  %v6591_v13 = vld [vmem:[%s6583_s25 + $0x10] sm:$0xf]  ;;  %v6594_v14 = vld [vmem:[%s6583_s25 + $0x14] sm:$0x1]  ;;  %v2044_v20 = vshrl.u32 %v5247_v11, 16 }
  0x16   : > { %v228_v15 = vrot.slane %v226_v7, 4  ;;  %v231_v16 = vrot.slane %v229_v8, 5  ;;  %v237_v17 = vrot.slane %v235_v9, 5  ;;  %v241_v18 = vrot.slane %v239_v10, 4  ;;  %v174_v27 = vld [vmem:[%s6583_s25 + $0xc] sm:$0xf] }
  0x17   : > { %v247_v19 = vrot.slane %v245_v12, 5  ;;  %v2047_v21 = vshll.u32 %v5247_v11, 16  ;;  %v2053_v22 = vshll.u32 %v6591_v13, 16  ;;  %v2057_v25 = vshrl.u32 %v6591_v13, 16  ;;  %v175_v32 = vld [vmem:[%s6583_s25 + $0x10] sm:$0xf] }
  0x18   : > { %v232_v23 = vor.u32 %v231_v16, %v228_v15  ;;  %v242_v24 = vor.u32 %v241_v18, %v237_v17  ;;  %v2063_v26 = vshll.u32 %v6594_v14, 16  ;;  %v2046_v29 = vrot.slane %v2044_v20, 4  ;;  %v207_v38 = vld [vmem:[%s6583_s25 + $0x14] sm:$0x1]  ;;  %v5250_v49 = vld [vmem:[%s6583_s25 + $0x18] sm:$0xf] }
  0x19   : > { %v2049_v30 = vrot.slane %v2047_v21, 5  ;;  %v2055_v31 = vrot.slane %v2053_v22, 5  ;;  %v2059_v35 = vrot.slane %v2057_v25, 4  ;;  %v250_v39 = vshrl.u32 %v174_v27, 16  ;;  %v6614_v54 = vld [vmem:[%s6583_s25 + $0x1c] sm:$0xf] }
  0x1a   : > { %v233_v33 = vrot.slane %v232_v23, 4  ;;  %v243_v34 = vrot.slane %v242_v24, 4  ;;  %v2065_v37 = vrot.slane %v2063_v26, 5  ;;  %v253_v40 = vshll.u32 %v174_v27, 16  ;;  %v6622_v59 = vld [vmem:[%s6583_s25 + $0x20] sm:$0x1] }
  0x1b   : > { %v2050_v36 = vor.u32 %v2049_v30, %v2046_v29  ;;  %v2060_v43 = vor.u32 %v2059_v35, %v2055_v31  ;;  %v259_v44 = vshll.u32 %v175_v32, 16  ;;  %v252_v47 = vrot.slane %v250_v39, 4  ;;  %v176_v10 = vld [vmem:[%s6583_s25 + $0x18] sm:$0xf]  ;;  %v208_v24 = vld [vmem:[%s6583_s25 + $0x20] sm:$0x1] }
  0x1c   : > { %v238_v41 = vsel %vm6602_vm2, %v233_v33, %v237_v17  ;;  %v248_v42 = vsel %vm6602_vm2, %v243_v34, %v247_v19  ;;  %v255_v48 = vrot.slane %v253_v40, 5  ;;  %v263_v52 = vshrl.u32 %v175_v32, 16  ;;  %v177_v17 = vld [vmem:[%s6583_s25 + $0x1c] sm:$0xf]  ;;  %v5253_v32 = vld [vmem:[%s6583_s25 + $0x24] sm:$0xf] }
  0x1d   : > { %v5063_v45 = vcombine.low %v238_v41, %v248_v42  ;;  %v2051_v46 = vrot.slane %v2050_v36, 4  ;;  %v2061_v50 = vrot.slane %v2060_v43, 4  ;;  %v261_v51 = vrot.slane %v259_v44, 5 }
  0x1e   : > { %v269_v53 = vshll.u32 %v207_v38, 16  ;;  %v2791_v56 = vrot.slane %v6591_v13, 5  ;;  %v2794_v57 = vrot.slane %v6594_v14, 5  ;;  %v256_v58 = vor.u32 %v255_v48, %v252_v47  ;;  %v6414_v38 = vld [vmem:[%s8371_s1 + $0x10] sm:$0xff]   ;;  %v6857_v14 = vld [vmem:[%s6583_s25 + $0x7c] sm:$0xf] }
  0x1f   : > { %5837 = vmatprep.mubr.msk.bf16.mxu1 %vm666_vm3, %v5063_v45  ;;  %v2056_v55 = vsel %vm6602_vm2, %v2051_v46, %v2055_v31  ;;  %v2066_v60 = vsel %vm6602_vm2, %v2061_v50, %v2065_v37  ;;  %v265_v61 = vrot.slane %v263_v52, 4  ;;  %v2068_v63 = vshrl.u32 %v5250_v49, 16  ;;  %v6645_v37 = vld [vmem:[%s6583_s25 + $0x28] sm:$0xf]  ;;  %v6654_v45 = vld [vmem:[%s6583_s25 + $0x2c] sm:$0x1] }
  0x20   : > { %v271_v62 = vrot.slane %v269_v53, 5  ;;  %v5297_v0 = vcombine.low %v2056_v55, %v2066_v60  ;;  %v257_v1 = vrot.slane %v256_v58, 4  ;;  %v2071_v4 = vshll.u32 %v5250_v49, 16  ;;  %v178_v52 = vld [vmem:[%s6583_s25 + $0x24] sm:$0xf] }
  0x21   : > { %v2077_v5 = vshll.u32 %v6614_v54, 16  ;;  %v266_v6 = vor.u32 %v265_v61, %v261_v51  ;;  %v2070_v7 = vrot.slane %v2068_v63, 4  ;;  %v2081_v8 = vshrl.u32 %v6614_v54, 16  ;;  %v179_v61 = vld [vmem:[%s6583_s25 + $0x28] sm:$0xf] }
  0x22   : > { %v2087_v9 = vshll.u32 %v6622_v59, 16  ;;  %5973 = vmatprep.mubr.msk.bf16.mxu0 %vm666_vm3, %v5297_v0  ;;  %v262_v11 = vsel %vm6602_vm2, %v257_v1, %v261_v51  ;;  %v2073_v12 = vrot.slane %v2071_v4, 5  ;;  %v2798_v16 = vrot.slane %v6614_v54, 5 }
  0x23   : > { %v2079_v15 = vrot.slane %v2077_v5, 5  ;;  %v267_v18 = vrot.slane %v266_v6, 4  ;;  %v2083_v19 = vrot.slane %v2081_v8, 4  ;;  %v2801_v21 = vrot.slane %v6622_v59, 5  ;;  %v209_v6 = vld [vmem:[%s6583_s25 + $0x2c] sm:$0x1] }
  0x24   : > { %v2089_v20 = vrot.slane %v2087_v9, 5  ;;  %v2074_v22 = vor.u32 %v2073_v12, %v2070_v7  ;;  %v6638_v23 = vrot.slane %v2798_v16, 4  ;;  %v274_v25 = vshrl.u32 %v176_v10, 16 }
  0x25   : > { %v277_v26 = vshll.u32 %v176_v10, 16  ;;  %v272_v27 = vsel %vm6602_vm2, %v267_v18, %v271_v62  ;;  %v2084_v29 = vor.u32 %v2083_v19, %v2079_v15  ;;  %v283_v30 = vshll.u32 %v177_v17, 16  ;;  %v6665_v62 = vld [vmem:[%s8371_s1 + $0x30] sm:$0xff]  }
  0x26   : > { %v287_v31 = vshrl.u32 %v177_v17, 16  ;;  %v5064_v33 = vcombine.low %v262_v11, %v272_v27  ;;  %v2075_v34 = vrot.slane %v2074_v22, 4  ;;  %v276_v35 = vrot.slane %v274_v25, 4  ;;  %v6678_v22 = vld [vmem:[%s6583_s25 + $0x34] sm:$0xf] }
  0x27   : > { %v279_v36 = vrot.slane %v277_v26, 5  ;;  %v2085_v39 = vrot.slane %v2084_v29, 4  ;;  %v285_v40 = vrot.slane %v283_v30, 5  ;;  %v293_v42 = vshll.u32 %v208_v24, 16  ;;  %v6685_v30 = vld [vmem:[%s6583_s25 + $0x38] sm:$0x1] }
  0x28   : > { %v289_v41 = vrot.slane %v287_v31, 4  ;;  %5838 = vmatmul.mubr.msk.bf16.vlgmr.msra.gmra.mrb[0].mxu1 %vm666_vm3, %v5064_v33  ;;  %v2080_v43 = vsel %vm6602_vm2, %v2075_v34, %v2079_v15  ;;  %v2092_v46 = vshrl.u32 %v5253_v32, 16  ;;  %v2095_v47 = vshll.u32 %v5253_v32, 16  ;;  %v5256_v15 = vld [vmem:[%s6583_s25 + $0x30] sm:$0xf] }
  0x29   : > { %v280_v44 = vor.u32 %v279_v36, %v276_v35  ;;  %5870 = vmatpush3.bf16.msra.mxu1 %v6571_v2  ;;  %v2090_v48 = vsel %vm6602_vm2, %v2085_v39, %v2089_v20  ;;  %v295_v50 = vrot.slane %v293_v42, 5  ;;  %v2101_v51 = vshll.u32 %v6645_v37, 16  ;;  %v180_v42 = vld [vmem:[%s6583_s25 + $0x30] sm:$0xf] }
  0x2a   : > { %v290_v49 = vor.u32 %v289_v41, %v285_v40  ;;  %v5298_v53 = vcombine.low %v2080_v43, %v2090_v48  ;;  %v2094_v58 = vrot.slane %v2092_v46, 4  ;;  %v2097_v60 = vrot.slane %v2095_v47, 5  ;;  %5903 = vmatprep.subr.bf16.mxu1 %v6414_v38  ;;  %v181_v48 = vld [vmem:[%s6583_s25 + $0x34] sm:$0xf] }
  0x2b   : > { %v281_v55 = vrot.slane %v280_v44, 4  ;;  %v2103_v63 = vrot.slane %v2101_v51, 5  ;;  %v2105_v0 = vshrl.u32 %v6645_v37, 16  ;;  %v2111_v1 = vshll.u32 %v6654_v45, 16 }
  0x2c   : > { %v291_v2 = vrot.slane %v290_v49, 4  ;;  %5974 = vmatmul.mubr.msk.bf16.vlgmr.msra.gmra.mrb[0].mxu0 %vm666_vm3, %v5298_v53  ;;  %v2098_v5 = vor.u32 %v2097_v60, %v2094_v58  ;;  %v298_v7 = vshrl.u32 %v178_v52, 16  ;;  %v301_v8 = vshll.u32 %v178_v52, 16  ;;  %v210_v53 = vld [vmem:[%s6583_s25 + $0x38] sm:$0x1] }
  0x2d   : > { %v286_v4 = vsel %vm6602_vm2, %v281_v55, %v285_v40  ;;  %6006 = vmatpush3.bf16.msra.mxu0 %v6578_v3  ;;  %v2107_v10 = vrot.slane %v2105_v0, 4  ;;  %v2113_v11 = vrot.slane %v2111_v1, 5  ;;  %v307_v12 = vshll.u32 %v179_v61, 16 }
  0x2e   : > { %v296_v9 = vsel %vm6602_vm2, %v291_v2, %v295_v50  ;;  %v2099_v18 = vrot.slane %v2098_v5, 4  ;;  %v300_v19 = vrot.slane %v298_v7, 4  ;;  %v303_v20 = vrot.slane %v301_v8, 5  ;;  %6039 = vmatprep.subr.bf16.mxu0 %v6665_v62 }
  0x2f   : > { %v5065_v17 = vcombine.low %v286_v4, %v296_v9  ;;  %v2108_v24 = vor.u32 %v2107_v10, %v2103_v63  ;;  %v309_v25 = vrot.slane %v307_v12, 5  ;;  %v311_v26 = vshrl.u32 %v179_v61, 16  ;;  %v5259_v4 = vld [vmem:[%s6583_s25 + $0x3c] sm:$0xf]  ;;  %v6702_v9 = vld [vmem:[%s6583_s25 + $0x40] sm:$0xf] }
  0x30   : > { %v317_v3 = vshll.u32 %v209_v6, 16  ;;  %v2104_v27 = vsel %vm6602_vm2, %v2099_v18, %v2103_v63  ;;  %v304_v29 = vor.u32 %v303_v20, %v300_v19  ;;  %v2116_v31 = vshrl.u32 %v5256_v15, 16  ;;  %v6707_v20 = vld [vmem:[%s6583_s25 + $0x44] sm:$0x1] }
  0x31   : > { %5841 = vmatprep.mubr.msk.bf16.mxu1 %vm666_vm3, %v5065_v17  ;;  %v2119_v32 = vshll.u32 %v5256_v15, 16  ;;  %v2109_v33 = vrot.slane %v2108_v24, 4  ;;  %v313_v34 = vrot.slane %v311_v26, 4  ;;  %v2125_v36 = vshll.u32 %v6678_v22, 16 }
  0x32   : > { %v319_v35 = vrot.slane %v317_v3, 5  ;;  %v305_v38 = vrot.slane %v304_v29, 4  ;;  %v2118_v39 = vrot.slane %v2116_v31, 4  ;;  %v2129_v41 = vshrl.u32 %v6678_v22, 16  ;;  %v182_v29 = vld [vmem:[%s6583_s25 + $0x3c] sm:$0xf] }
  0x33   : > { %v2121_v40 = vrot.slane %v2119_v32, 5  ;;  %v2114_v43 = vsel %vm6602_vm2, %v2109_v33, %v2113_v11  ;;  %v314_v44 = vor.u32 %v313_v34, %v309_v25  ;;  %v2127_v46 = vrot.slane %v2125_v36, 5 }
  0x34   : > { %v2135_v47 = vshll.u32 %v6685_v30, 16  ;;  %v5299_v49 = vcombine.low %v2104_v27, %v2114_v43  ;;  %v310_v50 = vsel %vm6602_vm2, %v305_v38, %v309_v25  ;;  %v2131_v52 = vrot.slane %v2129_v41, 4 }
  0x35   : > { %v2122_v51 = vor.u32 %v2121_v40, %v2118_v39  ;;  %v315_v55 = vrot.slane %v314_v44, 4  ;;  %v322_v60 = vshrl.u32 %v180_v42, 16  ;;  %v325_v61 = vshll.u32 %v180_v42, 16 }
  0x36   : > { %v2137_v58 = vrot.slane %v2135_v47, 5  ;;  %5977 = vmatprep.mubr.msk.bf16.mxu0 %vm666_vm3, %v5299_v49  ;;  %v2132_v63 = vor.u32 %v2131_v52, %v2127_v46  ;;  %v331_v0 = vshll.u32 %v181_v48, 16  ;;  %v335_v1 = vshrl.u32 %v181_v48, 16  ;;  %v211_v49 = vld [vmem:[%s6583_s25 + $0x44] sm:$0x1] }
  0x37   : > { %v2123_v2 = vrot.slane %v2122_v51, 4  ;;  %v320_v5 = vsel %vm6602_vm2, %v315_v55, %v319_v35  ;;  %v324_v6 = vrot.slane %v322_v60, 4  ;;  %v327_v7 = vrot.slane %v325_v61, 5  ;;  %v183_v35 = vld [vmem:[%s6583_s25 + $0x40] sm:$0xf] }
  0x38   : > { %v341_v8 = vshll.u32 %v210_v53, 16  ;;  %v5066_v10 = vcombine.low %v310_v50, %v320_v5  ;;  %v2133_v12 = vrot.slane %v2132_v63, 4  ;;  %v333_v15 = vrot.slane %v331_v0, 5  ;;  %v5262_v51 = vld [vmem:[%s6583_s25 + $0x48] sm:$0xf] }
  0x39   : > { %v2128_v11 = vsel %vm6602_vm2, %v2123_v2, %v2127_v46  ;;  %v328_v17 = vor.u32 %v327_v7, %v324_v6  ;;  %v337_v18 = vrot.slane %v335_v1, 4  ;;  %v2140_v24 = vshrl.u32 %v5259_v4, 16  ;;  %v6725_v60 = vld [vmem:[%s6583_s25 + $0x4c] sm:$0xf] }
  0x3a   : > { %v343_v19 = vrot.slane %v341_v8, 5  ;;  %5842 = vmatmul.mubr.msk.bf16.gmra.mrb[4].mxu1 %vm666_vm3, %v5066_v10  ;;  %v2138_v25 = vsel %vm6602_vm2, %v2133_v12, %v2137_v58  ;;  %v2143_v26 = vshll.u32 %v5259_v4, 16  ;;  %v2149_v3 = vshll.u32 %v6702_v9, 16  ;;  %v6733_v10 = vld [vmem:[%s6583_s25 + $0x50] sm:$0x1] }
  0x3b   : > { %v2153_v27 = vshrl.u32 %v6702_v9, 16  ;;  %v5300_v31 = vcombine.low %v2128_v11, %v2138_v25  ;;  %v329_v32 = vrot.slane %v328_v17, 4  ;;  %v338_v33 = vor.u32 %v337_v18, %v333_v15  ;;  %v6740_v25 = vld [vmem:[%s6583_s25 + $0x4c] sm:$0xf] }
  0x3c   : > { %v2142_v34 = vrot.slane %v2140_v24, 4  ;;  %v2145_v36 = vrot.slane %v2143_v26, 5  ;;  %v2151_v38 = vrot.slane %v2149_v3, 5  ;;  %v2159_v40 = vshll.u32 %v6707_v20, 16 }
  0x3d   : > { %v2155_v39 = vrot.slane %v2153_v27, 4  ;;  %5978 = vmatmul.mubr.msk.bf16.gmra.mrb[4].mxu0 %vm666_vm3, %v5300_v31  ;;  %v334_v41 = vsel %vm6602_vm2, %v329_v32, %v333_v15  ;;  %v339_v42 = vrot.slane %v338_v33, 4  ;;  %v346_v43 = vshrl.u32 %v182_v29, 16  ;;  %v6737_v15 = vld [vmem:[%s6583_s25 + $0x48] sm:$0xf] }
  0x3e   : > { %v349_v44 = vshll.u32 %v182_v29, 16  ;;  %v2146_v46 = vor.u32 %v2145_v36, %v2142_v34  ;;  %v2161_v48 = vrot.slane %v2159_v40, 5  ;;  %v355_v50 = vshll.u32 %v183_v35, 16  ;;  %v212_v34 = vld [vmem:[%s6583_s25 + $0x50] sm:$0x1] }
  0x3f   : > { %v2156_v47 = vor.u32 %v2155_v39, %v2151_v38  ;;  %v344_v52 = vsel %vm6602_vm2, %v339_v42, %v343_v19  ;;  %v348_v53 = vrot.slane %v346_v43, 4  ;;  %v359_v58 = vshrl.u32 %v183_v35, 16 }
  0x40   : > { %v351_v55 = vrot.slane %v349_v44, 5  ;;  %v5067_v61 = vcombine.low %v334_v41, %v344_v52  ;;  %v2147_v2 = vrot.slane %v2146_v46, 4  ;;  %v357_v0 = vrot.slane %v355_v50, 5  ;;  %v5265_v41 = vld [vmem:[%s6583_s25 + $0x54] sm:$0xf] }
  0x41   : > { %v2157_v63 = vrot.slane %v2156_v47, 4  ;;  %v361_v4 = vrot.slane %v359_v58, 4  ;;  %v365_v5 = vshll.u32 %v211_v49, 16  ;;  %v2164_v6 = vshrl.u32 %v5262_v51, 16 }
  0x42   : > { %v352_v1 = vor.u32 %v351_v55, %v348_v53  ;;  %5845 = vmatprep.mubr.msk.bf16.mxu1 %vm666_vm3, %v5067_v61  ;;  %v2152_v7 = vsel %vm6602_vm2, %v2147_v2, %v2151_v38  ;;  %v2167_v11 = vshll.u32 %v5262_v51, 16  ;;  %v2173_v12 = vshll.u32 %v6725_v60, 16  ;;  %v6756_v51 = vld [vmem:[%s6583_s25 + $0x58] sm:$0xf] }
  0x43   : > { %v2162_v8 = vsel %vm6602_vm2, %v2157_v63, %v2161_v48  ;;  %v362_v19 = vor.u32 %v361_v4, %v357_v0  ;;  %v367_v24 = vrot.slane %v365_v5, 5  ;;  %v2166_v26 = vrot.slane %v2164_v6, 4 }
  0x44   : > { %v5301_v17 = vcombine.low %v2152_v7, %v2162_v8  ;;  %v353_v18 = vrot.slane %v352_v1, 4  ;;  %v2169_v3 = vrot.slane %v2167_v11, 5  ;;  %v2175_v27 = vrot.slane %v2173_v12, 5  ;;  %v6766_v8 = vld [vmem:[%s6583_s25 + $0x54] sm:$0xf] }
  0x45   : > { %v2177_v29 = vshrl.u32 %v6725_v60, 16  ;;  %v363_v32 = vrot.slane %v362_v19, 4  ;;  %v2183_v33 = vshll.u32 %v6733_v10, 16  ;;  %v370_v35 = vshrl.u32 %v6737_v15, 16  ;;  %v6772_v19 = vld [vmem:[%s6583_s25 + $0x58] sm:$0xf] }
  0x46   : > { %5981 = vmatprep.mubr.msk.bf16.mxu0 %vm666_vm3, %v5301_v17  ;;  %v358_v31 = vsel %vm6602_vm2, %v353_v18, %v357_v0  ;;  %v2170_v36 = vor.u32 %v2169_v3, %v2166_v26  ;;  %v373_v39 = vshll.u32 %v6737_v15, 16  ;;  %v379_v40 = vshll.u32 %v6740_v25, 16  ;;  %v6762_v0 = vld [vmem:[%s6583_s25 + $0x5c] sm:$0x1] }
  0x47   : > { %v2179_v38 = vrot.slane %v2177_v29, 4  ;;  %v368_v42 = vsel %vm6602_vm2, %v363_v32, %v367_v24  ;;  %v2185_v43 = vrot.slane %v2183_v33, 5  ;;  %v372_v44 = vrot.slane %v370_v35, 4  ;;  %v213_v33 = vld [vmem:[%s6583_s25 + $0x5c] sm:$0x1] }
  0x48   : > { %v383_v46 = vshrl.u32 %v6740_v25, 16  ;;  %v5068_v47 = vcombine.low %v358_v31, %v368_v42  ;;  %v2171_v48 = vrot.slane %v2170_v36, 4  ;;  %v375_v50 = vrot.slane %v373_v39, 5 }
  0x49   : > { %v2180_v49 = vor.u32 %v2179_v38, %v2175_v27  ;;  %v381_v52 = vrot.slane %v379_v40, 5  ;;  %v389_v55 = vshll.u32 %v212_v34, 16  ;;  %v2188_v58 = vshrl.u32 %v5265_v41, 16  ;;  %v5268_v40 = vld [vmem:[%s6583_s25 + $0x60] sm:$0xf] }
  0x4a   : > { %v385_v53 = vrot.slane %v383_v46, 4  ;;  %5846 = vmatmul.mubr.msk.bf16.gmra.mrb[8].mxu1 %vm666_vm3, %v5068_v47  ;;  %v2176_v61 = vsel %vm6602_vm2, %v2171_v48, %v2175_v27  ;;  %v376_v63 = vor.u32 %v375_v50, %v372_v44  ;;  %v2191_v1 = vshll.u32 %v5265_v41, 16  ;;  %v6786_v46 = vld [vmem:[%s6583_s25 + $0x64] sm:$0xf] }
  0x4b   : > { %v2181_v2 = vrot.slane %v2180_v49, 4  ;;  %v391_v5 = vrot.slane %v389_v55, 5  ;;  %v2190_v6 = vrot.slane %v2188_v58, 4  ;;  %v2197_v7 = vshll.u32 %v6756_v51, 16  ;;  %v6793_v55 = vld [vmem:[%s6583_s25 + $0x68] sm:$0x1] }
  0x4c   : > { %v386_v4 = vor.u32 %v385_v53, %v381_v52  ;;  %v377_v12 = vrot.slane %v376_v63, 4  ;;  %v2193_v17 = vrot.slane %v2191_v1, 5  ;;  %v2201_v18 = vshrl.u32 %v6756_v51, 16 }
  0x4d   : > { %v2186_v11 = vsel %vm6602_vm2, %v2181_v2, %v2185_v43  ;;  %v2199_v3 = vrot.slane %v2197_v7, 5  ;;  %v2207_v27 = vshll.u32 %v6762_v0, 16  ;;  %v394_v34 = vshrl.u32 %v6766_v8, 16 }
  0x4e   : > { %v5302_v24 = vcombine.low %v2176_v61, %v2186_v11  ;;  %v387_v26 = vrot.slane %v386_v4, 4  ;;  %v382_v29 = vsel %vm6602_vm2, %v377_v12, %v381_v52  ;;  %v2194_v31 = vor.u32 %v2193_v17, %v2190_v6  ;;  %v6803_v17 = vld [vmem:[%s6583_s25 + $0x64] sm:$0xf] }
  0x4f   : > { %v2203_v32 = vrot.slane %v2201_v18, 4  ;;  %v2209_v36 = vrot.slane %v2207_v27, 5  ;;  %v397_v38 = vshll.u32 %v6766_v8, 16  ;;  %v403_v39 = vshll.u32 %v6772_v19, 16 }
  0x50   : > { %5982 = vmatmul.mubr.msk.bf16.gmra.mrb[8].mxu0 %vm666_vm3, %v5302_v24  ;;  %v392_v35 = vsel %vm6602_vm2, %v387_v26, %v391_v5  ;;  %v2195_v42 = vrot.slane %v2194_v31, 4  ;;  %v396_v44 = vrot.slane %v394_v34, 4  ;;  %v407_v49 = vshrl.u32 %v6772_v19, 16  ;;  %v6797_v5 = vld [vmem:[%s6583_s25 + $0x60] sm:$0xf] }
  0x51   : > { %v5069_v41 = vcombine.low %v382_v29, %v392_v35  ;;  %v2204_v43 = vor.u32 %v2203_v32, %v2199_v3  ;;  %v399_v47 = vrot.slane %v397_v38, 5  ;;  %v405_v48 = vrot.slane %v403_v39, 5  ;;  %v214_v35 = vld [vmem:[%s6583_s25 + $0x68] sm:$0x1] }
  0x52   : > { %v413_v50 = vshll.u32 %v213_v33, 16  ;;  %v2200_v52 = vsel %vm6602_vm2, %v2195_v42, %v2199_v3  ;;  %v2212_v58 = vshrl.u32 %v5268_v40, 16  ;;  %v2215_v61 = vshll.u32 %v5268_v40, 16 }
  0x53   : > { %5849 = vmatprep.mubr.msk.bf16.mxu1 %vm666_vm3, %v5069_v41  ;;  %v2205_v53 = vrot.slane %v2204_v43, 4  ;;  %v400_v2 = vor.u32 %v399_v47, %v396_v44  ;;  %v409_v63 = vrot.slane %v407_v49, 4  ;;  %v2221_v4 = vshll.u32 %v6786_v46, 16  ;;  %v5330_v43 = vld [vmem:[%s6583_s25 + $0xc] sm:$0xe] }
  0x54   : > { %v415_v1 = vrot.slane %v413_v50, 5  ;;  %v2214_v7 = vrot.slane %v2212_v58, 4  ;;  %v2217_v11 = vrot.slane %v2215_v61, 5  ;;  %v2225_v12 = vshrl.u32 %v6786_v46, 16 }
  0x55   : > { %v2210_v6 = vsel %vm6602_vm2, %v2205_v53, %v2209_v36  ;;  %v401_v24 = vrot.slane %v400_v2, 4  ;;  %v410_v26 = vor.u32 %v409_v63, %v405_v48  ;;  %v2223_v3 = vrot.slane %v2221_v4, 5 }
  0x56   : > { %v5303_v18 = vcombine.low %v2200_v52, %v2210_v6  ;;  %v2218_v27 = vor.u32 %v2217_v11, %v2214_v7  ;;  %v2227_v29 = vrot.slane %v2225_v12, 4  ;;  %v2231_v31 = vshll.u32 %v6793_v55, 16  ;;  %v6831_v7 = vld [vmem:[%s6583_s25 + $0x70] sm:$0xf] }
  0x57   : > { %v418_v32 = vshrl.u32 %v6797_v5, 16  ;;  %v406_v33 = vsel %vm6602_vm2, %v401_v24, %v405_v48  ;;  %v411_v34 = vrot.slane %v410_v26, 4  ;;  %v421_v36 = vshll.u32 %v6797_v5, 16  ;;  %v6818_v48 = vld [vmem:[%s6583_s25 + $0x6c] sm:$0xf] }
  0x58   : > { %5985 = vmatprep.mubr.msk.bf16.mxu0 %vm666_vm3, %v5303_v18  ;;  %v427_v38 = vshll.u32 %v6803_v17, 16  ;;  %v2219_v39 = vrot.slane %v2218_v27, 4  ;;  %v2228_v40 = vor.u32 %v2227_v29, %v2223_v3  ;;  %v2233_v41 = vrot.slane %v2231_v31, 5  ;;  %v215_v31 = vld [vmem:[%s6583_s25 + $0x74] sm:$0x1] }
  0x59   : > { %v420_v42 = vrot.slane %v418_v32, 4  ;;  %v416_v44 = vsel %vm6602_vm2, %v411_v34, %v415_v1  ;;  %v423_v47 = vrot.slane %v421_v36, 5  ;;  %v431_v50 = vshrl.u32 %v6803_v17, 16  ;;  %v5331_v32 = vld [vmem:[%s6583_s25 + $0x18] sm:$0xe] }
  0x5a   : > { %v429_v49 = vrot.slane %v427_v38, 5  ;;  %v5070_v52 = vcombine.low %v406_v33, %v416_v44  ;;  %v2224_v53 = vsel %vm6602_vm2, %v2219_v39, %v2223_v3  ;;  %v2229_v58 = vrot.slane %v2228_v40, 4  ;;  %v6850_v38 = vld [vmem:[%s6583_s25 + $0x78] sm:$0xf] }
  0x5b   : > { %v437_v61 = vshll.u32 %v214_v35, 16  ;;  %v424_v63 = vor.u32 %v423_v47, %v420_v42  ;;  %v433_v1 = vrot.slane %v431_v50, 4  ;;  %v5346_v4 = vrot.slane %v5330_v43, 9  ;;  %v5332_v47 = vld [vmem:[%s6583_s25 + $0x24] sm:$0xe] }
  0x5c   : > { %v2793_v6 = vrot.slane %v2791_v56, 4  ;;  %5850 = vmatmul.mubr.msk.bf16.gmra.mrb[12].mxu1 %vm666_vm3, %v5070_v52  ;;  %v2234_v11 = vsel %vm6602_vm2, %v2229_v58, %v2233_v41  ;;  %v442_v18 = vshrl.u32 %v6818_v48, 16  ;;  %v445_v24 = vshll.u32 %v6818_v48, 16  ;;  %v216_v41 = vld [vmem:[%s6583_s25 + $0x80] sm:$0x1] }
  0x5d   : > { %v439_v12 = vrot.slane %v437_v61, 5  ;;  %v5304_v26 = vcombine.low %v2224_v53, %v2234_v11  ;;  %v425_v3 = vrot.slane %v424_v63, 4  ;;  %v434_v27 = vor.u32 %v433_v1, %v429_v49 }
  0x5e   : > { %v2792_v29 = vsel %vm6824_vm6, %v5346_v4, %v2791_v56  ;;  %v2795_v33 = vsel %vm6824_vm6, %v2793_v6, %v2794_v57  ;;  %v444_v34 = vrot.slane %v442_v18, 4  ;;  %v447_v35 = vrot.slane %v445_v24, 5  ;;  %v6884_v24 = vld [vmem:[%s6583_s25 + $0x88] sm:$0xf] }
  0x5f   : > { %v451_v36 = vshll.u32 %v6831_v7, 16  ;;  %5986 = vmatmul.mubr.msk.bf16.gmra.mrb[12].mxu0 %vm666_vm3, %v5304_v26  ;;  %v430_v13 = vsel %vm6602_vm2, %v425_v3, %v429_v49  ;;  %v435_v56 = vrot.slane %v434_v27, 4  ;;  %v5364_v39 = vcombine.low %v2792_v29, %v2795_v33 }
  0x60   : > { %v455_v40 = vshrl.u32 %v6831_v7, 16  ;;  %v448_v57 = vor.u32 %v447_v35, %v444_v34  ;;  %v461_v43 = vshll.u32 %v215_v31, 16  ;;  %v5347_v44 = vrot.slane %v5331_v32, 9  ;;  %v217_v35 = vld [vmem:[%s6583_s25 + $0x8c] sm:$0x1] }
  0x61   : > { %v453_v42 = vrot.slane %v451_v36, 5  ;;  %v440_v50 = vsel %vm6602_vm2, %v435_v56, %v439_v12  ;;  %6007 = vmatprep.mubr.msk.bf16.mxu0 %vm666_vm3, %v5364_v39  ;;  %v2802_v49 = vsel %vm6824_vm6, %v6638_v23, %v2801_v21  ;;  %v466_v53 = vshrl.u32 %v6850_v38, 16  ;;  %v6876_v12 = vld [vmem:[%s6583_s25 + $0x84] sm:$0xf] }
  0x62   : > { %v457_v52 = vrot.slane %v455_v40, 4  ;;  %v5071_v58 = vcombine.low %v430_v13, %v440_v50  ;;  %v449_v61 = vrot.slane %v448_v57, 4  ;;  %v463_v63 = vrot.slane %v461_v43, 5  ;;  %v5333_v40 = vld [vmem:[%s6583_s25 + $0x30] sm:$0xe] }
  0x63   : > { %v2799_v1 = vsel %vm6824_vm6, %v5347_v44, %v2798_v16  ;;  %v468_v11 = vrot.slane %v466_v53, 4  ;;  %v469_v59 = vshll.u32 %v6850_v38, 16  ;;  %v475_v23 = vshll.u32 %v6857_v14, 16  ;;  %v6889_v16 = vld [vmem:[%s8371_s1 + $0x38] sm:$0xff]   ;;  %v6908_v50 = vld [vmem:[%s6583_s25 + $0x90] sm:$0xf] }
  0x64   : > { %v458_v4 = vor.u32 %v457_v52, %v453_v42  ;;  %v5365_v6 = vcombine.low %v2799_v1, %v2802_v49  ;;  %5853 = vmatprep.mubr.msk.bf16.mxu1 %vm666_vm3, %v5071_v58  ;;  %v454_v21 = vsel %vm6602_vm2, %v449_v61, %v453_v42  ;;  %v479_v54 = vshrl.u32 %v6857_v14, 16  ;;  %v6913_v58 = vld [vmem:[%s6583_s25 + $0x94] sm:$0xf] }
  0x65   : > { %v485_v18 = vshll.u32 %v216_v41, 16  ;;  %v471_v3 = vrot.slane %v469_v59, 5  ;;  %v5348_v27 = vrot.slane %v5332_v47, 9  ;;  %v2805_v29 = vrot.slane %v6645_v37, 5 }
  0x66   : > { %v459_v26 = vrot.slane %v458_v4, 4  ;;  %v477_v31 = vrot.slane %v475_v23, 5  ;;  %v481_v32 = vrot.slane %v479_v54, 4  ;;  %v2808_v34 = vrot.slane %v6654_v45, 5  ;;  %v218_v23 = vld [vmem:[%s6583_s25 + $0x98] sm:$0x1] }
  0x67   : > { %v487_v33 = vrot.slane %v485_v18, 5  ;;  %6008 = vmatmul.mubr.msk.bf16.vlgmr.msra.gmra.mrb[0].mxu0 %vm666_vm3, %v5365_v6  ;;  %v472_v13 = vor.u32 %v471_v3, %v468_v11  ;;  %v2806_v56 = vsel %vm6824_vm6, %v5348_v27, %v2805_v29  ;;  %v2807_v39 = vrot.slane %v2805_v29, 4  ;;  %v5334_v27 = vld [vmem:[%s6583_s25 + $0x3c] sm:$0xe] }
  0x68   : > { %v464_v36 = vsel %vm6602_vm2, %v459_v26, %v463_v63  ;;  %6040 = vmatpush3.bf16.msra.mxu0 %v6665_v62  ;;  %v482_v37 = vor.u32 %v481_v32, %v477_v31  ;;  %v490_v45 = vshrl.u32 %v6876_v12, 16  ;;  %v493_v57 = vshll.u32 %v6876_v12, 16 }
  0x69   : > { %v5072_v41 = vcombine.low %v454_v21, %v464_v36  ;;  %v473_v42 = vrot.slane %v472_v13, 4  ;;  %v2809_v43 = vsel %vm6824_vm6, %v2807_v39, %v2808_v34  ;;  %v499_v44 = vshll.u32 %v6884_v24, 16  ;;  %6073 = vmatprep.subr.bf16.mxu0 %v6889_v16 }
  0x6a   : > { %v503_v47 = vshrl.u32 %v6884_v24, 16  ;;  %v483_v62 = vrot.slane %v482_v37, 4  ;;  %v5366_v52 = vcombine.low %v2806_v56, %v2809_v43  ;;  %v492_v49 = vrot.slane %v490_v45, 4 }
  0x6b   : > { %5854 = vmatmul.mubr.msk.bf16.gmra.mrb[16].mxu1 %vm666_vm3, %v5072_v41  ;;  %v495_v53 = vrot.slane %v493_v57, 5  ;;  %v478_v61 = vsel %vm6602_vm2, %v473_v42, %v477_v31  ;;  %v501_v63 = vrot.slane %v499_v44, 5  ;;  %v509_v4 = vshll.u32 %v217_v35, 16  ;;  %v6941_v42 = vld [vmem:[%s6583_s25 + $0xa0] sm:$0xf] }
  0x6c   : > { %v505_v1 = vrot.slane %v503_v47, 4  ;;  %v488_v6 = vsel %vm6602_vm2, %v483_v62, %v487_v33  ;;  %6011 = vmatprep.mubr.msk.bf16.mxu0 %vm666_vm3, %v5366_v52  ;;  %v5349_v59 = vrot.slane %v5333_v40, 9  ;;  %v2812_v21 = vrot.slane %v6678_v22, 5  ;;  %v6936_v40 = vld [vmem:[%s6583_s25 + $0x9c] sm:$0xf] }
  0x6d   : > { %v496_v11 = vor.u32 %v495_v53, %v492_v49  ;;  %v5073_v54 = vcombine.low %v478_v61, %v488_v6  ;;  %v511_v26 = vrot.slane %v509_v4, 5  ;;  %v2815_v3 = vrot.slane %v6685_v30, 5  ;;  %v219_v52 = vld [vmem:[%s6583_s25 + $0xa4] sm:$0x1] }
  0x6e   : > { %v506_v18 = vor.u32 %v505_v1, %v501_v63  ;;  %v2813_v31 = vsel %vm6824_vm6, %v5349_v59, %v2812_v21  ;;  %v2814_v32 = vrot.slane %v2812_v21, 4  ;;  %v514_v33 = vshrl.u32 %v6908_v50, 16  ;;  %v5335_v59 = vld [vmem:[%s6583_s25 + $0x48] sm:$0xe] }
  0x6f   : > { %v497_v29 = vrot.slane %v496_v11, 4  ;;  %5857 = vmatprep.mubr.msk.bf16.mxu1 %vm666_vm3, %v5073_v54  ;;  %v517_v22 = vshll.u32 %v6908_v50, 16  ;;  %v523_v35 = vshll.u32 %v6913_v58, 16  ;;  %v527_v36 = vshrl.u32 %v6913_v58, 16 }
  0x70   : > { %v507_v34 = vrot.slane %v506_v18, 4  ;;  %v2816_v13 = vsel %vm6824_vm6, %v2814_v32, %v2815_v3  ;;  %v516_v56 = vrot.slane %v514_v33, 4  ;;  %v533_v39 = vshll.u32 %v218_v23, 16  ;;  %v6960_v33 = vld [vmem:[%s6583_s25 + $0xa8] sm:$0xf] }
  0x71   : > { %v502_v30 = vsel %vm6602_vm2, %v497_v29, %v501_v63  ;;  %v5367_v37 = vcombine.low %v2813_v31, %v2816_v13  ;;  %v519_v45 = vrot.slane %v517_v22, 5  ;;  %v525_v57 = vrot.slane %v523_v35, 5 }
  0x72   : > { %v512_v41 = vsel %vm6602_vm2, %v507_v34, %v511_v26  ;;  %v529_v44 = vrot.slane %v527_v36, 4  ;;  %v535_v47 = vrot.slane %v533_v39, 5  ;;  %v5350_v62 = vrot.slane %v5334_v27, 9 }
  0x73   : > { %v5074_v43 = vcombine.low %v502_v30, %v512_v41  ;;  %6012 = vmatmul.mubr.msk.bf16.gmra.mrb[4].mxu0 %vm666_vm3, %v5367_v37  ;;  %v520_v49 = vor.u32 %v519_v45, %v516_v56  ;;  %v2819_v53 = vrot.slane %v6702_v9, 5  ;;  %v2822_v61 = vrot.slane %v6707_v20, 5  ;;  %v6965_v30 = vld [vmem:[%s6583_s25 + $0xac] sm:$0xf]  ;;  %v220_v37 = vld [vmem:[%s6583_s25 + $0xb0] sm:$0x1] }
  0x74   : > { %v538_v63 = vshrl.u32 %v6936_v40, 16  ;;  %v530_v1 = vor.u32 %v529_v44, %v525_v57  ;;  %v541_v4 = vshll.u32 %v6936_v40, 16  ;;  %v547_v6 = vshll.u32 %v6941_v42, 16  ;;  %v5336_v45 = vld [vmem:[%s6583_s25 + $0x54] sm:$0xe] }
  0x75   : > { %5858 = vmatmul.mubr.msk.bf16.gmra.mrb[20].mxu1 %vm666_vm3, %v5074_v43  ;;  %v551_v11 = vshrl.u32 %v6941_v42, 16  ;;  %v521_v21 = vrot.slane %v520_v49, 4  ;;  %v2820_v23 = vsel %vm6824_vm6, %v5350_v62, %v2819_v53  ;;  %v2821_v9 = vrot.slane %v2819_v53, 4  ;;  %v6975_v62 = vld [vmem:[%s6583_s25 + $0xb4] sm:$0xf] }
  0x76   : > { %v540_v20 = vrot.slane %v538_v63, 4  ;;  %v531_v54 = vrot.slane %v530_v1, 4  ;;  %v543_v18 = vrot.slane %v541_v4, 5  ;;  %v549_v26 = vrot.slane %v547_v6, 5  ;;  %v6987_v4 = vld [vmem:[%s6583_s25 + $0xb8] sm:$0xf] }
  0x77   : > { %v553_v3 = vrot.slane %v551_v11, 4  ;;  %v526_v27 = vsel %vm6602_vm2, %v521_v21, %v525_v57  ;;  %v2823_v29 = vsel %vm6824_vm6, %v2821_v9, %v2822_v61  ;;  %v557_v31 = vshll.u32 %v219_v52, 16 }
  0x78   : > { %v5351_v32 = vrot.slane %v5335_v59, 9  ;;  %v536_v34 = vsel %vm6602_vm2, %v531_v54, %v535_v47  ;;  %v5368_v22 = vcombine.low %v2820_v23, %v2823_v29  ;;  %v544_v35 = vor.u32 %v543_v18, %v540_v20  ;;  %v221_v18 = vld [vmem:[%s6583_s25 + $0xbc] sm:$0x1] }
  0x79   : > { %v554_v36 = vor.u32 %v553_v3, %v549_v26  ;;  %v5075_v13 = vcombine.low %v526_v27, %v536_v34  ;;  %v559_v56 = vrot.slane %v557_v31, 5  ;;  %v2826_v39 = vrot.slane %v6725_v60, 5  ;;  %v5337_v31 = vld [vmem:[%s6583_s25 + $0x60] sm:$0xe] }
  0x7a   : > { %v2829_v41 = vrot.slane %v6733_v10, 5  ;;  %6015 = vmatprep.mubr.msk.bf16.mxu0 %vm666_vm3, %v5368_v22  ;;  %v545_v57 = vrot.slane %v544_v35, 4  ;;  %v562_v44 = vshrl.u32 %v6960_v33, 16  ;;  %v565_v47 = vshll.u32 %v6960_v33, 16 }
  0x7b   : > { %v555_v43 = vrot.slane %v554_v36, 4  ;;  %5861 = vmatprep.mubr.msk.bf16.mxu1 %vm666_vm3, %v5075_v13  ;;  %v2827_v60 = vsel %vm6824_vm6, %v5351_v32, %v2826_v39  ;;  %v2828_v52 = vrot.slane %v2826_v39, 4  ;;  %v571_v10 = vshll.u32 %v6965_v30, 16  ;;  %v5338_v36 = vld [vmem:[%s6583_s25 + $0x6c] sm:$0xe] }
  0x7c   : > { %v575_v49 = vshrl.u32 %v6965_v30, 16  ;;  %v550_v53 = vsel %vm6602_vm2, %v545_v57, %v549_v26  ;;  %v564_v63 = vrot.slane %v562_v44, 4  ;;  %v567_v1 = vrot.slane %v565_v47, 5 }
  0x7d   : > { %v560_v61 = vsel %vm6602_vm2, %v555_v43, %v559_v56  ;;  %v2830_v11 = vsel %vm6824_vm6, %v2828_v52, %v2829_v41  ;;  %v573_v59 = vrot.slane %v571_v10, 5  ;;  %v581_v20 = vshll.u32 %v220_v37, 16  ;;  %v5273_v52 = vld [vmem:[%s6583_s25 + $0x74] sm:$0x1] }
  0x7e   : > { %v5076_v6 = vcombine.low %v550_v53, %v560_v61  ;;  %v577_v21 = vrot.slane %v575_v49, 4  ;;  %v5369_v23 = vcombine.low %v2827_v60, %v2830_v11  ;;  %v568_v9 = vor.u32 %v567_v1, %v564_v63  ;;  %v5272_v60 = vld [vmem:[%s6583_s25 + $0x70] sm:$0xf] }
  0x7f   : > { %v5352_v54 = vrot.slane %v5336_v45, 9  ;;  %v2833_v3 = vrot.slane %v6756_v51, 5  ;;  %v2836_v27 = vrot.slane %v6762_v0, 5  ;;  %v586_v29 = vshrl.u32 %v6975_v62, 16 }
  0x80   : > { %5862 = vmatmul.mubr.msk.bf16.gmra.mrb[24].mxu1 %vm666_vm3, %v5076_v6  ;;  %v578_v26 = vor.u32 %v577_v21, %v573_v59  ;;  %6016 = vmatmul.mubr.msk.bf16.gmra.mrb[8].mxu0 %vm666_vm3, %v5369_v23  ;;  %v569_v32 = vrot.slane %v568_v9, 4  ;;  %v583_v34 = vrot.slane %v581_v20, 5  ;;  %v589_v22 = vshll.u32 %v6975_v62, 16 }
  0x81   : > { %v595_v35 = vshll.u32 %v6987_v4, 16  ;;  %v2834_v51 = vsel %vm6824_vm6, %v5352_v54, %v2833_v3  ;;  %v2835_v56 = vrot.slane %v2833_v3, 4  ;;  %v588_v0 = vrot.slane %v586_v29, 4  ;;  %v5339_v54 = vld [vmem:[%s6583_s25 + $0x78] sm:$0xe] }
  0x82   : > { %v579_v13 = vrot.slane %v578_v26, 4  ;;  %v574_v39 = vsel %vm6602_vm2, %v569_v32, %v573_v59  ;;  %v591_v41 = vrot.slane %v589_v22, 5  ;;  %v599_v45 = vshrl.u32 %v6987_v4, 16  ;;  %v6465_v29 = vld [vmem:[%s6583_s25] sm:$0xf] }
  0x83   : > { %v597_v37 = vrot.slane %v595_v35, 5  ;;  %v2837_v43 = vsel %vm6824_vm6, %v2835_v56, %v2836_v27  ;;  %v605_v44 = vshll.u32 %v221_v18, 16  ;;  %v5353_v47 = vrot.slane %v5337_v31, 9  ;;  %v7027_v31 = vld [vmem:[%s6583_s25 + $0x4] sm:$0xf] }
  0x84   : > { %v584_v57 = vsel %vm6602_vm2, %v579_v13, %v583_v34  ;;  %v5370_v49 = vcombine.low %v2834_v51, %v2837_v43  ;;  %v592_v53 = vor.u32 %v591_v41, %v588_v0  ;;  %v601_v61 = vrot.slane %v599_v45, 4  ;;  %v7031_v34 = vld [vmem:[%s6583_s25 + $0x7c] sm:$0xf]  ;;  %v7034_v22 = vld [vmem:[%s6583_s25 + $0x80] sm:$0x1] }
  0x85   : > { %v5077_v10 = vcombine.low %v574_v39, %v584_v57  ;;  %v607_v63 = vrot.slane %v605_v44, 5  ;;  %v2840_v1 = vrot.slane %v6786_v46, 5  ;;  %v2843_v6 = vrot.slane %v6793_v55, 5  ;;  %v5340_v35 = vld [vmem:[%s6583_s25 + $0x84] sm:$0xe] }
  0x86   : > { %v5354_v11 = vrot.slane %v5338_v36, 9  ;;  %6019 = vmatprep.mubr.msk.bf16.mxu0 %vm666_vm3, %v5370_v49  ;;  %v593_v59 = vrot.slane %v592_v53, 4  ;;  %v602_v21 = vor.u32 %v601_v61, %v597_v37  ;;  %v2847_v23 = vrot.slane %v5272_v60, 5  ;;  %v5278_v0 = vld [vmem:[%s6583_s25 + $0x88] sm:$0xf] }
  0x87   : > { %5865 = vmatprep.mubr.msk.bf16.mxu1 %vm666_vm3, %v5077_v10  ;;  %v2850_v9 = vrot.slane %v5273_v52, 5  ;;  %v2841_v20 = vsel %vm6824_vm6, %v5353_v47, %v2840_v1  ;;  %v2842_v46 = vrot.slane %v2840_v1, 4  ;;  %v5096_v32 = vcombine.low %v6465_v29, %v7027_v31  ;;  %v5279_v39 = vld [vmem:[%s6583_s25 + $0x8c] sm:$0x1]  ;;  %v5281_v45 = vld [vmem:[%s6583_s25 + $0x94] sm:$0xf] }
  0x88   : > { %v598_v55 = vsel %vm6602_vm2, %v593_v59, %v597_v37  ;;  %v603_v18 = vrot.slane %v602_v21, 4  ;;  %v2848_v26 = vsel %vm6824_vm6, %v5354_v11, %v2847_v23  ;;  %v2849_v3 = vrot.slane %v2847_v23, 4  ;;  %v5282_v52 = vld [vmem:[%s6583_s25 + $0x98] sm:$0x1]  ;;  %v5341_v10 = vld [vmem:[%s6583_s25 + $0x90] sm:$0xe] }
  0x89   : > { %v2844_v27 = vsel %vm6824_vm6, %v2842_v46, %v2843_v6  ;;  %v5355_v56 = vrot.slane %v5339_v54, 9  ;;  %v2854_v57 = vrot.slane %v7031_v34, 5  ;;  %v2857_v43 = vrot.slane %v7034_v22, 5  ;;  %v5285_v11 = vld [vmem:[%s6583_s25 + $0xa4] sm:$0x1] }
  0x8a   : > { %v608_v36 = vsel %vm6602_vm2, %v603_v18, %v607_v63  ;;  %v5371_v13 = vcombine.low %v2841_v20, %v2844_v27  ;;  %v2851_v51 = vsel %vm6824_vm6, %v2849_v3, %v2850_v9  ;;  %v5356_v44 = vrot.slane %v5340_v35, 9  ;;  %v5284_v63 = vld [vmem:[%s6583_s25 + $0xa0] sm:$0xf]  ;;  %v5342_v59 = vld [vmem:[%s6583_s25 + $0x9c] sm:$0xe] }
  0x8b   : > { %v5078_v41 = vcombine.low %v598_v55, %v608_v36  ;;  %v5372_v37 = vcombine.low %v2848_v26, %v2851_v51  ;;  %v2861_v47 = vrot.slane %v5278_v0, 5  ;;  %v2864_v60 = vrot.slane %v5279_v39, 5  ;;  %v6467_v21 = vld [vmem:[%s6583_s25 + $0xc] sm:$0xf]  ;;  %v7061_v23 = vld [vmem:[%s6583_s25 + $0x10] sm:$0xf] }
  0x8c   : > { %6020 = vmatmul.mubr.msk.bf16.gmra.mrb[12].mxu0 %vm666_vm3, %v5371_v13  ;;  %v2855_v49 = vsel %vm6824_vm6, %v5355_v56, %v2854_v57  ;;  %v2856_v53 = vrot.slane %v2854_v57, 4  ;;  %v2868_v61 = vrot.slane %v5281_v45, 5  ;;  %v5097_v9 = vcombine.low %v6467_v21, %v7061_v23  ;;  %v6469_v27 = vld [vmem:[%s6583_s25 + $0x18] sm:$0xf]  ;;  %v7070_v29 = vld [vmem:[%s6583_s25 + $0x1c] sm:$0xf] }
  0x8d   : > { %5866 = vmatmul.mubr.msk.bf16.gmra.mrb[28].mxu1 %vm666_vm3, %v5078_v41  ;;  %6023 = vmatprep.mubr.msk.bf16.mxu0 %vm666_vm3, %v5372_v37  ;;  %v2862_v1 = vsel %vm6824_vm6, %v5356_v44, %v2861_v47  ;;  %v2863_v6 = vrot.slane %v2861_v47, 4  ;;  %v5357_v46 = vrot.slane %v5341_v10, 9  ;;  %v2871_v54 = vrot.slane %v5282_v52, 5  ;;  %v5287_v51 = vld [vmem:[%s6583_s25 + $0xac] sm:$0xf]  ;;  %v7078_v39 = vld [vmem:[%s8371_s1 + $0x18] sm:$0xff]  }
  0x8e   : > { %5871 = vmatprep.mubr.msk.bf16.mxu1 %vm666_vm3, %v5096_v32  ;;  %v2858_v20 = vsel %vm6824_vm6, %v2856_v53, %v2857_v43  ;;  %v2870_v26 = vrot.slane %v2868_v61, 4  ;;  %v2875_v3 = vrot.slane %v5284_v63, 5  ;;  %v5098_v32 = vcombine.low %v6469_v27, %v7070_v29  ;;  %v5290_v0 = vld [vmem:[%s6583_s25 + $0xb8] sm:$0xf]  ;;  %v6471_v57 = vld [vmem:[%s8371_s1 + $0x10] sm:$0xff]  }
  0x8f   : > { %v5373_v55 = vcombine.low %v2855_v49, %v2858_v20  ;;  %v2865_v18 = vsel %vm6824_vm6, %v2863_v6, %v2864_v60  ;;  %v5358_v36 = vrot.slane %v5342_v59, 9  ;;  %v2878_v13 = vrot.slane %v5285_v11, 5  ;;  %v5288_v47 = vld [vmem:[%s6583_s25 + $0xb0] sm:$0x1]  ;;  %v5343_v60 = vld [vmem:[%s6583_s25 + $0xa8] sm:$0xe] }
  0x90   : > { %v5374_v35 = vcombine.low %v2862_v1, %v2865_v18  ;;  %v2877_v56 = vrot.slane %v2875_v3, 4  ;;  %v2869_v41 = vsel %vm6824_vm6, %v5357_v46, %v2868_v61  ;;  %v2872_v37 = vsel %vm6824_vm6, %v2870_v26, %v2871_v54  ;;  %v5291_v10 = vld [vmem:[%s6583_s25 + $0xbc] sm:$0x1]  ;;  %v5344_v49 = vld [vmem:[%s6583_s25 + $0xb4] sm:$0xe] }
  0x91   : > { %v2882_v45 = vrot.slane %v5287_v51, 5  ;;  %v2876_v43 = vsel %vm6824_vm6, %v5358_v36, %v2875_v3  ;;  %v2889_v52 = vrot.slane %v5290_v0, 5  ;;  %v6472_v53 = vld [vmem:[%s6583_s25 + $0x24] sm:$0xf]  ;;  %v7102_v61 = vld [vmem:[%s6583_s25 + $0x28] sm:$0xf]  ;;  %v5375_v1 = vcombine.low %v2869_v41, %v2872_v37 }
  0x92   : > { %v2879_v44 = vsel %vm6824_vm6, %v2877_v56, %v2878_v13  ;;  %v5099_v63 = vcombine.low %v6472_v53, %v7102_v61  ;;  %v5293_v6 = vld [vmem:[%s6583_s25 + $0xc4] sm:$0xf]  ;;  %v5359_v59 = vrot.slane %v5343_v60, 9  ;;  %v6474_v20 = vld [vmem:[%s6583_s25 + $0x30] sm:$0xf]  ;;  %v2892_v26 = vrot.slane %v5291_v10, 5 }
  0x93   : > { %v5376_v11 = vcombine.low %v2876_v43, %v2879_v44  ;;  %v2884_v21 = vrot.slane %v2882_v45, 4  ;;  %v7108_v46 = vld [vmem:[%s6583_s25 + $0x34] sm:$0xf]  ;;  %v2891_v18 = vrot.slane %v2889_v52, 4  ;;  %v5294_v13 = vld [vmem:[%s6583_s25 + $0xc8] sm:$0x1] }
  0x94   : > { %6024 = vmatmul.mubr.msk.bf16.gmra.mrb[16].mxu0 %vm666_vm3, %v5373_v55  ;;  %v5100_v54 = vcombine.low %v6474_v20, %v7108_v46  ;;  %v5360_v55 = vrot.slane %v5344_v49, 9  ;;  %v2883_v3 = vsel %vm6824_vm6, %v5359_v59, %v2882_v45  ;;  %v5345_v51 = vld [vmem:[%s6583_s25 + $0xc0] sm:$0xe]  ;;  %v6476_v56 = vld [vmem:[%s6583_s25 + $0x3c] sm:$0xf]  ;;  %v2899_v44 = vrot.slane %v5294_v13, 5 }
  0x95   : > { %5872 = vmatmul.mubr.msk.bf16.vlgmr.msra.gmra.mrb[0].mxu1 %vm666_vm3, %v5097_v9  ;;  %6027 = vmatprep.mubr.msk.bf16.mxu0 %vm666_vm3, %v5374_v35  ;;  %v2885_v9 = vrot.slane %v5288_v47, 5  ;;  %v2893_v36 = vsel %vm6824_vm6, %v2891_v18, %v2892_v26  ;;  %v7127_v0 = vld [vmem:[%s6583_s25 + $0x40] sm:$0xf]  ;;  %v5102_v47 = vcombine.low %v6737_v15, %v6740_v25  ;;  %v2269_v10 = vshll.u32 %v7031_v34, 16  ;;  %v6423_v53 = vld [vmem:[%s6583_s25 + $0x18] sm:$0xff]  }
  0x96   : > { %5904 = vmatpush3.bf16.msra.mxu1 %v6471_v57  ;;  %5875 = vmatprep.mubr.msk.bf16.mxu1 %vm666_vm3, %v5098_v32  ;;  %v2896_v32 = vrot.slane %v5293_v6, 5  ;;  %v2890_v35 = vsel %vm6824_vm6, %v5360_v55, %v2889_v52  ;;  %v5101_v41 = vcombine.low %v6476_v56, %v7127_v0  ;;  %v5361_v57 = vrot.slane %v5345_v51, 9 }
  0x97   : > { %5937 = vmatprep.subr.bf16.mxu1 %v7078_v39  ;;  %v2886_v27 = vsel %vm6824_vm6, %v2884_v21, %v2885_v9  ;;  %v5378_v45 = vcombine.low %v2890_v35, %v2893_v36  ;;  %v2273_v15 = vshrl.u32 %v7031_v34, 16  ;;  %v5103_v49 = vcombine.low %v6766_v8, %v6772_v19  ;;  %v1171_v8 = vld [vmem:[%s6583_s25] sm:$0xe]  ;;  %v1172_v19 = vld [vmem:[%s6583_s25 + $0xc] sm:$0xe] }
  0x98   : > { %v5377_v37 = vcombine.low %v2883_v3, %v2886_v27  ;;  %v2898_v43 = vrot.slane %v2896_v32, 4  ;;  %v2897_v60 = vsel %vm6824_vm6, %v5361_v57, %v2896_v32  ;;  %v1231_v21 = vrot.slane %v7061_v23, 5  ;;  %v1173_v34 = vld [vmem:[%s6583_s25 + $0x18] sm:$0xe]  ;;  %v6426_v27 = vld [vmem:[%s6583_s25 + $0x24] sm:$0xff]   ;;  %v6428_v32 = vld [vmem:[%s6583_s25 + $0x30] sm:$0xff]  }
  0x99   : > { %v2275_v6 = vrot.slane %v2273_v15, 4  ;;  %v2279_v9 = vshll.u32 %v7034_v22, 16  ;;  %v1224_v23 = vrot.slane %v7027_v31, 5  ;;  %v1238_v20 = vrot.slane %v7070_v29, 5  ;;  %v1175_v36 = vld [vmem:[%s6583_s25 + $0x30] sm:$0xe] }
  0x9a   : > { %v2900_v52 = vsel %vm6824_vm6, %v2898_v43, %v2899_v44  ;;  %v5105_v18 = vcombine.low %v6818_v48, %v6831_v7  ;;  %v1245_v26 = vrot.slane %v7102_v61, 5  ;;  %v1252_v3 = vrot.slane %v7108_v46, 5  ;;  %v6480_v48 = vld [vmem:[%s6583_s25 + $0x20] sm:$0x1]  ;;  %v6481_v57 = vld [vmem:[%s6583_s25 + $0x2c] sm:$0x1] }
  0x9b   : > { %v5379_v25 = vcombine.low %v2897_v60, %v2900_v52  ;;  %v5106_v22 = vcombine.low %v6850_v38, %v6857_v14  ;;  %v5107_v31 = vcombine.low %v6876_v12, %v6884_v24  ;;  %v5129_v29 = vrot.slane %v1171_v8, 9  ;;  %v7179_v46 = vld [vmem:[%s8371_s1 + $0x40] sm:$0xff]  }
  0x9c   : > { %6028 = vmatmul.mubr.msk.bf16.gmra.mrb[20].mxu0 %vm666_vm3, %v5375_v1  ;;  %v7147_v1 = vrot.slane %v2269_v10, 5  ;;  %v5130_v35 = vrot.slane %v1172_v19, 9  ;;  %v1233_v13 = vrot.slane %v1231_v21, 4  ;;  %v5131_v51 = vrot.slane %v1173_v34, 9  ;;  %v6482_v10 = vld [vmem:[%s6583_s25 + $0x38] sm:$0x1] }
  0x9d   : > { %5876 = vmatmul.mubr.msk.bf16.gmra.mrb[4].mxu1 %vm666_vm3, %v5099_v63  ;;  %6031 = vmatprep.mubr.msk.bf16.mxu0 %vm666_vm3, %v5376_v11  ;;  %v5104_v63 = vcombine.low %v6797_v5, %v6803_v17  ;;  %v6478_v11 = vld [vmem:[%s6583_s25 + $0x8] sm:$0x1]  ;;  %v6479_v5 = vld [vmem:[%s6583_s25 + $0x14] sm:$0x1]  ;;  %v1241_v7 = vrot.slane %v6480_v48, 5  ;;  %v5108_v38 = vcombine.low %v6908_v50, %v6913_v58  ;;  %v5109_v14 = vcombine.low %v6936_v40, %v6941_v42 }
  0x9e   : > { %5879 = vmatprep.mubr.msk.bf16.mxu1 %vm666_vm3, %v5100_v54  ;;  %8390 = vst [vmem:[#allocation2_spill] sm:$0xff] %v7147_v1  ;;  %v1227_v59 = vrot.slane %v6478_v11, 5  ;;  %v1234_v17 = vrot.slane %v6479_v5, 5  ;;  %v1174_v54 = vld [vmem:[%s6583_s25 + $0x24] sm:$0xe]  ;;  %v2276_v55 = vor.u32 %v2275_v6, %v7147_v1  ;;  %v1226_v56 = vrot.slane %v1224_v23, 4 }
  0x9f   : > { %v5132_v61 = vrot.slane %v1174_v54, 9  ;;  %v1248_v43 = vrot.slane %v6481_v57, 5  ;;  %v5133_v44 = vrot.slane %v1175_v36, 9  ;;  %v5110_v60 = vcombine.low %v6960_v33, %v6965_v30  ;;  %v1177_v6 = vld [vmem:[%s6583_s25 + $0x48] sm:$0xe]  ;;  %v6434_v58 = vld [vmem:[%s6583_s25 + $0x54] sm:$0xff]  }
  0xa0   : > { %v7192_v52 = vsel %vm6824_vm6, %v5129_v29, %v1224_v23  ;;  %v1255_v15 = vrot.slane %v6482_v10, 5  ;;  %v7213_v11 = vrot.slane %v2276_v55, 4  ;;  %v5464_v34 = vld [vmem:[%s6583_s25 + $0x18] sm:$0xf]  ;;  %v6432_v5 = vld [vmem:[%s6583_s25 + $0x48] sm:$0xff]  }
  0xa1   : > { %v7228_v19 = vsel %vm6824_vm6, %v5132_v61, %v1245_v26  ;;  %v6483_v23 = vld [vmem:[%s6583_s25 + $0x44] sm:$0x1]  ;;  %v1178_v55 = vld [vmem:[%s6583_s25 + $0x54] sm:$0xe]  ;;  %v3614_v48 = vshll.u32 %v5464_v34, 16 }
  0xa2   : > { %8392 = vst [vmem:[#allocation4_spill] sm:$0xff] %v7213_v11  ;;  %v5136_v10 = vrot.slane %v1178_v55, 9  ;;  %v5470_v55 = vld [vmem:[%s6583_s25 + $0x30] sm:$0xf]  ;;  %v5471_v50 = vld [vmem:[%s6583_s25 + $0x34] sm:$0xf] }
  0xa3   : > { %v3616_v24 = vrot.slane %v3614_v48, 5 }
  0xa4   : > { %6032 = vmatmul.mubr.msk.bf16.gmra.mrb[24].mxu0 %vm666_vm3, %v5377_v37  ;;  %v1176_v37 = vld [vmem:[%s6583_s25 + $0x3c] sm:$0xe] }
  0xa5   : > { %5880 = vmatmul.mubr.msk.bf16.gmra.mrb[8].mxu1 %vm666_vm3, %v5101_v41  ;;  %6035 = vmatprep.mubr.msk.bf16.mxu0 %vm666_vm3, %v5378_v45  ;;  %v1240_v41 = vrot.slane %v1238_v20, 4  ;;  %v1247_v45 = vrot.slane %v1245_v26, 4 }
  0xa6   : > { %5883 = vmatprep.mubr.msk.bf16.mxu1 %vm666_vm3, %v5102_v47  ;;  %v1254_v47 = vrot.slane %v1252_v3, 4 }
  0xa7   : > { %v7224_v8 = vsel %vm6824_vm6, %v1240_v41, %v1241_v7  ;;  %v7243_v26 = vsel %vm6824_vm6, %v1247_v45, %v1248_v43  ;;  %v6485_v45 = vld [vmem:[%s6583_s25 + $0x50] sm:$0x1]  ;;  %v3668_v41 = vshll.u32 %v5471_v50, 16 }
  0xa8   : > { %v1269_v57 = vrot.slane %v6485_v45, 5  ;;  %v8400_v11 = vcombine.low %v7228_v19, %v7243_v26 }
  0xac   : > { %6036 = vmatmul.mubr.msk.bf16.gmra.mrb[28].mxu0 %vm666_vm3, %v5379_v25  ;;  %v1259_v25 = vrot.slane %v7127_v0, 5  ;;  %v7210_v0 = vsel %vm6824_vm6, %v5131_v51, %v1238_v20  ;;  %v1262_v20 = vrot.slane %v6483_v23, 5  ;;  %v3611_v51 = vshrl.u32 %v5464_v34, 16  ;;  %v7287_v34 = vld [vmem:[%s6583_s25 + $0x5c] sm:$0x1] }
  0xad   : > { %5884 = vmatmul.mubr.msk.bf16.gmra.mrb[12].mxu1 %vm666_vm3, %v5103_v49  ;;  %6041 = vmatprep.mubr.msk.bf16.mxu0 %vm666_vm3, %v6423_v53  ;;  %v7196_v49 = vrot.slane %v2279_v9, 5  ;;  %v7202_v53 = vsel %vm6824_vm6, %v5130_v35, %v1231_v21  ;;  %v7220_v21 = vsel %vm6824_vm6, %v1226_v56, %v1227_v59  ;;  %v5134_v9 = vrot.slane %v1176_v37, 9  ;;  %v6484_v59 = vld [vmem:[%s6583_s25 + $0x4c] sm:$0xf] }
  0xae   : > { %5887 = vmatprep.mubr.msk.bf16.mxu1 %vm666_vm3, %v5104_v63  ;;  %v7206_v63 = vsel %vm6824_vm6, %v1233_v13, %v1234_v17  ;;  %v7234_v17 = vsel %vm6824_vm6, %v5133_v44, %v1252_v3  ;;  %v1266_v54 = vrot.slane %v6484_v59, 5  ;;  %v1261_v3 = vrot.slane %v1259_v25, 4  ;;  %v7258_v13 = vld [vmem:[%s6583_s25 + $0x60] sm:$0xe] }
  0xaf   : > { %8391 = vst [vmem:[#allocation3_spill] sm:$0xff] %v7196_v49  ;;  %v7268_v43 = vsel %vm6824_vm6, %v5134_v9, %v1259_v25  ;;  %v6486_v25 = vld [vmem:[%s6583_s25 + $0x58] sm:$0xf]  ;;  %v1276_v9 = vrot.slane %v7287_v34, 5  ;;  %v5137_v23 = vrot.slane %v7258_v13, 9  ;;  %v3613_v12 = vrot.slane %v3611_v51, 4 }
  0xb0   : > { %v1268_v37 = vrot.slane %v1266_v54, 4  ;;  %v7272_v44 = vsel %vm6824_vm6, %v1261_v3, %v1262_v20  ;;  %v6488_v20 = vld [vmem:[%s6583_s25 + $0x64] sm:$0xf]  ;;  %v6489_v34 = vld [vmem:[%s6583_s25 + $0x70] sm:$0xf]  ;;  %v3672_v56 = vshrl.u32 %v5471_v50, 16 }
  0xb1   : > { %v1280_v59 = vrot.slane %v6488_v20, 5  ;;  %v1287_v20 = vrot.slane %v6489_v34, 5  ;;  %v5469_v34 = vld [vmem:[%s6583_s25 + $0x2c] sm:$0x1] }
  0xb2   : > { %v7304_v3 = vsel %vm6824_vm6, %v1268_v37, %v1269_v57  ;;  %v3659_v37 = vshrl.u32 %v5470_v55, 16  ;;  %v3662_v57 = vshll.u32 %v5470_v55, 16 }
  0xb3   : > { %v1282_v36 = vrot.slane %v1280_v59, 4 }
  0xb4   : > { %6042 = vmatmul.mubr.msk.bf16.vlgmr.msra.gmra.mrb[0].mxu0 %vm666_vm3, %v6426_v27  ;;  %v7247_v27 = vsel %vm6824_vm6, %v1254_v47, %v1255_v15  ;;  %v5466_v15 = vld [vmem:[%s6583_s25 + $0x20] sm:$0x1]  ;;  %v3664_v50 = vrot.slane %v3662_v57, 5  ;;  %v6440_v57 = vld [vmem:[%s6583_s25 + $0x78] sm:$0xff]  }
  0xb5   : > { %5888 = vmatmul.mubr.msk.bf16.gmra.mrb[16].mxu1 %vm666_vm3, %v5105_v18  ;;  %6074 = vmatpush3.bf16.msra.mxu0 %v6889_v16  ;;  %v6430_v16 = vld [vmem:[%s6583_s25 + $0x3c] sm:$0xff]   ;;  %v3630_v48 = vshll.u32 %v5466_v15, 16 }
  0xb6   : > { %5891 = vmatprep.mubr.msk.bf16.mxu1 %vm666_vm3, %v5106_v22  ;;  %6045 = vmatprep.mubr.msk.bf16.mxu0 %vm666_vm3, %v6428_v32  ;;  %v5465_v18 = vld [vmem:[%s6583_s25 + $0x1c] sm:$0xf]  ;;  %v5135_v22 = vrot.slane %v1177_v6, 9  ;;  %v5467_v6 = vld [vmem:[%s6583_s25 + $0x24] sm:$0xf] }
  0xb7   : > { %6107 = vmatprep.subr.bf16.mxu0 %v7179_v46  ;;  %v3620_v7 = vshll.u32 %v5465_v18, 16  ;;  %v3624_v61 = vshrl.u32 %v5465_v18, 16  ;;  %v3638_v13 = vshll.u32 %v5467_v6, 16  ;;  %v3617_v18 = vor.u32 %v3616_v24, %v3613_v12 }
  0xb8   : > { %v7276_v47 = vsel %vm6824_vm6, %v5135_v22, %v1266_v54  ;;  %v5468_v54 = vld [vmem:[%s6583_s25 + $0x28] sm:$0xf]  ;;  %v3635_v22 = vshrl.u32 %v5467_v6, 16  ;;  %v1289_v24 = vrot.slane %v1287_v20, 4 }
  0xb9   : > { %v3640_v29 = vrot.slane %v3638_v13, 5  ;;  %v3661_v13 = vrot.slane %v3659_v37, 4  ;;  %v3618_v40 = vrot.slane %v3617_v18, 4 }
  0xba   : > { %v3637_v15 = vrot.slane %v3635_v22, 4  ;;  %v5472_v22 = vld [vmem:[%s6583_s25 + $0x38] sm:$0x1] }
  0xbb   : > { %v3678_v37 = vshll.u32 %v5472_v22, 16 }
  0xbc   : > { %6046 = vmatmul.mubr.msk.bf16.gmra.mrb[4].mxu0 %vm666_vm3, %v6430_v16  ;;  %v1273_v16 = vrot.slane %v6486_v25, 5  ;;  %v1180_v25 = vld [vmem:[%s6583_s25 + $0x6c] sm:$0xe] }
  0xbd   : > { %5892 = vmatmul.mubr.msk.bf16.gmra.mrb[20].mxu1 %vm666_vm3, %v5107_v31  ;;  %6049 = vmatprep.mubr.msk.bf16.mxu0 %vm666_vm3, %v6432_v5  ;;  %v7297_v31 = vrot.slane %v3620_v7, 5  ;;  %v3626_v5 = vrot.slane %v3624_v61, 4  ;;  %v3644_v7 = vshll.u32 %v5468_v54, 16  ;;  %v3648_v61 = vshrl.u32 %v5468_v54, 16 }
  0xbe   : > { %5895 = vmatprep.mubr.msk.bf16.mxu1 %vm666_vm3, %v5108_v38  ;;  %v6436_v38 = vld [vmem:[%s6583_s25 + $0x60] sm:$0xff]   ;;  %v7311_v51 = vsel %vm6824_vm6, %v5136_v10, %v1273_v16  ;;  %v1275_v45 = vrot.slane %v1273_v16, 4  ;;  %v6490_v10 = vld [vmem:[%s6583_s25 + $0x68] sm:$0x1]  ;;  %v7318_v16 = vrot.slane %v3630_v48, 5  ;;  %v5138_v54 = vrot.slane %v1180_v25, 9 }
  0xbf   : > { %v3627_v6 = vor.u32 %v3626_v5, %v7297_v31  ;;  %v1283_v35 = vrot.slane %v6490_v10, 5  ;;  %v7321_v32 = vrot.slane %v3644_v7, 5  ;;  %v3650_v12 = vrot.slane %v3648_v61, 4  ;;  %v6491_v5 = vld [vmem:[%s6583_s25 + $0x74] sm:$0x1]  ;;  %v6438_v25 = vld [vmem:[%s6583_s25 + $0x6c] sm:$0xff]  }
  0xc0   : > { %v1290_v55 = vrot.slane %v6491_v5, 5  ;;  %v7340_v48 = vsel %vm6824_vm6, %v5137_v23, %v1280_v59  ;;  %v3641_v7 = vor.u32 %v3640_v29, %v3637_v15  ;;  %v3654_v61 = vshll.u32 %v5469_v34, 16  ;;  %v6493_v10 = vld [vmem:[%s6583_s25 + $0x88] sm:$0xf] }
  0xc1   : > { %v3628_v42 = vrot.slane %v3627_v6, 4  ;;  %v7345_v33 = vsel %vm6824_vm6, %v1275_v45, %v1276_v9  ;;  %v7353_v23 = vsel %vm6824_vm6, %v1282_v36, %v1283_v35  ;;  %v7357_v29 = vsel %vm6824_vm6, %v5138_v54, %v1287_v20  ;;  %v1182_v45 = vld [vmem:[%s6583_s25 + $0x84] sm:$0xe]  ;;  %v5473_v20 = vld [vmem:[%s6583_s25 + $0x3c] sm:$0xf] }
  0xc2   : > { %v7361_v9 = vsel %vm6824_vm6, %v1289_v24, %v1290_v55  ;;  %v3665_v59 = vor.u32 %v3664_v50, %v3661_v13  ;;  %v3623_v6 = vsel %vm6602_vm2, %v3618_v40, %v7297_v31  ;;  %v1301_v15 = vrot.slane %v6493_v10, 5  ;;  %v6494_v24 = vld [vmem:[%s6583_s25 + $0x80] sm:$0x1] }
  0xc3   : > { %v3633_v35 = vsel %vm6602_vm2, %v3628_v42, %v7318_v16  ;;  %v3642_v54 = vrot.slane %v3641_v7, 4  ;;  %v3656_v34 = vrot.slane %v3654_v61, 5  ;;  %v1297_v5 = vrot.slane %v6494_v24, 5  ;;  %v7375_v55 = vld [vmem:[%s6583_s25 + $0x40] sm:$0xf] }
  0xc4   : > { %6050 = vmatmul.mubr.msk.bf16.gmra.mrb[8].mxu0 %vm666_vm3, %v6434_v58  ;;  %v3674_v58 = vrot.slane %v3672_v56, 4  ;;  %v1181_v56 = vld [vmem:[%s6583_s25 + $0x78] sm:$0xe]  ;;  %8393 = vst [vmem:[#allocation5_spill] sm:$0xff] %v7375_v55  ;;  %v3680_v13 = vrot.slane %v3678_v37, 5  ;;  %v5140_v16 = vrot.slane %v1182_v45, 9  ;;  %v8394_v50 = vcombine.low %v6975_v62, %v6987_v4 }
  0xc5   : > { %5896 = vmatmul.mubr.msk.bf16.gmra.mrb[24].mxu1 %vm666_vm3, %v5109_v14  ;;  %6053 = vmatprep.mubr.msk.bf16.mxu0 %vm666_vm3, %v6436_v38  ;;  %v7334_v14 = vrot.slane %v3668_v41, 5  ;;  %v6492_v41 = vld [vmem:[%s6583_s25 + $0x7c] sm:$0xf]  ;;  %v3666_v40 = vrot.slane %v3665_v59, 4  ;;  %v6495_v42 = vld [vmem:[%s6583_s25 + $0x8c] sm:$0x1]  ;;  %v3647_v45 = vsel %vm6602_vm2, %v3642_v54, %v7321_v32 }
  0xc6   : > { %5899 = vmatprep.mubr.msk.bf16.mxu1 %vm666_vm3, %v5110_v60  ;;  %v3651_v60 = vor.u32 %v3650_v12, %v7321_v32  ;;  %v1294_v18 = vrot.slane %v6492_v41, 5  ;;  %v5139_v12 = vrot.slane %v1181_v56, 9  ;;  %v3683_v7 = vshrl.u32 %v5473_v20, 16  ;;  %v6441_v41 = vld [vmem:[%s6583_s25 + $0x84] sm:$0xff]   ;;  %v6442_v59 = vld [vmem:[%s6583_s25 + $0x90] sm:$0xff]  }
  0xc7   : > { %v3675_v36 = vor.u32 %v3674_v58, %v7334_v14  ;;  %v1304_v58 = vrot.slane %v6495_v42, 5  ;;  %v3686_v61 = vshll.u32 %v5473_v20, 16  ;;  %v1303_v56 = vrot.slane %v1301_v15, 4  ;;  %v7415_v20 = vld [vmem:[%s6583_s25 + $0x4c] sm:$0xf] }
  0xc8   : > { %v3652_v31 = vrot.slane %v3651_v60, 4  ;;  %v1296_v22 = vrot.slane %v1294_v18, 4  ;;  %v3692_v62 = vshll.u32 %v7375_v55, 16  ;;  %v3696_v4 = vshrl.u32 %v7375_v55, 16  ;;  %v7493_v37 = vld [vmem:[%s6583_s25 + $0x5c] sm:$0x1] }
  0xc9   : > { %v3676_v60 = vrot.slane %v3675_v36, 4  ;;  %v7407_v10 = vsel %vm6824_vm6, %v5139_v12, %v1294_v18  ;;  %v3671_v24 = vsel %vm6602_vm2, %v3666_v40, %v7334_v14  ;;  %v7422_v32 = vsel %vm6824_vm6, %v5140_v16, %v1301_v15  ;;  %v7426_v18 = vld [vmem:[%s6583_s25 + $0x58] sm:$0xf]  ;;  %v7440_v40 = vld [vmem:[%s6583_s25 + $0x90] sm:$0xe] }
  0xca   : > { %v3657_v36 = vsel %vm6602_vm2, %v3652_v31, %v3656_v34  ;;  %v3685_v54 = vrot.slane %v3683_v7, 4  ;;  %v3688_v34 = vrot.slane %v3686_v61, 5  ;;  %v5479_v31 = vld [vmem:[%s6583_s25 + $0x54] sm:$0xf]  ;;  %v3698_v14 = vrot.slane %v3696_v4, 4 }
  0xcb   : > { %v3681_v12 = vsel %vm6602_vm2, %v3676_v60, %v3680_v13  ;;  %v3716_v42 = vshll.u32 %v7415_v20, 16  ;;  %v3720_v7 = vshrl.u32 %v7415_v20, 16  ;;  %v3731_v13 = vshrl.u32 %v5479_v31, 16  ;;  %v1184_v38 = vld [vmem:[%s6583_s25 + $0x9c] sm:$0xe] }
  0xcc   : > { %6054 = vmatmul.mubr.msk.bf16.gmra.mrb[12].mxu0 %vm666_vm3, %v6438_v25  ;;  %v8395_v25 = vcombine.low %v7192_v52, %v7220_v21  ;;  %v7395_v52 = vcombine.low %v3623_v6, %v3633_v35  ;;  %v7411_v6 = vsel %vm6824_vm6, %v1296_v22, %v1297_v5  ;;  %v5476_v35 = vld [vmem:[%s6583_s25 + $0x48] sm:$0xf]  ;;  %v7432_v5 = vsel %vm6824_vm6, %v1303_v56, %v1304_v58  ;;  %v7435_v22 = vld [vmem:[%s6583_s25 + $0x44] sm:$0x1] }
  0xcd   : > { %5900 = vmatmul.mubr.msk.bf16.gmra.mrb[28].mxu1 %vm666_vm3, %v8394_v50  ;;  %6057 = vmatprep.mubr.msk.bf16.mxu0 %vm666_vm3, %v6440_v57  ;;  %8396 = vst [vmem:[#allocation6_spill] sm:$0xff] %v7435_v22  ;;  %v7437_v50 = vrot.slane %v3692_v62, 5  ;;  %v3707_v15 = vshrl.u32 %v5476_v35, 16  ;;  %v3710_v16 = vshll.u32 %v5476_v35, 16  ;;  %v3734_v61 = vshll.u32 %v5479_v31, 16 }
  0xce   : > { %5905 = vmatprep.mubr.msk.bf16.mxu1 %vm666_vm3, %v8395_v25  ;;  %v3740_v58 = vshll.u32 %v7426_v18, 16  ;;  %v3744_v25 = vshrl.u32 %v7426_v18, 16  ;;  %v8397_v60 = vcombine.low %v7202_v53, %v7206_v63  ;;  %v7452_v56 = vcombine.low %v3647_v45, %v3657_v36  ;;  %v7469_v35 = vld [vmem:[%s6583_s25 + $0x50] sm:$0x1]  ;;  %v6498_v62 = vld [vmem:[%s6583_s25 + $0x98] sm:$0x1] }
  0xcf   : > { %v7456_v4 = vcombine.low %v3671_v24, %v3681_v12  ;;  %v8398_v53 = vcombine.low %v7210_v0, %v7224_v8  ;;  %v3699_v45 = vor.u32 %v3698_v14, %v7437_v50  ;;  %v5482_v24 = vld [vmem:[%s6583_s25 + $0x60] sm:$0xf]  ;;  %v3709_v31 = vrot.slane %v3707_v15, 4  ;;  %v7475_v8 = vld [vmem:[%s6583_s25 + $0x64] sm:$0xf]  ;;  %v6444_v14 = vld [vmem:[%s6583_s25 + $0xa8] sm:$0xff]  }
  0xd0   : > { %v7472_v12 = vrot.slane %v3716_v42, 5  ;;  %v3722_v0 = vrot.slane %v3720_v7, 4  ;;  %v3736_v15 = vrot.slane %v3734_v61, 5  ;;  %v6497_v7 = vld [vmem:[%s6583_s25 + $0x94] sm:$0xf]  ;;  %v1311_v21 = vrot.slane %v6498_v62, 5 }
  0xd1   : > { %v1308_v63 = vrot.slane %v6497_v7, 5  ;;  %v3726_v57 = vshll.u32 %v7469_v35, 16  ;;  %v3755_v36 = vshrl.u32 %v5482_v24, 16  ;;  %v3768_v61 = vshrl.u32 %v7475_v8, 16  ;;  %v6499_v7 = vld [vmem:[%s6583_s25 + $0xa0] sm:$0xf] }
  0xd2   : > { %v1315_v55 = vrot.slane %v6499_v7, 5  ;;  %v3700_v62 = vrot.slane %v3699_v45, 4  ;;  %v1322_v45 = vrot.slane %v6965_v30, 5  ;;  %v7520_v7 = vld [vmem:[%s6583_s25 + $0x68] sm:$0x1]  ;;  %v6445_v30 = vld [vmem:[%s6583_s25 + $0xb4] sm:$0xff]  }
  0xd3   : > { %v3757_v19 = vrot.slane %v3755_v36, 4  ;;  %8402 = vst [vmem:[#allocation8_spill] sm:$0xff] %v7520_v7  ;;  %v6446_v36 = vld [vmem:[%s6583_s25 + $0xc0] sm:$0xff]  }
  0xd4   : > { %6058 = vmatmul.mubr.msk.bf16.gmra.mrb[16].mxu0 %vm666_vm3, %v6441_v41  ;;  %v3702_v41 = vshll.u32 %v7435_v22, 16  ;;  %v3758_v22 = vshll.u32 %v5482_v24, 16  ;;  %v3750_v24 = vshll.u32 %v7493_v37, 16 }
  0xd5   : > { %5906 = vmatmul.mubr.msk.bf16.vlgmr.msra.gmra.mrb[0].mxu1 %vm666_vm3, %v8397_v60  ;;  %6061 = vmatprep.mubr.msk.bf16.mxu0 %vm666_vm3, %v6442_v59  ;;  %v3689_v59 = vor.u32 %v3688_v34, %v3685_v54  ;;  %v7480_v54 = vld [vmem:[%s8371_s1 + $0x20] sm:$0xff]   ;;  %v3733_v60 = vrot.slane %v3731_v13, 4  ;;  %v3764_v13 = vshll.u32 %v7475_v8, 16 }
  0xd6   : > { %5938 = vmatpush3.bf16.msra.mxu1 %v7078_v39  ;;  %5909 = vmatprep.mubr.msk.bf16.mxu1 %vm666_vm3, %v8398_v53  ;;  %v3712_v39 = vrot.slane %v3710_v16, 5  ;;  %8399 = vst [vmem:[#allocation7_spill] sm:$0xff] %v7480_v54  ;;  %v6443_v34 = vld [vmem:[%s6583_s25 + $0x9c] sm:$0xff]   ;;  %v7485_v53 = vrot.slane %v3740_v58, 5  ;;  %v3746_v16 = vrot.slane %v3744_v25, 4  ;;  %v7487_v42 = vrot.slane %v3702_v41, 5 }
  0xd7   : > { %6141 = vmatprep.subr.bf16.mxu1 %v7480_v54  ;;  %v7498_v58 = vrot.slane %v3689_v59, 4  ;;  %v3723_v41 = vor.u32 %v3722_v0, %v7472_v12  ;;  %v3737_v54 = vor.u32 %v3736_v15, %v3733_v60  ;;  %v1310_v59 = vrot.slane %v1308_v63, 4  ;;  %v1185_v0 = vld [vmem:[%s6583_s25 + $0xa8] sm:$0xe] }
  0xd8   : > { %v3713_v25 = vor.u32 %v3712_v39, %v3709_v31  ;;  %v3747_v1 = vor.u32 %v3746_v16, %v7485_v53  ;;  %v3728_v31 = vrot.slane %v3726_v57, 5  ;;  %v5142_v39 = vrot.slane %v1184_v38, 9  ;;  %v6500_v57 = vld [vmem:[%s6583_s25 + $0xa4] sm:$0x1] }
  0xd9   : > { %v3760_v26 = vrot.slane %v3758_v22, 5  ;;  %v7516_v60 = vrot.slane %v3764_v13, 5  ;;  %v3724_v15 = vrot.slane %v3723_v41, 4  ;;  %v1317_v16 = vrot.slane %v1315_v55, 4  ;;  %v6501_v41 = vld [vmem:[%s6583_s25 + $0xb0] sm:$0x1] }
  0xda   : > { %v1318_v38 = vrot.slane %v6500_v57, 5  ;;  %v5143_v49 = vrot.slane %v1185_v0, 9  ;;  %v3695_v22 = vsel %vm6602_vm2, %v7498_v58, %v7437_v50  ;;  %v8403_v13 = vrot.slane %v7440_v40, 9  ;;  %v1186_v50 = vld [vmem:[%s6583_s25 + $0xb4] sm:$0xe] }
  0xdb   : > { %v1325_v57 = vrot.slane %v6501_v41, 5  ;;  %v3774_v0 = vshll.u32 %v7520_v7, 16  ;;  %v5485_v58 = vld [vmem:[%s6583_s25 + $0x6c] sm:$0xf]  ;;  %v7544_v40 = vsel %vm6824_vm6, %v1310_v59, %v1311_v21  ;;  %v8405_v59 = vcombine.low %v7268_v43, %v7272_v44 }
  0xdc   : > { %6062 = vmatmul.mubr.msk.bf16.gmra.mrb[20].mxu0 %vm666_vm3, %v6443_v34  ;;  %v8401_v34 = vcombine.low %v7234_v17, %v7247_v27  ;;  %v3738_v17 = vrot.slane %v3737_v54, 4  ;;  %v3748_v27 = vrot.slane %v3747_v1, 4  ;;  %v3705_v1 = vsel %vm6602_vm2, %v3700_v62, %v7487_v42 }
  0xdd   : > { %5910 = vmatmul.mubr.msk.bf16.gmra.mrb[4].mxu1 %vm666_vm3, %v8400_v11  ;;  %6065 = vmatprep.mubr.msk.bf16.mxu0 %vm666_vm3, %v6444_v14  ;;  %v3770_v11 = vrot.slane %v3768_v61, 4  ;;  %v3714_v14 = vrot.slane %v3713_v25, 4  ;;  %v7532_v61 = vsel %vm6824_vm6, %v8403_v13, %v1308_v63  ;;  %v1324_v25 = vrot.slane %v1322_v45, 4 }
  0xde   : > { %5913 = vmatprep.mubr.msk.bf16.mxu1 %vm666_vm3, %v8401_v34  ;;  %v3752_v34 = vrot.slane %v3750_v24, 5  ;;  %v3761_v54 = vor.u32 %v3760_v26, %v3757_v19  ;;  %v7551_v42 = vsel %vm6824_vm6, %v5142_v39, %v1315_v55  ;;  %v7555_v62 = vsel %vm6824_vm6, %v1317_v16, %v1318_v38  ;;  %v6502_v39 = vld [vmem:[%s6583_s25 + $0xb8] sm:$0xf] }
  0xdf   : > { %v3771_v24 = vor.u32 %v3770_v11, %v7516_v60  ;;  %v3719_v63 = vsel %vm6602_vm2, %v3714_v14, %v7472_v12  ;;  %v3729_v19 = vsel %vm6602_vm2, %v3724_v15, %v3728_v31  ;;  %v3743_v21 = vsel %vm6602_vm2, %v3738_v17, %v7485_v53  ;;  %v7604_v17 = vld [vmem:[%s6583_s25 + $0x7c] sm:$0xf] }
  0xe0   : > { %v3753_v12 = vsel %vm6602_vm2, %v3748_v27, %v3752_v34  ;;  %v7567_v55 = vsel %vm6824_vm6, %v5143_v49, %v1322_v45  ;;  %v7576_v31 = vsel %vm6824_vm6, %v1324_v25, %v1325_v57  ;;  %v5144_v53 = vrot.slane %v1186_v50, 9  ;;  %v7580_v49 = vld [vmem:[%s6583_s25 + $0x70] sm:$0xf]  ;;  %8409 = vst [vmem:[#allocation12_spill] sm:$0xff] %v7604_v17  ;;  %v5491_v27 = vld [vmem:[%s6583_s25 + $0x84] sm:$0xf] }
  0xe1   : > { %8404 = vst [vmem:[#allocation9_spill] sm:$0xff] %v7567_v55  ;;  %8406 = vst [vmem:[#allocation10_spill] sm:$0xff] %v7576_v31  ;;  %v1329_v26 = vrot.slane %v6502_v39, 5  ;;  %v3779_v45 = vshrl.u32 %v5485_v58, 16  ;;  %v8408_v43 = vcombine.low %v7276_v47, %v7304_v3  ;;  %v7586_v44 = vcombine.low %v3695_v22, %v3705_v1  ;;  %v5488_v3 = vld [vmem:[%s6583_s25 + $0x78] sm:$0xf] }
  0xe2   : > { %8407 = vst [vmem:[#allocation11_spill] sm:$0xff] %v7580_v49  ;;  %v7588_v11 = vrot.slane %v3761_v54, 4  ;;  %v7590_v14 = vrot.slane %v3771_v24, 4  ;;  %v7592_v15 = vrot.slane %v3774_v0, 5  ;;  %v7596_v38 = vcombine.low %v3719_v63, %v3729_v19  ;;  %v6447_v34 = vld [vmem:[%s6583_s25 + $0xcc] sm:$0xff]  }
  0xe3   : > { %v7600_v47 = vcombine.low %v3743_v21, %v3753_v12  ;;  %v7611_v22 = vld [vmem:[%s6583_s25 + $0xbc] sm:$0x1]  ;;  %v3782_v25 = vshll.u32 %v5485_v58, 16  ;;  %v3788_v41 = vshll.u32 %v7580_v49, 16  ;;  %v7616_v57 = vld [vmem:[%s6583_s25 + $0x88] sm:$0xf]  ;;  %v7620_v1 = vsel %vm6824_vm6, %v5144_v53, %v1329_v26 }
  0xe4   : > { %6066 = vmatmul.mubr.msk.bf16.gmra.mrb[24].mxu0 %vm666_vm3, %v6445_v30  ;;  %8410 = vst [vmem:[#allocation13_spill] sm:$0xff] %v7616_v57  ;;  %v7622_v54 = vrot.slane %v1329_v26, 4  ;;  %v7624_v24 = vrot.slane %v3779_v45, 4  ;;  %v3792_v0 = vshrl.u32 %v7580_v49, 16  ;;  %v5494_v50 = vld [vmem:[%s6583_s25 + $0x90] sm:$0xf]  ;;  %v8413_v58 = vcombine.low %v7311_v51, %v7345_v33 }
  0xe5   : > { %5914 = vmatmul.mubr.msk.bf16.gmra.mrb[8].mxu1 %vm666_vm3, %v8405_v59  ;;  %6069 = vmatprep.mubr.msk.bf16.mxu0 %vm666_vm3, %v6446_v36  ;;  %v3803_v19 = vshrl.u32 %v5488_v3, 16  ;;  %v3806_v21 = vshll.u32 %v5488_v3, 16  ;;  %v7637_v12 = vld [vmem:[%s6583_s25 + $0x94] sm:$0xf]  ;;  %v3812_v53 = vshll.u32 %v7604_v17, 16  ;;  %v3816_v39 = vshrl.u32 %v7604_v17, 16 }
  0xe6   : > { %5917 = vmatprep.mubr.msk.bf16.mxu1 %vm666_vm3, %v8408_v43  ;;  %8411 = vst [vmem:[#allocation14_spill] sm:$0xff] %v7637_v12  ;;  %v7640_v59 = vld [vmem:[%s6583_s25 + $0x74] sm:$0x1]  ;;  %v3827_v26 = vshrl.u32 %v5491_v27, 16  ;;  %v3830_v45 = vshll.u32 %v5491_v27, 16  ;;  %v3836_v43 = vshll.u32 %v7616_v57, 16 }
  0xe7   : > { %8412 = vst [vmem:[#allocation15_spill] sm:$0xff] %v7640_v59  ;;  %v3840_v36 = vshrl.u32 %v7616_v57, 16  ;;  %v3851_v30 = vshrl.u32 %v5494_v50, 16  ;;  %v3854_v3 = vshll.u32 %v5494_v50, 16  ;;  %v3784_v63 = vrot.slane %v3782_v25, 5 }
  0xe8   : > { %v7653_v27 = vrot.slane %v3788_v41, 5  ;;  %v3860_v16 = vshll.u32 %v7637_v12, 16  ;;  %v3864_v13 = vshrl.u32 %v7637_v12, 16  ;;  %v8414_v50 = vcombine.low %v7340_v48, %v7353_v23  ;;  %v5497_v41 = vld [vmem:[%s6583_s25 + $0x9c] sm:$0xf] }
  0xe9   : > { %v3794_v51 = vrot.slane %v3792_v0, 4  ;;  %v3798_v33 = vshll.u32 %v7640_v59, 16  ;;  %v3808_v25 = vrot.slane %v3806_v21, 5  ;;  %v3818_v57 = vrot.slane %v3816_v39, 4  ;;  %v7669_v17 = vld [vmem:[%s6583_s25 + $0x8c] sm:$0x1] }
  0xea   : > { %v3829_v49 = vrot.slane %v3827_v26, 4  ;;  %v3832_v12 = vrot.slane %v3830_v45, 5  ;;  %v7671_v31 = vrot.slane %v3836_v43, 5  ;;  %v3842_v48 = vrot.slane %v3840_v36, 4  ;;  %v7677_v0 = vld [vmem:[%s6583_s25 + $0x98] sm:$0x1] }
  0xeb   : > { %v3853_v23 = vrot.slane %v3851_v30, 4  ;;  %v3856_v55 = vrot.slane %v3854_v3, 5  ;;  %v7679_v59 = vrot.slane %v3860_v16, 5  ;;  %v3875_v21 = vshrl.u32 %v5497_v41, 16 }
  0xec   : > { %6070 = vmatmul.mubr.msk.bf16.gmra.mrb[28].mxu0 %vm666_vm3, %v6447_v34  ;;  %v7656_v34 = vld [vmem:[%s6583_s25 + $0x80] sm:$0x1]  ;;  %v3785_v39 = vor.u32 %v3784_v63, %v7624_v24  ;;  %v3795_v7 = vor.u32 %v3794_v51, %v7653_v27  ;;  %v3833_v30 = vor.u32 %v3832_v12, %v3829_v49  ;;  %v3843_v16 = vor.u32 %v3842_v48, %v7671_v31 }
  0xed   : > { %5918 = vmatmul.mubr.msk.bf16.gmra.mrb[12].mxu1 %vm666_vm3, %v8413_v58  ;;  %6075 = vmatprep.mubr.msk.bf16.mxu0 %vm666_vm3, %v7395_v52  ;;  %v3805_v52 = vrot.slane %v3803_v19, 4  ;;  %v7666_v58 = vrot.slane %v3812_v53, 5  ;;  %v3866_v19 = vrot.slane %v3864_v13, 4  ;;  %v3878_v53 = vshll.u32 %v5497_v41, 16 }
  0xee   : > { %5921 = vmatprep.mubr.msk.bf16.mxu1 %vm666_vm3, %v8414_v50  ;;  %v7674_v50 = vld [vmem:[%s6583_s25 + $0xa0] sm:$0xf]  ;;  %v3822_v45 = vshll.u32 %v7656_v34, 16  ;;  %v3846_v13 = vshll.u32 %v7669_v17, 16  ;;  %v3857_v24 = vor.u32 %v3856_v55, %v3853_v23  ;;  %v3870_v63 = vshll.u32 %v7677_v0, 16 }
  0xef   : > { %v3809_v26 = vor.u32 %v3808_v25, %v3805_v52  ;;  %v3819_v36 = vor.u32 %v3818_v57, %v7666_v58  ;;  %v3884_v43 = vshll.u32 %v7674_v50, 16  ;;  %v3888_v3 = vshrl.u32 %v7674_v50, 16 }
  0xf0   : > { %v8415_v51 = vcombine.low %v7357_v29, %v7361_v9  ;;  %v3800_v49 = vrot.slane %v3798_v33, 5  ;;  %v3867_v57 = vor.u32 %v3866_v19, %v7679_v59  ;;  %v3877_v12 = vrot.slane %v3875_v21, 4 }
  0xf1   : > { %v8416_v52 = vcombine.low %v7407_v10, %v7411_v6  ;;  %v3786_v55 = vrot.slane %v3785_v39, 4  ;;  %v3796_v29 = vrot.slane %v3795_v7, 4  ;;  %v3810_v9 = vrot.slane %v3809_v26, 4 }
  0xf2   : > { %v3824_v25 = vrot.slane %v3822_v45, 5  ;;  %v3820_v33 = vrot.slane %v3819_v36, 4  ;;  %v3834_v41 = vrot.slane %v3833_v30, 4  ;;  %v7705_v48 = vrot.slane %v3884_v43, 5 }
  0xf3   : > { %v3890_v23 = vrot.slane %v3888_v3, 4  ;;  %v3844_v19 = vrot.slane %v3843_v16, 4  ;;  %v3848_v21 = vrot.slane %v3846_v13, 5  ;;  %v3858_v10 = vrot.slane %v3857_v24, 4 }
  0xf4   : > { %6076 = vmatmul.mubr.msk.bf16.vlgmr.msra.gmra.mrb[0].mxu0 %vm666_vm3, %v7452_v56  ;;  %v3880_v56 = vrot.slane %v3878_v53, 5  ;;  %v3872_v6 = vrot.slane %v3870_v63, 5  ;;  %v7708_v53 = vld [vmem:[%s6583_s25 + $0xa4] sm:$0x1]  ;;  %v8417_v26 = vrot.slane %v7611_v22, 5  ;;  %v3791_v36 = vsel %vm6602_vm2, %v3786_v55, %v7653_v27 }
  0xf5   : > { %5922 = vmatmul.mubr.msk.bf16.gmra.mrb[16].mxu1 %vm666_vm3, %v8415_v51  ;;  %6108 = vmatpush3.bf16.msra.mxu0 %v7179_v46  ;;  %v5500_v46 = vld [vmem:[%s6583_s25 + $0xa8] sm:$0xf]  ;;  %v3868_v51 = vrot.slane %v3867_v57, 4  ;;  %v3801_v30 = vsel %vm6602_vm2, %v3796_v29, %v3800_v49  ;;  %v3815_v43 = vsel %vm6602_vm2, %v3810_v9, %v7666_v58  ;;  %v3825_v22 = vsel %vm6602_vm2, %v3820_v33, %v3824_v25 }
  0xf6   : > { %5925 = vmatprep.mubr.msk.bf16.mxu1 %vm666_vm3, %v8416_v52  ;;  %6079 = vmatprep.mubr.msk.bf16.mxu0 %vm666_vm3, %v7456_v4  ;;  %v3881_v52 = vor.u32 %v3880_v56, %v3877_v12  ;;  %v7711_v4 = vld [vmem:[%s6583_s25 + $0xac] sm:$0xf]  ;;  %v3899_v7 = vshrl.u32 %v5500_v46, 16  ;;  %v3902_v39 = vshll.u32 %v5500_v46, 16  ;;  %v7718_v45 = vsel %vm6824_vm6, %v7622_v54, %v8417_v26 }
  0xf7   : > { %v3839_v54 = vsel %vm6602_vm2, %v3834_v41, %v7671_v31  ;;  %v3891_v3 = vor.u32 %v3890_v23, %v7705_v48  ;;  %v3894_v16 = vshll.u32 %v7708_v53, 16  ;;  %v3849_v27 = vsel %vm6602_vm2, %v3844_v19, %v3848_v21  ;;  %v5551_v31 = vld [vmem:[%s6583_s25 + $0x48] sm:$0xe]  ;;  %v5554_v26 = vld [vmem:[%s6583_s25 + $0x6c] sm:$0xe] }
  0xf8   : > { %v3863_v58 = vsel %vm6602_vm2, %v3858_v10, %v7679_v59  ;;  %v3908_v13 = vshll.u32 %v7711_v4, 16  ;;  %v3912_v24 = vshrl.u32 %v7711_v4, 16  ;;  %v8418_v63 = vcombine.low %v7422_v32, %v7432_v5  ;;  %v7754_v59 = vld [vmem:[%s6583_s25 + $0xb0] sm:$0x1] }
  0xf9   : > { %v3882_v49 = vrot.slane %v3881_v52, 4  ;;  %v3901_v57 = vrot.slane %v3899_v7, 4  ;;  %v3904_v12 = vrot.slane %v3902_v39, 5  ;;  %v8419_v56 = vcombine.low %v7532_v61, %v7544_v40  ;;  %v5503_v40 = vld [vmem:[%s6583_s25 + $0xb4] sm:$0xf] }
  0xfa   : > { %v8420_v32 = vsel %vm6602_vm2, %v7590_v14, %v7592_v15  ;;  %v8421_v5 = vsel %vm6602_vm2, %v7588_v11, %v7516_v60  ;;  %v5162_v55 = vcombine.low %v7620_v1, %v7718_v45  ;;  %v7772_v29 = vcombine.low %v3791_v36, %v3801_v30  ;;  %v5552_v15 = vld [vmem:[%s6583_s25 + $0x54] sm:$0xe] }
  0xfb   : > { %v7774_v61 = vcombine.low %v3815_v43, %v3825_v22  ;;  %v7777_v9 = vcombine.low %v3839_v54, %v3849_v27  ;;  %v3892_v25 = vrot.slane %v3891_v3, 4  ;;  %v3896_v46 = vrot.slane %v3894_v16, 5  ;;  %v8423_v16 = vld [vmem:[#allocation8_spill] sm:$0xff] }
  0xfc   : > { %6080 = vmatmul.mubr.msk.bf16.gmra.mrb[4].mxu0 %vm666_vm3, %v7586_v44  ;;  %v3873_v44 = vsel %vm6602_vm2, %v3868_v51, %v3872_v6  ;;  %v5567_v14 = vrot.slane %v5551_v31, 9  ;;  %v7782_v60 = vrot.slane %v3908_v13, 5  ;;  %v3914_v11 = vrot.slane %v3912_v24, 4  ;;  %v5553_v6 = vld [vmem:[%s6583_s25 + $0x60] sm:$0xe]  ;;  %v8424_v13 = vld [vmem:[#allocation9_spill] sm:$0xff] }
  0xfd   : > { %5926 = vmatmul.mubr.msk.bf16.gmra.mrb[20].mxu1 %vm666_vm3, %v8418_v63  ;;  %6083 = vmatprep.mubr.msk.bf16.mxu0 %vm666_vm3, %v7596_v38  ;;  %v5520_v38 = vcombine.low %v8421_v5, %v8420_v32  ;;  %v7780_v33 = vcombine.low %v3863_v58, %v3873_v44  ;;  %v3918_v41 = vshll.u32 %v7754_v59, 16  ;;  %v3887_v23 = vsel %vm6602_vm2, %v3882_v49, %v7705_v48  ;;  %v8425_v24 = vld [vmem:[#allocation10_spill] sm:$0xff]  ;;  %v8427_v63 = vld [vmem:[#allocation11_spill] sm:$0xff] }
  0xfe   : > { %5929 = vmatprep.mubr.msk.bf16.mxu1 %vm666_vm3, %v8419_v56  ;;  %v3905_v19 = vor.u32 %v3904_v12, %v3901_v57  ;;  %v4386_v21 = vrot.slane %v7415_v20, 5  ;;  %v4389_v10 = vrot.slane %v7469_v35, 5  ;;  %v3923_v51 = vshrl.u32 %v5503_v40, 16  ;;  %v7804_v35 = vld [vmem:[%s6583_s25 + $0xb8] sm:$0xf]  ;;  %v8428_v49 = vld [vmem:[#allocation15_spill] sm:$0xff] }
  0xff   : > { %v5568_v52 = vrot.slane %v5552_v15, 9  ;;  %v4393_v7 = vrot.slane %v7426_v18, 5  ;;  %v4396_v39 = vrot.slane %v7493_v37, 5  ;;  %v3897_v36 = vsel %vm6602_vm2, %v3892_v25, %v3896_v46  ;;  %v5506_v12 = vld [vmem:[%s6583_s25 + $0xc0] sm:$0xf] }
 0x100   : > { %v3926_v30 = vshll.u32 %v5503_v40, 16  ;;  %v7798_v48 = vsel %vm6824_vm6, %v5567_v14, %v4386_v21  ;;  %v4388_v43 = vrot.slane %v4386_v21, 4  ;;  %v3915_v20 = vor.u32 %v3914_v11, %v7782_v60  ;;  %v5555_v14 = vld [vmem:[%s6583_s25 + $0x78] sm:$0xe] }
 0x101   : > { %v7808_v37 = vsel %vm6824_vm6, %v5568_v52, %v4393_v7  ;;  %v4395_v18 = vrot.slane %v4393_v7, 4  ;;  %v5569_v22 = vrot.slane %v5553_v6, 9  ;;  %v8422_v54 = vcombine.low %v7551_v42, %v7555_v62  ;;  %v6449_v6 = vld [vmem:[%s6583_s25 + $0xc] sm:$0xff]  }
 0x102   : > { %v4400_v3 = vrot.slane %v7475_v8, 5  ;;  %v4403_v27 = vrot.slane %v8423_v16, 5  ;;  %v5570_v58 = vrot.slane %v5554_v26, 9  ;;  %v8426_v31 = vcombine.low %v8424_v13, %v8425_v24  ;;  %v8430_v13 = vld [vmem:[#allocation3_spill] sm:$0xff]  ;;  %v8431_v24 = vld [vmem:[#allocation4_spill] sm:$0xff] }
 0x103   : > { %v7829_v62 = vsel %vm6824_vm6, %v4395_v18, %v4396_v39  ;;  %v4407_v44 = vrot.slane %v8427_v63, 5  ;;  %v4410_v8 = vrot.slane %v8428_v49, 5  ;;  %v3932_v57 = vshll.u32 %v7804_v35, 16  ;;  %v7866_v39 = vld [vmem:[%s6583_s25 + $0xc4] sm:$0xf]  ;;  %v8432_v49 = vld [vmem:[#allocation13_spill] sm:$0xff] }
 0x104   : > { %6084 = vmatmul.mubr.msk.bf16.gmra.mrb[8].mxu0 %vm666_vm3, %v7600_v47  ;;  %v7817_v47 = vsel %vm6824_vm6, %v4388_v43, %v4389_v10  ;;  %v5586_v56 = vcombine.low %v7808_v37, %v7829_v62  ;;  %v7839_v32 = vsel %vm6824_vm6, %v5569_v22, %v4400_v3  ;;  %v4402_v5 = vrot.slane %v4400_v3, 4  ;;  %v5274_v10 = vld [vmem:[%s6583_s25 + $0x78] sm:$0xf]  ;;  %v8429_v22 = vld [vmem:[#allocation12_spill] sm:$0xff]  ;;  %v6514_v62 = vld [vmem:[%s6583_s25 + $0xa0] sm:$0xf] }
 0x105   : > { %5930 = vmatmul.mubr.msk.bf16.gmra.mrb[24].mxu1 %vm666_vm3, %v8422_v54  ;;  %6087 = vmatprep.mubr.msk.bf16.mxu0 %vm666_vm3, %v5520_v38  ;;  %v5585_v42 = vcombine.low %v7798_v48, %v7817_v47  ;;  %v7841_v38 = vrot.slane %v3918_v41, 5  ;;  %v3936_v40 = vshrl.u32 %v7804_v35, 16  ;;  %v7846_v25 = vsel %vm6824_vm6, %v5570_v58, %v4407_v44 }
 0x106   : > { %5933 = vmatprep.mubr.msk.bf16.mxu1 %vm666_vm3, %v8426_v31  ;;  %v4409_v46 = vrot.slane %v4407_v44, 4  ;;  %v7849_v15 = vcombine.low %v3887_v23, %v3897_v36  ;;  %v7851_v11 = vrot.slane %v3905_v19, 4  ;;  %v7853_v21 = vrot.slane %v3923_v51, 4 }
 0x107   : > { %v7857_v41 = vsel %vm6824_vm6, %v4402_v5, %v4403_v27  ;;  %v7861_v52 = vrot.slane %v3915_v20, 4  ;;  %v7863_v7 = vrot.slane %v3926_v30, 5  ;;  %v7874_v51 = vrot.slane %v3932_v57, 5  ;;  %v5556_v20 = vld [vmem:[%s6583_s25 + $0x84] sm:$0xe] }
 0x108   : > { %v5587_v23 = vcombine.low %v7839_v32, %v7857_v41  ;;  %v7872_v19 = vsel %vm6824_vm6, %v4409_v46, %v4410_v8  ;;  %v3947_v26 = vshrl.u32 %v5506_v12, 16  ;;  %v5571_v43 = vrot.slane %v5555_v14, 9  ;;  %v7882_v30 = vld [vmem:[%s6583_s25 + $0xbc] sm:$0x1]  ;;  %v5509_v5 = vld [vmem:[%s6583_s25 + $0xcc] sm:$0xf] }
 0x109   : > { %v5588_v36 = vcombine.low %v7846_v25, %v7872_v19  ;;  %v3950_v18 = vshll.u32 %v5506_v12, 16  ;;  %v4414_v54 = vrot.slane %v8429_v22, 5  ;;  %v4417_v3 = vrot.slane %v7656_v34, 5  ;;  %v6450_v14 = vld [vmem:[%s6583_s25 + $0x18] sm:$0xff]   ;;  %v5557_v22 = vld [vmem:[%s6583_s25 + $0x90] sm:$0xe] }
 0x10a   : > { %v2260_v16 = vshrl.u32 %v5274_v10, 16  ;;  %v3956_v27 = vshll.u32 %v7866_v39, 16  ;;  %v2263_v58 = vshll.u32 %v5274_v10, 16  ;;  %v2282_v34 = vsel %vm6602_vm2, %v8431_v24, %v8430_v13  ;;  %v8433_v24 = vld [vmem:[#allocation14_spill] sm:$0xff]  ;;  %v6518_v19 = vld [vmem:[%s6583_s25 + $0xac] sm:$0xf] }
 0x10b   : > { %v7901_v1 = vsel %vm6824_vm6, %v5571_v43, %v4414_v54  ;;  %v4416_v45 = vrot.slane %v4414_v54, 4  ;;  %v3938_v31 = vrot.slane %v3936_v40, 4  ;;  %v3942_v63 = vshll.u32 %v7882_v30, 16 }
 0x10c   : > { %6088 = vmatmul.mubr.msk.bf16.gmra.mrb[12].mxu0 %vm666_vm3, %v7772_v29  ;;  %v3960_v29 = vshrl.u32 %v7866_v39, 16  ;;  %v2265_v44 = vrot.slane %v2263_v58, 5  ;;  %v4421_v8 = vrot.slane %v8432_v49, 5  ;;  %v3911_v57 = vsel %vm6602_vm2, %v7851_v11, %v7782_v60  ;;  %v6451_v60 = vld [vmem:[%s6583_s25 + $0x24] sm:$0xff]  }
 0x10d   : > { %5934 = vmatmul.mubr.msk.bf16.gmra.mrb[28].mxu1 %vm666_vm3, %v5162_v55  ;;  %6091 = vmatprep.mubr.msk.bf16.mxu0 %vm666_vm3, %v7774_v61  ;;  %v2262_v55 = vrot.slane %v2260_v16, 4  ;;  %v5572_v61 = vrot.slane %v5556_v20, 9  ;;  %v3929_v12 = vor.u32 %v7863_v7, %v7853_v21  ;;  %v7914_v46 = vsel %vm6824_vm6, %v4416_v45, %v4417_v3  ;;  %v7925_v7 = vld [vmem:[%s6583_s25 + $0xd0] sm:$0xf] }
 0x10e   : > { %5939 = vmatprep.mubr.msk.bf16.mxu1 %vm666_vm3, %v6449_v6  ;;  %v4424_v40 = vrot.slane %v7669_v17, 5  ;;  %v3949_v10 = vrot.slane %v3947_v26, 4  ;;  %v3952_v6 = vrot.slane %v3950_v18, 5  ;;  %v5589_v43 = vcombine.low %v7901_v1, %v7914_v46  ;;  %v7937_v18 = vld [vmem:[%s6583_s25 + $0xc8] sm:$0x1] }
 0x10f   : > { %v2266_v20 = vor.u32 %v2265_v44, %v2262_v55  ;;  %v7922_v11 = vrot.slane %v3956_v27, 5  ;;  %v3962_v21 = vrot.slane %v3960_v29, 4  ;;  %v7929_v54 = vsel %vm6824_vm6, %v5572_v61, %v4421_v8  ;;  %v8434_v55 = vld [vmem:[#allocation2_spill] sm:$0xff] }
 0x110   : > { %v4423_v3 = vrot.slane %v4421_v8, 4  ;;  %v3921_v17 = vsel %vm6602_vm2, %v7861_v52, %v7841_v38  ;;  %v3939_v26 = vor.u32 %v3938_v31, %v7874_v51  ;;  %v3971_v16 = vshrl.u32 %v5509_v5, 16  ;;  %v8435_v31 = vld [vmem:[#allocation7_spill] sm:$0xff] }
 0x111   : > { %v2267_v27 = vrot.slane %v2266_v20, 4  ;;  %v3974_v29 = vshll.u32 %v5509_v5, 16  ;;  %v5573_v13 = vrot.slane %v5557_v22, 9  ;;  %v4428_v45 = vrot.slane %v8433_v24, 5 }
 0x112   : > { %v7943_v58 = vsel %vm6824_vm6, %v4423_v3, %v4424_v40  ;;  %v3980_v38 = vshll.u32 %v7925_v7, 16  ;;  %v3984_v52 = vshrl.u32 %v7925_v7, 16  ;;  %v3953_v44 = vor.u32 %v3952_v6, %v3949_v10  ;;  %v5558_v10 = vld [vmem:[%s6583_s25 + $0x9c] sm:$0xe]  ;;  %v6452_v6 = vld [vmem:[%s6583_s25 + $0x30] sm:$0xff]  }
 0x113   : > { %v5590_v61 = vcombine.low %v7929_v54, %v7943_v58  ;;  %v3966_v49 = vshll.u32 %v7937_v18, 16  ;;  %v3944_v5 = vrot.slane %v3942_v63, 5  ;;  %v7964_v40 = vsel %vm6824_vm6, %v5573_v13, %v4428_v45  ;;  %v6453_v13 = vld [vmem:[%s6583_s25 + $0x3c] sm:$0xff]  }
 0x114   : > { %6092 = vmatmul.mubr.msk.bf16.gmra.mrb[16].mxu0 %vm666_vm3, %v7777_v9  ;;  %v2272_v9 = vsel %vm6602_vm2, %v2267_v27, %v8434_v55  ;;  %v4431_v20 = vrot.slane %v7677_v0, 5  ;;  %v5526_v22 = vcombine.low %v3911_v57, %v3921_v17  ;;  %v3930_v3 = vrot.slane %v3929_v12, 4 }
 0x115   : > { %5940 = vmatmul.mubr.msk.bf16.vlgmr.msra.gmra.mrb[0].mxu1 %vm666_vm3, %v6450_v14  ;;  %6095 = vmatprep.mubr.msk.bf16.mxu0 %vm666_vm3, %v7780_v33  ;;  %v3963_v33 = vor.u32 %v3962_v21, %v7922_v11  ;;  %v7960_v8 = vcombine.low %v2272_v9, %v2282_v34  ;;  %v4430_v14 = vrot.slane %v4428_v45, 4  ;;  %v3940_v27 = vrot.slane %v3939_v26, 4  ;;  %v7970_v21 = vld [vmem:[%s6583_s25 + $0xd4] sm:$0x1]  ;;  %v5547_v9 = vld [vmem:[%s6583_s25 + $0x18] sm:$0xe] }
 0x116   : > { %6142 = vmatpush3.bf16.msra.mxu1 %v8435_v31  ;;  %5943 = vmatprep.mubr.msk.bf16.mxu1 %vm666_vm3, %v6451_v60  ;;  %v3973_v60 = vrot.slane %v3971_v16, 4  ;;  %v3976_v24 = vrot.slane %v3974_v29, 5  ;;  %v7972_v34 = vrot.slane %v3980_v38, 5  ;;  %v3986_v55 = vrot.slane %v3984_v52, 4 }
 0x117   : > { %v7976_v63 = vsel %vm6824_vm6, %v4430_v14, %v4431_v20  ;;  %v3954_v45 = vrot.slane %v3953_v44, 4  ;;  %v3964_v0 = vrot.slane %v3963_v33, 4  ;;  %v3968_v57 = vrot.slane %v3966_v49, 5  ;;  %v6504_v33 = vld [vmem:[%s6583_s25 + $0x1c] sm:$0xf] }
 0x118   : > { %v5591_v12 = vcombine.low %v7964_v40, %v7976_v63  ;;  %v5574_v17 = vrot.slane %v5558_v10, 9  ;;  %v4435_v26 = vrot.slane %v7674_v50, 5  ;;  %v3935_v16 = vsel %vm6602_vm2, %v3930_v3, %v7874_v51  ;;  %v5559_v14 = vld [vmem:[%s6583_s25 + $0xa8] sm:$0xe] }
 0x119   : > { %v3945_v29 = vsel %vm6602_vm2, %v3940_v27, %v3944_v5  ;;  %v3990_v38 = vshll.u32 %v7970_v21, 16  ;;  %v4438_v52 = vrot.slane %v7708_v53, 5  ;;  %v3977_v50 = vor.u32 %v3976_v24, %v3973_v60  ;;  %v6454_v60 = vld [vmem:[%s6583_s25 + $0x48] sm:$0xff]   ;;  %v6505_v24 = vld [vmem:[%s6583_s25 + $0x20] sm:$0x1] }
 0x11a   : > { %v7997_v51 = vsel %vm6824_vm6, %v5574_v17, %v4435_v26  ;;  %v4437_v31 = vrot.slane %v4435_v26, 4  ;;  %v3959_v53 = vsel %vm6602_vm2, %v3954_v45, %v7922_v11  ;;  %v3969_v44 = vsel %vm6602_vm2, %v3964_v0, %v3968_v57  ;;  %v5560_v26 = vld [vmem:[%s6583_s25 + $0xb4] sm:$0xe] }
 0x11b   : > { %v4358_v49 = vrot.slane %v6504_v33, 5  ;;  %v5527_v20 = vcombine.low %v3935_v16, %v3945_v29  ;;  %v5563_v3 = vrot.slane %v5547_v9, 9  ;;  %v5528_v11 = vcombine.low %v3959_v53, %v3969_v44  ;;  %v5549_v33 = vld [vmem:[%s6583_s25 + $0x30] sm:$0xe] }
 0x11c   : > { %6096 = vmatmul.mubr.msk.bf16.gmra.mrb[20].mxu0 %vm666_vm3, %v7849_v15  ;;  %v3987_v15 = vor.u32 %v3986_v55, %v7972_v34  ;;  %v8008_v5 = vsel %vm6824_vm6, %v4437_v31, %v4438_v52  ;;  %v3978_v10 = vrot.slane %v3977_v50, 4  ;;  %v4361_v55 = vrot.slane %v6505_v24, 5  ;;  %v5548_v52 = vld [vmem:[%s6583_s25 + $0x24] sm:$0xe]  ;;  %v6506_v50 = vld [vmem:[%s6583_s25 + $0x28] sm:$0xf] }
 0x11d   : > { %5944 = vmatmul.mubr.msk.bf16.gmra.mrb[4].mxu1 %vm666_vm3, %v6452_v6  ;;  %6099 = vmatprep.mubr.msk.bf16.mxu0 %vm666_vm3, %v5526_v22  ;;  %v3992_v22 = vrot.slane %v3990_v38, 5  ;;  %v5592_v27 = vcombine.low %v7997_v51, %v8008_v5  ;;  %v4360_v45 = vrot.slane %v4358_v49, 4  ;;  %v5575_v0 = vrot.slane %v5559_v14, 9  ;;  %v6507_v31 = vld [vmem:[%s6583_s25 + $0x34] sm:$0xf] }
 0x11e   : > { %5947 = vmatprep.mubr.msk.bf16.mxu1 %vm666_vm3, %v6453_v13  ;;  %v3988_v6 = vrot.slane %v3987_v15, 4  ;;  %v6455_v13 = vld [vmem:[%s6583_s25 + $0x54] sm:$0xff]   ;;  %v4442_v57 = vrot.slane %v7711_v4, 5  ;;  %v4445_v17 = vrot.slane %v7754_v59, 5  ;;  %v3983_v4 = vsel %vm6602_vm2, %v3978_v10, %v7972_v34  ;;  %v6456_v10 = vld [vmem:[%s6583_s25 + $0x60] sm:$0xff]  }
 0x11f   : > { %v4359_v38 = vsel %vm6824_vm6, %v5563_v3, %v4358_v49  ;;  %v4365_v15 = vrot.slane %v6506_v50, 5  ;;  %v4362_v9 = vsel %vm6824_vm6, %v4360_v45, %v4361_v55  ;;  %v4372_v53 = vrot.slane %v6507_v31, 5  ;;  %v6508_v3 = vld [vmem:[%s6583_s25 + $0x2c] sm:$0x1]  ;;  %v6523_v51 = vld [vmem:[%s6583_s25 + $0xc8] sm:$0x1] }
 0x120   : > { %v8022_v16 = vsel %vm6824_vm6, %v5575_v0, %v4442_v57  ;;  %v4444_v29 = vrot.slane %v4442_v57, 4  ;;  %v3993_v59 = vsel %vm6602_vm2, %v3988_v6, %v3992_v22  ;;  %v5576_v44 = vrot.slane %v5560_v26, 9  ;;  %v6457_v45 = vld [vmem:[%s6583_s25 + $0x6c] sm:$0xff]   ;;  %v5561_v26 = vld [vmem:[%s6583_s25 + $0xc0] sm:$0xe] }
 0x121   : > { %v4449_v14 = vrot.slane %v7804_v35, 5  ;;  %v5564_v22 = vrot.slane %v5548_v52, 9  ;;  %v5581_v6 = vcombine.low %v4359_v38, %v4362_v9  ;;  %v4367_v24 = vrot.slane %v4365_v15, 4  ;;  %v6509_v35 = vld [vmem:[%s6583_s25 + $0x38] sm:$0x1] }
 0x122   : > { %v8041_v34 = vsel %vm6824_vm6, %v4444_v29, %v4445_v17  ;;  %v5565_v0 = vrot.slane %v5549_v33, 9  ;;  %v4374_v57 = vrot.slane %v4372_v53, 4  ;;  %v4375_v17 = vrot.slane %v6509_v35, 5  ;;  %v8436_v38 = vld [vmem:[#allocation5_spill] sm:$0xff] }
 0x123   : > { %v5593_v49 = vcombine.low %v8022_v16, %v8041_v34  ;;  %v8052_v55 = vsel %vm6824_vm6, %v5576_v44, %v4449_v14  ;;  %v4379_v52 = vrot.slane %v8436_v38, 5  ;;  %v5577_v50 = vrot.slane %v5561_v26, 9  ;;  %v5550_v44 = vld [vmem:[%s6583_s25 + $0x3c] sm:$0xe]  ;;  %v6510_v38 = vld [vmem:[%s6583_s25 + $0x70] sm:$0xf] }
 0x124   : > { %6100 = vmatmul.mubr.msk.bf16.gmra.mrb[24].mxu0 %vm666_vm3, %v5527_v20  ;;  %v5529_v20 = vcombine.low %v3983_v4, %v3993_v59  ;;  %v4366_v4 = vsel %vm6824_vm6, %v5564_v22, %v4365_v15  ;;  %v4373_v9 = vsel %vm6824_vm6, %v5565_v0, %v4372_v53  ;;  %v4376_v31 = vsel %vm6824_vm6, %v4374_v57, %v4375_v17  ;;  %v5271_v22 = vld [vmem:[%s6583_s25 + $0x6c] sm:$0xf] }
 0x125   : > { %5948 = vmatmul.mubr.msk.bf16.gmra.mrb[8].mxu1 %vm666_vm3, %v6454_v60  ;;  %6103 = vmatprep.mubr.msk.bf16.mxu0 %vm666_vm3, %v5528_v11  ;;  %v4368_v60 = vrot.slane %v6508_v3, 5  ;;  %v4452_v11 = vrot.slane %v7882_v30, 5  ;;  %v4456_v33 = vrot.slane %v7866_v39, 5  ;;  %v4459_v15 = vrot.slane %v7937_v18, 5 }
 0x126   : > { %5951 = vmatprep.mubr.msk.bf16.mxu1 %vm666_vm3, %v6455_v13  ;;  %v4451_v13 = vrot.slane %v4449_v14, 4  ;;  %v5562_v14 = vld [vmem:[%s6583_s25 + $0xcc] sm:$0xe]  ;;  %v4381_v53 = vrot.slane %v4379_v52, 4  ;;  %v2236_v0 = vshrl.u32 %v5271_v22, 16  ;;  %v2239_v57 = vshll.u32 %v5271_v22, 16 }
 0x127   : > { %v4369_v59 = vsel %vm6824_vm6, %v4367_v24, %v4368_v60  ;;  %v8083_v3 = vsel %vm6824_vm6, %v5577_v50, %v4456_v33  ;;  %v4458_v60 = vrot.slane %v4456_v33, 4  ;;  %v8437_v24 = vld [vmem:[#allocation6_spill] sm:$0xff]  ;;  %v5578_v18 = vrot.slane %v5562_v14, 9 }
 0x128   : > { %v8059_v29 = vsel %vm6824_vm6, %v4451_v13, %v4452_v11  ;;  %v6458_v11 = vld [vmem:[%s6583_s25 + $0x78] sm:$0xff]   ;;  %v4382_v13 = vrot.slane %v8437_v24, 5  ;;  %v4463_v17 = vrot.slane %v7925_v7, 5  ;;  %v4466_v26 = vrot.slane %v7970_v21, 5 }
 0x129   : > { %v5594_v30 = vcombine.low %v8052_v55, %v8059_v29  ;;  %v8090_v39 = vsel %vm6824_vm6, %v4458_v60, %v4459_v15  ;;  %v2245_v50 = vshll.u32 %v6510_v38, 16  ;;  %v6460_v15 = vld [vmem:[%s6583_s25 + $0x90] sm:$0xff]   ;;  %v6461_v60 = vld [vmem:[%s6583_s25 + $0x9c] sm:$0xff]   ;;  %v2423_v5 = vshll.u32 %v6523_v51, 16 }
 0x12a   : > { %v5595_v35 = vcombine.low %v8083_v3, %v8090_v39  ;;  %v8107_v7 = vsel %vm6824_vm6, %v5578_v18, %v4463_v17  ;;  %v4465_v21 = vrot.slane %v4463_v17, 4  ;;  %v5280_v17 = vld [vmem:[%s6583_s25 + $0x90] sm:$0xf] }
 0x12b   : > { %v2247_v14 = vrot.slane %v2245_v50, 5 }
 0x12c   : > { %6104 = vmatmul.mubr.msk.bf16.gmra.mrb[28].mxu0 %vm666_vm3, %v5529_v20  ;;  %v5582_v20 = vcombine.low %v4366_v4, %v4369_v59  ;;  %v4383_v59 = vsel %vm6824_vm6, %v4381_v53, %v4382_v13 }
 0x12d   : > { %5952 = vmatmul.mubr.msk.bf16.gmra.mrb[12].mxu1 %vm666_vm3, %v6456_v10  ;;  %6109 = vmatprep.mubr.msk.bf16.mxu0 %vm666_vm3, %v5581_v6  ;;  %v5583_v10 = vcombine.low %v4373_v9, %v4376_v31  ;;  %v5566_v6 = vrot.slane %v5550_v44, 9  ;;  %v2249_v9 = vshrl.u32 %v6510_v38, 16  ;;  %v2238_v31 = vrot.slane %v2236_v0, 4  ;;  %v6463_v38 = vld [vmem:[%s6583_s25 + $0xb4] sm:$0xff]  }
 0x12e   : > { %5955 = vmatprep.mubr.msk.bf16.mxu1 %vm666_vm3, %v6457_v45  ;;  %v6459_v45 = vld [vmem:[%s6583_s25 + $0x84] sm:$0xff]   ;;  %v2241_v44 = vrot.slane %v2239_v57, 5 }
 0x12f   : > { %v4380_v4 = vsel %vm6824_vm6, %v5566_v6, %v4379_v52  ;;  %v8111_v52 = vsel %vm6824_vm6, %v4465_v21, %v4466_v26  ;;  %v6511_v6 = vld [vmem:[%s6583_s25 + $0x74] sm:$0x1]  ;;  %v6462_v26 = vld [vmem:[%s6583_s25 + $0xa8] sm:$0xff]   ;;  %v2308_v21 = vshrl.u32 %v5280_v17, 16 }
 0x130   : > { %v5584_v33 = vcombine.low %v4380_v4, %v4383_v59  ;;  %v5596_v22 = vcombine.low %v8107_v7, %v8111_v52  ;;  %v2255_v53 = vshll.u32 %v6511_v6, 16  ;;  %v5283_v59 = vld [vmem:[%s6583_s25 + $0x9c] sm:$0xf]  ;;  %v6515_v6 = vld [vmem:[%s6583_s25 + $0x8c] sm:$0x1] }
 0x132   : > { %v2257_v48 = vrot.slane %v2255_v53, 5  ;;  %v2303_v53 = vshll.u32 %v6515_v6, 16 }
 0x134   : > { %6110 = vmatmul.mubr.msk.bf16.vlgmr.msra.gmra.mrb[0].mxu0 %vm666_vm3, %v5582_v20  ;;  %v2251_v20 = vrot.slane %v2249_v9, 4 }
 0x135   : > { %5956 = vmatmul.mubr.msk.bf16.gmra.mrb[16].mxu1 %vm666_vm3, %v6458_v11  ;;  %6113 = vmatprep.mubr.msk.bf16.mxu0 %vm666_vm3, %v5583_v10  ;;  %v5277_v11 = vld [vmem:[%s6583_s25 + $0x84] sm:$0xf]  ;;  %v2242_v10 = vor.u32 %v2241_v44, %v2238_v31  ;;  %v2311_v31 = vshll.u32 %v5280_v17, 16 }
 0x136   : > { %5959 = vmatprep.mubr.msk.bf16.mxu1 %vm666_vm3, %v6459_v45  ;;  %v2252_v2 = vor.u32 %v2251_v20, %v2247_v14  ;;  %v2284_v24 = vshrl.u32 %v5277_v11, 16  ;;  %v2287_v13 = vshll.u32 %v5277_v11, 16  ;;  %v6512_v45 = vld [vmem:[%s6583_s25 + $0x88] sm:$0xf]  ;;  %v2335_v11 = vshll.u32 %v5283_v59, 16 }
 0x137   : > { %v2293_v18 = vshll.u32 %v6512_v45, 16  ;;  %v2297_v0 = vshrl.u32 %v6512_v45, 16  ;;  %v2243_v57 = vrot.slane %v2242_v10, 4  ;;  %v2341_v10 = vshll.u32 %v6514_v62, 16 }
 0x138   : > { %v2253_v4 = vrot.slane %v2252_v2, 4  ;;  %v2286_v47 = vrot.slane %v2284_v24, 4  ;;  %v2310_v24 = vrot.slane %v2308_v21, 4  ;;  %v2313_v32 = vrot.slane %v2311_v31, 5  ;;  %v6517_v31 = vld [vmem:[%s6583_s25 + $0xa4] sm:$0x1] }
 0x139   : > { %v8131_v50 = vrot.slane %v2293_v18, 5  ;;  %v2299_v9 = vrot.slane %v2297_v0, 4  ;;  %v2248_v44 = vsel %vm6602_vm2, %v2243_v57, %v2247_v14  ;;  %v2337_v45 = vrot.slane %v2335_v11, 5  ;;  %v6464_v18 = vld [vmem:[%s6583_s25 + $0xc0] sm:$0xff]  }
 0x13a   : > { %v2258_v14 = vsel %vm6602_vm2, %v2253_v4, %v2257_v48  ;;  %v8154_v17 = vrot.slane %v2341_v10, 5  ;;  %v5286_v4 = vld [vmem:[%s6583_s25 + $0xa8] sm:$0xf] }
 0x13b   : > { %v2300_v2 = vor.u32 %v2299_v9, %v8131_v50  ;;  %v5305_v0 = vcombine.low %v2248_v44, %v2258_v14  ;;  %v2351_v44 = vshll.u32 %v6517_v31, 16  ;;  %v2359_v25 = vshll.u32 %v5286_v4, 16 }
 0x13c   : > { %6114 = vmatmul.mubr.msk.bf16.gmra.mrb[4].mxu0 %vm666_vm3, %v5584_v33  ;;  %v6513_v33 = vld [vmem:[%s6583_s25 + $0x94] sm:$0xf] }
 0x13d   : > { %5960 = vmatmul.mubr.msk.bf16.gmra.mrb[20].mxu1 %vm666_vm3, %v6460_v15  ;;  %6117 = vmatprep.mubr.msk.bf16.mxu0 %vm666_vm3, %v5585_v42  ;;  %v2289_v42 = vrot.slane %v2287_v13, 5  ;;  %v2317_v15 = vshll.u32 %v6513_v33, 16  ;;  %v2321_v20 = vshrl.u32 %v6513_v33, 16  ;;  %v2301_v48 = vrot.slane %v2300_v2, 4 }
 0x13e   : > { %5963 = vmatprep.mubr.msk.bf16.mxu1 %vm666_vm3, %v6461_v60  ;;  %v2332_v60 = vshrl.u32 %v5283_v59, 16  ;;  %v6516_v59 = vld [vmem:[%s6583_s25 + $0x98] sm:$0x1]  ;;  %v2356_v33 = vshrl.u32 %v5286_v4, 16  ;;  %v5292_v4 = vld [vmem:[%s6583_s25 + $0xc0] sm:$0xf] }
 0x13f   : > { %v2290_v37 = vor.u32 %v2289_v42, %v2286_v47  ;;  %v8151_v41 = vrot.slane %v2317_v15, 5  ;;  %v2305_v47 = vrot.slane %v2303_v53, 5  ;;  %v2314_v42 = vor.u32 %v2313_v32, %v2310_v24  ;;  %v5289_v15 = vld [vmem:[%s6583_s25 + $0xb4] sm:$0xf] }
 0x140   : > { %v2334_v13 = vrot.slane %v2332_v60, 4  ;;  %v2369_v60 = vshrl.u32 %v6518_v19, 16  ;;  %v2380_v1 = vshrl.u32 %v5289_v15, 16  ;;  %v2383_v46 = vshll.u32 %v5289_v15, 16 }
 0x141   : > { %v2291_v57 = vrot.slane %v2290_v37, 4  ;;  %v2306_v14 = vsel %vm6602_vm2, %v2301_v48, %v2305_v47  ;;  %v2315_v37 = vrot.slane %v2314_v42, 4  ;;  %v2353_v53 = vrot.slane %v2351_v44, 5 }
 0x142   : > { %v2338_v21 = vor.u32 %v2337_v45, %v2334_v13  ;;  %v2358_v24 = vrot.slane %v2356_v33, 4  ;;  %v2371_v45 = vrot.slane %v2369_v60, 4  ;;  %v6522_v33 = vld [vmem:[%s6583_s25 + $0xbc] sm:$0x1] }
 0x143   : > { %v2296_v11 = vsel %vm6602_vm2, %v2291_v57, %v8131_v50  ;;  %v2320_v48 = vsel %vm6602_vm2, %v2315_v37, %v8151_v41  ;;  %v2399_v40 = vshll.u32 %v6522_v33, 16 }
 0x144   : > { %6118 = vmatmul.mubr.msk.bf16.gmra.mrb[8].mxu0 %vm666_vm3, %v5586_v56  ;;  %v2345_v56 = vshrl.u32 %v6514_v62, 16  ;;  %v2339_v6 = vrot.slane %v2338_v21, 4  ;;  %v5307_v50 = vcombine.low %v2296_v11, %v2306_v14 }
 0x145   : > { %5964 = vmatmul.mubr.msk.bf16.gmra.mrb[24].mxu1 %vm666_vm3, %v6462_v26  ;;  %6121 = vmatprep.mubr.msk.bf16.mxu0 %vm666_vm3, %v5587_v23  ;;  %v2323_v23 = vrot.slane %v2321_v20, 4 }
 0x146   : > { %5967 = vmatprep.mubr.msk.bf16.mxu1 %vm666_vm3, %v6463_v38  ;;  %v2347_v26 = vrot.slane %v2345_v56, 4  ;;  %v2327_v38 = vshll.u32 %v6516_v59, 16  ;;  %v2344_v42 = vsel %vm6602_vm2, %v2339_v6, %v8154_v17  ;;  %v2425_v6 = vrot.slane %v2423_v5, 5 }
 0x147   : > { %v2324_v9 = vor.u32 %v2323_v23, %v8151_v41  ;;  %v2361_v23 = vrot.slane %v2359_v25, 5  ;;  %v6520_v41 = vld [vmem:[%s6583_s25 + $0xb0] sm:$0x1] }
 0x148   : > { %v2348_v20 = vor.u32 %v2347_v26, %v8154_v17  ;;  %v2329_v62 = vrot.slane %v2327_v38, 5  ;;  %v2375_v59 = vshll.u32 %v6520_v41, 16  ;;  %v2404_v38 = vshrl.u32 %v5292_v4, 16 }
 0x149   : > { %v2325_v2 = vrot.slane %v2324_v9, 4  ;;  %v2362_v58 = vor.u32 %v2361_v23, %v2358_v24  ;;  %v2407_v17 = vshll.u32 %v5292_v4, 16  ;;  %v6521_v9 = vld [vmem:[%s6583_s25 + $0xc4] sm:$0xf] }
 0x14a   : > { %v2349_v32 = vrot.slane %v2348_v20, 4  ;;  %v2413_v21 = vshll.u32 %v6521_v9, 16  ;;  %v2417_v31 = vshrl.u32 %v6521_v9, 16  ;;  %v2377_v25 = vrot.slane %v2375_v59, 5 }
 0x14b   : > { %v2330_v47 = vsel %vm6602_vm2, %v2325_v2, %v2329_v62  ;;  %v2363_v15 = vrot.slane %v2362_v58, 4  ;;  %v2401_v62 = vrot.slane %v2399_v40, 5 }
 0x14c   : > { %6122 = vmatmul.mubr.msk.bf16.gmra.mrb[12].mxu0 %vm666_vm3, %v5588_v36  ;;  %v2365_v36 = vshll.u32 %v6518_v19, 16  ;;  %v2354_v54 = vsel %vm6602_vm2, %v2349_v32, %v2353_v53  ;;  %v5308_v63 = vcombine.low %v2320_v48, %v2330_v47  ;;  %v2406_v19 = vrot.slane %v2404_v38, 4 }
 0x14d   : > { %5968 = vmatmul.mubr.msk.bf16.gmra.mrb[28].mxu1 %vm666_vm3, %v6464_v18  ;;  %6125 = vmatprep.mubr.msk.bf16.mxu0 %vm666_vm3, %v5589_v43  ;;  %v6519_v43 = vld [vmem:[%s6583_s25 + $0xb8] sm:$0xf]  ;;  %v2382_v18 = vrot.slane %v2380_v1, 4  ;;  %v2415_v60 = vrot.slane %v2413_v21, 5  ;;  %v2419_v11 = vrot.slane %v2417_v31, 4 }
 0x14e   : > { %5989 = vmatprep.mubr.msk.bf16.mxu1 %vm666_vm3, %v5305_v0  ;;  %v2389_v10 = vshll.u32 %v6519_v43, 16  ;;  %v2393_v56 = vshrl.u32 %v6519_v43, 16  ;;  %v2367_v13 = vrot.slane %v2365_v36, 5  ;;  %v2385_v0 = vrot.slane %v2383_v46, 5 }
 0x14f   : > { %v2409_v36 = vrot.slane %v2407_v17, 5 }
 0x150   : > { %v2391_v57 = vrot.slane %v2389_v10, 5  ;;  %v2395_v26 = vrot.slane %v2393_v56, 4  ;;  %v2368_v1 = vsel %vm6602_vm2, %v2363_v15, %v2367_v13  ;;  %v2420_v10 = vor.u32 %v2419_v11, %v2415_v60 }
 0x151   : > { %v2410_v43 = vor.u32 %v2409_v36, %v2406_v19 }
 0x152   : > { %v2396_v44 = vor.u32 %v2395_v26, %v2391_v57  ;;  %v2421_v2 = vrot.slane %v2420_v10, 4  ;;  %v8257_v26 = vld [vmem:[%s8372_s2] ss:$0 sm:$0xff] }
 0x153   : > { %v2411_v56 = vrot.slane %v2410_v43, 4 }
 0x154   : > { %6126 = vmatmul.mubr.msk.bf16.gmra.mrb[16].mxu0 %vm666_vm3, %v5590_v61  ;;  %v2372_v61 = vor.u32 %v2371_v45, %v2367_v13  ;;  %v2397_v37 = vrot.slane %v2396_v44, 4  ;;  %v2426_v24 = vsel %vm6602_vm2, %v2421_v2, %v2425_v6 }
 0x155   : > { %5990 = vmatmul.mubr.msk.bf16.vlgmr.msra.gmra.mrb[16].mxu1 %vm666_vm3, %v7960_v8  ;;  %6129 = vmatprep.mubr.msk.bf16.mxu0 %vm666_vm3, %v5591_v12  ;;  %v2386_v8 = vor.u32 %v2385_v0, %v2382_v18  ;;  %v5309_v12 = vcombine.low %v2344_v42, %v2354_v54  ;;  %v2416_v53 = vsel %vm6602_vm2, %v2411_v56, %v2415_v60 }
 0x156   : > { %5993 = vmatprep.mubr.msk.bf16.mxu1 %vm666_vm3, %v5307_v50  ;;  %v2373_v20 = vrot.slane %v2372_v61, 4  ;;  %v2402_v16 = vsel %vm6602_vm2, %v2397_v37, %v2401_v62  ;;  %v5312_v32 = vcombine.low %v2416_v53, %v2426_v24 }
 0x157   : > { %v2387_v14 = vrot.slane %v2386_v8, 4 }
 0x158   : > { %v2378_v46 = vsel %vm6602_vm2, %v2373_v20, %v2377_v25 }
 0x159   : > { %v5310_v34 = vcombine.low %v2368_v1, %v2378_v46 }
 0x15c   : > { %6130 = vmatmul.mubr.msk.bf16.gmra.mrb[20].mxu0 %vm666_vm3, %v5592_v27  ;;  %v2392_v27 = vsel %vm6602_vm2, %v2387_v14, %v2391_v57 }
 0x15d   : > { %5994 = vmatmul.mubr.msk.bf16.gmra.mrb[20].mxu1 %vm666_vm3, %v5308_v63  ;;  %6133 = vmatprep.mubr.msk.bf16.mxu0 %vm666_vm3, %v5593_v49  ;;  %v5311_v49 = vcombine.low %v2392_v27, %v2402_v16 }
 0x15e   : > { %5997 = vmatprep.mubr.msk.bf16.mxu1 %vm666_vm3, %v5309_v12 }
 0x164   : > { %6134 = vmatmul.mubr.msk.bf16.gmra.mrb[24].mxu0 %vm666_vm3, %v5594_v30 }
 0x165   : > { %5998 = vmatmul.mubr.msk.bf16.gmra.mrb[24].mxu1 %vm666_vm3, %v5310_v34  ;;  %6137 = vmatprep.mubr.msk.bf16.mxu0 %vm666_vm3, %v5595_v35 }
 0x166   : > { %6001 = vmatprep.mubr.msk.bf16.mxu1 %vm666_vm3, %v5311_v49 }
 0x16c   : > { %6138 = vmatmul.mubr.msk.bf16.gmra.mrb[28].mxu0 %vm666_vm3, %v5596_v22 }
 0x16d   : > { %6002 = vmatmul.mubr.msk.bf16.gmra.mrb[28].mxu1 %vm666_vm3, %v5312_v32 }
 0x1e8   : > { %v5941_v55 = vpop.f32.mrb[0].mxu1 }
 0x1e9   : > { %v1836_v29 = vpop.f32.mrb[1].mxu1 }
 0x1ea   : > { %v5942_v30 = vpop.f32.mrb[2].mxu1 }
 0x1eb   : > { %v1839_v3 = vpop.f32.mrb[3].mxu1 }
 0x1f0   : > { %v5945_v39 = vpop.f32.mrb[4].mxu1 }
 0x1f1   : > { %v1852_v35 = vpop.f32.mrb[5].mxu1 }
 0x1f2   : > { %v5946_v23 = vpop.f32.mrb[6].mxu1 }
 0x1f3   : > { %v1855_v13 = vpop.f32.mrb[7].mxu1 }
 0x1f8   : > { %v5949_v45 = vpop.f32.mrb[8].mxu1 }
 0x1f9   : > { %v1868_v28 = vpop.f32.mrb[9].mxu1 }
 0x1fa   : > { %v8242_v50 = vpop.f32.mrb[10].mxu1 }
 0x1fb   : > { %v8244_v18 = vpop.f32.mrb[11].mxu1 }
 0x200   : > { %v8246_v7 = vpop.f32.mrb[12].mxu1 }
 0x201   : > { %v8248_v52 = vpop.f32.mrb[13].mxu1 }
 0x202   : > { %v8250_v22 = vpop.f32.mrb[14].mxu1 }
 0x203   : > { %v8252_v0 = vpop.f32.mrb[15].mxu1 }
 0x207   : > { %v6111_v57 = vpop.f32.mrb[0].mxu0 }
 0x208   : > { %v6143_v4 = vadd.f32 %v6111_v57, %v5941_v55  ;;  %v4607_v48 = vpop.f32.mrb[1].mxu0 }
 0x209   : > { %v6144_v47 = vadd.f32 %v4607_v48, %v1836_v29  ;;  %v6112_v42 = vpop.f32.mrb[2].mxu0 }
 0x20a   : > { %v4775_v54 = vadd.f32 %v6143_v4, %v8257_v26  ;;  %v6145_v58 = vadd.f32 %v6112_v42, %v5942_v30  ;;  %v4610_v61 = vpop.f32.mrb[3].mxu0 }
 0x20b   : > { %v4773_v41 = vadd.f32 %v6144_v47, %v8257_v26  ;;  %v6146_v59 = vadd.f32 %v4610_v61, %v1839_v3 }
 0x20c   : > { %v4807_v38 = vmax.f32 %v4775_v54, 0.0  ;;  %v4776_v17 = vadd.f32 %v6145_v58, %v8257_v26 }
 0x20d   : > { %v4805_v9 = vmax.f32 %v4773_v41, 0.0  ;;  %v4774_v21 = vadd.f32 %v6146_v59, %v8257_v26 }
 0x20e   : > { %v5652_v31 = vpack.c.bf16 %v4807_v38, %v4807_v38  ;;  %v4808_v8 = vmax.f32 %v4776_v17, 0.0 }
 0x20f   : > { %v5650_v44 = vpack.c.bf16 %v4805_v9, %v4805_v9  ;;  %v4806_v33 = vmax.f32 %v4774_v21, 0.0  ;;  %v6115_v40 = vpop.f32.mrb[4].mxu0 }
 0x210   : > { %4968 = vst.msk [vmem:[%s8266_s20 + $0x8] sm:$0xf] %vm4965_vm7, %v5652_v31  ;;  %v5653_v63 = vpack.c.bf16 %v4808_v8, %v4808_v8  ;;  %v6147_v12 = vadd.f32 %v6115_v40, %v5945_v39  ;;  %v4623_v15 = vpop.f32.mrb[5].mxu0 }
 0x211   : > { %4966 = vst.msk [vmem:[%s8266_s20] sm:$0xf] %vm4965_vm7, %v5650_v44  ;;  %v5651_v20 = vpack.c.bf16 %v4806_v33, %v4806_v33  ;;  %v6148_v25 = vadd.f32 %v4623_v15, %v1852_v35  ;;  %v6116_v19 = vpop.f32.mrb[6].mxu0 }
 0x212   : > { %4969 = vst.msk [vmem:[%s8266_s20 + $0xc] sm:$0xf] %vm4965_vm7, %v5653_v63  ;;  %v4779_v36 = vadd.f32 %v6147_v12, %v8257_v26  ;;  %v6149_v60 = vadd.f32 %v6116_v19, %v5946_v23  ;;  %v4626_v11 = vpop.f32.mrb[7].mxu0 }
 0x213   : > { %4967 = vst.msk [vmem:[%s8266_s20 + $0x4] sm:$0xf] %vm4965_vm7, %v5651_v20  ;;  %v4777_v14 = vadd.f32 %v6148_v25, %v8257_v26  ;;  %v6150_v37 = vadd.f32 %v4626_v11, %v1855_v13 }
 0x214   : > { %v4811_v62 = vmax.f32 %v4779_v36, 0.0  ;;  %v4780_v1 = vadd.f32 %v6149_v60, %v8257_v26 }
 0x215   : > { %v4809_v46 = vmax.f32 %v4777_v14, 0.0  ;;  %v4778_v43 = vadd.f32 %v6150_v37, %v8257_v26 }
 0x216   : > { %v5656_v10 = vpack.c.bf16 %v4811_v62, %v4811_v62  ;;  %v4812_v51 = vmax.f32 %v4780_v1, 0.0 }
 0x217   : > { %v5654_v5 = vpack.c.bf16 %v4809_v46, %v4809_v46  ;;  %v4810_v27 = vmax.f32 %v4778_v43, 0.0  ;;  %v6119_v16 = vpop.f32.mrb[8].mxu0 }
 0x218   : > { %4972 = vst.msk [vmem:[%s8266_s20 + $0x18] sm:$0xf] %vm4965_vm7, %v5656_v10  ;;  %v5657_v34 = vpack.c.bf16 %v4812_v51, %v4812_v51  ;;  %v6151_v49 = vadd.f32 %v6119_v16, %v5949_v45  ;;  %v4639_v56 = vpop.f32.mrb[9].mxu0 }
 0x219   : > { %4970 = vst.msk [vmem:[%s8266_s20 + $0x10] sm:$0xf] %vm4965_vm7, %v5654_v5  ;;  %v5655_v2 = vpack.c.bf16 %v4810_v27, %v4810_v27  ;;  %v6152_v6 = vadd.f32 %v4639_v56, %v1868_v28  ;;  %v6120_v53 = vpop.f32.mrb[10].mxu0 }
 0x21a   : > { %4973 = vst.msk [vmem:[%s8266_s20 + $0x1c] sm:$0xf] %vm4965_vm7, %v5657_v34  ;;  %v4783_v24 = vadd.f32 %v6151_v49, %v8257_v26  ;;  %v6153_v32 = vadd.f32 %v6120_v53, %v8242_v50  ;;  %v4642_v55 = vpop.f32.mrb[11].mxu0 }
 0x21b   : > { %4971 = vst.msk [vmem:[%s8266_s20 + $0x14] sm:$0xf] %vm4965_vm7, %v5655_v2  ;;  %v4781_v29 = vadd.f32 %v6152_v6, %v8257_v26  ;;  %v6154_v30 = vadd.f32 %v4642_v55, %v8244_v18 }
 0x21c   : > { %v4815_v3 = vmax.f32 %v4783_v24, 0.0  ;;  %v4784_v39 = vadd.f32 %v6153_v32, %v8257_v26 }
 0x21d   : > { %v4813_v35 = vmax.f32 %v4781_v29, 0.0  ;;  %v4782_v23 = vadd.f32 %v6154_v30, %v8257_v26 }
 0x21e   : > { %v5660_v13 = vpack.c.bf16 %v4815_v3, %v4815_v3  ;;  %v4816_v45 = vmax.f32 %v4784_v39, 0.0 }
 0x21f   : > { %v5658_v28 = vpack.c.bf16 %v4813_v35, %v4813_v35  ;;  %v4814_v50 = vmax.f32 %v4782_v23, 0.0  ;;  %v6123_v57 = vpop.f32.mrb[12].mxu0 }
 0x220   : > { %4976 = vst.msk [vmem:[%s8266_s20 + $0x28] sm:$0xf] %vm4965_vm7, %v5660_v13  ;;  %v5661_v4 = vpack.c.bf16 %v4816_v45, %v4816_v45  ;;  %v6155_v48 = vadd.f32 %v6123_v57, %v8246_v7  ;;  %v4655_v47 = vpop.f32.mrb[13].mxu0 }
 0x221   : > { %4974 = vst.msk [vmem:[%s8266_s20 + $0x20] sm:$0xf] %vm4965_vm7, %v5658_v28  ;;  %v5659_v18 = vpack.c.bf16 %v4814_v50, %v4814_v50  ;;  %v6156_v42 = vadd.f32 %v4655_v47, %v8248_v52  ;;  %v6124_v54 = vpop.f32.mrb[14].mxu0 }
 0x222   : > { %4977 = vst.msk [vmem:[%s8266_s20 + $0x2c] sm:$0xf] %vm4965_vm7, %v5661_v4  ;;  %v4787_v58 = vadd.f32 %v6155_v48, %v8257_v26  ;;  %v6157_v61 = vadd.f32 %v6124_v54, %v8250_v22  ;;  %v4658_v41 = vpop.f32.mrb[15].mxu0 }
 0x223   : > { %4975 = vst.msk [vmem:[%s8266_s20 + $0x24] sm:$0xf] %vm4965_vm7, %v5659_v18  ;;  %v4785_v7 = vadd.f32 %v6156_v42, %v8257_v26  ;;  %v6158_v59 = vadd.f32 %v4658_v41, %v8252_v0 }
 0x224   : > { %v4819_v38 = vmax.f32 %v4787_v58, 0.0  ;;  %v4788_v17 = vadd.f32 %v6157_v61, %v8257_v26 }
 0x225   : > { %v4817_v52 = vmax.f32 %v4785_v7, 0.0  ;;  %v4786_v9 = vadd.f32 %v6158_v59, %v8257_v26 }
 0x226   : > { %v5664_v21 = vpack.c.bf16 %v4819_v38, %v4819_v38  ;;  %v4820_v31 = vmax.f32 %v4788_v17, 0.0 }
 0x227   : > { %v5662_v8 = vpack.c.bf16 %v4817_v52, %v4817_v52  ;;  %v4818_v22 = vmax.f32 %v4786_v9, 0.0  ;;  %v6127_v44 = vpop.f32.mrb[16].mxu0 }
 0x228   : > { %4980 = vst.msk [vmem:[%s8266_s20 + $0x38] sm:$0xf] %vm4965_vm7, %v5664_v21  ;;  %v5665_v33 = vpack.c.bf16 %v4820_v31, %v4820_v31  ;;  %v5991_v40 = vpop.f32.mrb[16].mxu1  ;;  %v4671_v63 = vpop.f32.mrb[17].mxu0 }
 0x229   : > { %4978 = vst.msk [vmem:[%s8266_s20 + $0x30] sm:$0xf] %vm4965_vm7, %v5662_v8  ;;  %v5663_v0 = vpack.c.bf16 %v4818_v22, %v4818_v22  ;;  %v6159_v12 = vadd.f32 %v6127_v44, %v5991_v40  ;;  %v2630_v15 = vpop.f32.mrb[17].mxu1  ;;  %v6128_v20 = vpop.f32.mrb[18].mxu0 }
 0x22a   : > { %4981 = vst.msk [vmem:[%s8266_s20 + $0x3c] sm:$0xf] %vm4965_vm7, %v5665_v33  ;;  %v6160_v25 = vadd.f32 %v4671_v63, %v2630_v15  ;;  %v5992_v19 = vpop.f32.mrb[18].mxu1  ;;  %v4674_v36 = vpop.f32.mrb[19].mxu0 }
 0x22b   : > { %4979 = vst.msk [vmem:[%s8266_s20 + $0x34] sm:$0xf] %vm4965_vm7, %v5663_v0  ;;  %v4791_v60 = vadd.f32 %v6159_v12, %v8257_v26  ;;  %v6161_v11 = vadd.f32 %v6128_v20, %v5992_v19  ;;  %v2633_v14 = vpop.f32.mrb[19].mxu1 }
 0x22c   : > { %v4789_v37 = vadd.f32 %v6160_v25, %v8257_v26  ;;  %v6162_v62 = vadd.f32 %v4674_v36, %v2633_v14 }
 0x22d   : > { %v4823_v1 = vmax.f32 %v4791_v60, 0.0  ;;  %v4792_v46 = vadd.f32 %v6161_v11, %v8257_v26 }
 0x22e   : > { %v4821_v43 = vmax.f32 %v4789_v37, 0.0  ;;  %v4790_v10 = vadd.f32 %v6162_v62, %v8257_v26 }
 0x22f   : > { %v5668_v51 = vpack.c.bf16 %v4823_v1, %v4823_v1  ;;  %v4824_v5 = vmax.f32 %v4792_v46, 0.0  ;;  %v6131_v27 = vpop.f32.mrb[20].mxu0 }
 0x230   : > { %v5666_v16 = vpack.c.bf16 %v4821_v43, %v4821_v43  ;;  %v4822_v34 = vmax.f32 %v4790_v10, 0.0  ;;  %v5995_v49 = vpop.f32.mrb[20].mxu1  ;;  %v4687_v56 = vpop.f32.mrb[21].mxu0 }
 0x231   : > { %4984 = vst.msk [vmem:[%s8266_s20 + $0x48] sm:$0xf] %vm4965_vm7, %v5668_v51  ;;  %v5669_v2 = vpack.c.bf16 %v4824_v5, %v4824_v5  ;;  %v6163_v6 = vadd.f32 %v6131_v27, %v5995_v49  ;;  %v2646_v53 = vpop.f32.mrb[21].mxu1  ;;  %v6132_v24 = vpop.f32.mrb[22].mxu0 }
 0x232   : > { %4982 = vst.msk [vmem:[%s8266_s20 + $0x40] sm:$0xf] %vm4965_vm7, %v5666_v16  ;;  %v5667_v32 = vpack.c.bf16 %v4822_v34, %v4822_v34  ;;  %v6164_v55 = vadd.f32 %v4687_v56, %v2646_v53  ;;  %v5996_v29 = vpop.f32.mrb[22].mxu1  ;;  %v4690_v30 = vpop.f32.mrb[23].mxu0 }
 0x233   : > { %4985 = vst.msk [vmem:[%s8266_s20 + $0x4c] sm:$0xf] %vm4965_vm7, %v5669_v2  ;;  %v4795_v3 = vadd.f32 %v6163_v6, %v8257_v26  ;;  %v6165_v39 = vadd.f32 %v6132_v24, %v5996_v29  ;;  %v2649_v35 = vpop.f32.mrb[23].mxu1 }
 0x234   : > { %4983 = vst.msk [vmem:[%s8266_s20 + $0x44] sm:$0xf] %vm4965_vm7, %v5667_v32  ;;  %v4793_v23 = vadd.f32 %v6164_v55, %v8257_v26  ;;  %v6166_v13 = vadd.f32 %v4690_v30, %v2649_v35 }
 0x235   : > { %v4827_v45 = vmax.f32 %v4795_v3, 0.0  ;;  %v4796_v28 = vadd.f32 %v6165_v39, %v8257_v26 }
 0x236   : > { %v4825_v50 = vmax.f32 %v4793_v23, 0.0  ;;  %v4794_v57 = vadd.f32 %v6166_v13, %v8257_v26 }
 0x237   : > { %v5672_v4 = vpack.c.bf16 %v4827_v45, %v4827_v45  ;;  %v4828_v48 = vmax.f32 %v4796_v28, 0.0  ;;  %v6135_v47 = vpop.f32.mrb[24].mxu0 }
 0x238   : > { %v5670_v18 = vpack.c.bf16 %v4825_v50, %v4825_v50  ;;  %v4826_v42 = vmax.f32 %v4794_v57, 0.0  ;;  %v5999_v54 = vpop.f32.mrb[24].mxu1  ;;  %v4703_v58 = vpop.f32.mrb[25].mxu0 }
 0x239   : > { %4988 = vst.msk [vmem:[%s8266_s20 + $0x58] sm:$0xf] %vm4965_vm7, %v5672_v4  ;;  %v5673_v61 = vpack.c.bf16 %v4828_v48, %v4828_v48  ;;  %v6167_v41 = vadd.f32 %v6135_v47, %v5999_v54  ;;  %v2662_v7 = vpop.f32.mrb[25].mxu1  ;;  %v6136_v59 = vpop.f32.mrb[26].mxu0 }
 0x23a   : > { %4986 = vst.msk [vmem:[%s8266_s20 + $0x50] sm:$0xf] %vm4965_vm7, %v5670_v18  ;;  %v5671_v38 = vpack.c.bf16 %v4826_v42, %v4826_v42  ;;  %v6168_v17 = vadd.f32 %v4703_v58, %v2662_v7  ;;  %v6000_v52 = vpop.f32.mrb[26].mxu1  ;;  %v4706_v9 = vpop.f32.mrb[27].mxu0 }
 0x23b   : > { %4989 = vst.msk [vmem:[%s8266_s20 + $0x5c] sm:$0xf] %vm4965_vm7, %v5673_v61  ;;  %v4799_v21 = vadd.f32 %v6167_v41, %v8257_v26  ;;  %v6169_v31 = vadd.f32 %v6136_v59, %v6000_v52  ;;  %v2665_v8 = vpop.f32.mrb[27].mxu1 }
 0x23c   : > { %4987 = vst.msk [vmem:[%s8266_s20 + $0x54] sm:$0xf] %vm4965_vm7, %v5671_v38  ;;  %v4797_v22 = vadd.f32 %v6168_v17, %v8257_v26  ;;  %v6170_v44 = vadd.f32 %v4706_v9, %v2665_v8 }
 0x23d   : > { %v4831_v33 = vmax.f32 %v4799_v21, 0.0  ;;  %v4800_v40 = vadd.f32 %v6169_v31, %v8257_v26 }
 0x23e   : > { %v4829_v63 = vmax.f32 %v4797_v22, 0.0  ;;  %v4798_v0 = vadd.f32 %v6170_v44, %v8257_v26 }
 0x23f   : > { %v5676_v12 = vpack.c.bf16 %v4831_v33, %v4831_v33  ;;  %v4832_v15 = vmax.f32 %v4800_v40, 0.0  ;;  %v6139_v20 = vpop.f32.mrb[28].mxu0 }
 0x240   : > { %v5674_v25 = vpack.c.bf16 %v4829_v63, %v4829_v63  ;;  %v4830_v19 = vmax.f32 %v4798_v0, 0.0  ;;  %v6003_v36 = vpop.f32.mrb[28].mxu1  ;;  %v4719_v60 = vpop.f32.mrb[29].mxu0 }
 0x241   : > { %4992 = vst.msk [vmem:[%s8266_s20 + $0x68] sm:$0xf] %vm4965_vm7, %v5676_v12  ;;  %v5677_v11 = vpack.c.bf16 %v4832_v15, %v4832_v15  ;;  %v6171_v14 = vadd.f32 %v6139_v20, %v6003_v36  ;;  %v2678_v37 = vpop.f32.mrb[29].mxu1  ;;  %v6140_v62 = vpop.f32.mrb[30].mxu0 }
 0x242   : > { %4990 = vst.msk [vmem:[%s8266_s20 + $0x60] sm:$0xf] %vm4965_vm7, %v5674_v25  ;;  %v5675_v1 = vpack.c.bf16 %v4830_v19, %v4830_v19  ;;  %v6172_v46 = vadd.f32 %v4719_v60, %v2678_v37  ;;  %v6004_v43 = vpop.f32.mrb[30].mxu1  ;;  %v4722_v10 = vpop.f32.mrb[31].mxu0 }
 0x243   : > { %4993 = vst.msk [vmem:[%s8266_s20 + $0x6c] sm:$0xf] %vm4965_vm7, %v5677_v11  ;;  %v4803_v51 = vadd.f32 %v6171_v14, %v8257_v26  ;;  %v6173_v5 = vadd.f32 %v6140_v62, %v6004_v43  ;;  %v2681_v27 = vpop.f32.mrb[31].mxu1 }
 0x244   : > { %4991 = vst.msk [vmem:[%s8266_s20 + $0x64] sm:$0xf] %vm4965_vm7, %v5675_v1  ;;  %v4801_v16 = vadd.f32 %v6172_v46, %v8257_v26  ;;  %v6174_v34 = vadd.f32 %v4722_v10, %v2681_v27 }
 0x245   : > { %v4835_v49 = vmax.f32 %v4803_v51, 0.0  ;;  %v4804_v56 = vadd.f32 %v6173_v5, %v8257_v26 }
 0x246   : > { %v4833_v2 = vmax.f32 %v4801_v16, 0.0  ;;  %v4802_v6 = vadd.f32 %v6174_v34, %v8257_v26 }
 0x247   : > { %v5680_v53 = vpack.c.bf16 %v4835_v49, %v4835_v49  ;;  %v4836_v24 = vmax.f32 %v4804_v56, 0.0 }
 0x248   : > { %v5678_v32 = vpack.c.bf16 %v4833_v2, %v4833_v2  ;;  %v4834_v55 = vmax.f32 %v4802_v6, 0.0 }
 0x249   : > { %4996 = vst.msk [vmem:[%s8266_s20 + $0x78] sm:$0xf] %vm4965_vm7, %v5680_v53  ;;  %v5681_v29 = vpack.c.bf16 %v4836_v24, %v4836_v24 }
 0x24a   : > { %4994 = vst.msk [vmem:[%s8266_s20 + $0x70] sm:$0xf] %vm4965_vm7, %v5678_v32  ;;  %v5679_v30 = vpack.c.bf16 %v4834_v55, %v4834_v55 }
 0x24b   : > { %4997 = vst.msk [vmem:[%s8266_s20 + $0x7c] sm:$0xf] %vm4965_vm7, %v5681_v29 }
 0x24c   : > { %4995 = vst.msk [vmem:[%s8266_s20 + $0x74] sm:$0xf] %vm4965_vm7, %v5679_v30 }
 0x24d PF: > { %s13_s12 = sadd.s32 1, %s6530_s12  }
 0x24e   : > { %p10_p4 = scmp.ge.s32.totalorder %s13_s12, 6  }
 0x250   :  { %12 = sbr.rel (!%p10_p4) target bundleno = 1 (0x1), region = 72 }

// kernel: resnet_pl_loss.15
= control target key start
LH: loop header
LB: loop body
LE: loop exit
PB: predicated region body
PF: predicated region fallthrough
CT: control target
= control target key end

     0   :  { %7 = vsyncpa [#allocation3], 0  ;;  %s335_s9 = smov 0   ;;  %s369_s0 = inlined_call_operand.vmem [shape: bf16[64,128], index: 0, kind: input, shape index: {}, may-alias: {0,1}]   ;;  %s370_s1 = inlined_call_operand.vmem [shape: bf16[64,128], index: 1, kind: input, shape index: {}, may-alias: {0,1}]   ;;  %s371_s2 = inlined_call_operand.hbm [shape: f32[1,1], index: 2, kind: output, shape index: {}]  }
   0x1 LB: > { %s341_s10 = sadd.s32 4294967295, %s316_s9   ;;  %p253_p0 = scmp.ge.s32.totalorder %s316_s9, 1  ;;  %s316_s9 = sphi %s335_s9, %s13_s9  }
   0x2   : > { %p124_p1 = scmp.lt.s32.totalorder %s316_s9, 3 }
   0x4   : > { %p125_p2 = pnand %p253_p0, %p124_p1 }
   0x5   : > { %s254_s11 = sshll.u32 (!%p125_p2), %s341_s10, 1  ;;  %p281_p5 = scmp.eq.s32.totalorder (!%p125_p2), %s341_s10, 0 }
   0x6   : > { %128 = sbr.rel (%p125_p2) target bundleno = 239 (0xef), region = 28  ;;  %p148_p3 = scmp.lt.s32.totalorder (!%p125_p2), %s254_s11, 7 }
   0x7   : > { %s264_s12 = sadd.s32 (!%p125_p2), 4, %s254_s11  ;;  %s318_s21 = smov (!%p125_p2), 0.0  }
   0x8   : > { %p155_p4 = scmp.lt.s32.totalorder (!%p125_p2), %s264_s12, 7  ;;  %p282_p6 = scmp.eq.s32.totalorder (!%p125_p2), %s341_s10, 1 }
   0x9   : > { %s294_s27 = scalar_lea.hbm (!%p125_p2), %s371_s2, 16 }
   0xa   : > { %p295_p7 = scmp.ne.s32.totalorder (!%p125_p2), %s371_s2, %s294_s27  ;;  %p300_p10 = scmp.lt.u32.totalorder (!%p125_p2), %s294_s27, %s371_s2 }
   0xc   : > { %p296_p8 = pnand (!%p125_p2), %p295_p7, %p282_p6 }
   0xd   : > { %s373_s11 = smov (!%p148_p3, %s254_s11), 7  ;;  %s375_s12 = smov (!%p155_p4, %s264_s12), 7 }
   0xe   : > { %s255_s13 = sshll.u32 %s373_s11, 2  ;;  %s257_s17 = sshll.u32 %s375_s12, 2 }
   0xf   : > { %s151_s16 = scalar_lea.vmem %s369_s0, %s255_s13  ;;  %s158_s20 = scalar_lea.vmem %s370_s1, %s257_s17 }
  0x10   : > { %v266_v0 = vld [vmem:[%s151_s16] sm:$0xff]   ;;  %276 = sst [smem:[#allocation2]] (%p281_p5), %s318_s21  ;;  %p297_p9 = pneg %p296_p8 }
  0x11   : > { %v267_v1 = vunpack.c.l.bf16 %v266_v0  ;;  %v268_v2 = vunpack.c.h.bf16 %v266_v0  ;;  %v270_v3 = vld [vmem:[%s158_s20] sm:$0xff]   ;;  %s177_s22 = sld [smem:[#allocation2]] }
  0x12   : > { %v271_v4 = vunpack.c.l.bf16 %v270_v3  ;;  %v272_v5 = vunpack.c.h.bf16 %v270_v3  ;;  %p302_p11 = pnand %p300_p10, %p297_p9 }
  0x14   : > { %v175_v6 = vsub.f32 %v267_v1, %v271_v4  ;;  %v176_v7 = vsub.f32 %v268_v2, %v272_v5 }
  0x16   : > { %v178_v8 = vmul.f32 %v175_v6, %v175_v6  ;;  %v179_v9 = vmul.f32 %v176_v7, %v176_v7 }
  0x18   : > { %v180_v10 = vadd.f32 %v179_v9, %v178_v8 }
  0x1a   : > { %181 = vadd.xlane.f32.xlu0 %v180_v10 }
  0xa7   : > { %v182_v11 = vpop.xlane.xlu0 %181 }
  0xa8   : > { %v183_v12 = vrot.slane %v182_v11, 4 }
  0xaa   : > { %v184_v13 = vadd.f32 %v183_v12, %v182_v11 }
  0xac   : > { %v185_v14 = vrot.slane %v184_v13, 2 }
  0xae   : > { %v186_v15 = vadd.f32 %v185_v14, %v184_v13 }
  0xb0   : > { %v187_v16 = vrot.slane %v186_v15, 1 }
  0xb2   : > { %v188_v17 = vadd.f32 %v187_v16, %v186_v15 }
  0xb4   : > { %273 = vpush %v188_v17 }
  0xe5   : > { %s274_s23 = spop %273 }
  0xe6   : > { %s190_s24 = sadd.f32 %s274_s23, %s177_s22 }
  0xe8   : > { %192 = sst [smem:[#allocation2]] %s190_s24 }
  0xe9   : > { %305 = shalt.err (!%p302_p11)
}
  0xea   : > { %s319_s4 = smov [#allocation2]  }
  0xeb   : > { %278 = dma.smem_to_hbm (%p282_p6), %s319_s4, 16, %s371_s2, [#allocation3]  }
  0xec   : > { %311 = dma.done.wait (%p282_p6), [#allocation3], 16  }
  0xed   : > { %313 = vsyncadd (%p282_p6), [#allocation3], 4294967280 }
  0xee   : > { %206 = sfence }
  0xef PF: > { %s13_s9 = sadd.s32 1, %s316_s9  }
  0xf0   : > { %p10_p12 = scmp.ge.s32.totalorder %s13_s9, 4  }
  0xf2   :  { %12 = sbr.rel (!%p10_p12) target bundleno = 1 (0x1), region = 64 }
  0xf9   :  { %212 = vsyncpa [#allocation3], 1 }
  0xfa   :  { %214 = vsyncpa [#allocation3 + $0x1], 1 }

// kernel: resnet_pl_loss.11
= control target key start
LH: loop header
LB: loop body
LE: loop exit
PB: predicated region body
PF: predicated region fallthrough
CT: control target
= control target key end

     0   :  { %s2185_s12 = smov 0   ;;  %s2444_s0 = inlined_call_operand.vmem [shape: bf16[4,4,9,9,16], index: 0, kind: input, shape index: {}]   ;;  %s2445_s1 = inlined_call_operand.vmem [shape: bf16[9,16,32], index: 1, kind: input, shape index: {}]   ;;  %s2446_s2 = inlined_call_operand.vmem [shape: f32[1,32], index: 2, kind: input, shape index: {}]   ;;  %s2447_s3 = inlined_call_operand.vmem [shape: bf16[4,64,32], index: 3, kind: output, shape index: {}]  }
   0x1 LB: > { %s1717_s13 = sadd.s32 4294967295, %s2163_s12   ;;  %p1721_p0 = scmp.ge.s32.totalorder %s2163_s12, 1  ;;  %s2163_s12 = sphi %s2185_s12, %s13_s12  }
   0x2   : > { %p137_p1 = scmp.lt.s32.totalorder %s2163_s12, 5 }
   0x4   : > { %p138_p2 = pnand %p1721_p0, %p137_p1 }
   0x5   : > { %v2124_v0 = vld [vmem:[%s2445_s1 + $0x8] sm:$0xff] (!%p138_p2)   ;;  %p161_p3 = scmp.lt.s32.totalorder (!%p138_p2), %s1717_s13, 3  ;;  %v2199_v1 = vld [vmem:[%s2445_s1 + $0x20] sm:$0xff] (!%p138_p2)   ;;  %vm220_vm0 = vcmask (!%p138_p2), 130048   ;;  %vm417_vm1 = vsmask.f32 (!%p138_p2), 3328 }
   0x6   : > { %141 = sbr.rel (%p138_p2) target bundleno = 318 (0x13e), region = 32  ;;  %1959 = vmatprep.subr.bf16.mxu1 (!%p138_p2), %v2124_v0  ;;  %v2127_v2 = vld [vmem:[%s2445_s1] sm:$0xff] (!%p138_p2)   ;;  %1999 = vmatprep.subr.bf16.mxu0 (!%p138_p2), %v2199_v1  ;;  %v2129_v3 = vld [vmem:[%s2445_s1 + $0x28] sm:$0xff] (!%p138_p2)   ;;  %v2222_v6 = vld [vmem:[%s2445_s1 + $0x30] sm:$0xff] (!%p138_p2)   ;;  %vm418_vm2 = vsmask.f32 (!%p138_p2), 7440 }
   0x7   : > { %1960 = vmatpush3.bf16.msra.mxu1 (!%p138_p2), %v2124_v0  ;;  %2000 = vmatpush3.bf16.msra.mxu0 (!%p138_p2), %v2199_v1  ;;  %v2227_v7 = vld [vmem:[%s2445_s1 + $0x10] sm:$0xff] (!%p138_p2)   ;;  %vm2251_vm3 = vmor (!%p138_p2), %vm417_vm1, %vm418_vm2  ;;  %vm1653_vm4 = vcmask (!%p138_p2), 257024  }
   0x8   : > { %1969 = vmatprep.subr.bf16.mxu1 (!%p138_p2), %v2127_v2  ;;  %2009 = vmatprep.subr.bf16.mxu0 (!%p138_p2), %v2129_v3 }
   0xd   : > { %s2451_s13 = smov (!%p161_p3, %s1717_s13), 3 }
   0xe   : > { %s2115_s22 = smul.u32 288, %s2451_s13  ;;  %s1905_s11 = sshll.u32 %s2451_s13, 5 }
   0xf   : > { %s2423_s16 = scalar_lea.vmem %s2447_s3, %s1905_s11 }
  0x10   : > { %s2215_s25 = scalar_lea.vmem %s2444_s0, %s2115_s22 }
  0x11   : > { %v2126_v4 = vld [vmem:[%s2215_s25 + $0x48] ss:$8 sps:$4 sm:$0xff]   ;;  %v2128_v5 = vld [vmem:[%s2215_s25 + $0xd8] ss:$8 sps:$4 sm:$0xff]   ;;  %v1803_v13 = vld [vmem:[%s2215_s25 + $0x94] sm:$0x1] }
  0x12   : > { %1961 = vmatprep.mubr.msk.bf16.mxu1 %vm220_vm0, %v2126_v4  ;;  %v2130_v8 = vld [vmem:[%s2215_s25 + $0x58] ss:$8 sps:$4 sm:$0xff]   ;;  %2001 = vmatprep.mubr.msk.bf16.mxu0 %vm220_vm0, %v2128_v5  ;;  %v2131_v9 = vld [vmem:[%s2215_s25 + $0xe8] ss:$8 sps:$4 sm:$0xff]   ;;  %v1805_v15 = vld [vmem:[%s2215_s25 + $0x9c] sm:$0x1] }
  0x13   : > { %1962 = vmatmul.mubr.msk.bf16.vlgmr.msra.gmra.mrb[0].mxu1 %vm220_vm0, %v2130_v8  ;;  %v2132_v10 = vld [vmem:[%s2215_s25 + $0x68] ss:$8 sps:$4 sm:$0xff]   ;;  %2002 = vmatmul.mubr.msk.bf16.vlgmr.msra.gmra.mrb[0].mxu0 %vm220_vm0, %v2131_v9  ;;  %v2133_v11 = vld [vmem:[%s2215_s25 + $0x78] ss:$8 sps:$4 sm:$0xff]   ;;  %v910_v18 = vshll.u32 %v1803_v13, 16  ;;  %v924_v21 = vshll.u32 %v1805_v15, 16 }
  0x14   : > { %1970 = vmatpush3.bf16.msra.mxu1 %v2127_v2  ;;  %2010 = vmatpush3.bf16.msra.mxu0 %v2129_v3  ;;  %v1802_v12 = vld [vmem:[%s2215_s25 + $0x90] sm:$0xf]  ;;  %v1804_v14 = vld [vmem:[%s2215_s25 + $0x98] sm:$0xf]  ;;  %v1806_v22 = vld [vmem:[%s2215_s25 + $0xa0] sm:$0xf] }
  0x15   : > { %1965 = vmatprep.mubr.msk.bf16.mxu1 %vm220_vm0, %v2132_v10  ;;  %v901_v16 = vshrl.u32 %v1802_v12, 16  ;;  %v904_v17 = vshll.u32 %v1802_v12, 16  ;;  %v915_v19 = vshrl.u32 %v1804_v14, 16  ;;  %2019 = vmatprep.subr.bf16.mxu0 %v2222_v6  ;;  %v918_v20 = vshll.u32 %v1804_v14, 16  ;;  %v1807_v23 = vld [vmem:[%s2215_s25 + $0xa4] sm:$0x1] }
  0x16   : > { %1979 = vmatprep.subr.bf16.mxu1 %v2227_v7  ;;  %v912_v26 = vrot.slane %v910_v18, 5  ;;  %v1808_v28 = vld [vmem:[%s2215_s25 + $0xa8] sm:$0xf]  ;;  %v926_v30 = vrot.slane %v924_v21, 5  ;;  %v1809_v31 = vld [vmem:[%s2215_s25 + $0xac] sm:$0x1] }
  0x17   : > { %v903_v24 = vrot.slane %v901_v16, 4  ;;  %v906_v25 = vrot.slane %v904_v17, 5  ;;  %v917_v27 = vrot.slane %v915_v19, 4  ;;  %v920_v29 = vrot.slane %v918_v20, 5  ;;  %v2135_v47 = vld [vmem:[%s2215_s25] ss:$8 sps:$4 sm:$0xff]  }
  0x18   : > { %v929_v32 = vshrl.u32 %v1806_v22, 16  ;;  %v932_v33 = vshll.u32 %v1806_v22, 16  ;;  %v938_v35 = vshll.u32 %v1807_v23, 16  ;;  %v943_v36 = vshrl.u32 %v1808_v28, 16  ;;  %v2137_v53 = vld [vmem:[%s2215_s25 + $0x10] ss:$8 sps:$4 sm:$0xff]  }
  0x19   : > { %v907_v34 = vor.u32 %v906_v25, %v903_v24  ;;  %v946_v37 = vshll.u32 %v1808_v28, 16  ;;  %v921_v39 = vor.u32 %v920_v29, %v917_v27  ;;  %v952_v42 = vshll.u32 %v1809_v31, 16  ;;  %v1810_v54 = vld [vmem:[%s2215_s25 + $0xb0] sm:$0xf]  ;;  %v1811_v55 = vld [vmem:[%s2215_s25 + $0xb4] sm:$0x1] }
  0x1a   : > { %v931_v40 = vrot.slane %v929_v32, 4  ;;  %v934_v41 = vrot.slane %v932_v33, 5  ;;  %v940_v44 = vrot.slane %v938_v35, 5  ;;  %v945_v45 = vrot.slane %v943_v36, 4  ;;  %v1812_v58 = vld [vmem:[%s2215_s25 + $0xb8] sm:$0xf] }
  0x1b   : > { %1966 = vmatmul.mubr.msk.bf16.gmra.mrb[4].mxu1 %vm220_vm0, %v2133_v11  ;;  %v908_v43 = vrot.slane %v907_v34, 4  ;;  %v948_v46 = vrot.slane %v946_v37, 5  ;;  %v922_v48 = vrot.slane %v921_v39, 4  ;;  %v954_v50 = vrot.slane %v952_v42, 5  ;;  %v1813_v59 = vld [vmem:[%s2215_s25 + $0xbc] sm:$0x1] }
  0x1c   : > { %v935_v49 = vor.u32 %v934_v41, %v931_v40  ;;  %1971 = vmatprep.mubr.msk.bf16.mxu1 %vm220_vm0, %v2135_v47  ;;  %v957_v60 = vshrl.u32 %v1810_v54, 16  ;;  %v960_v63 = vshll.u32 %v1810_v54, 16  ;;  %v966_v0 = vshll.u32 %v1811_v55, 16  ;;  %v1814_v2 = vld [vmem:[%s2215_s25 + $0xc0] sm:$0xf]  ;;  %v2273_v10 = vld [vmem:[%s2445_s1 + $0x18] sm:$0xff]  }
  0x1d   : > { %v913_v51 = vsel %vm2251_vm3, %v908_v43, %v912_v26  ;;  %v949_v52 = vor.u32 %v948_v46, %v945_v45  ;;  %v927_v56 = vsel %vm2251_vm3, %v922_v48, %v926_v30  ;;  %v971_v5 = vshrl.u32 %v1812_v58, 16  ;;  %v1815_v9 = vld [vmem:[%s2215_s25 + $0xc4] sm:$0x1]  ;;  %v1816_v15 = vld [vmem:[%s2215_s25 + $0xc8] sm:$0xf]  ;;  %v2284_v21 = vld [vmem:[%s2445_s1 + $0x38] sm:$0xff]  }
  0x1e   : > { %v936_v57 = vrot.slane %v935_v49, 4  ;;  %v1820_v61 = vcombine.low %v913_v51, %v927_v56  ;;  %v959_v4 = vrot.slane %v957_v60, 4  ;;  %v974_v8 = vshll.u32 %v1812_v58, 16  ;;  %v1817_v19 = vld [vmem:[%s2215_s25 + $0xcc] sm:$0x1] }
  0x1f   : > { %v950_v62 = vrot.slane %v949_v52, 4  ;;  %v962_v12 = vrot.slane %v960_v63, 5  ;;  %v968_v13 = vrot.slane %v966_v0, 5  ;;  %v980_v14 = vshll.u32 %v1813_v59, 16  ;;  %v2138_v33 = vld [vmem:[%s2215_s25 + $0x20] ss:$8 sps:$4 sm:$0xff]  }
  0x20   : > { %v941_v3 = vsel %vm2251_vm3, %v936_v57, %v940_v44  ;;  %2011 = vmatprep.mubr.msk.bf16.mxu0 %vm220_vm0, %v1820_v61  ;;  %v973_v17 = vrot.slane %v971_v5, 4  ;;  %v976_v18 = vrot.slane %v974_v8, 5  ;;  %v985_v20 = vshrl.u32 %v1814_v2, 16  ;;  %v2140_v47 = vld [vmem:[%s2215_s25 + $0x8] ss:$8 sps:$4 sm:$0xff]  }
  0x21   : > { %v955_v11 = vsel %vm2251_vm3, %v950_v62, %v954_v50  ;;  %v963_v22 = vor.u32 %v962_v12, %v959_v4  ;;  %v982_v23 = vrot.slane %v980_v14, 5  ;;  %v988_v24 = vshll.u32 %v1814_v2, 16  ;;  %v401_v48 = vld [vmem:[%s2215_s25] sm:$0xf]  ;;  %v402_v49 = vld [vmem:[%s2215_s25 + $0x4] sm:$0x1] }
  0x22   : > { %v1821_v16 = vcombine.low %v941_v3, %v955_v11  ;;  %v994_v25 = vshll.u32 %v1815_v9, 16  ;;  %v977_v26 = vor.u32 %v976_v18, %v973_v17  ;;  %v987_v27 = vrot.slane %v985_v20, 4  ;;  %v403_v51 = vld [vmem:[%s2215_s25 + $0x8] sm:$0xf]  ;;  %v404_v52 = vld [vmem:[%s2215_s25 + $0xc] sm:$0x1] }
  0x23   : > { %1972 = vmatmul.mubr.msk.bf16.vlgmr.msra.gmra.mrb[0].mxu1 %vm220_vm0, %v2137_v53  ;;  %v999_v28 = vshrl.u32 %v1816_v15, 16  ;;  %v1002_v29 = vshll.u32 %v1816_v15, 16  ;;  %v964_v30 = vrot.slane %v963_v22, 4  ;;  %v990_v31 = vrot.slane %v988_v24, 5  ;;  %v405_v2 = vld [vmem:[%s2215_s25 + $0x10] sm:$0xf] }
  0x24   : > { %1980 = vmatpush3.bf16.msra.mxu1 %v2227_v7  ;;  %2012 = vmatmul.mubr.msk.bf16.vlgmr.msra.gmra.mrb[0].mxu0 %vm220_vm0, %v1821_v16  ;;  %v1008_v32 = vshll.u32 %v1817_v19, 16  ;;  %v978_v7 = vrot.slane %v977_v26, 4  ;;  %v996_v39 = vrot.slane %v994_v25, 5  ;;  %v421_v53 = vshrl.u32 %v401_v48, 16  ;;  %v406_v5 = vld [vmem:[%s2215_s25 + $0x14] sm:$0x1] }
  0x25   : > { %1989 = vmatprep.subr.bf16.mxu1 %v2273_v10  ;;  %2020 = vmatpush3.bf16.msra.mxu0 %v2222_v6  ;;  %v1001_v34 = vrot.slane %v999_v28, 4  ;;  %v1004_v35 = vrot.slane %v1002_v29, 5  ;;  %v969_v36 = vsel %vm2251_vm3, %v964_v30, %v968_v13  ;;  %v991_v37 = vor.u32 %v990_v31, %v987_v27  ;;  %v2139_v6 = vld [vmem:[%s2215_s25 + $0x30] ss:$8 sps:$4 sm:$0xff]   ;;  %v408_v13 = vld [vmem:[%s2215_s25 + $0x1c] sm:$0x1] }
  0x26   : > { %2029 = vmatprep.subr.bf16.mxu0 %v2284_v21  ;;  %1975 = vmatprep.mubr.msk.bf16.mxu1 %vm220_vm0, %v2138_v33  ;;  %v983_v40 = vsel %vm2251_vm3, %v978_v7, %v982_v23  ;;  %v1010_v42 = vrot.slane %v1008_v32, 5  ;;  %v424_v54 = vshll.u32 %v401_v48, 16  ;;  %v430_v56 = vshll.u32 %v402_v49, 16  ;;  %v407_v8 = vld [vmem:[%s2215_s25 + $0x18] sm:$0xf]  ;;  %v2321_v29 = vld [vmem:[%s2445_s1 + $0x40] sm:$0xff]  }
  0x27   : > { %v1005_v41 = vor.u32 %v1004_v35, %v1001_v34  ;;  %v1822_v43 = vcombine.low %v969_v36, %v983_v40  ;;  %v992_v44 = vrot.slane %v991_v37, 4  ;;  %v435_v57 = vshrl.u32 %v403_v51, 16  ;;  %v2142_v11 = vld [vmem:[%s2215_s25 + $0x18] ss:$8 sps:$4 sm:$0xff]   ;;  %v2144_v32 = vld [vmem:[%s2215_s25 + $0x28] ss:$8 sps:$4 sm:$0xff]  }
  0x28   : > { %v438_v58 = vshll.u32 %v403_v51, 16  ;;  %v423_v59 = vrot.slane %v421_v53, 4  ;;  %v426_v60 = vrot.slane %v424_v54, 5  ;;  %v444_v61 = vshll.u32 %v404_v52, 16  ;;  %v409_v33 = vld [vmem:[%s2215_s25 + $0x20] sm:$0xf] }
  0x29   : > { %v1006_v45 = vrot.slane %v1005_v41, 4  ;;  %2015 = vmatprep.mubr.msk.bf16.mxu0 %vm220_vm0, %v1822_v43  ;;  %v997_v46 = vsel %vm2251_vm3, %v992_v44, %v996_v39  ;;  %v432_v62 = vrot.slane %v430_v56, 5  ;;  %v437_v63 = vrot.slane %v435_v57, 4  ;;  %v410_v35 = vld [vmem:[%s2215_s25 + $0x24] sm:$0x1] }
  0x2a   : > { %v440_v0 = vrot.slane %v438_v58, 5  ;;  %v427_v3 = vor.u32 %v426_v60, %v423_v59  ;;  %v446_v4 = vrot.slane %v444_v61, 5  ;;  %v449_v9 = vshrl.u32 %v405_v2, 16  ;;  %v411_v36 = vld [vmem:[%s2215_s25 + $0x28] sm:$0xf] }
  0x2b   : > { %1976 = vmatmul.mubr.msk.bf16.gmra.mrb[4].mxu1 %vm220_vm0, %v2139_v6  ;;  %v1011_v50 = vsel %vm2251_vm3, %v1006_v45, %v1010_v42  ;;  %v452_v14 = vshll.u32 %v405_v2, 16  ;;  %v458_v15 = vshll.u32 %v406_v5, 16  ;;  %v463_v16 = vshrl.u32 %v407_v8, 16  ;;  %v412_v37 = vld [vmem:[%s2215_s25 + $0x2c] sm:$0x1] }
  0x2c   : > { %v1823_v55 = vcombine.low %v997_v46, %v1011_v50  ;;  %v441_v12 = vor.u32 %v440_v0, %v437_v63  ;;  %v428_v17 = vrot.slane %v427_v3, 4  ;;  %v451_v18 = vrot.slane %v449_v9, 4  ;;  %v413_v42 = vld [vmem:[%s2215_s25 + $0x30] sm:$0xf]  ;;  %v2145_v49 = vld [vmem:[%s2215_s25 + $0x38] ss:$8 sps:$4 sm:$0xff]  }
  0x2d   : > { %v466_v19 = vshll.u32 %v407_v8, 16  ;;  %v472_v20 = vshll.u32 %v408_v13, 16  ;;  %v454_v23 = vrot.slane %v452_v14, 5  ;;  %v465_v24 = vrot.slane %v463_v16, 4  ;;  %v415_v53 = vld [vmem:[%s2215_s25 + $0x38] sm:$0xf] }
  0x2e   : > { %2016 = vmatmul.mubr.msk.bf16.gmra.mrb[4].mxu0 %vm220_vm0, %v1823_v55  ;;  %v442_v22 = vrot.slane %v441_v12, 4  ;;  %v433_v25 = vsel %vm2251_vm3, %v428_v17, %v432_v62  ;;  %v460_v26 = vrot.slane %v458_v15, 5  ;;  %v477_v6 = vshrl.u32 %v409_v33, 16  ;;  %v416_v57 = vld [vmem:[%s2215_s25 + $0x3c] sm:$0x1] }
  0x2f   : > { %2021 = vmatprep.mubr.msk.bf16.mxu0 %vm220_vm0, %v2140_v47  ;;  %v468_v27 = vrot.slane %v466_v19, 5  ;;  %v474_v28 = vrot.slane %v472_v20, 5  ;;  %v455_v31 = vor.u32 %v454_v23, %v451_v18  ;;  %v480_v40 = vshll.u32 %v409_v33, 16  ;;  %v414_v47 = vld [vmem:[%s2215_s25 + $0x34] sm:$0x1] }
  0x30   : > { %v447_v30 = vsel %vm2251_vm3, %v442_v22, %v446_v4  ;;  %v486_v41 = vshll.u32 %v410_v35, 16  ;;  %v491_v44 = vshrl.u32 %v411_v36, 16  ;;  %v494_v45 = vshll.u32 %v411_v36, 16  ;;  %v2146_v3 = vld [vmem:[%s2215_s25 + $0x50] ss:$8 sps:$4 sm:$0xff]  }
  0x31   : > { %v1755_v7 = vcombine.low %v433_v25, %v447_v30  ;;  %v469_v34 = vor.u32 %v468_v27, %v465_v24  ;;  %v456_v39 = vrot.slane %v455_v31, 4  ;;  %v500_v46 = vshll.u32 %v412_v37, 16  ;;  %v2148_v24 = vld [vmem:[%s2215_s25 + $0x60] ss:$8 sps:$4 sm:$0xff]   ;;  %v1868_v31 = vld [vmem:[%s2215_s25 + $0xc] sm:$0x1] }
  0x32   : > { %v479_v50 = vrot.slane %v477_v6, 4  ;;  %v482_v51 = vrot.slane %v480_v40, 5  ;;  %v488_v52 = vrot.slane %v486_v41, 5  ;;  %v493_v54 = vrot.slane %v491_v44, 4  ;;  %v1867_v30 = vld [vmem:[%s2215_s25 + $0x8] sm:$0xf] }
  0x33   : > { %1981 = vmatprep.mubr.msk.bf16.mxu1 %vm220_vm0, %v1755_v7  ;;  %v470_v43 = vrot.slane %v469_v34, 4  ;;  %v461_v48 = vsel %vm2251_vm3, %v456_v39, %v460_v26  ;;  %v496_v55 = vrot.slane %v494_v45, 5  ;;  %v502_v56 = vrot.slane %v500_v46, 5  ;;  %v2149_v26 = vld [vmem:[%s2215_s25 + $0x90] ss:$8 sps:$4 sm:$0xff]  }
  0x34   : > { %v483_v59 = vor.u32 %v482_v51, %v479_v50  ;;  %v505_v60 = vshrl.u32 %v413_v42, 16  ;;  %v508_v61 = vshll.u32 %v413_v42, 16  ;;  %v514_v63 = vshll.u32 %v414_v47, 16  ;;  %v1870_v33 = vld [vmem:[%s2215_s25 + $0x14] sm:$0x1] }
  0x35   : > { %v497_v62 = vor.u32 %v496_v55, %v493_v54  ;;  %v519_v0 = vshrl.u32 %v415_v53, 16  ;;  %v522_v2 = vshll.u32 %v415_v53, 16  ;;  %v528_v9 = vshll.u32 %v416_v57, 16  ;;  %v2150_v37 = vld [vmem:[%s2215_s25 + $0xa0] ss:$8 sps:$4 sm:$0xff]  }
  0x36   : > { %2022 = vmatmul.mubr.msk.bf16.vlgmr.msra.gmra.mrb[0].mxu0 %vm220_vm0, %v2142_v11  ;;  %v484_v4 = vrot.slane %v483_v59, 4  ;;  %v507_v5 = vrot.slane %v505_v60, 4  ;;  %v510_v8 = vrot.slane %v508_v61, 5  ;;  %v516_v16 = vrot.slane %v514_v63, 5  ;;  %v2152_v39 = vld [vmem:[%s2215_s25 + $0x80] ss:$8 sps:$4 sm:$0xff]  }
  0x37   : > { %2030 = vmatpush3.bf16.msra.mxu0 %v2284_v21  ;;  %2025 = vmatprep.mubr.msk.bf16.mxu0 %vm220_vm0, %v2144_v32  ;;  %v475_v21 = vsel %vm2251_vm3, %v470_v43, %v474_v28  ;;  %v498_v11 = vrot.slane %v497_v62, 4  ;;  %v521_v12 = vrot.slane %v519_v0, 4  ;;  %v524_v13 = vrot.slane %v522_v2, 5  ;;  %v2151_v28 = vld [vmem:[%s2215_s25 + $0x70] ss:$8 sps:$4 sm:$0xff]  }
  0x38   : > { %2039 = vmatprep.subr.bf16.mxu0 %v2321_v29  ;;  %v1756_v58 = vcombine.low %v461_v48, %v475_v21  ;;  %v489_v14 = vsel %vm2251_vm3, %v484_v4, %v488_v52  ;;  %v511_v15 = vor.u32 %v510_v8, %v507_v5  ;;  %v530_v18 = vrot.slane %v528_v9, 5  ;;  %v1869_v32 = vld [vmem:[%s2215_s25 + $0x10] sm:$0xf]  ;;  %v1871_v41 = vld [vmem:[%s2215_s25 + $0x18] sm:$0xf] }
  0x39   : > { %v503_v17 = vsel %vm2251_vm3, %v498_v11, %v502_v56  ;;  %v1381_v7 = vshrl.u32 %v1867_v30, 16  ;;  %v1384_v34 = vshll.u32 %v1867_v30, 16  ;;  %v1390_v35 = vshll.u32 %v1868_v31, 16  ;;  %v1872_v42 = vld [vmem:[%s2215_s25 + $0x1c] sm:$0x1] }
  0x3a   : > { %1982 = vmatmul.mubr.msk.bf16.vlgmr.msra.gmra.mrb[0].mxu1 %vm220_vm0, %v1756_v58  ;;  %v1757_v19 = vcombine.low %v489_v14, %v503_v17  ;;  %v512_v20 = vrot.slane %v511_v15, 4  ;;  %v1395_v36 = vshrl.u32 %v1869_v32, 16  ;;  %v1398_v6 = vshll.u32 %v1869_v32, 16  ;;  %v2153_v43 = vld [vmem:[%s2215_s25 + $0xb0] ss:$8 sps:$4 sm:$0xff]  }
  0x3b   : > { %1990 = vmatpush3.bf16.msra.mxu1 %v2273_v10  ;;  %v525_v10 = vor.u32 %v524_v13, %v521_v12  ;;  %v1404_v40 = vshll.u32 %v1870_v33, 16  ;;  %v1383_v44 = vrot.slane %v1381_v7, 4  ;;  %v1392_v45 = vrot.slane %v1390_v35, 5  ;;  %v1873_v47 = vld [vmem:[%s2215_s25 + $0x20] sm:$0xf] }
  0x3c   : > { %2049 = vmatprep.subr.bf16.mxu1 %v2199_v1  ;;  %1985 = vmatprep.mubr.msk.bf16.mxu1 %vm220_vm0, %v1757_v19  ;;  %v517_v23 = vsel %vm2251_vm3, %v512_v20, %v516_v16  ;;  %v1397_v46 = vrot.slane %v1395_v36, 4  ;;  %v1400_v48 = vrot.slane %v1398_v6, 5  ;;  %v1874_v50 = vld [vmem:[%s2215_s25 + $0x24] sm:$0x1]  ;;  %v1409_v51 = vshrl.u32 %v1871_v41, 16 }
  0x3d   : > { %v526_v22 = vrot.slane %v525_v10, 4  ;;  %v1412_v52 = vshll.u32 %v1871_v41, 16  ;;  %v1418_v21 = vshll.u32 %v1872_v42, 16  ;;  %v1423_v54 = vshrl.u32 %v1873_v47, 16  ;;  %v1875_v4 = vld [vmem:[%s2215_s25 + $0x28] sm:$0xf] }
  0x3e   : > { %2026 = vmatmul.mubr.msk.bf16.gmra.mrb[4].mxu0 %vm220_vm0, %v2145_v49  ;;  %v1406_v49 = vrot.slane %v1404_v40, 5  ;;  %v1426_v55 = vshll.u32 %v1873_v47, 16  ;;  %v1401_v56 = vor.u32 %v1400_v48, %v1397_v46  ;;  %v1411_v57 = vrot.slane %v1409_v51, 4  ;;  %v1876_v5 = vld [vmem:[%s2215_s25 + $0x2c] sm:$0x1] }
  0x3f   : > { %2031 = vmatprep.mubr.msk.bf16.mxu0 %vm220_vm0, %v2146_v3  ;;  %v531_v25 = vsel %vm2251_vm3, %v526_v22, %v530_v18  ;;  %v1414_v58 = vrot.slane %v1412_v52, 5  ;;  %v1432_v59 = vshll.u32 %v1874_v50, 16  ;;  %v1420_v61 = vrot.slane %v1418_v21, 5  ;;  %v1877_v11 = vld [vmem:[%s2215_s25 + $0x30] sm:$0xf] }
  0x40   : > { %v1758_v27 = vcombine.low %v517_v23, %v531_v25  ;;  %v1425_v62 = vrot.slane %v1423_v54, 4  ;;  %v1428_v63 = vrot.slane %v1426_v55, 5  ;;  %v1402_v0 = vrot.slane %v1401_v56, 4  ;;  %v1878_v12 = vld [vmem:[%s2215_s25 + $0x34] sm:$0x1] }
  0x41   : > { %v1415_v2 = vor.u32 %v1414_v58, %v1411_v57  ;;  %v1434_v3 = vrot.slane %v1432_v59, 5  ;;  %v1437_v13 = vshrl.u32 %v1875_v4, 16  ;;  %v1440_v14 = vshll.u32 %v1875_v4, 16  ;;  %v2154_v22 = vld [vmem:[%s2215_s25 + $0xc0] ss:$8 sps:$4 sm:$0xff]  }
  0x42   : > { %1986 = vmatmul.mubr.msk.bf16.gmra.mrb[4].mxu1 %vm220_vm0, %v1758_v27  ;;  %v1429_v9 = vor.u32 %v1428_v63, %v1425_v62  ;;  %v1407_v15 = vsel %vm2251_vm3, %v1402_v0, %v1406_v49  ;;  %v1446_v17 = vshll.u32 %v1876_v5, 16  ;;  %v1451_v10 = vshrl.u32 %v1877_v11, 16  ;;  %v1879_v32 = vld [vmem:[%s2215_s25 + $0x38] sm:$0xf]  ;;  %v1880_v33 = vld [vmem:[%s2215_s25 + $0x3c] sm:$0x1] }
  0x43   : > { %1991 = vmatprep.mubr.msk.bf16.mxu1 %vm220_vm0, %v2149_v26  ;;  %v1416_v16 = vrot.slane %v1415_v2, 4  ;;  %v1439_v19 = vrot.slane %v1437_v13, 4  ;;  %v1442_v20 = vrot.slane %v1440_v14, 5  ;;  %v1454_v26 = vshll.u32 %v1877_v11, 16  ;;  %v1881_v35 = vld [vmem:[%s2215_s25 + $0x40] sm:$0xf] }
  0x44   : > { %v1430_v18 = vrot.slane %v1429_v9, 4  ;;  %v1453_v25 = vrot.slane %v1451_v10, 4  ;;  %v1448_v30 = vrot.slane %v1446_v17, 5  ;;  %v1460_v31 = vshll.u32 %v1878_v12, 16  ;;  %v1882_v36 = vld [vmem:[%s2215_s25 + $0x44] sm:$0x1] }
  0x45   : > { %v1421_v23 = vsel %vm2251_vm3, %v1416_v16, %v1420_v61  ;;  %v1468_v40 = vshll.u32 %v1879_v32, 16  ;;  %v1474_v41 = vshll.u32 %v1880_v33, 16  ;;  %v1488_v46 = vshll.u32 %v1882_v36, 16  ;;  %v2156_v59 = vld [vmem:[%s2215_s25 + $0x108] ss:$8 sps:$4 sm:$0xff]  }
  0x46   : > { %2032 = vmatmul.mubr.msk.bf16.vlgmr.msra.gmra.mrb[0].mxu0 %vm220_vm0, %v2148_v24  ;;  %v2155_v24 = vld [vmem:[%s2215_s25 + $0xf8] ss:$8 sps:$4 sm:$0xff]   ;;  %v1435_v27 = vsel %vm2251_vm3, %v1430_v18, %v1434_v3  ;;  %v1462_v6 = vrot.slane %v1460_v31, 5 }
  0x47   : > { %2040 = vmatpush3.bf16.msra.mxu0 %v2321_v29  ;;  %2035 = vmatprep.mubr.msk.bf16.mxu0 %vm220_vm0, %v2151_v28  ;;  %v1386_v29 = vrot.slane %v1384_v34, 5  ;;  %v1443_v28 = vor.u32 %v1442_v20, %v1439_v19  ;;  %v1886_v7 = vcombine.low %v1421_v23, %v1435_v27  ;;  %v1456_v34 = vrot.slane %v1454_v26, 5  ;;  %v1894_v4 = vld [vmem:[%s2446_s2] ss:$0 sm:$0xff] }
  0x48   : > { %v1476_v52 = vrot.slane %v1474_v41, 5  ;;  %v1490_v54 = vrot.slane %v1488_v46, 5 }
  0x49   : > { %v1387_v53 = vor.u32 %v1386_v29, %v1383_v44  ;;  %v1457_v42 = vor.u32 %v1456_v34, %v1453_v25  ;;  %v1479_v44 = vshrl.u32 %v1881_v35, 16  ;;  %v1482_v29 = vshll.u32 %v1881_v35, 16 }
  0x4a   : > { %1992 = vmatmul.mubr.msk.bf16.vlgmr.msra.gmra.mrb[0].mxu1 %vm220_vm0, %v2150_v37  ;;  %v1465_v37 = vshrl.u32 %v1879_v32, 16 }
  0x4b   : > { %v1388_v60 = vrot.slane %v1387_v53, 4  ;;  %2050 = vmatpush3.bf16.msra.mxu1 %v2199_v1  ;;  %1995 = vmatprep.mubr.msk.bf16.mxu1 %vm220_vm0, %v2153_v43  ;;  %v1458_v48 = vrot.slane %v1457_v42, 4  ;;  %v1481_v49 = vrot.slane %v1479_v44, 4  ;;  %v1484_v50 = vrot.slane %v1482_v29, 5 }
  0x4c   : > { %v1467_v43 = vrot.slane %v1465_v37, 4 }
  0x4d   : > { %v1393_v8 = vsel %vm2251_vm3, %v1388_v60, %v1392_v45  ;;  %v1470_v45 = vrot.slane %v1468_v40, 5  ;;  %v1463_v53 = vsel %vm2251_vm3, %v1458_v48, %v1462_v6  ;;  %v1485_v21 = vor.u32 %v1484_v50, %v1481_v49 }
  0x4e   : > { %2036 = vmatmul.mubr.msk.bf16.gmra.mrb[4].mxu0 %vm220_vm0, %v2152_v39  ;;  %v1885_v1 = vcombine.low %v1393_v8, %v1407_v15  ;;  %v1444_v39 = vrot.slane %v1443_v28, 4 }
  0x4f   : > { %v1471_v51 = vor.u32 %v1470_v45, %v1467_v43  ;;  %v1486_v57 = vrot.slane %v1485_v21, 4 }
  0x50   : > { %2041 = vmatprep.mubr.msk.bf16.mxu0 %vm220_vm0, %v1885_v1  ;;  %v1449_v47 = vsel %vm2251_vm3, %v1444_v39, %v1448_v30 }
  0x51   : > { %v1887_v55 = vcombine.low %v1449_v47, %v1463_v53  ;;  %v1472_v56 = vrot.slane %v1471_v51, 4  ;;  %v1491_v60 = vsel %vm2251_vm3, %v1486_v57, %v1490_v54 }
  0x52   : > { %1996 = vmatmul.mubr.msk.bf16.gmra.mrb[4].mxu1 %vm220_vm0, %v2154_v22 }
  0x53   : > { %2005 = vmatprep.mubr.msk.bf16.mxu1 %vm220_vm0, %v2155_v24  ;;  %v1477_v58 = vsel %vm2251_vm3, %v1472_v56, %v1476_v52 }
  0x54   : > { %v1888_v61 = vcombine.low %v1477_v58, %v1491_v60 }
  0x56   : > { %2042 = vmatmul.mubr.msk.bf16.vlgmr.msra.gmra.mrb[0].mxu0 %vm220_vm0, %v1886_v7 }
  0x57   : > { %2045 = vmatprep.mubr.msk.bf16.mxu0 %vm220_vm0, %v1887_v55 }
  0x5e   : > { %2046 = vmatmul.mubr.msk.bf16.gmra.mrb[4].mxu0 %vm220_vm0, %v1888_v61  ;;  %2006 = vmatmul.mubr.msk.bf16.vlgmr.msra.gmra.mrb[4].mxu1 %vm220_vm0, %v2156_v59 }
 0x11d   : > { %v1993_v62 = vpop.f32.mrb[0].mxu1 }
 0x11e   : > { %v722_v63 = vpop.f32.mrb[1].mxu1 }
 0x11f   : > { %v1994_v0 = vpop.f32.mrb[2].mxu1 }
 0x120   : > { %v725_v2 = vpop.f32.mrb[3].mxu1 }
 0x129   : > { %v2043_v3 = vpop.f32.mrb[0].mxu0 }
 0x12a   : > { %v2051_v5 = vadd.f32 %v2043_v3, %v1993_v62  ;;  %v1559_v8 = vpop.f32.mrb[1].mxu0 }
 0x12b   : > { %v2052_v9 = vadd.f32 %v1559_v8, %v722_v63  ;;  %v2044_v11 = vpop.f32.mrb[2].mxu0 }
 0x12c   : > { %v1607_v38 = vadd.f32 %v2051_v5, %v1894_v4  ;;  %v2053_v12 = vadd.f32 %v2044_v11, %v1994_v0  ;;  %v1562_v13 = vpop.f32.mrb[3].mxu0 }
 0x12d   : > { %v1605_v14 = vadd.f32 %v2052_v9, %v1894_v4  ;;  %v2054_v15 = vadd.f32 %v1562_v13, %v725_v2 }
 0x12e   : > { %v1615_v16 = vmax.f32 %v1607_v38, 0.0  ;;  %v1608_v17 = vadd.f32 %v2053_v12, %v1894_v4 }
 0x12f   : > { %v1613_v10 = vmax.f32 %v1605_v14, 0.0  ;;  %v1606_v1 = vadd.f32 %v2054_v15, %v1894_v4 }
 0x130   : > { %v1908_v18 = vpack.c.bf16 %v1615_v16, %v1615_v16  ;;  %v1616_v19 = vmax.f32 %v1608_v17, 0.0 }
 0x131   : > { %v1906_v20 = vpack.c.bf16 %v1613_v10, %v1613_v10  ;;  %v1614_v22 = vmax.f32 %v1606_v1, 0.0  ;;  %v2047_v25 = vpop.f32.mrb[4].mxu0  ;;  %v2007_v26 = vpop.f32.mrb[4].mxu1 }
 0x132   : > { %1656 = vst.msk [vmem:[%s2423_s16 + $0x8] sm:$0xf] %vm1653_vm4, %v1908_v18  ;;  %v1909_v23 = vpack.c.bf16 %v1616_v19, %v1616_v19  ;;  %v1575_v27 = vpop.f32.mrb[5].mxu0  ;;  %v2055_v28 = vadd.f32 %v2047_v25, %v2007_v26  ;;  %v861_v30 = vpop.f32.mrb[5].mxu1 }
 0x133   : > { %1654 = vst.msk [vmem:[%s2423_s16] sm:$0xf] %vm1653_vm4, %v1906_v20  ;;  %v1907_v24 = vpack.c.bf16 %v1614_v22, %v1614_v22  ;;  %v2048_v31 = vpop.f32.mrb[6].mxu0  ;;  %v2056_v32 = vadd.f32 %v1575_v27, %v861_v30  ;;  %v2008_v33 = vpop.f32.mrb[6].mxu1 }
 0x134   : > { %1657 = vst.msk [vmem:[%s2423_s16 + $0xc] sm:$0xf] %vm1653_vm4, %v1909_v23  ;;  %v1578_v7 = vpop.f32.mrb[7].mxu0  ;;  %v1611_v34 = vadd.f32 %v2055_v28, %v1894_v4  ;;  %v2057_v35 = vadd.f32 %v2048_v31, %v2008_v33  ;;  %v864_v36 = vpop.f32.mrb[7].mxu1 }
 0x135   : > { %1655 = vst.msk [vmem:[%s2423_s16 + $0x4] sm:$0xf] %vm1653_vm4, %v1907_v24  ;;  %v1609_v37 = vadd.f32 %v2056_v32, %v1894_v4  ;;  %v2058_v39 = vadd.f32 %v1578_v7, %v864_v36 }
 0x136   : > { %v1619_v6 = vmax.f32 %v1611_v34, 0.0  ;;  %v1612_v40 = vadd.f32 %v2057_v35, %v1894_v4 }
 0x137   : > { %v1617_v41 = vmax.f32 %v1609_v37, 0.0  ;;  %v1610_v42 = vadd.f32 %v2058_v39, %v1894_v4 }
 0x138   : > { %v1912_v43 = vpack.c.bf16 %v1619_v6, %v1619_v6  ;;  %v1620_v44 = vmax.f32 %v1612_v40, 0.0 }
 0x139   : > { %v1910_v29 = vpack.c.bf16 %v1617_v41, %v1617_v41  ;;  %v1618_v45 = vmax.f32 %v1610_v42, 0.0 }
 0x13a   : > { %1660 = vst.msk [vmem:[%s2423_s16 + $0x18] sm:$0xf] %vm1653_vm4, %v1912_v43  ;;  %v1913_v46 = vpack.c.bf16 %v1620_v44, %v1620_v44 }
 0x13b   : > { %1658 = vst.msk [vmem:[%s2423_s16 + $0x10] sm:$0xf] %vm1653_vm4, %v1910_v29  ;;  %v1911_v47 = vpack.c.bf16 %v1618_v45, %v1618_v45 }
 0x13c   : > { %1661 = vst.msk [vmem:[%s2423_s16 + $0x1c] sm:$0xf] %vm1653_vm4, %v1913_v46 }
 0x13d   : > { %1659 = vst.msk [vmem:[%s2423_s16 + $0x14] sm:$0xf] %vm1653_vm4, %v1911_v47 }
 0x13e PF: > { %s13_s12 = sadd.s32 1, %s2163_s12  }
 0x13f   : > { %p10_p4 = scmp.ge.s32.totalorder %s13_s12, 6  }
 0x141   :  { %12 = sbr.rel (!%p10_p4) target bundleno = 1 (0x1), region = 75 }

// kernel: resnet_pl_loss.12
= control target key start
LH: loop header
LB: loop body
LE: loop exit
PB: predicated region body
PF: predicated region fallthrough
CT: control target
= control target key end

     0   :  { %s2316_s12 = smov 0   ;;  %s2692_s0 = inlined_call_operand.vmem [shape: bf16[4,1,12,12,32], index: 0, kind: input, shape index: {}]   ;;  %s2693_s1 = inlined_call_operand.vmem [shape: bf16[9,32,64], index: 1, kind: input, shape index: {}]   ;;  %s2694_s2 = inlined_call_operand.vmem [shape: f32[1,64], index: 2, kind: input, shape index: {}]   ;;  %s2695_s3 = inlined_call_operand.vmem [shape: bf16[4,64,64], index: 3, kind: output, shape index: {}]  }
   0x1 LB: > { %s1741_s13 = sadd.s32 4294967295, %s2294_s12   ;;  %p1745_p0 = scmp.ge.s32.totalorder %s2294_s12, 1  ;;  %s2294_s12 = sphi %s2316_s12, %s13_s12  }
   0x2   : > { %p137_p1 = scmp.lt.s32.totalorder %s2294_s12, 5 }
   0x4   : > { %p138_p2 = pnand %p1745_p0, %p137_p1 }
   0x5   : > { %v2258_v0 = vld [vmem:[%s2693_s1 + $0x10] sm:$0xff] (!%p138_p2)   ;;  %p161_p3 = scmp.lt.s32.totalorder (!%p138_p2), %s1741_s13, 3  ;;  %v2330_v1 = vld [vmem:[%s2693_s1 + $0x40] sm:$0xff] (!%p138_p2)   ;;  %vm216_vm0 = vcmask (!%p138_p2), 1042432   ;;  %v2260_v2 = vld [vmem:[%s2693_s1 + $0x18] sm:$0xff] (!%p138_p2)   ;;  %vm217_vm1 = vcmask (!%p138_p2), 1046532  }
   0x6   : > { %141 = sbr.rel (%p138_p2) target bundleno = 322 (0x142), region = 32  ;;  %2073 = vmatprep.subr.bf16.mxu1 (!%p138_p2), %v2258_v0  ;;  %2121 = vmatprep.subr.bf16.mxu0 (!%p138_p2), %v2330_v1  ;;  %v2341_v3 = vld [vmem:[%s2693_s1 + $0x48] sm:$0xff] (!%p138_p2)   ;;  %vm2345_vm2 = vmor (!%p138_p2), %vm216_vm0, %vm217_vm1  ;;  %v2353_v5 = vld [vmem:[%s2693_s1] sm:$0xff] (!%p138_p2)   ;;  %vm280_vm3 = vcmask (!%p138_p2), 261120   ;;  %vm499_vm4 = vcmask (!%p138_p2), 1041408   ;;  %vm500_vm5 = vcmask (!%p138_p2), 1045508  }
   0x7   : > { %2074 = vmatpush3.bf16.msra.mxu1 (!%p138_p2), %v2258_v0  ;;  %2122 = vmatpush3.bf16.msra.mxu0 (!%p138_p2), %v2330_v1  ;;  %v2363_v6 = vld [vmem:[%s2693_s1 + $0x50] sm:$0xff] (!%p138_p2)   ;;  %v2265_v44 = vld [vmem:[%s2693_s1 + $0x8] sm:$0xff] (!%p138_p2)   ;;  %v2264_v52 = vld [vmem:[%s2693_s1 + $0x58] sm:$0xff] (!%p138_p2)   ;;  %vm1677_vm7 = vcmask (!%p138_p2), 519168  }
   0x8   : > { %2075 = vmatprep.subr.bf16.mxu1 (!%p138_p2), %v2260_v2  ;;  %2123 = vmatprep.subr.bf16.mxu0 (!%p138_p2), %v2341_v3  ;;  %vm2424_vm6 = vmor (!%p138_p2), %vm499_vm4, %vm500_vm5 }
   0xb   : > { %2076 = vmatpush3.bf16.msra.mxu1 (!%p138_p2), %v2260_v2  ;;  %2124 = vmatpush3.bf16.msra.mxu0 (!%p138_p2), %v2341_v3 }
   0xc   : > { %2085 = vmatprep.subr.bf16.mxu1 (!%p138_p2), %v2353_v5  ;;  %2133 = vmatprep.subr.bf16.mxu0 (!%p138_p2), %v2363_v6 }
   0xd   : > { %s2701_s13 = smov (!%p161_p3, %s1741_s13), 3 }
   0xe   : > { %s2249_s22 = smul.u32 96, %s2701_s13  ;;  %s2010_s4 = sshll.u32 %s2701_s13, 5 }
   0xf   : > { %s2671_s7 = scalar_lea.vmem %s2695_s3, %s2010_s4 }
  0x10   : > { %s2358_s27 = scalar_lea.vmem %s2692_s0, %s2249_s22 }
  0x11   : > { %v184_v7 = vld [vmem:[%s2358_s27] sm:$0xe]  ;;  %v185_v8 = vld [vmem:[%s2358_s27 + $0x4] sm:$0x1]  ;;  %v186_v9 = vld [vmem:[%s2358_s27 + $0x8] sm:$0xe] }
  0x12   : > { %v187_v10 = vld [vmem:[%s2358_s27 + $0xc] sm:$0x1]  ;;  %v1749_v11 = vrot.slane %v184_v7, 9  ;;  %v221_v12 = vrot.slane %v185_v8, 5  ;;  %v1750_v13 = vrot.slane %v186_v9, 9 }
  0x13   : > { %v225_v14 = vrot.slane %v187_v10, 5  ;;  %v1825_v15 = vld [vmem:[%s2358_s27 + $0x10] sm:$0xe]  ;;  %v1826_v16 = vld [vmem:[%s2358_s27 + $0x14] sm:$0x1] }
  0x14   : > { %v222_v17 = vsel %vm2345_vm2, %v1749_v11, %v221_v12  ;;  %v1827_v18 = vld [vmem:[%s2358_s27 + $0x18] sm:$0xe]  ;;  %v1828_v19 = vld [vmem:[%s2358_s27 + $0x1c] sm:$0x1]  ;;  %v1841_v20 = vrot.slane %v1825_v15, 9  ;;  %v813_v21 = vrot.slane %v1826_v16, 5 }
  0x15   : > { %v226_v22 = vsel %vm2345_vm2, %v1750_v13, %v225_v14  ;;  %v1842_v23 = vrot.slane %v1827_v18, 9  ;;  %v817_v24 = vrot.slane %v1828_v19, 5  ;;  %v188_v25 = vld [vmem:[%s2358_s27 + $0x10] sm:$0xe]  ;;  %v189_v26 = vld [vmem:[%s2358_s27 + $0x14] sm:$0x1] }
  0x16   : > { %v1761_v27 = vcombine.low %v222_v17, %v226_v22  ;;  %v814_v28 = vsel %vm2345_vm2, %v1841_v20, %v813_v21  ;;  %v190_v29 = vld [vmem:[%s2358_s27 + $0x18] sm:$0xe]  ;;  %v191_v30 = vld [vmem:[%s2358_s27 + $0x1c] sm:$0x1]  ;;  %v1751_v31 = vrot.slane %v188_v25, 9  ;;  %v229_v32 = vrot.slane %v189_v26, 5 }
  0x17   : > { %v818_v33 = vsel %vm2345_vm2, %v1842_v23, %v817_v24  ;;  %v1752_v34 = vrot.slane %v190_v29, 9  ;;  %v233_v35 = vrot.slane %v191_v30, 5  ;;  %v1829_v36 = vld [vmem:[%s2358_s27 + $0x20] sm:$0xe]  ;;  %v1830_v37 = vld [vmem:[%s2358_s27 + $0x24] sm:$0x1] }
  0x18   : > { %2077 = vmatprep.mubr.msk.bf16.mxu1 %vm280_vm3, %v1761_v27  ;;  %v1853_v38 = vcombine.low %v814_v28, %v818_v33  ;;  %v230_v39 = vsel %vm2345_vm2, %v1751_v31, %v229_v32  ;;  %v1831_v40 = vld [vmem:[%s2358_s27 + $0x28] sm:$0xe]  ;;  %v1832_v41 = vld [vmem:[%s2358_s27 + $0x2c] sm:$0x1]  ;;  %v1843_v42 = vrot.slane %v1829_v36, 9  ;;  %v821_v43 = vrot.slane %v1830_v37, 5 }
  0x19   : > { %v234_v45 = vsel %vm2345_vm2, %v1752_v34, %v233_v35  ;;  %v1844_v46 = vrot.slane %v1831_v40, 9  ;;  %v825_v47 = vrot.slane %v1832_v41, 5  ;;  %v192_v48 = vld [vmem:[%s2358_s27 + $0x20] sm:$0xe]  ;;  %v193_v49 = vld [vmem:[%s2358_s27 + $0x24] sm:$0x1] }
  0x1a   : > { %2125 = vmatprep.mubr.msk.bf16.mxu0 %vm280_vm3, %v1853_v38  ;;  %v1762_v50 = vcombine.low %v230_v39, %v234_v45  ;;  %v822_v51 = vsel %vm2345_vm2, %v1843_v42, %v821_v43  ;;  %v194_v53 = vld [vmem:[%s2358_s27 + $0x28] sm:$0xe]  ;;  %v195_v54 = vld [vmem:[%s2358_s27 + $0x2c] sm:$0x1]  ;;  %v1753_v55 = vrot.slane %v192_v48, 9  ;;  %v237_v56 = vrot.slane %v193_v49, 5 }
  0x1b   : > { %v826_v57 = vsel %vm2345_vm2, %v1844_v46, %v825_v47  ;;  %v1754_v58 = vrot.slane %v194_v53, 9  ;;  %v241_v59 = vrot.slane %v195_v54, 5  ;;  %v196_v62 = vld [vmem:[%s2358_s27 + $0x30] sm:$0xe]  ;;  %v197_v63 = vld [vmem:[%s2358_s27 + $0x34] sm:$0x1] }
  0x1c   : > { %2078 = vmatmul.mubr.msk.bf16.vlgmr.msra.gmra.mrb[0].mxu1 %vm280_vm3, %v1762_v50  ;;  %v1854_v60 = vcombine.low %v822_v51, %v826_v57  ;;  %v238_v61 = vsel %vm2345_vm2, %v1753_v55, %v237_v56  ;;  %v198_v0 = vld [vmem:[%s2358_s27 + $0x38] sm:$0xe]  ;;  %v199_v7 = vld [vmem:[%s2358_s27 + $0x3c] sm:$0x1]  ;;  %v1755_v8 = vrot.slane %v196_v62, 9  ;;  %v245_v9 = vrot.slane %v197_v63, 5 }
  0x1d   : > { %2086 = vmatpush3.bf16.msra.mxu1 %v2353_v5  ;;  %v242_v2 = vsel %vm2345_vm2, %v1754_v58, %v241_v59  ;;  %v1756_v10 = vrot.slane %v198_v0, 9  ;;  %v249_v5 = vrot.slane %v199_v7, 5  ;;  %v1863_v13 = vld [vmem:[%s2358_s27 + $0x10] sm:$0xc]  ;;  %v1864_v14 = vld [vmem:[%s2358_s27 + $0x14] sm:$0x3] }
  0x1e   : > { %2126 = vmatmul.mubr.msk.bf16.vlgmr.msra.gmra.mrb[0].mxu0 %vm280_vm3, %v1854_v60  ;;  %v1763_v12 = vcombine.low %v238_v61, %v242_v2  ;;  %2087 = vmatprep.subr.bf16.mxu1 %v2265_v44  ;;  %v2266_v15 = vld [vmem:[%s2693_s1 + $0x60] sm:$0xff]   ;;  %v246_v17 = vsel %vm2345_vm2, %v1755_v8, %v245_v9  ;;  %v1865_v18 = vld [vmem:[%s2358_s27 + $0x18] sm:$0xc]  ;;  %v1866_v19 = vld [vmem:[%s2358_s27 + $0x1c] sm:$0x3]  ;;  %v1879_v20 = vrot.slane %v1863_v13, 10 }
  0x1f   : > { %v2437_v16 = vld [vmem:[%s2693_s1 + $0x20] sm:$0xff]   ;;  %2134 = vmatpush3.bf16.msra.mxu0 %v2363_v6  ;;  %v991_v21 = vrot.slane %v1864_v14, 6  ;;  %v250_v22 = vsel %vm2345_vm2, %v1756_v10, %v249_v5  ;;  %v1880_v23 = vrot.slane %v1865_v18, 10  ;;  %v995_v24 = vrot.slane %v1866_v19, 6  ;;  %v1869_v28 = vld [vmem:[%s2358_s27 + $0x28] sm:$0xc] }
  0x20   : > { %2135 = vmatprep.subr.bf16.mxu0 %v2264_v52  ;;  %2081 = vmatprep.mubr.msk.bf16.mxu1 %vm280_vm3, %v1763_v12  ;;  %v1764_v25 = vcombine.low %v246_v17, %v250_v22  ;;  %v1867_v26 = vld [vmem:[%s2358_s27 + $0x20] sm:$0xc]  ;;  %v1868_v27 = vld [vmem:[%s2358_s27 + $0x24] sm:$0x3]  ;;  %v1870_v30 = vld [vmem:[%s2358_s27 + $0x2c] sm:$0x3] }
  0x21   : > { %2088 = vmatpush3.bf16.msra.mxu1 %v2265_v44  ;;  %v992_v6 = vsel %vm2424_vm6, %v1879_v20, %v991_v21  ;;  %v996_v29 = vsel %vm2424_vm6, %v1880_v23, %v995_v24  ;;  %v1881_v31 = vrot.slane %v1867_v26, 10  ;;  %v999_v32 = vrot.slane %v1868_v27, 6  ;;  %v2267_v37 = vld [vmem:[%s2358_s27] ss:$8 sps:$4 sm:$0xff]   ;;  %v2269_v40 = vld [vmem:[%s2358_s27 + $0x10] ss:$8 sps:$4 sm:$0xff]  }
  0x22   : > { %v1882_v33 = vrot.slane %v1869_v28, 10  ;;  %2097 = vmatprep.subr.bf16.mxu1 %v2437_v16  ;;  %v1891_v34 = vcombine.low %v992_v6, %v996_v29  ;;  %v1003_v35 = vrot.slane %v1870_v30, 6  ;;  %v1871_v41 = vld [vmem:[%s2358_s27 + $0x30] sm:$0xc]  ;;  %v1872_v42 = vld [vmem:[%s2358_s27 + $0x34] sm:$0x3] }
  0x23   : > { %2136 = vmatpush3.bf16.msra.mxu0 %v2264_v52  ;;  %v1000_v36 = vsel %vm2424_vm6, %v1881_v31, %v999_v32  ;;  %v1873_v43 = vld [vmem:[%s2358_s27 + $0x38] sm:$0xc]  ;;  %v1874_v44 = vld [vmem:[%s2358_s27 + $0x3c] sm:$0x3]  ;;  %v1883_v45 = vrot.slane %v1871_v41, 10  ;;  %v1007_v46 = vrot.slane %v1872_v42, 6 }
  0x24   : > { %2082 = vmatmul.mubr.msk.bf16.gmra.mrb[4].mxu1 %vm280_vm3, %v1764_v25  ;;  %2145 = vmatprep.subr.bf16.mxu0 %v2266_v15  ;;  %v1004_v38 = vsel %vm2424_vm6, %v1882_v33, %v1003_v35  ;;  %v1884_v47 = vrot.slane %v1873_v43, 10  ;;  %v1011_v48 = vrot.slane %v1874_v44, 6  ;;  %v2270_v49 = vld [vmem:[%s2693_s1 + $0x68] sm:$0xff]   ;;  %v1875_v51 = vld [vmem:[%s2358_s27 + $0x40] sm:$0xc]  ;;  %v2275_v62 = vld [vmem:[%s2693_s1 + $0x70] sm:$0xff]  }
  0x25   : > { %2137 = vmatprep.mubr.msk.bf16.mxu0 %vm280_vm3, %v1891_v34  ;;  %v1892_v39 = vcombine.low %v1000_v36, %v1004_v38  ;;  %2089 = vmatprep.mubr.msk.bf16.mxu1 %vm280_vm3, %v2267_v37  ;;  %v1008_v50 = vsel %vm2424_vm6, %v1883_v45, %v1007_v46  ;;  %v1876_v52 = vld [vmem:[%s2358_s27 + $0x44] sm:$0x3]  ;;  %v1877_v53 = vld [vmem:[%s2358_s27 + $0x48] sm:$0xc]  ;;  %v1878_v55 = vld [vmem:[%s2358_s27 + $0x4c] sm:$0x3] }
  0x26   : > { %v1012_v54 = vsel %vm2424_vm6, %v1884_v47, %v1011_v48  ;;  %v1885_v56 = vrot.slane %v1875_v51, 10  ;;  %v1015_v57 = vrot.slane %v1876_v52, 6  ;;  %v1886_v58 = vrot.slane %v1877_v53, 10  ;;  %v2272_v59 = vld [vmem:[%s2693_s1 + $0x28] sm:$0xff]   ;;  %v2498_v7 = vld [vmem:[%s2693_s1 + $0x30] sm:$0xff]   ;;  %v2279_v31 = vld [vmem:[%s2693_s1 + $0x78] sm:$0xff]  }
  0x27   : > { %v1893_v60 = vcombine.low %v1008_v50, %v1012_v54  ;;  %v1019_v61 = vrot.slane %v1878_v55, 6  ;;  %v2271_v0 = vld [vmem:[%s2358_s27 + $0x20] ss:$8 sps:$4 sm:$0xff]   ;;  %v2273_v10 = vld [vmem:[%s2358_s27 + $0x30] ss:$8 sps:$4 sm:$0xff]  }
  0x28   : > { %v1016_v63 = vsel %vm2424_vm6, %v1885_v56, %v1015_v57  ;;  %v2274_v9 = vld [vmem:[%s2358_s27 + $0x20] ss:$8 sps:$4 sm:$0xff]   ;;  %v468_v5 = vld [vmem:[%s2358_s27 + $0x4] sm:$0x3]  ;;  %v470_v14 = vld [vmem:[%s2358_s27 + $0xc] sm:$0x3] }
  0x29   : > { %v1020_v2 = vsel %vm2424_vm6, %v1886_v58, %v1019_v61  ;;  %v467_v12 = vld [vmem:[%s2358_s27] sm:$0xc]  ;;  %v469_v13 = vld [vmem:[%s2358_s27 + $0x8] sm:$0xc]  ;;  %v508_v18 = vrot.slane %v470_v14, 6  ;;  %v2281_v43 = vld [vmem:[%s2693_s1 + $0x38] sm:$0xff]  }
  0x2a   : > { %2138 = vmatmul.mubr.msk.bf16.vlgmr.msra.gmra.mrb[0].mxu0 %vm280_vm3, %v1892_v39  ;;  %v1894_v8 = vcombine.low %v1016_v63, %v1020_v2  ;;  %v1782_v17 = vrot.slane %v469_v13, 10  ;;  %v471_v19 = vld [vmem:[%s2358_s27 + $0x10] sm:$0xc]  ;;  %v472_v20 = vld [vmem:[%s2358_s27 + $0x14] sm:$0x3]  ;;  %v2282_v54 = vld [vmem:[%s2693_s1 + $0x80] sm:$0xff]  }
  0x2b   : > { %2146 = vmatpush3.bf16.msra.mxu0 %v2266_v15  ;;  %2141 = vmatprep.mubr.msk.bf16.mxu0 %vm280_vm3, %v1893_v60  ;;  %v1781_v15 = vrot.slane %v467_v12, 10  ;;  %v473_v23 = vld [vmem:[%s2358_s27 + $0x18] sm:$0xc]  ;;  %v474_v24 = vld [vmem:[%s2358_s27 + $0x1c] sm:$0x3]  ;;  %v1783_v25 = vrot.slane %v471_v19, 10 }
  0x2c   : > { %2090 = vmatmul.mubr.msk.bf16.vlgmr.msra.gmra.mrb[0].mxu1 %vm280_vm3, %v2269_v40  ;;  %2147 = vmatprep.subr.bf16.mxu0 %v2270_v49  ;;  %v509_v22 = vsel %vm2424_vm6, %v1782_v17, %v508_v18  ;;  %v512_v6 = vrot.slane %v472_v20, 6  ;;  %v1784_v27 = vrot.slane %v473_v23, 10  ;;  %v516_v28 = vrot.slane %v474_v24, 6  ;;  %v2276_v29 = vld [vmem:[%s2358_s27 + $0x30] ss:$8 sps:$4 sm:$0xff]  }
  0x2d   : > { %2098 = vmatpush3.bf16.msra.mxu1 %v2437_v16  ;;  %2093 = vmatprep.mubr.msk.bf16.mxu1 %vm280_vm3, %v2271_v0  ;;  %v504_v16 = vrot.slane %v468_v5, 6  ;;  %v2278_v33 = vld [vmem:[%s2358_s27 + $0x40] ss:$8 sps:$4 sm:$0xff]   ;;  %v476_v36 = vld [vmem:[%s2358_s27 + $0x24] sm:$0x3] }
  0x2e   : > { %2099 = vmatprep.subr.bf16.mxu1 %v2272_v59  ;;  %v513_v30 = vsel %vm2424_vm6, %v1783_v25, %v512_v6  ;;  %v517_v32 = vsel %vm2424_vm6, %v1784_v27, %v516_v28  ;;  %v475_v35 = vld [vmem:[%s2358_s27 + $0x20] sm:$0xc]  ;;  %v477_v37 = vld [vmem:[%s2358_s27 + $0x28] sm:$0xc]  ;;  %v478_v38 = vld [vmem:[%s2358_s27 + $0x2c] sm:$0x3] }
  0x2f   : > { %2148 = vmatpush3.bf16.msra.mxu0 %v2270_v49  ;;  %v505_v21 = vsel %vm2424_vm6, %v1781_v15, %v504_v16  ;;  %v1794_v34 = vcombine.low %v513_v30, %v517_v32  ;;  %v1785_v39 = vrot.slane %v475_v35, 10  ;;  %v520_v40 = vrot.slane %v476_v36, 6  ;;  %v479_v45 = vld [vmem:[%s2358_s27 + $0x30] sm:$0xc]  ;;  %v480_v46 = vld [vmem:[%s2358_s27 + $0x34] sm:$0x3] }
  0x30   : > { %2157 = vmatprep.subr.bf16.mxu0 %v2275_v62  ;;  %v1793_v26 = vcombine.low %v505_v21, %v509_v22  ;;  %v1786_v41 = vrot.slane %v477_v37, 10  ;;  %v524_v42 = vrot.slane %v478_v38, 6  ;;  %v481_v47 = vld [vmem:[%s2358_s27 + $0x38] sm:$0xc]  ;;  %v482_v50 = vld [vmem:[%s2358_s27 + $0x3c] sm:$0x3] }
  0x31   : > { %2100 = vmatpush3.bf16.msra.mxu1 %v2272_v59  ;;  %v521_v44 = vsel %vm2424_vm6, %v1785_v39, %v520_v40  ;;  %v2280_v48 = vld [vmem:[%s2358_s27 + $0x50] ss:$8 sps:$4 sm:$0xff]   ;;  %v1787_v51 = vrot.slane %v479_v45, 10  ;;  %v528_v52 = vrot.slane %v480_v46, 6  ;;  %v1788_v53 = vrot.slane %v481_v47, 10  ;;  %v2285_v37 = vld [vmem:[%s2693_s1 + $0x88] sm:$0xff]  }
  0x32   : > { %2142 = vmatmul.mubr.msk.bf16.gmra.mrb[4].mxu0 %vm280_vm3, %v1894_v8  ;;  %2109 = vmatprep.subr.bf16.mxu1 %v2498_v7  ;;  %v525_v49 = vsel %vm2424_vm6, %v1786_v41, %v524_v42  ;;  %v532_v56 = vrot.slane %v482_v50, 6  ;;  %v1923_v57 = vld [vmem:[%s2358_s27 + $0x20] sm:$0xe]  ;;  %v1924_v58 = vld [vmem:[%s2358_s27 + $0x24] sm:$0x1] }
  0x33   : > { %2149 = vmatprep.mubr.msk.bf16.mxu0 %vm280_vm3, %v2274_v9  ;;  %v1795_v55 = vcombine.low %v521_v44, %v525_v49  ;;  %v529_v59 = vsel %vm2424_vm6, %v1787_v51, %v528_v52  ;;  %v1925_v60 = vld [vmem:[%s2358_s27 + $0x28] sm:$0xe]  ;;  %v1926_v61 = vld [vmem:[%s2358_s27 + $0x2c] sm:$0x1]  ;;  %v1300_v63 = vrot.slane %v1924_v58, 5 }
  0x34   : > { %2094 = vmatmul.mubr.msk.bf16.gmra.mrb[4].mxu1 %vm280_vm3, %v2273_v10  ;;  %v533_v0 = vsel %vm2424_vm6, %v1788_v53, %v532_v56  ;;  %v1940_v2 = vrot.slane %v1925_v60, 9  ;;  %v1927_v10 = vld [vmem:[%s2358_s27 + $0x30] sm:$0xe]  ;;  %v1928_v12 = vld [vmem:[%s2358_s27 + $0x34] sm:$0x1] }
  0x35   : > { %2101 = vmatprep.mubr.msk.bf16.mxu1 %vm280_vm3, %v1793_v26  ;;  %v1796_v8 = vcombine.low %v529_v59, %v533_v0  ;;  %v1929_v5 = vld [vmem:[%s2358_s27 + $0x38] sm:$0xe]  ;;  %v1930_v14 = vld [vmem:[%s2358_s27 + $0x3c] sm:$0x1]  ;;  %v1941_v15 = vrot.slane %v1927_v10, 9  ;;  %v1308_v16 = vrot.slane %v1928_v12, 5 }
  0x36   : > { %v1942_v17 = vrot.slane %v1929_v5, 9  ;;  %v1312_v19 = vrot.slane %v1930_v14, 5  ;;  %v2283_v21 = vld [vmem:[%s2358_s27 + $0x10] ss:$8 sps:$4 sm:$0xff]   ;;  %v1931_v23 = vld [vmem:[%s2358_s27 + $0x40] sm:$0xe] }
  0x37   : > { %v1309_v20 = vsel %vm2345_vm2, %v1941_v15, %v1308_v16  ;;  %v1932_v24 = vld [vmem:[%s2358_s27 + $0x44] sm:$0x1]  ;;  %v1933_v25 = vld [vmem:[%s2358_s27 + $0x48] sm:$0xe]  ;;  %v1934_v6 = vld [vmem:[%s2358_s27 + $0x4c] sm:$0x1] }
  0x38   : > { %v1313_v22 = vsel %vm2345_vm2, %v1942_v17, %v1312_v19  ;;  %v1943_v26 = vrot.slane %v1931_v23, 9  ;;  %v1316_v27 = vrot.slane %v1932_v24, 5  ;;  %v1944_v30 = vrot.slane %v1933_v25, 9  ;;  %v1937_v35 = vld [vmem:[%s2358_s27 + $0x58] sm:$0xe] }
  0x39   : > { %v1952_v28 = vcombine.low %v1309_v20, %v1313_v22  ;;  %v1938_v38 = vld [vmem:[%s2358_s27 + $0x5c] sm:$0x1]  ;;  %v1946_v41 = vrot.slane %v1937_v35, 9  ;;  %v2286_v44 = vld [vmem:[%s2358_s27 + $0x30] ss:$8 sps:$4 sm:$0xff]  }
  0x3a   : > { %2150 = vmatmul.mubr.msk.bf16.vlgmr.msra.gmra.mrb[0].mxu0 %vm280_vm3, %v2276_v29  ;;  %v2284_v29 = vld [vmem:[%s2358_s27 + $0x20] ss:$8 sps:$4 sm:$0xff]   ;;  %v1317_v32 = vsel %vm2345_vm2, %v1943_v26, %v1316_v27  ;;  %v1964_v50 = vld [vmem:[%s2358_s27 + $0x2c] sm:$0x3]  ;;  %v1966_v56 = vld [vmem:[%s2358_s27 + $0x34] sm:$0x3] }
  0x3b   : > { %2158 = vmatpush3.bf16.msra.mxu0 %v2275_v62  ;;  %2153 = vmatprep.mubr.msk.bf16.mxu0 %vm280_vm3, %v2278_v33  ;;  %v1939_v62 = vrot.slane %v1923_v57, 9  ;;  %v1935_v33 = vld [vmem:[%s2358_s27 + $0x50] sm:$0xe]  ;;  %v1961_v47 = vld [vmem:[%s2358_s27 + $0x20] sm:$0xc] }
  0x3c   : > { %2102 = vmatmul.mubr.msk.bf16.vlgmr.msra.gmra.mrb[0].mxu1 %vm280_vm3, %v1794_v34  ;;  %2159 = vmatprep.subr.bf16.mxu0 %v2279_v31  ;;  %v1936_v34 = vld [vmem:[%s2358_s27 + $0x54] sm:$0x1]  ;;  %v1945_v39 = vrot.slane %v1935_v33, 9  ;;  %v1963_v49 = vld [vmem:[%s2358_s27 + $0x28] sm:$0xc]  ;;  %v1977_v51 = vrot.slane %v1961_v47, 10 }
  0x3d   : > { %2110 = vmatpush3.bf16.msra.mxu1 %v2498_v7  ;;  %2105 = vmatprep.mubr.msk.bf16.mxu1 %vm280_vm3, %v1795_v55  ;;  %v1304_v7 = vrot.slane %v1926_v61, 5  ;;  %v1301_v9 = vsel %vm2345_vm2, %v1939_v62, %v1300_v63  ;;  %v1324_v40 = vrot.slane %v1936_v34, 5  ;;  %v1978_v53 = vrot.slane %v1963_v49, 10  ;;  %v1965_v55 = vld [vmem:[%s2358_s27 + $0x30] sm:$0xc] }
  0x3e   : > { %2111 = vmatprep.subr.bf16.mxu1 %v2281_v43  ;;  %v2287_v58 = vld [vmem:[%s2358_s27 + $0x40] ss:$8 sps:$4 sm:$0xff]   ;;  %v1967_v60 = vld [vmem:[%s2358_s27 + $0x38] sm:$0xc]  ;;  %v1968_v61 = vld [vmem:[%s2358_s27 + $0x3c] sm:$0x3] }
  0x3f   : > { %2160 = vmatpush3.bf16.msra.mxu0 %v2279_v31  ;;  %v1305_v13 = vsel %vm2345_vm2, %v1940_v2, %v1304_v7  ;;  %v1320_v31 = vrot.slane %v1934_v6, 5  ;;  %v1325_v45 = vsel %vm2345_vm2, %v1945_v39, %v1324_v40  ;;  %v1486_v62 = vrot.slane %v1966_v56, 6  ;;  %v1833_v7 = vld [vmem:[%s2358_s27 + $0x30] sm:$0xe]  ;;  %v1835_v10 = vld [vmem:[%s2358_s27 + $0x38] sm:$0xe] }
  0x40   : > { %2169 = vmatprep.subr.bf16.mxu0 %v2282_v54  ;;  %v1951_v18 = vcombine.low %v1301_v9, %v1305_v13  ;;  %v1980_v0 = vrot.slane %v1967_v60, 10  ;;  %v1490_v2 = vrot.slane %v1968_v61, 6  ;;  %v1836_v12 = vld [vmem:[%s2358_s27 + $0x3c] sm:$0x1]  ;;  %v1845_v5 = vrot.slane %v1833_v7, 9 }
  0x41   : > { %2112 = vmatpush3.bf16.msra.mxu1 %v2281_v43  ;;  %v1321_v36 = vsel %vm2345_vm2, %v1944_v30, %v1320_v31  ;;  %v1328_v43 = vrot.slane %v1938_v38, 5  ;;  %v1846_v14 = vrot.slane %v1835_v10, 9  ;;  %v833_v15 = vrot.slane %v1836_v12, 5  ;;  %v1969_v16 = vld [vmem:[%s2358_s27 + $0x40] sm:$0xc] }
  0x42   : > { %2154 = vmatmul.mubr.msk.bf16.gmra.mrb[4].mxu0 %vm280_vm3, %v2280_v48  ;;  %2181 = vmatprep.subr.bf16.mxu1 %v2330_v1  ;;  %v1953_v42 = vcombine.low %v1317_v32, %v1321_v36  ;;  %v1962_v48 = vld [vmem:[%s2358_s27 + $0x24] sm:$0x3]  ;;  %v1971_v20 = vld [vmem:[%s2358_s27 + $0x48] sm:$0xc]  ;;  %v1981_v22 = vrot.slane %v1969_v16, 10  ;;  %v1491_v23 = vsel %vm2424_vm6, %v1980_v0, %v1490_v2 }
  0x43   : > { %2161 = vmatprep.mubr.msk.bf16.mxu0 %vm280_vm3, %v1951_v18  ;;  %v1329_v46 = vsel %vm2345_vm2, %v1946_v41, %v1328_v43  ;;  %v1478_v52 = vrot.slane %v1962_v48, 6  ;;  %v1970_v17 = vld [vmem:[%s2358_s27 + $0x44] sm:$0x3]  ;;  %v834_v24 = vsel %vm2345_vm2, %v1846_v14, %v833_v15  ;;  %v1982_v25 = vrot.slane %v1971_v20, 10  ;;  %v1837_v26 = vld [vmem:[%s2358_s27 + $0x40] sm:$0xe] }
  0x44   : > { %2106 = vmatmul.mubr.msk.bf16.gmra.mrb[4].mxu1 %vm280_vm3, %v1796_v8  ;;  %v1954_v57 = vcombine.low %v1325_v45, %v1329_v46  ;;  %v1834_v8 = vld [vmem:[%s2358_s27 + $0x34] sm:$0x1]  ;;  %v1838_v27 = vld [vmem:[%s2358_s27 + $0x44] sm:$0x1]  ;;  %v1839_v30 = vld [vmem:[%s2358_s27 + $0x48] sm:$0xe] }
  0x45   : > { %2113 = vmatprep.mubr.msk.bf16.mxu1 %vm280_vm3, %v2283_v21  ;;  %v1479_v59 = vsel %vm2424_vm6, %v1977_v51, %v1478_v52  ;;  %v829_v13 = vrot.slane %v1834_v8, 5  ;;  %v1972_v21 = vld [vmem:[%s2358_s27 + $0x4c] sm:$0x3]  ;;  %v1847_v32 = vrot.slane %v1837_v26, 9  ;;  %v837_v33 = vrot.slane %v1838_v27, 5 }
  0x46   : > { %v1498_v6 = vrot.slane %v1972_v21, 6  ;;  %v1840_v31 = vld [vmem:[%s2358_s27 + $0x4c] sm:$0x1]  ;;  %v1848_v35 = vrot.slane %v1839_v30, 9  ;;  %v1974_v38 = vld [vmem:[%s2358_s27 + $0x54] sm:$0x3] }
  0x47   : > { %v830_v19 = vsel %vm2345_vm2, %v1845_v5, %v829_v13  ;;  %v841_v36 = vrot.slane %v1840_v31, 5  ;;  %v1975_v41 = vld [vmem:[%s2358_s27 + $0x58] sm:$0xc]  ;;  %v838_v47 = vsel %vm2345_vm2, %v1847_v32, %v837_v33 }
  0x48   : > { %v1499_v34 = vsel %vm2424_vm6, %v1982_v25, %v1498_v6  ;;  %v1984_v45 = vrot.slane %v1975_v41, 10 }
  0x49   : > { %v842_v48 = vsel %vm2345_vm2, %v1848_v35, %v841_v36 }
  0x4a   : > { %2162 = vmatmul.mubr.msk.bf16.vlgmr.msra.gmra.mrb[0].mxu0 %vm280_vm3, %v1952_v28  ;;  %v1855_v28 = vcombine.low %v830_v19, %v834_v24  ;;  %v1856_v51 = vcombine.low %v838_v47, %v842_v48 }
  0x4b   : > { %2170 = vmatpush3.bf16.msra.mxu0 %v2282_v54  ;;  %2165 = vmatprep.mubr.msk.bf16.mxu0 %vm280_vm3, %v1953_v42  ;;  %v1482_v54 = vrot.slane %v1964_v50, 6  ;;  %v1976_v42 = vld [vmem:[%s2358_s27 + $0x5c] sm:$0x3] }
  0x4c   : > { %2114 = vmatmul.mubr.msk.bf16.vlgmr.msra.gmra.mrb[0].mxu1 %vm280_vm3, %v2284_v29  ;;  %2171 = vmatprep.subr.bf16.mxu0 %v2285_v37  ;;  %v1506_v46 = vrot.slane %v1976_v42, 6 }
  0x4d   : > { %2183 = vmatpush3.bf16.msra.mxu1 %v2330_v1  ;;  %2117 = vmatprep.mubr.msk.bf16.mxu1 %vm280_vm3, %v2286_v44  ;;  %v1979_v1 = vrot.slane %v1965_v55, 10  ;;  %v1483_v63 = vsel %vm2424_vm6, %v1978_v53, %v1482_v54  ;;  %v1502_v44 = vrot.slane %v1974_v38, 6 }
  0x4e   : > { %2182 = vmatprep.subr.bf16.mxu1 %v2341_v3  ;;  %v1989_v9 = vcombine.low %v1479_v59, %v1483_v63  ;;  %v1507_v50 = vsel %vm2424_vm6, %v1984_v45, %v1506_v46 }
  0x4f   : > { %2172 = vmatpush3.bf16.msra.mxu0 %v2285_v37  ;;  %v1487_v18 = vsel %vm2424_vm6, %v1979_v1, %v1486_v62  ;;  %v1973_v37 = vld [vmem:[%s2358_s27 + $0x50] sm:$0xc] }
  0x50   : > { %v1990_v39 = vcombine.low %v1487_v18, %v1491_v23  ;;  %v1983_v43 = vrot.slane %v1973_v37, 10 }
  0x51   : > { %2184 = vmatpush3.bf16.msra.mxu1 %v2341_v3  ;;  %v1494_v3 = vrot.slane %v1970_v17, 6 }
  0x52   : > { %2166 = vmatmul.mubr.msk.bf16.gmra.mrb[4].mxu0 %vm280_vm3, %v1954_v57  ;;  %v1503_v49 = vsel %vm2424_vm6, %v1983_v43, %v1502_v44  ;;  %v1999_v57 = vld [vmem:[%s2694_s2] ss:$0 sm:$0xff] }
  0x53   : > { %2173 = vmatprep.mubr.msk.bf16.mxu0 %vm280_vm3, %v1989_v9  ;;  %v1495_v29 = vsel %vm2424_vm6, %v1981_v22, %v1494_v3  ;;  %v1992_v52 = vcombine.low %v1503_v49, %v1507_v50 }
  0x54   : > { %2118 = vmatmul.mubr.msk.bf16.gmra.mrb[4].mxu1 %vm280_vm3, %v2287_v58  ;;  %v1991_v40 = vcombine.low %v1495_v29, %v1499_v34 }
  0x55   : > { %2129 = vmatprep.mubr.msk.bf16.mxu1 %vm280_vm3, %v1855_v28 }
  0x5a   : > { %2174 = vmatmul.mubr.msk.bf16.vlgmr.msra.gmra.mrb[0].mxu0 %vm280_vm3, %v1990_v39 }
  0x5b   : > { %2177 = vmatprep.mubr.msk.bf16.mxu0 %vm280_vm3, %v1991_v40 }
  0x60   : > { %2130 = vmatmul.mubr.msk.bf16.vlgmr.msra.gmra.mrb[4].mxu1 %vm280_vm3, %v1856_v51 }
  0x62   : > { %2178 = vmatmul.mubr.msk.bf16.gmra.mrb[4].mxu0 %vm280_vm3, %v1992_v52 }
 0x11f   : > { %v2115_v53 = vpop.f32.mrb[0].mxu1 }
 0x120   : > { %v740_v4 = vpop.f32.mrb[1].mxu1 }
 0x121   : > { %v2116_v54 = vpop.f32.mrb[2].mxu1 }
 0x122   : > { %v743_v55 = vpop.f32.mrb[3].mxu1 }
 0x12d   : > { %v2175_v56 = vpop.f32.mrb[0].mxu0 }
 0x12e   : > { %v2185_v58 = vadd.f32 %v2175_v56, %v2115_v53  ;;  %v1583_v59 = vpop.f32.mrb[1].mxu0 }
 0x12f   : > { %v2186_v11 = vadd.f32 %v1583_v59, %v740_v4  ;;  %v2176_v60 = vpop.f32.mrb[2].mxu0 }
 0x130   : > { %v1631_v61 = vadd.f32 %v2185_v58, %v1999_v57  ;;  %v2187_v1 = vadd.f32 %v2176_v60, %v2116_v54  ;;  %v1586_v62 = vpop.f32.mrb[3].mxu0 }
 0x131   : > { %v1629_v63 = vadd.f32 %v2186_v11, %v1999_v57  ;;  %v2188_v0 = vadd.f32 %v1586_v62, %v743_v55 }
 0x132   : > { %v1639_v2 = vmax.f32 %v1631_v61, 0.0  ;;  %v1632_v7 = vadd.f32 %v2187_v1, %v1999_v57 }
 0x133   : > { %v1637_v8 = vmax.f32 %v1629_v63, 0.0  ;;  %v1630_v9 = vadd.f32 %v2188_v0, %v1999_v57  ;;  %v2131_v10 = vpop.f32.mrb[4].mxu1 }
 0x134   : > { %v2013_v12 = vpack.c.bf16 %v1639_v2, %v1639_v2  ;;  %v1640_v5 = vmax.f32 %v1632_v7, 0.0  ;;  %v934_v13 = vpop.f32.mrb[5].mxu1 }
 0x135   : > { %v2011_v14 = vpack.c.bf16 %v1637_v8, %v1637_v8  ;;  %v1638_v15 = vmax.f32 %v1630_v9, 0.0  ;;  %v2179_v16 = vpop.f32.mrb[4].mxu0  ;;  %v2132_v17 = vpop.f32.mrb[6].mxu1 }
 0x136   : > { %1680 = vst.msk [vmem:[%s2671_s7 + $0x8] sm:$0xf] %vm1677_vm7, %v2013_v12  ;;  %v2014_v18 = vpack.c.bf16 %v1640_v5, %v1640_v5  ;;  %v2189_v19 = vadd.f32 %v2179_v16, %v2131_v10  ;;  %v1599_v20 = vpop.f32.mrb[5].mxu0  ;;  %v937_v21 = vpop.f32.mrb[7].mxu1 }
 0x137   : > { %1678 = vst.msk [vmem:[%s2671_s7] sm:$0xf] %vm1677_vm7, %v2011_v14  ;;  %v2012_v22 = vpack.c.bf16 %v1638_v15, %v1638_v15  ;;  %v2190_v3 = vadd.f32 %v1599_v20, %v934_v13  ;;  %v2180_v23 = vpop.f32.mrb[6].mxu0 }
 0x138   : > { %1681 = vst.msk [vmem:[%s2671_s7 + $0xc] sm:$0xf] %vm1677_vm7, %v2014_v18  ;;  %v1635_v24 = vadd.f32 %v2189_v19, %v1999_v57  ;;  %v2191_v25 = vadd.f32 %v2180_v23, %v2132_v17  ;;  %v1602_v6 = vpop.f32.mrb[7].mxu0 }
 0x139   : > { %1679 = vst.msk [vmem:[%s2671_s7 + $0x4] sm:$0xf] %vm1677_vm7, %v2012_v22  ;;  %v1633_v26 = vadd.f32 %v2190_v3, %v1999_v57  ;;  %v2192_v27 = vadd.f32 %v1602_v6, %v937_v21 }
 0x13a   : > { %v1643_v28 = vmax.f32 %v1635_v24, 0.0  ;;  %v1636_v29 = vadd.f32 %v2191_v25, %v1999_v57 }
 0x13b   : > { %v1641_v30 = vmax.f32 %v1633_v26, 0.0  ;;  %v1634_v31 = vadd.f32 %v2192_v27, %v1999_v57 }
 0x13c   : > { %v2017_v32 = vpack.c.bf16 %v1643_v28, %v1643_v28  ;;  %v1644_v33 = vmax.f32 %v1636_v29, 0.0 }
 0x13d   : > { %v2015_v34 = vpack.c.bf16 %v1641_v30, %v1641_v30  ;;  %v1642_v35 = vmax.f32 %v1634_v31, 0.0 }
 0x13e   : > { %1684 = vst.msk [vmem:[%s2671_s7 + $0x18] sm:$0xf] %vm1677_vm7, %v2017_v32  ;;  %v2018_v36 = vpack.c.bf16 %v1644_v33, %v1644_v33 }
 0x13f   : > { %1682 = vst.msk [vmem:[%s2671_s7 + $0x10] sm:$0xf] %vm1677_vm7, %v2015_v34  ;;  %v2016_v37 = vpack.c.bf16 %v1642_v35, %v1642_v35 }
 0x140   : > { %1685 = vst.msk [vmem:[%s2671_s7 + $0x1c] sm:$0xf] %vm1677_vm7, %v2018_v36 }
 0x141   : > { %1683 = vst.msk [vmem:[%s2671_s7 + $0x14] sm:$0xf] %vm1677_vm7, %v2016_v37 }
 0x142 PF: > { %s13_s12 = sadd.s32 1, %s2294_s12  }
 0x143   : > { %p10_p4 = scmp.ge.s32.totalorder %s13_s12, 6  }
 0x145   :  { %12 = sbr.rel (!%p10_p4) target bundleno = 1 (0x1), region = 72 }

// kernel: resnet_pl_loss.13
= control target key start
LH: loop header
LB: loop body
LE: loop exit
PB: predicated region body
PF: predicated region fallthrough
CT: control target
= control target key end

     0   :  { %s2412_s12 = smov 0   ;;  %s2714_s0 = inlined_call_operand.vmem [shape: bf16[4,1,16,16,64], index: 0, kind: input, shape index: {}]   ;;  %s2715_s1 = inlined_call_operand.vmem [shape: bf16[9,64,64], index: 1, kind: input, shape index: {}]   ;;  %s2716_s2 = inlined_call_operand.vmem [shape: f32[1,64], index: 2, kind: input, shape index: {}]   ;;  %s2717_s3 = inlined_call_operand.vmem [shape: bf16[4,64,64], index: 3, kind: output, shape index: {}]  }
   0x1 LB: > { %s1738_s13 = sadd.s32 4294967295, %s2390_s12   ;;  %p1742_p0 = scmp.ge.s32.totalorder %s2390_s12, 1  ;;  %s2390_s12 = sphi %s2412_s12, %s13_s12  }
   0x2   : > { %p137_p1 = scmp.lt.s32.totalorder %s2390_s12, 5 }
   0x4   : > { %p138_p2 = pnand %p1742_p0, %p137_p1 }
   0x5   : > { %v2324_v0 = vld [vmem:[%s2715_s1 + $0x20] sm:$0xff] (!%p138_p2)   ;;  %p161_p3 = scmp.lt.s32.totalorder (!%p138_p2), %s1738_s13, 3  ;;  %v2326_v2 = vld [vmem:[%s2715_s1 + $0x28] sm:$0xff] (!%p138_p2)   ;;  %v2328_v4 = vld [vmem:[%s2715_s1 + $0x30] sm:$0xff] (!%p138_p2)   ;;  %vm220_vm0 = vcmask (!%p138_p2), 1041408   ;;  %vm221_vm1 = vcmask (!%p138_p2), 1045508  }
   0x6   : > { %141 = sbr.rel (%p138_p2) target bundleno = 319 (0x13f), region = 32  ;;  %v2325_v1 = vld [vmem:[%s2715_s1 + $0x80] sm:$0xff] (!%p138_p2)   ;;  %2100 = vmatprep.subr.bf16.mxu1 (!%p138_p2), %v2324_v0  ;;  %v2327_v3 = vld [vmem:[%s2715_s1 + $0x88] sm:$0xff] (!%p138_p2)   ;;  %v2329_v5 = vld [vmem:[%s2715_s1 + $0x90] sm:$0xff] (!%p138_p2)   ;;  %vm300_vm2 = vcmask (!%p138_p2), 523264   ;;  %vm1674_vm4 = vcmask (!%p138_p2), 519168  }
   0x7   : > { %2164 = vmatprep.subr.bf16.mxu0 (!%p138_p2), %v2325_v1  ;;  %2101 = vmatpush3.bf16.msra.mxu1 (!%p138_p2), %v2324_v0  ;;  %v2330_v6 = vld [vmem:[%s2715_s1 + $0x38] sm:$0xff] (!%p138_p2)   ;;  %vm2456_vm3 = vmor (!%p138_p2), %vm220_vm0, %vm221_vm1  ;;  %v2332_v19 = vld [vmem:[%s2715_s1] sm:$0xff] (!%p138_p2)  }
   0x8   : > { %2165 = vmatpush3.bf16.msra.mxu0 (!%p138_p2), %v2325_v1  ;;  %2102 = vmatprep.subr.bf16.mxu1 (!%p138_p2), %v2326_v2  ;;  %v2331_v10 = vld [vmem:[%s2715_s1 + $0x98] sm:$0xff] (!%p138_p2)   ;;  %v2333_v25 = vld [vmem:[%s2715_s1 + $0xa0] sm:$0xff] (!%p138_p2)   ;;  %v2334_v52 = vld [vmem:[%s2715_s1 + $0x8] sm:$0xff] (!%p138_p2)  }
   0x9   : > { %2166 = vmatprep.subr.bf16.mxu0 (!%p138_p2), %v2327_v3  ;;  %v2335_v54 = vld [vmem:[%s2715_s1 + $0xa8] sm:$0xff] (!%p138_p2)  }
   0xb   : > { %2103 = vmatpush3.bf16.msra.mxu1 (!%p138_p2), %v2326_v2 }
   0xc   : > { %2167 = vmatpush3.bf16.msra.mxu0 (!%p138_p2), %v2327_v3  ;;  %2104 = vmatprep.subr.bf16.mxu1 (!%p138_p2), %v2328_v4 }
   0xd   : > { %s2721_s13 = smov (!%p161_p3, %s1738_s13), 3  ;;  %2168 = vmatprep.subr.bf16.mxu0 %v2329_v5 }
   0xe   : > { %s2018_s24 = sshll.u32 %s2721_s13, 7  ;;  %s2019_s18 = sshll.u32 %s2721_s13, 5 }
   0xf   : > { %s2444_s29 = scalar_lea.vmem %s2714_s0, %s2018_s24  ;;  %2105 = vmatpush3.bf16.msra.mxu1 %v2328_v4  ;;  %s170_s21 = scalar_lea.vmem %s2717_s3, %s2019_s18 }
  0x10   : > { %v188_v7 = vld [vmem:[%s2444_s29] sm:$0xc]  ;;  %v189_v8 = vld [vmem:[%s2444_s29 + $0x4] sm:$0x3]  ;;  %v190_v9 = vld [vmem:[%s2444_s29 + $0x8] sm:$0xc]  ;;  %2169 = vmatpush3.bf16.msra.mxu0 %v2329_v5  ;;  %2106 = vmatprep.subr.bf16.mxu1 %v2330_v6 }
  0x11   : > { %v191_v11 = vld [vmem:[%s2444_s29 + $0xc] sm:$0x3]  ;;  %v1747_v13 = vrot.slane %v188_v7, 10  ;;  %v225_v14 = vrot.slane %v189_v8, 6  ;;  %v1748_v15 = vrot.slane %v190_v9, 10  ;;  %2170 = vmatprep.subr.bf16.mxu0 %v2331_v10 }
  0x12   : > { %v229_v16 = vrot.slane %v191_v11, 6  ;;  %v1835_v17 = vld [vmem:[%s2444_s29 + $0x20] sm:$0xc]  ;;  %v1836_v18 = vld [vmem:[%s2444_s29 + $0x24] sm:$0x3] }
  0x13   : > { %v226_v20 = vsel %vm2456_vm3, %v1747_v13, %v225_v14  ;;  %v1837_v21 = vld [vmem:[%s2444_s29 + $0x28] sm:$0xc]  ;;  %v1838_v22 = vld [vmem:[%s2444_s29 + $0x2c] sm:$0x3]  ;;  %v1851_v23 = vrot.slane %v1835_v17, 10  ;;  %v826_v24 = vrot.slane %v1836_v18, 6  ;;  %2107 = vmatpush3.bf16.msra.mxu1 %v2330_v6 }
  0x14   : > { %v230_v26 = vsel %vm2456_vm3, %v1748_v15, %v229_v16  ;;  %v1852_v27 = vrot.slane %v1837_v21, 10  ;;  %v830_v28 = vrot.slane %v1838_v22, 6  ;;  %v192_v29 = vld [vmem:[%s2444_s29 + $0x10] sm:$0xc]  ;;  %v193_v30 = vld [vmem:[%s2444_s29 + $0x14] sm:$0x3]  ;;  %2171 = vmatpush3.bf16.msra.mxu0 %v2331_v10  ;;  %2116 = vmatprep.subr.bf16.mxu1 %v2332_v19 }
  0x15   : > { %v1763_v31 = vcombine.low %v226_v20, %v230_v26  ;;  %v827_v32 = vsel %vm2456_vm3, %v1851_v23, %v826_v24  ;;  %v194_v33 = vld [vmem:[%s2444_s29 + $0x18] sm:$0xc]  ;;  %v195_v34 = vld [vmem:[%s2444_s29 + $0x1c] sm:$0x3]  ;;  %v1749_v35 = vrot.slane %v192_v29, 10  ;;  %v233_v36 = vrot.slane %v193_v30, 6  ;;  %2180 = vmatprep.subr.bf16.mxu0 %v2333_v25 }
  0x16   : > { %v831_v37 = vsel %vm2456_vm3, %v1852_v27, %v830_v28  ;;  %v1750_v38 = vrot.slane %v194_v33, 10  ;;  %v237_v39 = vrot.slane %v195_v34, 6  ;;  %v1839_v42 = vld [vmem:[%s2444_s29 + $0x30] sm:$0xc]  ;;  %v1840_v43 = vld [vmem:[%s2444_s29 + $0x34] sm:$0x3] }
  0x17   : > { %2108 = vmatprep.mubr.msk.bf16.mxu1 %vm300_vm2, %v1763_v31  ;;  %v1867_v40 = vcombine.low %v827_v32, %v831_v37  ;;  %v234_v41 = vsel %vm2456_vm3, %v1749_v35, %v233_v36  ;;  %v1841_v44 = vld [vmem:[%s2444_s29 + $0x38] sm:$0xc]  ;;  %v1842_v46 = vld [vmem:[%s2444_s29 + $0x3c] sm:$0x3]  ;;  %v1853_v47 = vrot.slane %v1839_v42, 10  ;;  %v834_v48 = vrot.slane %v1840_v43, 6 }
  0x18   : > { %v238_v45 = vsel %vm2456_vm3, %v1750_v38, %v237_v39  ;;  %v1854_v49 = vrot.slane %v1841_v44, 10  ;;  %v838_v51 = vrot.slane %v1842_v46, 6  ;;  %v196_v56 = vld [vmem:[%s2444_s29 + $0x20] sm:$0xc]  ;;  %v197_v57 = vld [vmem:[%s2444_s29 + $0x24] sm:$0x3] }
  0x19   : > { %2172 = vmatprep.mubr.msk.bf16.mxu0 %vm300_vm2, %v1867_v40  ;;  %v1764_v50 = vcombine.low %v234_v41, %v238_v45  ;;  %v835_v53 = vsel %vm2456_vm3, %v1853_v47, %v834_v48  ;;  %v198_v59 = vld [vmem:[%s2444_s29 + $0x28] sm:$0xc]  ;;  %v199_v60 = vld [vmem:[%s2444_s29 + $0x2c] sm:$0x3]  ;;  %v1751_v61 = vrot.slane %v196_v56, 10  ;;  %v241_v62 = vrot.slane %v197_v57, 6 }
  0x1a   : > { %v839_v55 = vsel %vm2456_vm3, %v1854_v49, %v838_v51  ;;  %v1752_v63 = vrot.slane %v198_v59, 10  ;;  %v245_v0 = vrot.slane %v199_v60, 6  ;;  %v1843_v1 = vld [vmem:[%s2444_s29 + $0x40] sm:$0xc]  ;;  %v1844_v2 = vld [vmem:[%s2444_s29 + $0x44] sm:$0x3] }
  0x1b   : > { %2109 = vmatmul.mubr.msk.bf16.vlgmr.msra.gmra.mrb[0].mxu1 %vm300_vm2, %v1764_v50  ;;  %v1868_v58 = vcombine.low %v835_v53, %v839_v55  ;;  %v242_v3 = vsel %vm2456_vm3, %v1751_v61, %v241_v62  ;;  %v1845_v4 = vld [vmem:[%s2444_s29 + $0x48] sm:$0xc]  ;;  %v1846_v5 = vld [vmem:[%s2444_s29 + $0x4c] sm:$0x3]  ;;  %v1855_v6 = vrot.slane %v1843_v1, 10  ;;  %v842_v7 = vrot.slane %v1844_v2, 6 }
  0x1c   : > { %2117 = vmatpush3.bf16.msra.mxu1 %v2332_v19  ;;  %v246_v8 = vsel %vm2456_vm3, %v1752_v63, %v245_v0  ;;  %v1856_v9 = vrot.slane %v1845_v4, 10  ;;  %v846_v10 = vrot.slane %v1846_v5, 6  ;;  %v200_v11 = vld [vmem:[%s2444_s29 + $0x30] sm:$0xc]  ;;  %v201_v13 = vld [vmem:[%s2444_s29 + $0x34] sm:$0x3] }
  0x1d   : > { %2118 = vmatprep.subr.bf16.mxu1 %v2334_v52  ;;  %2173 = vmatmul.mubr.msk.bf16.vlgmr.msra.gmra.mrb[0].mxu0 %vm300_vm2, %v1868_v58  ;;  %v1765_v14 = vcombine.low %v242_v3, %v246_v8  ;;  %v843_v15 = vsel %vm2456_vm3, %v1855_v6, %v842_v7  ;;  %v202_v16 = vld [vmem:[%s2444_s29 + $0x38] sm:$0xc]  ;;  %v203_v17 = vld [vmem:[%s2444_s29 + $0x3c] sm:$0x3]  ;;  %v1753_v18 = vrot.slane %v200_v11, 10  ;;  %v249_v19 = vrot.slane %v201_v13, 6 }
  0x1e   : > { %2181 = vmatpush3.bf16.msra.mxu0 %v2333_v25  ;;  %v847_v20 = vsel %vm2456_vm3, %v1856_v9, %v846_v10  ;;  %v1754_v21 = vrot.slane %v202_v16, 10  ;;  %v253_v22 = vrot.slane %v203_v17, 6  ;;  %v2336_v25 = vld [vmem:[%s2715_s1 + $0x10] sm:$0xff]   ;;  %v1849_v29 = vld [vmem:[%s2444_s29 + $0x58] sm:$0xc]  ;;  %v2343_v45 = vld [vmem:[%s2715_s1 + $0x40] sm:$0xff]  }
  0x1f   : > { %2182 = vmatprep.subr.bf16.mxu0 %v2335_v54  ;;  %2112 = vmatprep.mubr.msk.bf16.mxu1 %vm300_vm2, %v1765_v14  ;;  %v1869_v23 = vcombine.low %v843_v15, %v847_v20  ;;  %v250_v24 = vsel %vm2456_vm3, %v1753_v18, %v249_v19  ;;  %v1847_v26 = vld [vmem:[%s2444_s29 + $0x50] sm:$0xc]  ;;  %v1848_v27 = vld [vmem:[%s2444_s29 + $0x54] sm:$0x3]  ;;  %v1850_v30 = vld [vmem:[%s2444_s29 + $0x5c] sm:$0x3] }
  0x20   : > { %2119 = vmatpush3.bf16.msra.mxu1 %v2334_v52  ;;  %v254_v28 = vsel %vm2456_vm3, %v1754_v21, %v253_v22  ;;  %v1857_v31 = vrot.slane %v1847_v26, 10  ;;  %v850_v32 = vrot.slane %v1848_v27, 6  ;;  %v1858_v34 = vrot.slane %v1849_v29, 10  ;;  %v2337_v37 = vld [vmem:[%s2715_s1 + $0xb0] sm:$0xff]   ;;  %v2338_v39 = vld [vmem:[%s2715_s1 + $0x18] sm:$0xff]   ;;  %v2345_v47 = vld [vmem:[%s2715_s1 + $0xc0] sm:$0xff]  }
  0x21   : > { %2176 = vmatprep.mubr.msk.bf16.mxu0 %vm300_vm2, %v1869_v23  ;;  %v1766_v33 = vcombine.low %v250_v24, %v254_v28  ;;  %2120 = vmatprep.subr.bf16.mxu1 %v2336_v25  ;;  %v854_v35 = vrot.slane %v1850_v30, 6  ;;  %v2339_v41 = vld [vmem:[%s2715_s1 + $0xb8] sm:$0xff]   ;;  %v2340_v42 = vld [vmem:[%s2444_s29] ss:$8 sps:$4 sm:$0xff]   ;;  %v2341_v43 = vld [vmem:[%s2444_s29 + $0x24] ss:$8 sps:$4 sm:$0xff]  }
  0x22   : > { %2183 = vmatpush3.bf16.msra.mxu0 %v2335_v54  ;;  %v851_v36 = vsel %vm2456_vm3, %v1857_v31, %v850_v32  ;;  %v2342_v44 = vld [vmem:[%s2444_s29 + $0x10] ss:$8 sps:$4 sm:$0xff]   ;;  %v2344_v46 = vld [vmem:[%s2444_s29 + $0x34] ss:$8 sps:$4 sm:$0xff]   ;;  %v2346_v48 = vld [vmem:[%s2715_s1 + $0x48] sm:$0xff]  }
  0x23   : > { %2113 = vmatmul.mubr.msk.bf16.gmra.mrb[4].mxu1 %vm300_vm2, %v1766_v33  ;;  %v855_v38 = vsel %vm2456_vm3, %v1858_v34, %v854_v35  ;;  %2184 = vmatprep.subr.bf16.mxu0 %v2337_v37  ;;  %v2347_v49 = vld [vmem:[%s2715_s1 + $0xc8] sm:$0xff]   ;;  %v2350_v52 = vld [vmem:[%s2444_s29 + $0x30] ss:$8 sps:$4 sm:$0xff]   ;;  %v2352_v54 = vld [vmem:[%s2444_s29 + $0x54] ss:$8 sps:$4 sm:$0xff]  }
  0x24   : > { %2121 = vmatpush3.bf16.msra.mxu1 %v2336_v25  ;;  %v1870_v40 = vcombine.low %v851_v36, %v855_v38  ;;  %2124 = vmatprep.mubr.msk.bf16.mxu1 %vm300_vm2, %v2340_v42  ;;  %v2348_v50 = vld [vmem:[%s2444_s29 + $0x20] ss:$8 sps:$4 sm:$0xff]   ;;  %v2349_v51 = vld [vmem:[%s2444_s29 + $0x44] ss:$8 sps:$4 sm:$0xff]   ;;  %v2351_v53 = vld [vmem:[%s2715_s1 + $0x50] sm:$0xff]  }
  0x25   : > { %2122 = vmatprep.subr.bf16.mxu1 %v2338_v39  ;;  %v2353_v55 = vld [vmem:[%s2715_s1 + $0xd0] sm:$0xff]   ;;  %v2354_v56 = vld [vmem:[%s2715_s1 + $0x58] sm:$0xff]   ;;  %v2356_v58 = vld [vmem:[%s2444_s29 + $0x4] ss:$8 sps:$4 sm:$0xff]  }
  0x26   : > { %2185 = vmatpush3.bf16.msra.mxu0 %v2337_v37  ;;  %v2355_v57 = vld [vmem:[%s2715_s1 + $0xd8] sm:$0xff]   ;;  %v2357_v59 = vld [vmem:[%s2444_s29 + $0x40] ss:$8 sps:$4 sm:$0xff]   ;;  %v2364_v2 = vld [vmem:[%s2444_s29 + $0x24] ss:$8 sps:$4 sm:$0xff]  }
  0x27   : > { %2177 = vmatmul.mubr.msk.bf16.gmra.mrb[4].mxu0 %vm300_vm2, %v1870_v40  ;;  %2186 = vmatprep.subr.bf16.mxu0 %v2339_v41  ;;  %v2358_v60 = vld [vmem:[%s2444_s29 + $0x14] ss:$8 sps:$4 sm:$0xff]   ;;  %v2359_v61 = vld [vmem:[%s2715_s1 + $0x60] sm:$0xff]   ;;  %v2360_v62 = vld [vmem:[%s2444_s29 + $0x50] ss:$8 sps:$4 sm:$0xff]  }
  0x28   : > { %2123 = vmatpush3.bf16.msra.mxu1 %v2338_v39  ;;  %2188 = vmatprep.mubr.msk.bf16.mxu0 %vm300_vm2, %v2341_v43  ;;  %v2361_v63 = vld [vmem:[%s2715_s1 + $0xe0] sm:$0xff]   ;;  %v2362_v0 = vld [vmem:[%s2715_s1 + $0x68] sm:$0xff]   ;;  %v2366_v4 = vld [vmem:[%s2444_s29 + $0x34] ss:$8 sps:$4 sm:$0xff]  }
  0x29   : > { %2132 = vmatprep.subr.bf16.mxu1 %v2343_v45  ;;  %v2363_v1 = vld [vmem:[%s2715_s1 + $0xe8] sm:$0xff]   ;;  %v2367_v5 = vld [vmem:[%s2715_s1 + $0x70] sm:$0xff]   ;;  %v2370_v8 = vld [vmem:[%s2715_s1 + $0x78] sm:$0xff]  }
  0x2a   : > { %2187 = vmatpush3.bf16.msra.mxu0 %v2339_v41  ;;  %v2365_v3 = vld [vmem:[%s2444_s29 + $0x60] ss:$8 sps:$4 sm:$0xff]   ;;  %v2368_v6 = vld [vmem:[%s2444_s29 + $0x70] ss:$8 sps:$4 sm:$0xff]   ;;  %v1936_v13 = vld [vmem:[%s2444_s29 + $0x44] sm:$0x3] }
  0x2b   : > { %2125 = vmatmul.mubr.msk.bf16.vlgmr.msra.gmra.mrb[0].mxu1 %vm300_vm2, %v2342_v44  ;;  %2196 = vmatprep.subr.bf16.mxu0 %v2345_v47  ;;  %v2369_v7 = vld [vmem:[%s2715_s1 + $0xf0] sm:$0xff]   ;;  %v2371_v9 = vld [vmem:[%s2715_s1 + $0xf8] sm:$0xff]   ;;  %v2372_v10 = vld [vmem:[%s2444_s29 + $0x20] ss:$8 sps:$4 sm:$0xff]   ;;  %v1313_v17 = vrot.slane %v1936_v13, 6 }
  0x2c   : > { %2133 = vmatpush3.bf16.msra.mxu1 %v2343_v45  ;;  %2128 = vmatprep.mubr.msk.bf16.mxu1 %vm300_vm2, %v2348_v50  ;;  %v1935_v11 = vld [vmem:[%s2444_s29 + $0x40] sm:$0xc]  ;;  %v1937_v14 = vld [vmem:[%s2444_s29 + $0x48] sm:$0xc]  ;;  %v1938_v15 = vld [vmem:[%s2444_s29 + $0x4c] sm:$0x3] }
  0x2d   : > { %2134 = vmatprep.subr.bf16.mxu1 %v2346_v48  ;;  %v1951_v16 = vrot.slane %v1935_v11, 10  ;;  %v1952_v18 = vrot.slane %v1937_v14, 10  ;;  %v1317_v19 = vrot.slane %v1938_v15, 6  ;;  %v2373_v21 = vld [vmem:[%s2444_s29 + $0x30] ss:$8 sps:$4 sm:$0xff]   ;;  %v2374_v33 = vld [vmem:[%s2715_s1 + $0x100] sm:$0xff]  }
  0x2e   : > { %v1939_v22 = vld [vmem:[%s2444_s29 + $0x50] sm:$0xc]  ;;  %v1940_v23 = vld [vmem:[%s2444_s29 + $0x54] sm:$0x3]  ;;  %v1941_v25 = vld [vmem:[%s2444_s29 + $0x58] sm:$0xc] }
  0x2f   : > { %2189 = vmatmul.mubr.msk.bf16.vlgmr.msra.gmra.mrb[0].mxu0 %vm300_vm2, %v2344_v46  ;;  %v1314_v20 = vsel %vm2456_vm3, %v1951_v16, %v1313_v17  ;;  %v1318_v24 = vsel %vm2456_vm3, %v1952_v18, %v1317_v19  ;;  %v1942_v26 = vld [vmem:[%s2444_s29 + $0x5c] sm:$0x3]  ;;  %v1953_v27 = vrot.slane %v1939_v22, 10  ;;  %v1321_v28 = vrot.slane %v1940_v23, 6  ;;  %v2375_v35 = vld [vmem:[%s2715_s1 + $0x108] sm:$0xff]  }
  0x30   : > { %2197 = vmatpush3.bf16.msra.mxu0 %v2345_v47  ;;  %2135 = vmatpush3.bf16.msra.mxu1 %v2346_v48  ;;  %v1967_v29 = vcombine.low %v1314_v20, %v1318_v24  ;;  %v1954_v30 = vrot.slane %v1941_v25, 10  ;;  %v1325_v31 = vrot.slane %v1942_v26, 6  ;;  %v2376_v37 = vld [vmem:[%s2444_s29 + $0x40] ss:$8 sps:$4 sm:$0xff]   ;;  %v1944_v39 = vld [vmem:[%s2444_s29 + $0x64] sm:$0x3] }
  0x31   : > { %2198 = vmatprep.subr.bf16.mxu0 %v2347_v49  ;;  %2192 = vmatprep.mubr.msk.bf16.mxu0 %vm300_vm2, %v2349_v51  ;;  %v1322_v32 = vsel %vm2456_vm3, %v1953_v27, %v1321_v28  ;;  %v1943_v38 = vld [vmem:[%s2444_s29 + $0x60] sm:$0xc]  ;;  %v1945_v40 = vld [vmem:[%s2444_s29 + $0x68] sm:$0xc]  ;;  %v1946_v41 = vld [vmem:[%s2444_s29 + $0x6c] sm:$0x3] }
  0x32   : > { %2136 = vmatprep.subr.bf16.mxu1 %v2351_v53  ;;  %v1326_v34 = vsel %vm2456_vm3, %v1954_v30, %v1325_v31  ;;  %v1955_v42 = vrot.slane %v1943_v38, 10  ;;  %v1329_v43 = vrot.slane %v1944_v39, 6  ;;  %v1956_v44 = vrot.slane %v1945_v40, 10  ;;  %v2377_v47 = vld [vmem:[%s2444_s29 + $0x50] ss:$8 sps:$4 sm:$0xff]  }
  0x33   : > { %2129 = vmatmul.mubr.msk.bf16.gmra.mrb[4].mxu1 %vm300_vm2, %v2350_v52  ;;  %v1968_v36 = vcombine.low %v1322_v32, %v1326_v34  ;;  %v1333_v45 = vrot.slane %v1946_v41, 6  ;;  %v1947_v48 = vld [vmem:[%s2444_s29 + $0x70] sm:$0xc]  ;;  %v1949_v51 = vld [vmem:[%s2444_s29 + $0x78] sm:$0xc] }
  0x34   : > { %2199 = vmatpush3.bf16.msra.mxu0 %v2347_v49  ;;  %2137 = vmatpush3.bf16.msra.mxu1 %v2351_v53  ;;  %v1330_v46 = vsel %vm2456_vm3, %v1955_v42, %v1329_v43  ;;  %v1948_v49 = vld [vmem:[%s2444_s29 + $0x74] sm:$0x3]  ;;  %v1950_v52 = vld [vmem:[%s2444_s29 + $0x7c] sm:$0x3]  ;;  %v1957_v53 = vrot.slane %v1947_v48, 10 }
  0x35   : > { %2200 = vmatprep.subr.bf16.mxu0 %v2353_v55  ;;  %2138 = vmatprep.subr.bf16.mxu1 %v2354_v56  ;;  %v1334_v50 = vsel %vm2456_vm3, %v1956_v44, %v1333_v45  ;;  %v2383_v12 = vld [vmem:[%s2444_s29 + $0x74] ss:$8 sps:$4 sm:$0xff]   ;;  %v2007_v19 = vld [vmem:[%s2716_s2] ss:$0 sm:$0xff] }
  0x36   : > { %2140 = vmatprep.mubr.msk.bf16.mxu1 %vm300_vm2, %v2356_v58 }
  0x37   : > { %2193 = vmatmul.mubr.msk.bf16.gmra.mrb[4].mxu0 %vm300_vm2, %v2352_v54  ;;  %v1337_v54 = vrot.slane %v1948_v49, 6 }
  0x38   : > { %2201 = vmatpush3.bf16.msra.mxu0 %v2353_v55  ;;  %2139 = vmatpush3.bf16.msra.mxu1 %v2354_v56  ;;  %v1969_v55 = vcombine.low %v1330_v46, %v1334_v50  ;;  %v1958_v56 = vrot.slane %v1949_v51, 10 }
  0x39   : > { %2202 = vmatprep.subr.bf16.mxu0 %v2355_v57  ;;  %2204 = vmatprep.mubr.msk.bf16.mxu0 %vm300_vm2, %v2357_v59  ;;  %v1338_v58 = vsel %vm2456_vm3, %v1957_v53, %v1337_v54  ;;  %v2378_v59 = vld [vmem:[%s2715_s1 + $0x110] sm:$0xff]  }
  0x3a   : > { %2148 = vmatprep.subr.bf16.mxu1 %v2359_v61 }
  0x3b   : > { %2141 = vmatmul.mubr.msk.bf16.vlgmr.msra.gmra.mrb[0].mxu1 %vm300_vm2, %v2358_v60 }
  0x3c   : > { %2203 = vmatpush3.bf16.msra.mxu0 %v2355_v57  ;;  %2149 = vmatpush3.bf16.msra.mxu1 %v2359_v61  ;;  %v1341_v57 = vrot.slane %v1950_v52, 6  ;;  %v2379_v61 = vld [vmem:[%s2715_s1 + $0x118] sm:$0xff]  }
  0x3d   : > { %2212 = vmatprep.subr.bf16.mxu0 %v2361_v63  ;;  %2150 = vmatprep.subr.bf16.mxu1 %v2362_v0 }
  0x3e   : > { %2144 = vmatprep.mubr.msk.bf16.mxu1 %vm300_vm2, %v2364_v2  ;;  %v1342_v60 = vsel %vm2456_vm3, %v1958_v56, %v1341_v57 }
  0x3f   : > { %2205 = vmatmul.mubr.msk.bf16.vlgmr.msra.gmra.mrb[0].mxu0 %vm300_vm2, %v2360_v62  ;;  %v1970_v62 = vcombine.low %v1338_v58, %v1342_v60 }
  0x40   : > { %2213 = vmatpush3.bf16.msra.mxu0 %v2361_v63  ;;  %2151 = vmatpush3.bf16.msra.mxu1 %v2362_v0  ;;  %v2380_v63 = vld [vmem:[%s2444_s29 + $0x44] ss:$8 sps:$4 sm:$0xff]  }
  0x41   : > { %2214 = vmatprep.subr.bf16.mxu0 %v2363_v1  ;;  %2208 = vmatprep.mubr.msk.bf16.mxu0 %vm300_vm2, %v2365_v3  ;;  %v2381_v0 = vld [vmem:[%s2444_s29 + $0x64] ss:$8 sps:$4 sm:$0xff]  }
  0x42   : > { %2152 = vmatprep.subr.bf16.mxu1 %v2367_v5 }
  0x43   : > { %2145 = vmatmul.mubr.msk.bf16.gmra.mrb[4].mxu1 %vm300_vm2, %v2366_v4 }
  0x44   : > { %2215 = vmatpush3.bf16.msra.mxu0 %v2363_v1  ;;  %2153 = vmatpush3.bf16.msra.mxu1 %v2367_v5  ;;  %v2382_v1 = vld [vmem:[%s2444_s29 + $0x54] ss:$8 sps:$4 sm:$0xff]  }
  0x45   : > { %2216 = vmatprep.subr.bf16.mxu0 %v2369_v7  ;;  %2154 = vmatprep.subr.bf16.mxu1 %v2370_v8 }
  0x46   : > { %2156 = vmatprep.mubr.msk.bf16.mxu1 %vm300_vm2, %v2372_v10 }
  0x47   : > { %2209 = vmatmul.mubr.msk.bf16.gmra.mrb[4].mxu0 %vm300_vm2, %v2368_v6 }
  0x48   : > { %2217 = vmatpush3.bf16.msra.mxu0 %v2369_v7  ;;  %2155 = vmatpush3.bf16.msra.mxu1 %v2370_v8 }
  0x49   : > { %2218 = vmatprep.subr.bf16.mxu0 %v2371_v9  ;;  %2220 = vmatprep.mubr.msk.bf16.mxu0 %vm300_vm2, %v1967_v29 }
  0x4a   : > { %2244 = vmatprep.subr.bf16.mxu1 %v2374_v33 }
  0x4b   : > { %2157 = vmatmul.mubr.msk.bf16.vlgmr.msra.gmra.mrb[0].mxu1 %vm300_vm2, %v2373_v21 }
  0x4c   : > { %2219 = vmatpush3.bf16.msra.mxu0 %v2371_v9  ;;  %2248 = vmatpush3.bf16.msra.mxu1 %v2374_v33 }
  0x4d   : > { %2228 = vmatprep.subr.bf16.mxu0 %v2374_v33  ;;  %2245 = vmatprep.subr.bf16.mxu1 %v2375_v35 }
  0x4e   : > { %2160 = vmatprep.mubr.msk.bf16.mxu1 %vm300_vm2, %v2376_v37 }
  0x4f   : > { %2221 = vmatmul.mubr.msk.bf16.vlgmr.msra.gmra.mrb[0].mxu0 %vm300_vm2, %v1968_v36 }
  0x50   : > { %2229 = vmatpush3.bf16.msra.mxu0 %v2374_v33  ;;  %2249 = vmatpush3.bf16.msra.mxu1 %v2375_v35 }
  0x51   : > { %2230 = vmatprep.subr.bf16.mxu0 %v2375_v35  ;;  %2224 = vmatprep.mubr.msk.bf16.mxu0 %vm300_vm2, %v1969_v55 }
  0x52   : > { %2246 = vmatprep.subr.bf16.mxu1 %v2378_v59 }
  0x53   : > { %2161 = vmatmul.mubr.msk.bf16.gmra.mrb[4].mxu1 %vm300_vm2, %v2377_v47 }
  0x54   : > { %2231 = vmatpush3.bf16.msra.mxu0 %v2375_v35  ;;  %2250 = vmatpush3.bf16.msra.mxu1 %v2378_v59 }
  0x55   : > { %2232 = vmatprep.subr.bf16.mxu0 %v2378_v59  ;;  %2247 = vmatprep.subr.bf16.mxu1 %v2379_v61 }
  0x56   : > { %2240 = vmatprep.mubr.msk.bf16.mxu1 %vm300_vm2, %v2381_v0 }
  0x57   : > { %2225 = vmatmul.mubr.msk.bf16.gmra.mrb[4].mxu0 %vm300_vm2, %v1970_v62 }
  0x58   : > { %2233 = vmatpush3.bf16.msra.mxu0 %v2378_v59  ;;  %2236 = vmatprep.mubr.msk.bf16.mxu0 %vm300_vm2, %v2380_v63 }
  0x59   : > { %2234 = vmatprep.subr.bf16.mxu0 %v2379_v61  ;;  %2251 = vmatpush3.bf16.msra.mxu1 %v2379_v61 }
  0x5c   : > { %2235 = vmatpush3.bf16.msra.mxu0 %v2379_v61  ;;  %2241 = vmatmul.mubr.msk.bf16.vlgmr.msra.gmra.mrb[8].mxu1 %vm300_vm2, %v2383_v12 }
  0x5f   : > { %2237 = vmatmul.mubr.msk.bf16.vlgmr.msra.gmra.mrb[0].mxu0 %vm300_vm2, %v2382_v1 }
 0x11e   : > { %v2158_v2 = vpop.f32.mrb[0].mxu1 }
 0x11f   : > { %v753_v3 = vpop.f32.mrb[1].mxu1 }
 0x120   : > { %v2159_v4 = vpop.f32.mrb[2].mxu1 }
 0x121   : > { %v756_v5 = vpop.f32.mrb[3].mxu1 }
 0x126   : > { %v2162_v6 = vpop.f32.mrb[4].mxu1 }
 0x127   : > { %v769_v7 = vpop.f32.mrb[5].mxu1 }
 0x128   : > { %v2163_v8 = vpop.f32.mrb[6].mxu1 }
 0x129   : > { %v772_v9 = vpop.f32.mrb[7].mxu1 }
 0x12a   : > { %v2226_v10 = vpop.f32.mrb[4].mxu0 }
 0x12b   : > { %v2256_v11 = vadd.f32 %v2226_v10, %v2162_v6  ;;  %v1450_v13 = vpop.f32.mrb[5].mxu0 }
 0x12c   : > { %v2258_v14 = vadd.f32 %v1450_v13, %v769_v7  ;;  %v2227_v15 = vpop.f32.mrb[6].mxu0 }
 0x12d   : > { %v2260_v16 = vadd.f32 %v2227_v15, %v2163_v8  ;;  %v1453_v17 = vpop.f32.mrb[7].mxu0 }
 0x12e   : > { %v2262_v18 = vadd.f32 %v1453_v17, %v772_v9 }
 0x12f   : > { %v2242_v20 = vpop.f32.mrb[8].mxu1 }
 0x130   : > { %v2257_v21 = vadd.f32 %v2256_v11, %v2242_v20  ;;  %v1596_v22 = vpop.f32.mrb[9].mxu1 }
 0x131   : > { %v2259_v24 = vadd.f32 %v2258_v14, %v1596_v22  ;;  %v2243_v25 = vpop.f32.mrb[10].mxu1 }
 0x132   : > { %v2238_v23 = vpop.f32.mrb[0].mxu0  ;;  %v1632_v27 = vadd.f32 %v2257_v21, %v2007_v19  ;;  %v2261_v29 = vadd.f32 %v2260_v16, %v2243_v25  ;;  %v1599_v30 = vpop.f32.mrb[11].mxu1 }
 0x133   : > { %v2252_v26 = vadd.f32 %v2238_v23, %v2158_v2  ;;  %v1580_v28 = vpop.f32.mrb[1].mxu0  ;;  %v1630_v32 = vadd.f32 %v2259_v24, %v2007_v19  ;;  %v2263_v34 = vadd.f32 %v2262_v18, %v1599_v30 }
 0x134   : > { %v2253_v31 = vadd.f32 %v1580_v28, %v753_v3  ;;  %v2239_v33 = vpop.f32.mrb[2].mxu0  ;;  %v1640_v36 = vmax.f32 %v1632_v27, 0.0  ;;  %v1633_v38 = vadd.f32 %v2261_v29, %v2007_v19 }
 0x135   : > { %v1628_v35 = vadd.f32 %v2252_v26, %v2007_v19  ;;  %v2254_v37 = vadd.f32 %v2239_v33, %v2159_v4  ;;  %v1583_v39 = vpop.f32.mrb[3].mxu0  ;;  %v1638_v41 = vmax.f32 %v1630_v32, 0.0  ;;  %v1631_v43 = vadd.f32 %v2263_v34, %v2007_v19 }
 0x136   : > { %v1626_v40 = vadd.f32 %v2253_v31, %v2007_v19  ;;  %v2255_v42 = vadd.f32 %v1583_v39, %v756_v5  ;;  %v2026_v45 = vpack.c.bf16 %v1640_v36, %v1640_v36  ;;  %v1641_v47 = vmax.f32 %v1633_v38, 0.0 }
 0x137   : > { %v1636_v44 = vmax.f32 %v1628_v35, 0.0  ;;  %v1629_v46 = vadd.f32 %v2254_v37, %v2007_v19  ;;  %v2024_v49 = vpack.c.bf16 %v1638_v41, %v1638_v41  ;;  %v1639_v51 = vmax.f32 %v1631_v43, 0.0 }
 0x138   : > { %v1634_v48 = vmax.f32 %v1626_v40, 0.0  ;;  %v1627_v50 = vadd.f32 %v2255_v42, %v2007_v19  ;;  %1681 = vst.msk [vmem:[%s170_s21 + $0x18] sm:$0xf] %vm1674_vm4, %v2026_v45  ;;  %v2027_v54 = vpack.c.bf16 %v1641_v47, %v1641_v47 }
 0x139   : > { %v2022_v52 = vpack.c.bf16 %v1636_v44, %v1636_v44  ;;  %v1637_v53 = vmax.f32 %v1629_v46, 0.0  ;;  %1679 = vst.msk [vmem:[%s170_s21 + $0x10] sm:$0xf] %vm1674_vm4, %v2024_v49  ;;  %v2025_v57 = vpack.c.bf16 %v1639_v51, %v1639_v51 }
 0x13a   : > { %v2020_v55 = vpack.c.bf16 %v1634_v48, %v1634_v48  ;;  %v1635_v56 = vmax.f32 %v1627_v50, 0.0  ;;  %1682 = vst.msk [vmem:[%s170_s21 + $0x1c] sm:$0xf] %vm1674_vm4, %v2027_v54 }
 0x13b   : > { %1677 = vst.msk [vmem:[%s170_s21 + $0x8] sm:$0xf] %vm1674_vm4, %v2022_v52  ;;  %v2023_v58 = vpack.c.bf16 %v1637_v53, %v1637_v53  ;;  %1680 = vst.msk [vmem:[%s170_s21 + $0x14] sm:$0xf] %vm1674_vm4, %v2025_v57 }
 0x13c   : > { %1675 = vst.msk [vmem:[%s170_s21] sm:$0xf] %vm1674_vm4, %v2020_v55  ;;  %v2021_v59 = vpack.c.bf16 %v1635_v56, %v1635_v56 }
 0x13d   : > { %1678 = vst.msk [vmem:[%s170_s21 + $0xc] sm:$0xf] %vm1674_vm4, %v2023_v58 }
 0x13e   : > { %1676 = vst.msk [vmem:[%s170_s21 + $0x4] sm:$0xf] %vm1674_vm4, %v2021_v59 }
 0x13f PF: > { %s13_s12 = sadd.s32 1, %s2390_s12  }
 0x140   : > { %p10_p4 = scmp.ge.s32.totalorder %s13_s12, 6  }
 0x142   :  { %12 = sbr.rel (!%p10_p4) target bundleno = 1 (0x1), region = 72 }

</bundles_post_ra>
